<compile_context>
chip_gen: v5e
topology: v5e:2x2
jax: 0.10.0
libtpu: 0.0.40
codegen_flags: <defaults>
</compile_context>

<pallas_src>
import functools
import math

import jax
import jax.numpy as jnp
from jax import lax
from jax.experimental import pallas as pl
from jax.experimental.pallas import tpu as pltpu

_LN_EPS = 1e-5  # PyTorch nn.LayerNorm default


def _gelu_tanh(x):
    # TODO(synk): PyTorch nn.GELU defaults to the exact erf formulation; the
    # tanh approximation (max abs err ~3e-4) is used because lax.erf is not
    # guaranteed to lower inside Mosaic kernels.
    c = math.sqrt(2.0 / math.pi)
    return 0.5 * x * (1.0 + jnp.tanh(c * (x + 0.044715 * x * x * x)))


def _layer_norm(y, gamma, beta):
    mu = jnp.mean(y, axis=-1, keepdims=True)
    yc = y - mu
    var = jnp.mean(yc * yc, axis=-1, keepdims=True)
    return yc * lax.rsqrt(var + _LN_EPS) * gamma + beta


def _encoder_kernel(
    x_ref, wq_ref, wk_ref, wv_ref, ra_ref, rb_ref,
    ga_ref, ba_ref, g1_ref, b1_ref,
    w1_ref, fb1_ref, w2_ref, fb2_ref, g2_ref, b2_ref,
    o_ref, *, num_heads: int, scale: float,
):
    L, D = x_ref.shape[1], x_ref.shape[2]
    hd = D // num_heads

    x = x_ref[0]                                   # [L, D] f32
    xb = x.astype(jnp.bfloat16)

    # QKV projections: bf16 operands on the MXU, f32 accumulation.
    # Softmax scale folded into q (QK^T and Srel are both linear in q).
    q = jnp.dot(xb, wq_ref[...], preferred_element_type=jnp.float32) * scale
    k = jnp.dot(xb, wk_ref[...], preferred_element_type=jnp.float32)
    v = jnp.dot(xb, wv_ref[...], preferred_element_type=jnp.float32)

    # q_shift[i] = q[i+1], last row 0 — via one tiny f32 MXU matmul against an
    # in-register permutation matrix (the MXU slot is idle here; an unaligned
    # sublane roll/slice of a 44-row operand is riskier to lower).
    row = lax.broadcasted_iota(jnp.int32, (L, L), 0)
    col = lax.broadcasted_iota(jnp.int32, (L, L), 1)
    shift = (col == row + 1).astype(jnp.float32)                    # [L, L]
    q_shift = jnp.dot(shift, q, preferred_element_type=jnp.float32)

    qb = q.astype(jnp.bfloat16)
    kb = k.astype(jnp.bfloat16)
    vb = v.astype(jnp.bfloat16)

    head_outs = []
    for h in range(num_heads):
        sl = slice(h * hd, (h + 1) * hd)

        # Relative-position term Srel (exact equivalent of the PyTorch
        # pad+reshape skew).  Tables are read one [L, L] slice at a time so
        # the full [hd, L, L] tables never occupy vregs.
        c0 = h * hd
        srel = q[:, c0:c0 + 1] * ra_ref[0] + q_shift[:, c0:c0 + 1] * rb_ref[0]
        for d in range(1, hd):
            c = c0 + d
            srel = srel + q[:, c:c + 1] * ra_ref[d] \
                        + q_shift[:, c:c + 1] * rb_ref[d]

        logits = lax.dot_general(qb[:, sl], kb[:, sl],
                                 (((1,), (1,)), ((), ())),
                                 preferred_element_type=jnp.float32) + srel
        logits = logits - jnp.max(logits, axis=-1, keepdims=True)
        p = jnp.exp(logits)
        p = p * pl.reciprocal(jnp.sum(p, axis=-1, keepdims=True), approx=True)
        head_outs.append(jnp.dot(p.astype(jnp.bfloat16), vb[:, sl],
                                 preferred_element_type=jnp.float32))

    attn = jnp.concatenate(head_outs, axis=-1)                      # [L, D]
    attn = _layer_norm(attn, ga_ref[...], ba_ref[...])              # to_out LN

    y1 = _layer_norm(x + attn, g1_ref[...], b1_ref[...])            # norm1

    hmid = jnp.dot(y1.astype(jnp.bfloat16), w1_ref[...],
                   preferred_element_type=jnp.float32) + fb1_ref[...]
    hmid = _gelu_tanh(hmid)
    ff = jnp.dot(hmid.astype(jnp.bfloat16), w2_ref[...],
                 preferred_element_type=jnp.float32) + fb2_ref[...]

    o_ref[0] = _layer_norm(y1 + ff, g2_ref[...], b2_ref[...]).astype(o_ref.dtype)


def _rel_tables(er):
    """Precompute Er lookup tables equivalent to the PyTorch skew trick."""
    L, hd = er.shape
    ii = jnp.arange(L)[:, None]
    jj = jnp.arange(L)[None, :]
    a_idx = jnp.clip(jj - ii + L - 1, 0, L - 1)
    a_tab = jnp.where((jj <= ii)[:, :, None], er[a_idx], 0.0)        # [L, L, hd]
    b_idx = jnp.clip(jj - ii - 2, 0, L - 1)
    b_tab = jnp.where((jj >= ii + 2)[:, :, None], er[b_idx], 0.0)    # [L, L, hd]
    return (jnp.transpose(a_tab, (2, 0, 1)).astype(jnp.float32),
            jnp.transpose(b_tab, (2, 0, 1)).astype(jnp.float32))


def transformer_encoder(x, params):
    B, L, D = x.shape
    H = params["num_heads"]
    hd = D // H
    Hf = params["w1"].shape[1]
    ra, rb = _rel_tables(params["er"])              # f32 (VPU contraction)

    bf16 = jnp.bfloat16
    wq = params["wq"].astype(bf16)
    wk = params["wk"].astype(bf16)
    wv = params["wv"].astype(bf16)
    w1 = params["w1"].astype(bf16)
    w2 = params["w2"].astype(bf16)

    kernel = functools.partial(_encoder_kernel, num_heads=H,
                               scale=float(D) ** -0.5)

    def const(shape):
        return pl.BlockSpec(shape, lambda b: (0,) * len(shape))

    in_specs = [
        pl.BlockSpec((1, L, D), lambda b: (b, 0, 0)),     # x
        const((D, D)), const((D, D)), const((D, D)),      # Wq, Wk, Wv (bf16)
        const((hd, L, L)), const((hd, L, L)),             # rel-pos tables
        const((1, D)), const((1, D)),                     # to_out LN
        const((1, D)), const((1, D)),                     # norm1
        const((D, Hf)), const((1, Hf)),                   # fc1
        const((Hf, D)), const((1, D)),                    # fc2
        const((1, D)), const((1, D)),                     # norm2
    ]

    return pl.pallas_call(
        kernel,
        out_shape=jax.ShapeDtypeStruct((B, L, D), x.dtype),
        grid=(B,),
        in_specs=in_specs,
        out_specs=pl.BlockSpec((1, L, D), lambda b: (b, 0, 0)),
        compiler_params=pltpu.CompilerParams(
            dimension_semantics=("parallel",),            # v7x megacore
        ),
    )(
        x,
        wq, wk, wv,
        ra, rb,
        params["g_attn"], params["b_attn"],
        params["g1"], params["b1"],
        w1, params["fb1"],
        w2, params["fb2"],
        params["g2"], params["b2"],
    )


def _reference(x, params):
    """Pure-JAX f32 replica of the PyTorch forward (incl. pad+reshape skew)."""
    B, L, D = x.shape
    H = params["num_heads"]
    hd = D // H
    scale = float(D) ** -0.5

    q = x @ params["wq"]
    k = x @ params["wk"]
    v = x @ params["wv"]
    q = q.reshape(B, L, H, hd).transpose(0, 2, 1, 3)      # [B, H, L, hd]
    v = v.reshape(B, L, H, hd).transpose(0, 2, 1, 3)      # [B, H, L, hd]
    k = k.reshape(B, L, H, hd).transpose(0, 2, 3, 1)      # [B, H, hd, L]

    qer = jnp.einsum("bhld,md->bhlm", q, params["er"])    # q @ Er.T
    padded = jnp.pad(qer, ((0, 0), (0, 0), (0, 0), (1, 0)))
    srel = padded.reshape(B, H, L + 1, L)[:, :, 1:, :]

    attn = (jnp.einsum("bhld,bhdm->bhlm", q, k) + srel) * scale
    attn = jax.nn.softmax(attn, axis=-1)
    out = jnp.einsum("bhlm,bhmd->bhld", attn, v)
    out = out.transpose(0, 2, 1, 3).reshape(B, L, D)
    out = _layer_norm(out, params["g_attn"], params["b_attn"])

    y1 = _layer_norm(x + out, params["g1"], params["b1"])
    ffn = _gelu_tanh(y1 @ params["w1"] + params["fb1"]) @ params["w2"] + params["fb2"]
    return _layer_norm(y1 + ffn, params["g2"], params["b2"])


if __name__ == "__main__":
    # seq_len=44 is hard-coded inside Attention_Rel_Vec; small dim/heads.
    B, L, D, H = 2, 44, 32, 4
    hd, Hf = D // H, int(D * 4.0)

    keys = jax.random.split(jax.random.PRNGKey(0), 16)
    nrm = lambda i, shape, s=1.0: jax.random.normal(keys[i], shape, jnp.float32) * s

    params = {
        "num_heads": H,
        "wq": nrm(1, (D, D), D ** -0.5),
        "wk": nrm(2, (D, D), D ** -0.5),
        "wv": nrm(3, (D, D), D ** -0.5),
        "er": nrm(4, (L, hd)),
        "g_attn": 1.0 + nrm(5, (1, D), 0.05), "b_attn": nrm(6, (1, D), 0.05),
        "g1": 1.0 + nrm(7, (1, D), 0.05), "b1": nrm(8, (1, D), 0.05),
        "g2": 1.0 + nrm(9, (1, D), 0.05), "b2": nrm(10, (1, D), 0.05),
        "w1": nrm(11, (D, Hf), D ** -0.5), "fb1": nrm(12, (1, Hf), 0.05),
        "w2": nrm(13, (Hf, D), Hf ** -0.5), "fb2": nrm(14, (1, D), 0.05),
    }
    x = nrm(0, (B, L, D))

    y = transformer_encoder(x, params)
    y = jax.block_until_ready(y)

    with jax.default_matmul_precision("highest"):
        y_ref = _reference(x, params)
    y_ref = jax.block_until_ready(y_ref)

    assert y.shape == (B, L, D)
    assert bool(jnp.all(jnp.isfinite(y)))
    # Tolerance covers bf16 MXU operand rounding + approx reciprocal
    # (f32 reference); kernel structure/numerics otherwise exact.
    assert jnp.allclose(y, y_ref, atol=3e-2, rtol=3e-2), \
        float(jnp.max(jnp.abs(y - y_ref)))

    print("KERNEL_OK")
</pallas_src>

<mosaic_0001>
module attributes {stable_mosaic.version = 11 : i64} {
  func.func @_encoder_kernel(%arg0: i32, %arg1: memref<1x44x32xf32, #tpu.memory_space<vmem>>, %arg2: memref<32x32xbf16, #tpu.memory_space<vmem>>, %arg3: memref<32x32xbf16, #tpu.memory_space<vmem>>, %arg4: memref<32x32xbf16, #tpu.memory_space<vmem>>, %arg5: memref<8x44x44xf32, #tpu.memory_space<vmem>>, %arg6: memref<8x44x44xf32, #tpu.memory_space<vmem>>, %arg7: memref<1x32xf32, #tpu.memory_space<vmem>>, %arg8: memref<1x32xf32, #tpu.memory_space<vmem>>, %arg9: memref<1x32xf32, #tpu.memory_space<vmem>>, %arg10: memref<1x32xf32, #tpu.memory_space<vmem>>, %arg11: memref<32x128xbf16, #tpu.memory_space<vmem>>, %arg12: memref<1x128xf32, #tpu.memory_space<vmem>>, %arg13: memref<128x32xbf16, #tpu.memory_space<vmem>>, %arg14: memref<1x32xf32, #tpu.memory_space<vmem>>, %arg15: memref<1x32xf32, #tpu.memory_space<vmem>>, %arg16: memref<1x32xf32, #tpu.memory_space<vmem>>, %arg17: memref<1x44x32xf32, #tpu.memory_space<vmem>>) attributes {dimension_semantics = [#tpu.dimension_semantics<parallel>], iteration_bounds = array<i64: 2>, scalar_prefetch = 0 : i64, scratch_operands = 0 : i64, tpu.core_type = #tpu.core_type<tc>, window_params = [{transform_indices = @transform_0, window_bounds = array<i64: 1, 44, 32>}, {pipeline_mode = #tpu.pipeline_mode<synchronous>, transform_indices = @transform_1, window_bounds = array<i64: 32, 32>}, {pipeline_mode = #tpu.pipeline_mode<synchronous>, transform_indices = @transform_2, window_bounds = array<i64: 32, 32>}, {pipeline_mode = #tpu.pipeline_mode<synchronous>, transform_indices = @transform_3, window_bounds = array<i64: 32, 32>}, {pipeline_mode = #tpu.pipeline_mode<synchronous>, transform_indices = @transform_4, window_bounds = array<i64: 8, 44, 44>}, {pipeline_mode = #tpu.pipeline_mode<synchronous>, transform_indices = @transform_5, window_bounds = array<i64: 8, 44, 44>}, {pipeline_mode = #tpu.pipeline_mode<synchronous>, transform_indices = @transform_6, window_bounds = array<i64: 1, 32>}, {pipeline_mode = #tpu.pipeline_mode<synchronous>, transform_indices = @transform_7, window_bounds = array<i64: 1, 32>}, {pipeline_mode = #tpu.pipeline_mode<synchronous>, transform_indices = @transform_8, window_bounds = array<i64: 1, 32>}, {pipeline_mode = #tpu.pipeline_mode<synchronous>, transform_indices = @transform_9, window_bounds = array<i64: 1, 32>}, {pipeline_mode = #tpu.pipeline_mode<synchronous>, transform_indices = @transform_10, window_bounds = array<i64: 32, 128>}, {pipeline_mode = #tpu.pipeline_mode<synchronous>, transform_indices = @transform_11, window_bounds = array<i64: 1, 128>}, {pipeline_mode = #tpu.pipeline_mode<synchronous>, transform_indices = @transform_12, window_bounds = array<i64: 128, 32>}, {pipeline_mode = #tpu.pipeline_mode<synchronous>, transform_indices = @transform_13, window_bounds = array<i64: 1, 32>}, {pipeline_mode = #tpu.pipeline_mode<synchronous>, transform_indices = @transform_14, window_bounds = array<i64: 1, 32>}, {pipeline_mode = #tpu.pipeline_mode<synchronous>, transform_indices = @transform_15, window_bounds = array<i64: 1, 32>}, {transform_indices = @transform_16, window_bounds = array<i64: 1, 44, 32>}]} {
    %c0 = arith.constant 0 : index
    %c0_0 = arith.constant 0 : index
    %c0_1 = arith.constant 0 : index
    %0 = vector.load %arg1[%c0, %c0_0, %c0_1] : memref<1x44x32xf32, #tpu.memory_space<vmem>>, vector<1x44x32xf32>
    %1 = vector.shape_cast %0 : vector<1x44x32xf32> to vector<44x32xf32>
    %2 = arith.truncf %1 : vector<44x32xf32> to vector<44x32xbf16>
    %c0_2 = arith.constant 0 : index
    %c0_3 = arith.constant 0 : index
    %3 = vector.load %arg2[%c0_2, %c0_3] : memref<32x32xbf16, #tpu.memory_space<vmem>>, vector<32x32xbf16>
    %cst = arith.constant dense<0.000000e+00> : vector<44x32xf32>
    %4 = tpu.matmul %2, %3, %cst {dimension_numbers = #tpu.dot_dimension_numbers<[1], [0], [0], [1], [0, 0, 1, 1], [], []>} : vector<44x32xbf16>, vector<32x32xbf16>, vector<44x32xf32> -> vector<44x32xf32>
    %cst_4 = arith.constant 0.176776692 : f32
    %5 = vector.broadcast %cst_4 : f32 to vector<44x32xf32>
    %6 = arith.mulf %4, %5 : vector<44x32xf32>
    %c0_5 = arith.constant 0 : index
    %c0_6 = arith.constant 0 : index
    %7 = vector.load %arg3[%c0_5, %c0_6] : memref<32x32xbf16, #tpu.memory_space<vmem>>, vector<32x32xbf16>
    %cst_7 = arith.constant dense<0.000000e+00> : vector<44x32xf32>
    %8 = tpu.matmul %2, %7, %cst_7 {dimension_numbers = #tpu.dot_dimension_numbers<[1], [0], [0], [1], [0, 0, 1, 1], [], []>} : vector<44x32xbf16>, vector<32x32xbf16>, vector<44x32xf32> -> vector<44x32xf32>
    %c0_8 = arith.constant 0 : index
    %c0_9 = arith.constant 0 : index
    %9 = vector.load %arg4[%c0_8, %c0_9] : memref<32x32xbf16, #tpu.memory_space<vmem>>, vector<32x32xbf16>
    %cst_10 = arith.constant dense<0.000000e+00> : vector<44x32xf32>
    %10 = tpu.matmul %2, %9, %cst_10 {dimension_numbers = #tpu.dot_dimension_numbers<[1], [0], [0], [1], [0, 0, 1, 1], [], []>} : vector<44x32xbf16>, vector<32x32xbf16>, vector<44x32xf32> -> vector<44x32xf32>
    %11 = tpu.iota {dimensions = array<i32: 0>} : vector<44x44xi32>
    %12 = tpu.iota {dimensions = array<i32: 1>} : vector<44x44xi32>
    %c1_i32 = arith.constant 1 : i32
    %13 = vector.broadcast %c1_i32 : i32 to vector<44x44xi32>
    %14 = arith.addi %11, %13 : vector<44x44xi32>
    %15 = arith.cmpi eq, %12, %14 : vector<44x44xi32>
    %16 = arith.extui %15 : vector<44x44xi1> to vector<44x44xi32>
    %17 = arith.sitofp %16 : vector<44x44xi32> to vector<44x44xf32>
    %cst_11 = arith.constant dense<0.000000e+00> : vector<44x32xf32>
    %18 = tpu.matmul %17, %6, %cst_11 {dimension_numbers = #tpu.dot_dimension_numbers<[1], [0], [0], [1], [0, 0, 1, 1], [], []>} : vector<44x44xf32>, vector<44x32xf32>, vector<44x32xf32> -> vector<44x32xf32>
    %19 = arith.truncf %6 : vector<44x32xf32> to vector<44x32xbf16>
    %20 = arith.truncf %8 : vector<44x32xf32> to vector<44x32xbf16>
    %21 = arith.truncf %10 : vector<44x32xf32> to vector<44x32xbf16>
    %22 = vector.extract_strided_slice %6 {offsets = [0, 0], sizes = [44, 1], strides = [1, 1]} : vector<44x32xf32> to vector<44x1xf32>
    %c0_12 = arith.constant 0 : index
    %c0_13 = arith.constant 0 : index
    %c0_14 = arith.constant 0 : index
    %23 = vector.load %arg5[%c0_12, %c0_13, %c0_14] : memref<8x44x44xf32, #tpu.memory_space<vmem>>, vector<1x44x44xf32>
    %24 = vector.shape_cast %23 : vector<1x44x44xf32> to vector<44x44xf32>
    %25 = vector.broadcast %22 : vector<44x1xf32> to vector<44x44xf32>
    %26 = arith.mulf %25, %24 : vector<44x44xf32>
    %27 = vector.extract_strided_slice %18 {offsets = [0, 0], sizes = [44, 1], strides = [1, 1]} : vector<44x32xf32> to vector<44x1xf32>
    %c0_15 = arith.constant 0 : index
    %c0_16 = arith.constant 0 : index
    %c0_17 = arith.constant 0 : index
    %28 = vector.load %arg6[%c0_15, %c0_16, %c0_17] : memref<8x44x44xf32, #tpu.memory_space<vmem>>, vector<1x44x44xf32>
    %29 = vector.shape_cast %28 : vector<1x44x44xf32> to vector<44x44xf32>
    %30 = vector.broadcast %27 : vector<44x1xf32> to vector<44x44xf32>
    %31 = arith.mulf %30, %29 : vector<44x44xf32>
    %32 = arith.addf %26, %31 : vector<44x44xf32>
    %33 = vector.extract_strided_slice %6 {offsets = [0, 1], sizes = [44, 1], strides = [1, 1]} : vector<44x32xf32> to vector<44x1xf32>
    %c1 = arith.constant 1 : index
    %c0_18 = arith.constant 0 : index
    %c0_19 = arith.constant 0 : index
    %34 = vector.load %arg5[%c1, %c0_18, %c0_19] : memref<8x44x44xf32, #tpu.memory_space<vmem>>, vector<1x44x44xf32>
    %35 = vector.shape_cast %34 : vector<1x44x44xf32> to vector<44x44xf32>
    %36 = vector.broadcast %33 : vector<44x1xf32> to vector<44x44xf32>
    %37 = arith.mulf %36, %35 : vector<44x44xf32>
    %38 = arith.addf %32, %37 : vector<44x44xf32>
    %39 = vector.extract_strided_slice %18 {offsets = [0, 1], sizes = [44, 1], strides = [1, 1]} : vector<44x32xf32> to vector<44x1xf32>
    %c1_20 = arith.constant 1 : index
    %c0_21 = arith.constant 0 : index
    %c0_22 = arith.constant 0 : index
    %40 = vector.load %arg6[%c1_20, %c0_21, %c0_22] : memref<8x44x44xf32, #tpu.memory_space<vmem>>, vector<1x44x44xf32>
    %41 = vector.shape_cast %40 : vector<1x44x44xf32> to vector<44x44xf32>
    %42 = vector.broadcast %39 : vector<44x1xf32> to vector<44x44xf32>
    %43 = arith.mulf %42, %41 : vector<44x44xf32>
    %44 = arith.addf %38, %43 : vector<44x44xf32>
    %45 = vector.extract_strided_slice %6 {offsets = [0, 2], sizes = [44, 1], strides = [1, 1]} : vector<44x32xf32> to vector<44x1xf32>
    %c2 = arith.constant 2 : index
    %c0_23 = arith.constant 0 : index
    %c0_24 = arith.constant 0 : index
    %46 = vector.load %arg5[%c2, %c0_23, %c0_24] : memref<8x44x44xf32, #tpu.memory_space<vmem>>, vector<1x44x44xf32>
    %47 = vector.shape_cast %46 : vector<1x44x44xf32> to vector<44x44xf32>
    %48 = vector.broadcast %45 : vector<44x1xf32> to vector<44x44xf32>
    %49 = arith.mulf %48, %47 : vector<44x44xf32>
    %50 = arith.addf %44, %49 : vector<44x44xf32>
    %51 = vector.extract_strided_slice %18 {offsets = [0, 2], sizes = [44, 1], strides = [1, 1]} : vector<44x32xf32> to vector<44x1xf32>
    %c2_25 = arith.constant 2 : index
    %c0_26 = arith.constant 0 : index
    %c0_27 = arith.constant 0 : index
    %52 = vector.load %arg6[%c2_25, %c0_26, %c0_27] : memref<8x44x44xf32, #tpu.memory_space<vmem>>, vector<1x44x44xf32>
    %53 = vector.shape_cast %52 : vector<1x44x44xf32> to vector<44x44xf32>
    %54 = vector.broadcast %51 : vector<44x1xf32> to vector<44x44xf32>
    %55 = arith.mulf %54, %53 : vector<44x44xf32>
    %56 = arith.addf %50, %55 : vector<44x44xf32>
    %57 = vector.extract_strided_slice %6 {offsets = [0, 3], sizes = [44, 1], strides = [1, 1]} : vector<44x32xf32> to vector<44x1xf32>
    %c3 = arith.constant 3 : index
    %c0_28 = arith.constant 0 : index
    %c0_29 = arith.constant 0 : index
    %58 = vector.load %arg5[%c3, %c0_28, %c0_29] : memref<8x44x44xf32, #tpu.memory_space<vmem>>, vector<1x44x44xf32>
    %59 = vector.shape_cast %58 : vector<1x44x44xf32> to vector<44x44xf32>
    %60 = vector.broadcast %57 : vector<44x1xf32> to vector<44x44xf32>
    %61 = arith.mulf %60, %59 : vector<44x44xf32>
    %62 = arith.addf %56, %61 : vector<44x44xf32>
    %63 = vector.extract_strided_slice %18 {offsets = [0, 3], sizes = [44, 1], strides = [1, 1]} : vector<44x32xf32> to vector<44x1xf32>
    %c3_30 = arith.constant 3 : index
    %c0_31 = arith.constant 0 : index
    %c0_32 = arith.constant 0 : index
    %64 = vector.load %arg6[%c3_30, %c0_31, %c0_32] : memref<8x44x44xf32, #tpu.memory_space<vmem>>, vector<1x44x44xf32>
    %65 = vector.shape_cast %64 : vector<1x44x44xf32> to vector<44x44xf32>
    %66 = vector.broadcast %63 : vector<44x1xf32> to vector<44x44xf32>
    %67 = arith.mulf %66, %65 : vector<44x44xf32>
    %68 = arith.addf %62, %67 : vector<44x44xf32>
    %69 = vector.extract_strided_slice %6 {offsets = [0, 4], sizes = [44, 1], strides = [1, 1]} : vector<44x32xf32> to vector<44x1xf32>
    %c4 = arith.constant 4 : index
    %c0_33 = arith.constant 0 : index
    %c0_34 = arith.constant 0 : index
    %70 = vector.load %arg5[%c4, %c0_33, %c0_34] : memref<8x44x44xf32, #tpu.memory_space<vmem>>, vector<1x44x44xf32>
    %71 = vector.shape_cast %70 : vector<1x44x44xf32> to vector<44x44xf32>
    %72 = vector.broadcast %69 : vector<44x1xf32> to vector<44x44xf32>
    %73 = arith.mulf %72, %71 : vector<44x44xf32>
    %74 = arith.addf %68, %73 : vector<44x44xf32>
    %75 = vector.extract_strided_slice %18 {offsets = [0, 4], sizes = [44, 1], strides = [1, 1]} : vector<44x32xf32> to vector<44x1xf32>
    %c4_35 = arith.constant 4 : index
    %c0_36 = arith.constant 0 : index
    %c0_37 = arith.constant 0 : index
    %76 = vector.load %arg6[%c4_35, %c0_36, %c0_37] : memref<8x44x44xf32, #tpu.memory_space<vmem>>, vector<1x44x44xf32>
    %77 = vector.shape_cast %76 : vector<1x44x44xf32> to vector<44x44xf32>
    %78 = vector.broadcast %75 : vector<44x1xf32> to vector<44x44xf32>
    %79 = arith.mulf %78, %77 : vector<44x44xf32>
    %80 = arith.addf %74, %79 : vector<44x44xf32>
    %81 = vector.extract_strided_slice %6 {offsets = [0, 5], sizes = [44, 1], strides = [1, 1]} : vector<44x32xf32> to vector<44x1xf32>
    %c5 = arith.constant 5 : index
    %c0_38 = arith.constant 0 : index
    %c0_39 = arith.constant 0 : index
    %82 = vector.load %arg5[%c5, %c0_38, %c0_39] : memref<8x44x44xf32, #tpu.memory_space<vmem>>, vector<1x44x44xf32>
    %83 = vector.shape_cast %82 : vector<1x44x44xf32> to vector<44x44xf32>
    %84 = vector.broadcast %81 : vector<44x1xf32> to vector<44x44xf32>
    %85 = arith.mulf %84, %83 : vector<44x44xf32>
    %86 = arith.addf %80, %85 : vector<44x44xf32>
    %87 = vector.extract_strided_slice %18 {offsets = [0, 5], sizes = [44, 1], strides = [1, 1]} : vector<44x32xf32> to vector<44x1xf32>
    %c5_40 = arith.constant 5 : index
    %c0_41 = arith.constant 0 : index
    %c0_42 = arith.constant 0 : index
    %88 = vector.load %arg6[%c5_40, %c0_41, %c0_42] : memref<8x44x44xf32, #tpu.memory_space<vmem>>, vector<1x44x44xf32>
    %89 = vector.shape_cast %88 : vector<1x44x44xf32> to vector<44x44xf32>
    %90 = vector.broadcast %87 : vector<44x1xf32> to vector<44x44xf32>
    %91 = arith.mulf %90, %89 : vector<44x44xf32>
    %92 = arith.addf %86, %91 : vector<44x44xf32>
    %93 = vector.extract_strided_slice %6 {offsets = [0, 6], sizes = [44, 1], strides = [1, 1]} : vector<44x32xf32> to vector<44x1xf32>
    %c6 = arith.constant 6 : index
    %c0_43 = arith.constant 0 : index
    %c0_44 = arith.constant 0 : index
    %94 = vector.load %arg5[%c6, %c0_43, %c0_44] : memref<8x44x44xf32, #tpu.memory_space<vmem>>, vector<1x44x44xf32>
    %95 = vector.shape_cast %94 : vector<1x44x44xf32> to vector<44x44xf32>
    %96 = vector.broadcast %93 : vector<44x1xf32> to vector<44x44xf32>
    %97 = arith.mulf %96, %95 : vector<44x44xf32>
    %98 = arith.addf %92, %97 : vector<44x44xf32>
    %99 = vector.extract_strided_slice %18 {offsets = [0, 6], sizes = [44, 1], strides = [1, 1]} : vector<44x32xf32> to vector<44x1xf32>
    %c6_45 = arith.constant 6 : index
    %c0_46 = arith.constant 0 : index
    %c0_47 = arith.constant 0 : index
    %100 = vector.load %arg6[%c6_45, %c0_46, %c0_47] : memref<8x44x44xf32, #tpu.memory_space<vmem>>, vector<1x44x44xf32>
    %101 = vector.shape_cast %100 : vector<1x44x44xf32> to vector<44x44xf32>
    %102 = vector.broadcast %99 : vector<44x1xf32> to vector<44x44xf32>
    %103 = arith.mulf %102, %101 : vector<44x44xf32>
    %104 = arith.addf %98, %103 : vector<44x44xf32>
    %105 = vector.extract_strided_slice %6 {offsets = [0, 7], sizes = [44, 1], strides = [1, 1]} : vector<44x32xf32> to vector<44x1xf32>
    %c7 = arith.constant 7 : index
    %c0_48 = arith.constant 0 : index
    %c0_49 = arith.constant 0 : index
    %106 = vector.load %arg5[%c7, %c0_48, %c0_49] : memref<8x44x44xf32, #tpu.memory_space<vmem>>, vector<1x44x44xf32>
    %107 = vector.shape_cast %106 : vector<1x44x44xf32> to vector<44x44xf32>
    %108 = vector.broadcast %105 : vector<44x1xf32> to vector<44x44xf32>
    %109 = arith.mulf %108, %107 : vector<44x44xf32>
    %110 = arith.addf %104, %109 : vector<44x44xf32>
    %111 = vector.extract_strided_slice %18 {offsets = [0, 7], sizes = [44, 1], strides = [1, 1]} : vector<44x32xf32> to vector<44x1xf32>
    %c7_50 = arith.constant 7 : index
    %c0_51 = arith.constant 0 : index
    %c0_52 = arith.constant 0 : index
    %112 = vector.load %arg6[%c7_50, %c0_51, %c0_52] : memref<8x44x44xf32, #tpu.memory_space<vmem>>, vector<1x44x44xf32>
    %113 = vector.shape_cast %112 : vector<1x44x44xf32> to vector<44x44xf32>
    %114 = vector.broadcast %111 : vector<44x1xf32> to vector<44x44xf32>
    %115 = arith.mulf %114, %113 : vector<44x44xf32>
    %116 = arith.addf %110, %115 : vector<44x44xf32>
    %117 = vector.extract_strided_slice %19 {offsets = [0, 0], sizes = [44, 8], strides = [1, 1]} : vector<44x32xbf16> to vector<44x8xbf16>
    %118 = vector.extract_strided_slice %20 {offsets = [0, 0], sizes = [44, 8], strides = [1, 1]} : vector<44x32xbf16> to vector<44x8xbf16>
    %cst_53 = arith.constant dense<0.000000e+00> : vector<44x44xf32>
    %119 = tpu.matmul %117, %118, %cst_53 {dimension_numbers = #tpu.dot_dimension_numbers<[1], [1], [0], [0], [0, 0, 1, 0], [], []>} : vector<44x8xbf16>, vector<44x8xbf16>, vector<44x44xf32> -> vector<44x44xf32>
    %120 = arith.addf %119, %116 : vector<44x44xf32>
    %cst_54 = arith.constant dense<0xFF800000> : vector<44xf32>
    %121 = vector.multi_reduction <maximumf>, %120, %cst_54 [1] : vector<44x44xf32> to vector<44xf32>
    %122 = vector.shape_cast %121 : vector<44xf32> to vector<44x1xf32>
    %123 = vector.broadcast %122 : vector<44x1xf32> to vector<44x44xf32>
    %124 = arith.subf %120, %123 : vector<44x44xf32>
    %125 = math.exp %124 : vector<44x44xf32>
    %cst_55 = arith.constant dense<0.000000e+00> : vector<44xf32>
    %126 = vector.multi_reduction <add>, %125, %cst_55 [1] : vector<44x44xf32> to vector<44xf32>
    %127 = vector.shape_cast %126 : vector<44xf32> to vector<44x1xf32>
    %128 = tpu.reciprocal %127 {approx = true} : vector<44x1xf32> -> vector<44x1xf32>
    %129 = vector.broadcast %128 : vector<44x1xf32> to vector<44x44xf32>
    %130 = arith.mulf %125, %129 : vector<44x44xf32>
    %131 = arith.truncf %130 : vector<44x44xf32> to vector<44x44xbf16>
    %132 = vector.extract_strided_slice %21 {offsets = [0, 0], sizes = [44, 8], strides = [1, 1]} : vector<44x32xbf16> to vector<44x8xbf16>
    %cst_56 = arith.constant dense<0.000000e+00> : vector<44x8xf32>
    %133 = tpu.matmul %131, %132, %cst_56 {dimension_numbers = #tpu.dot_dimension_numbers<[1], [0], [0], [1], [0, 0, 1, 1], [], []>} : vector<44x44xbf16>, vector<44x8xbf16>, vector<44x8xf32> -> vector<44x8xf32>
    %134 = vector.extract_strided_slice %6 {offsets = [0, 8], sizes = [44, 1], strides = [1, 1]} : vector<44x32xf32> to vector<44x1xf32>
    %c0_57 = arith.constant 0 : index
    %c0_58 = arith.constant 0 : index
    %c0_59 = arith.constant 0 : index
    %135 = vector.load %arg5[%c0_57, %c0_58, %c0_59] : memref<8x44x44xf32, #tpu.memory_space<vmem>>, vector<1x44x44xf32>
    %136 = vector.shape_cast %135 : vector<1x44x44xf32> to vector<44x44xf32>
    %137 = vector.broadcast %134 : vector<44x1xf32> to vector<44x44xf32>
    %138 = arith.mulf %137, %136 : vector<44x44xf32>
    %139 = vector.extract_strided_slice %18 {offsets = [0, 8], sizes = [44, 1], strides = [1, 1]} : vector<44x32xf32> to vector<44x1xf32>
    %c0_60 = arith.constant 0 : index
    %c0_61 = arith.constant 0 : index
    %c0_62 = arith.constant 0 : index
    %140 = vector.load %arg6[%c0_60, %c0_61, %c0_62] : memref<8x44x44xf32, #tpu.memory_space<vmem>>, vector<1x44x44xf32>
    %141 = vector.shape_cast %140 : vector<1x44x44xf32> to vector<44x44xf32>
    %142 = vector.broadcast %139 : vector<44x1xf32> to vector<44x44xf32>
    %143 = arith.mulf %142, %141 : vector<44x44xf32>
    %144 = arith.addf %138, %143 : vector<44x44xf32>
    %145 = vector.extract_strided_slice %6 {offsets = [0, 9], sizes = [44, 1], strides = [1, 1]} : vector<44x32xf32> to vector<44x1xf32>
    %c1_63 = arith.constant 1 : index
    %c0_64 = arith.constant 0 : index
    %c0_65 = arith.constant 0 : index
    %146 = vector.load %arg5[%c1_63, %c0_64, %c0_65] : memref<8x44x44xf32, #tpu.memory_space<vmem>>, vector<1x44x44xf32>
    %147 = vector.shape_cast %146 : vector<1x44x44xf32> to vector<44x44xf32>
    %148 = vector.broadcast %145 : vector<44x1xf32> to vector<44x44xf32>
    %149 = arith.mulf %148, %147 : vector<44x44xf32>
    %150 = arith.addf %144, %149 : vector<44x44xf32>
    %151 = vector.extract_strided_slice %18 {offsets = [0, 9], sizes = [44, 1], strides = [1, 1]} : vector<44x32xf32> to vector<44x1xf32>
    %c1_66 = arith.constant 1 : index
    %c0_67 = arith.constant 0 : index
    %c0_68 = arith.constant 0 : index
    %152 = vector.load %arg6[%c1_66, %c0_67, %c0_68] : memref<8x44x44xf32, #tpu.memory_space<vmem>>, vector<1x44x44xf32>
    %153 = vector.shape_cast %152 : vector<1x44x44xf32> to vector<44x44xf32>
    %154 = vector.broadcast %151 : vector<44x1xf32> to vector<44x44xf32>
    %155 = arith.mulf %154, %153 : vector<44x44xf32>
    %156 = arith.addf %150, %155 : vector<44x44xf32>
    %157 = vector.extract_strided_slice %6 {offsets = [0, 10], sizes = [44, 1], strides = [1, 1]} : vector<44x32xf32> to vector<44x1xf32>
    %c2_69 = arith.constant 2 : index
    %c0_70 = arith.constant 0 : index
    %c0_71 = arith.constant 0 : index
    %158 = vector.load %arg5[%c2_69, %c0_70, %c0_71] : memref<8x44x44xf32, #tpu.memory_space<vmem>>, vector<1x44x44xf32>
    %159 = vector.shape_cast %158 : vector<1x44x44xf32> to vector<44x44xf32>
    %160 = vector.broadcast %157 : vector<44x1xf32> to vector<44x44xf32>
    %161 = arith.mulf %160, %159 : vector<44x44xf32>
    %162 = arith.addf %156, %161 : vector<44x44xf32>
    %163 = vector.extract_strided_slice %18 {offsets = [0, 10], sizes = [44, 1], strides = [1, 1]} : vector<44x32xf32> to vector<44x1xf32>
    %c2_72 = arith.constant 2 : index
    %c0_73 = arith.constant 0 : index
    %c0_74 = arith.constant 0 : index
    %164 = vector.load %arg6[%c2_72, %c0_73, %c0_74] : memref<8x44x44xf32, #tpu.memory_space<vmem>>, vector<1x44x44xf32>
    %165 = vector.shape_cast %164 : vector<1x44x44xf32> to vector<44x44xf32>
    %166 = vector.broadcast %163 : vector<44x1xf32> to vector<44x44xf32>
    %167 = arith.mulf %166, %165 : vector<44x44xf32>
    %168 = arith.addf %162, %167 : vector<44x44xf32>
    %169 = vector.extract_strided_slice %6 {offsets = [0, 11], sizes = [44, 1], strides = [1, 1]} : vector<44x32xf32> to vector<44x1xf32>
    %c3_75 = arith.constant 3 : index
    %c0_76 = arith.constant 0 : index
    %c0_77 = arith.constant 0 : index
    %170 = vector.load %arg5[%c3_75, %c0_76, %c0_77] : memref<8x44x44xf32, #tpu.memory_space<vmem>>, vector<1x44x44xf32>
    %171 = vector.shape_cast %170 : vector<1x44x44xf32> to vector<44x44xf32>
    %172 = vector.broadcast %169 : vector<44x1xf32> to vector<44x44xf32>
    %173 = arith.mulf %172, %171 : vector<44x44xf32>
    %174 = arith.addf %168, %173 : vector<44x44xf32>
    %175 = vector.extract_strided_slice %18 {offsets = [0, 11], sizes = [44, 1], strides = [1, 1]} : vector<44x32xf32> to vector<44x1xf32>
    %c3_78 = arith.constant 3 : index
    %c0_79 = arith.constant 0 : index
    %c0_80 = arith.constant 0 : index
    %176 = vector.load %arg6[%c3_78, %c0_79, %c0_80] : memref<8x44x44xf32, #tpu.memory_space<vmem>>, vector<1x44x44xf32>
    %177 = vector.shape_cast %176 : vector<1x44x44xf32> to vector<44x44xf32>
    %178 = vector.broadcast %175 : vector<44x1xf32> to vector<44x44xf32>
    %179 = arith.mulf %178, %177 : vector<44x44xf32>
    %180 = arith.addf %174, %179 : vector<44x44xf32>
    %181 = vector.extract_strided_slice %6 {offsets = [0, 12], sizes = [44, 1], strides = [1, 1]} : vector<44x32xf32> to vector<44x1xf32>
    %c4_81 = arith.constant 4 : index
    %c0_82 = arith.constant 0 : index
    %c0_83 = arith.constant 0 : index
    %182 = vector.load %arg5[%c4_81, %c0_82, %c0_83] : memref<8x44x44xf32, #tpu.memory_space<vmem>>, vector<1x44x44xf32>
    %183 = vector.shape_cast %182 : vector<1x44x44xf32> to vector<44x44xf32>
    %184 = vector.broadcast %181 : vector<44x1xf32> to vector<44x44xf32>
    %185 = arith.mulf %184, %183 : vector<44x44xf32>
    %186 = arith.addf %180, %185 : vector<44x44xf32>
    %187 = vector.extract_strided_slice %18 {offsets = [0, 12], sizes = [44, 1], strides = [1, 1]} : vector<44x32xf32> to vector<44x1xf32>
    %c4_84 = arith.constant 4 : index
    %c0_85 = arith.constant 0 : index
    %c0_86 = arith.constant 0 : index
    %188 = vector.load %arg6[%c4_84, %c0_85, %c0_86] : memref<8x44x44xf32, #tpu.memory_space<vmem>>, vector<1x44x44xf32>
    %189 = vector.shape_cast %188 : vector<1x44x44xf32> to vector<44x44xf32>
    %190 = vector.broadcast %187 : vector<44x1xf32> to vector<44x44xf32>
    %191 = arith.mulf %190, %189 : vector<44x44xf32>
    %192 = arith.addf %186, %191 : vector<44x44xf32>
    %193 = vector.extract_strided_slice %6 {offsets = [0, 13], sizes = [44, 1], strides = [1, 1]} : vector<44x32xf32> to vector<44x1xf32>
    %c5_87 = arith.constant 5 : index
    %c0_88 = arith.constant 0 : index
    %c0_89 = arith.constant 0 : index
    %194 = vector.load %arg5[%c5_87, %c0_88, %c0_89] : memref<8x44x44xf32, #tpu.memory_space<vmem>>, vector<1x44x44xf32>
    %195 = vector.shape_cast %194 : vector<1x44x44xf32> to vector<44x44xf32>
    %196 = vector.broadcast %193 : vector<44x1xf32> to vector<44x44xf32>
    %197 = arith.mulf %196, %195 : vector<44x44xf32>
    %198 = arith.addf %192, %197 : vector<44x44xf32>
    %199 = vector.extract_strided_slice %18 {offsets = [0, 13], sizes = [44, 1], strides = [1, 1]} : vector<44x32xf32> to vector<44x1xf32>
    %c5_90 = arith.constant 5 : index
    %c0_91 = arith.constant 0 : index
    %c0_92 = arith.constant 0 : index
    %200 = vector.load %arg6[%c5_90, %c0_91, %c0_92] : memref<8x44x44xf32, #tpu.memory_space<vmem>>, vector<1x44x44xf32>
    %201 = vector.shape_cast %200 : vector<1x44x44xf32> to vector<44x44xf32>
    %202 = vector.broadcast %199 : vector<44x1xf32> to vector<44x44xf32>
    %203 = arith.mulf %202, %201 : vector<44x44xf32>
    %204 = arith.addf %198, %203 : vector<44x44xf32>
    %205 = vector.extract_strided_slice %6 {offsets = [0, 14], sizes = [44, 1], strides = [1, 1]} : vector<44x32xf32> to vector<44x1xf32>
    %c6_93 = arith.constant 6 : index
    %c0_94 = arith.constant 0 : index
    %c0_95 = arith.constant 0 : index
    %206 = vector.load %arg5[%c6_93, %c0_94, %c0_95] : memref<8x44x44xf32, #tpu.memory_space<vmem>>, vector<1x44x44xf32>
    %207 = vector.shape_cast %206 : vector<1x44x44xf32> to vector<44x44xf32>
    %208 = vector.broadcast %205 : vector<44x1xf32> to vector<44x44xf32>
    %209 = arith.mulf %208, %207 : vector<44x44xf32>
    %210 = arith.addf %204, %209 : vector<44x44xf32>
    %211 = vector.extract_strided_slice %18 {offsets = [0, 14], sizes = [44, 1], strides = [1, 1]} : vector<44x32xf32> to vector<44x1xf32>
    %c6_96 = arith.constant 6 : index
    %c0_97 = arith.constant 0 : index
    %c0_98 = arith.constant 0 : index
    %212 = vector.load %arg6[%c6_96, %c0_97, %c0_98] : memref<8x44x44xf32, #tpu.memory_space<vmem>>, vector<1x44x44xf32>
    %213 = vector.shape_cast %212 : vector<1x44x44xf32> to vector<44x44xf32>
    %214 = vector.broadcast %211 : vector<44x1xf32> to vector<44x44xf32>
    %215 = arith.mulf %214, %213 : vector<44x44xf32>
    %216 = arith.addf %210, %215 : vector<44x44xf32>
    %217 = vector.extract_strided_slice %6 {offsets = [0, 15], sizes = [44, 1], strides = [1, 1]} : vector<44x32xf32> to vector<44x1xf32>
    %c7_99 = arith.constant 7 : index
    %c0_100 = arith.constant 0 : index
    %c0_101 = arith.constant 0 : index
    %218 = vector.load %arg5[%c7_99, %c0_100, %c0_101] : memref<8x44x44xf32, #tpu.memory_space<vmem>>, vector<1x44x44xf32>
    %219 = vector.shape_cast %218 : vector<1x44x44xf32> to vector<44x44xf32>
    %220 = vector.broadcast %217 : vector<44x1xf32> to vector<44x44xf32>
    %221 = arith.mulf %220, %219 : vector<44x44xf32>
    %222 = arith.addf %216, %221 : vector<44x44xf32>
    %223 = vector.extract_strided_slice %18 {offsets = [0, 15], sizes = [44, 1], strides = [1, 1]} : vector<44x32xf32> to vector<44x1xf32>
    %c7_102 = arith.constant 7 : index
    %c0_103 = arith.constant 0 : index
    %c0_104 = arith.constant 0 : index
    %224 = vector.load %arg6[%c7_102, %c0_103, %c0_104] : memref<8x44x44xf32, #tpu.memory_space<vmem>>, vector<1x44x44xf32>
    %225 = vector.shape_cast %224 : vector<1x44x44xf32> to vector<44x44xf32>
    %226 = vector.broadcast %223 : vector<44x1xf32> to vector<44x44xf32>
    %227 = arith.mulf %226, %225 : vector<44x44xf32>
    %228 = arith.addf %222, %227 : vector<44x44xf32>
    %229 = vector.extract_strided_slice %19 {offsets = [0, 8], sizes = [44, 8], strides = [1, 1]} : vector<44x32xbf16> to vector<44x8xbf16>
    %230 = vector.extract_strided_slice %20 {offsets = [0, 8], sizes = [44, 8], strides = [1, 1]} : vector<44x32xbf16> to vector<44x8xbf16>
    %cst_105 = arith.constant dense<0.000000e+00> : vector<44x44xf32>
    %231 = tpu.matmul %229, %230, %cst_105 {dimension_numbers = #tpu.dot_dimension_numbers<[1], [1], [0], [0], [0, 0, 1, 0], [], []>} : vector<44x8xbf16>, vector<44x8xbf16>, vector<44x44xf32> -> vector<44x44xf32>
    %232 = arith.addf %231, %228 : vector<44x44xf32>
    %cst_106 = arith.constant dense<0xFF800000> : vector<44xf32>
    %233 = vector.multi_reduction <maximumf>, %232, %cst_106 [1] : vector<44x44xf32> to vector<44xf32>
    %234 = vector.shape_cast %233 : vector<44xf32> to vector<44x1xf32>
    %235 = vector.broadcast %234 : vector<44x1xf32> to vector<44x44xf32>
    %236 = arith.subf %232, %235 : vector<44x44xf32>
    %237 = math.exp %236 : vector<44x44xf32>
    %cst_107 = arith.constant dense<0.000000e+00> : vector<44xf32>
    %238 = vector.multi_reduction <add>, %237, %cst_107 [1] : vector<44x44xf32> to vector<44xf32>
    %239 = vector.shape_cast %238 : vector<44xf32> to vector<44x1xf32>
    %240 = tpu.reciprocal %239 {approx = true} : vector<44x1xf32> -> vector<44x1xf32>
    %241 = vector.broadcast %240 : vector<44x1xf32> to vector<44x44xf32>
    %242 = arith.mulf %237, %241 : vector<44x44xf32>
    %243 = arith.truncf %242 : vector<44x44xf32> to vector<44x44xbf16>
    %244 = vector.extract_strided_slice %21 {offsets = [0, 8], sizes = [44, 8], strides = [1, 1]} : vector<44x32xbf16> to vector<44x8xbf16>
    %cst_108 = arith.constant dense<0.000000e+00> : vector<44x8xf32>
    %245 = tpu.matmul %243, %244, %cst_108 {dimension_numbers = #tpu.dot_dimension_numbers<[1], [0], [0], [1], [0, 0, 1, 1], [], []>} : vector<44x44xbf16>, vector<44x8xbf16>, vector<44x8xf32> -> vector<44x8xf32>
    %246 = vector.extract_strided_slice %6 {offsets = [0, 16], sizes = [44, 1], strides = [1, 1]} : vector<44x32xf32> to vector<44x1xf32>
    %c0_109 = arith.constant 0 : index
    %c0_110 = arith.constant 0 : index
    %c0_111 = arith.constant 0 : index
    %247 = vector.load %arg5[%c0_109, %c0_110, %c0_111] : memref<8x44x44xf32, #tpu.memory_space<vmem>>, vector<1x44x44xf32>
    %248 = vector.shape_cast %247 : vector<1x44x44xf32> to vector<44x44xf32>
    %249 = vector.broadcast %246 : vector<44x1xf32> to vector<44x44xf32>
    %250 = arith.mulf %249, %248 : vector<44x44xf32>
    %251 = vector.extract_strided_slice %18 {offsets = [0, 16], sizes = [44, 1], strides = [1, 1]} : vector<44x32xf32> to vector<44x1xf32>
    %c0_112 = arith.constant 0 : index
    %c0_113 = arith.constant 0 : index
    %c0_114 = arith.constant 0 : index
    %252 = vector.load %arg6[%c0_112, %c0_113, %c0_114] : memref<8x44x44xf32, #tpu.memory_space<vmem>>, vector<1x44x44xf32>
    %253 = vector.shape_cast %252 : vector<1x44x44xf32> to vector<44x44xf32>
    %254 = vector.broadcast %251 : vector<44x1xf32> to vector<44x44xf32>
    %255 = arith.mulf %254, %253 : vector<44x44xf32>
    %256 = arith.addf %250, %255 : vector<44x44xf32>
    %257 = vector.extract_strided_slice %6 {offsets = [0, 17], sizes = [44, 1], strides = [1, 1]} : vector<44x32xf32> to vector<44x1xf32>
    %c1_115 = arith.constant 1 : index
    %c0_116 = arith.constant 0 : index
    %c0_117 = arith.constant 0 : index
    %258 = vector.load %arg5[%c1_115, %c0_116, %c0_117] : memref<8x44x44xf32, #tpu.memory_space<vmem>>, vector<1x44x44xf32>
    %259 = vector.shape_cast %258 : vector<1x44x44xf32> to vector<44x44xf32>
    %260 = vector.broadcast %257 : vector<44x1xf32> to vector<44x44xf32>
    %261 = arith.mulf %260, %259 : vector<44x44xf32>
    %262 = arith.addf %256, %261 : vector<44x44xf32>
    %263 = vector.extract_strided_slice %18 {offsets = [0, 17], sizes = [44, 1], strides = [1, 1]} : vector<44x32xf32> to vector<44x1xf32>
    %c1_118 = arith.constant 1 : index
    %c0_119 = arith.constant 0 : index
    %c0_120 = arith.constant 0 : index
    %264 = vector.load %arg6[%c1_118, %c0_119, %c0_120] : memref<8x44x44xf32, #tpu.memory_space<vmem>>, vector<1x44x44xf32>
    %265 = vector.shape_cast %264 : vector<1x44x44xf32> to vector<44x44xf32>
    %266 = vector.broadcast %263 : vector<44x1xf32> to vector<44x44xf32>
    %267 = arith.mulf %266, %265 : vector<44x44xf32>
    %268 = arith.addf %262, %267 : vector<44x44xf32>
    %269 = vector.extract_strided_slice %6 {offsets = [0, 18], sizes = [44, 1], strides = [1, 1]} : vector<44x32xf32> to vector<44x1xf32>
    %c2_121 = arith.constant 2 : index
    %c0_122 = arith.constant 0 : index
    %c0_123 = arith.constant 0 : index
    %270 = vector.load %arg5[%c2_121, %c0_122, %c0_123] : memref<8x44x44xf32, #tpu.memory_space<vmem>>, vector<1x44x44xf32>
    %271 = vector.shape_cast %270 : vector<1x44x44xf32> to vector<44x44xf32>
    %272 = vector.broadcast %269 : vector<44x1xf32> to vector<44x44xf32>
    %273 = arith.mulf %272, %271 : vector<44x44xf32>
    %274 = arith.addf %268, %273 : vector<44x44xf32>
    %275 = vector.extract_strided_slice %18 {offsets = [0, 18], sizes = [44, 1], strides = [1, 1]} : vector<44x32xf32> to vector<44x1xf32>
    %c2_124 = arith.constant 2 : index
    %c0_125 = arith.constant 0 : index
    %c0_126 = arith.constant 0 : index
    %276 = vector.load %arg6[%c2_124, %c0_125, %c0_126] : memref<8x44x44xf32, #tpu.memory_space<vmem>>, vector<1x44x44xf32>
    %277 = vector.shape_cast %276 : vector<1x44x44xf32> to vector<44x44xf32>
    %278 = vector.broadcast %275 : vector<44x1xf32> to vector<44x44xf32>
    %279 = arith.mulf %278, %277 : vector<44x44xf32>
    %280 = arith.addf %274, %279 : vector<44x44xf32>
    %281 = vector.extract_strided_slice %6 {offsets = [0, 19], sizes = [44, 1], strides = [1, 1]} : vector<44x32xf32> to vector<44x1xf32>
    %c3_127 = arith.constant 3 : index
    %c0_128 = arith.constant 0 : index
    %c0_129 = arith.constant 0 : index
    %282 = vector.load %arg5[%c3_127, %c0_128, %c0_129] : memref<8x44x44xf32, #tpu.memory_space<vmem>>, vector<1x44x44xf32>
    %283 = vector.shape_cast %282 : vector<1x44x44xf32> to vector<44x44xf32>
    %284 = vector.broadcast %281 : vector<44x1xf32> to vector<44x44xf32>
    %285 = arith.mulf %284, %283 : vector<44x44xf32>
    %286 = arith.addf %280, %285 : vector<44x44xf32>
    %287 = vector.extract_strided_slice %18 {offsets = [0, 19], sizes = [44, 1], strides = [1, 1]} : vector<44x32xf32> to vector<44x1xf32>
    %c3_130 = arith.constant 3 : index
    %c0_131 = arith.constant 0 : index
    %c0_132 = arith.constant 0 : index
    %288 = vector.load %arg6[%c3_130, %c0_131, %c0_132] : memref<8x44x44xf32, #tpu.memory_space<vmem>>, vector<1x44x44xf32>
    %289 = vector.shape_cast %288 : vector<1x44x44xf32> to vector<44x44xf32>
    %290 = vector.broadcast %287 : vector<44x1xf32> to vector<44x44xf32>
    %291 = arith.mulf %290, %289 : vector<44x44xf32>
    %292 = arith.addf %286, %291 : vector<44x44xf32>
    %293 = vector.extract_strided_slice %6 {offsets = [0, 20], sizes = [44, 1], strides = [1, 1]} : vector<44x32xf32> to vector<44x1xf32>
    %c4_133 = arith.constant 4 : index
    %c0_134 = arith.constant 0 : index
    %c0_135 = arith.constant 0 : index
    %294 = vector.load %arg5[%c4_133, %c0_134, %c0_135] : memref<8x44x44xf32, #tpu.memory_space<vmem>>, vector<1x44x44xf32>
    %295 = vector.shape_cast %294 : vector<1x44x44xf32> to vector<44x44xf32>
    %296 = vector.broadcast %293 : vector<44x1xf32> to vector<44x44xf32>
    %297 = arith.mulf %296, %295 : vector<44x44xf32>
    %298 = arith.addf %292, %297 : vector<44x44xf32>
    %299 = vector.extract_strided_slice %18 {offsets = [0, 20], sizes = [44, 1], strides = [1, 1]} : vector<44x32xf32> to vector<44x1xf32>
    %c4_136 = arith.constant 4 : index
    %c0_137 = arith.constant 0 : index
    %c0_138 = arith.constant 0 : index
    %300 = vector.load %arg6[%c4_136, %c0_137, %c0_138] : memref<8x44x44xf32, #tpu.memory_space<vmem>>, vector<1x44x44xf32>
    %301 = vector.shape_cast %300 : vector<1x44x44xf32> to vector<44x44xf32>
    %302 = vector.broadcast %299 : vector<44x1xf32> to vector<44x44xf32>
    %303 = arith.mulf %302, %301 : vector<44x44xf32>
    %304 = arith.addf %298, %303 : vector<44x44xf32>
    %305 = vector.extract_strided_slice %6 {offsets = [0, 21], sizes = [44, 1], strides = [1, 1]} : vector<44x32xf32> to vector<44x1xf32>
    %c5_139 = arith.constant 5 : index
    %c0_140 = arith.constant 0 : index
    %c0_141 = arith.constant 0 : index
    %306 = vector.load %arg5[%c5_139, %c0_140, %c0_141] : memref<8x44x44xf32, #tpu.memory_space<vmem>>, vector<1x44x44xf32>
    %307 = vector.shape_cast %306 : vector<1x44x44xf32> to vector<44x44xf32>
    %308 = vector.broadcast %305 : vector<44x1xf32> to vector<44x44xf32>
    %309 = arith.mulf %308, %307 : vector<44x44xf32>
    %310 = arith.addf %304, %309 : vector<44x44xf32>
    %311 = vector.extract_strided_slice %18 {offsets = [0, 21], sizes = [44, 1], strides = [1, 1]} : vector<44x32xf32> to vector<44x1xf32>
    %c5_142 = arith.constant 5 : index
    %c0_143 = arith.constant 0 : index
    %c0_144 = arith.constant 0 : index
    %312 = vector.load %arg6[%c5_142, %c0_143, %c0_144] : memref<8x44x44xf32, #tpu.memory_space<vmem>>, vector<1x44x44xf32>
    %313 = vector.shape_cast %312 : vector<1x44x44xf32> to vector<44x44xf32>
    %314 = vector.broadcast %311 : vector<44x1xf32> to vector<44x44xf32>
    %315 = arith.mulf %314, %313 : vector<44x44xf32>
    %316 = arith.addf %310, %315 : vector<44x44xf32>
    %317 = vector.extract_strided_slice %6 {offsets = [0, 22], sizes = [44, 1], strides = [1, 1]} : vector<44x32xf32> to vector<44x1xf32>
    %c6_145 = arith.constant 6 : index
    %c0_146 = arith.constant 0 : index
    %c0_147 = arith.constant 0 : index
    %318 = vector.load %arg5[%c6_145, %c0_146, %c0_147] : memref<8x44x44xf32, #tpu.memory_space<vmem>>, vector<1x44x44xf32>
    %319 = vector.shape_cast %318 : vector<1x44x44xf32> to vector<44x44xf32>
    %320 = vector.broadcast %317 : vector<44x1xf32> to vector<44x44xf32>
    %321 = arith.mulf %320, %319 : vector<44x44xf32>
    %322 = arith.addf %316, %321 : vector<44x44xf32>
    %323 = vector.extract_strided_slice %18 {offsets = [0, 22], sizes = [44, 1], strides = [1, 1]} : vector<44x32xf32> to vector<44x1xf32>
    %c6_148 = arith.constant 6 : index
    %c0_149 = arith.constant 0 : index
    %c0_150 = arith.constant 0 : index
    %324 = vector.load %arg6[%c6_148, %c0_149, %c0_150] : memref<8x44x44xf32, #tpu.memory_space<vmem>>, vector<1x44x44xf32>
    %325 = vector.shape_cast %324 : vector<1x44x44xf32> to vector<44x44xf32>
    %326 = vector.broadcast %323 : vector<44x1xf32> to vector<44x44xf32>
    %327 = arith.mulf %326, %325 : vector<44x44xf32>
    %328 = arith.addf %322, %327 : vector<44x44xf32>
    %329 = vector.extract_strided_slice %6 {offsets = [0, 23], sizes = [44, 1], strides = [1, 1]} : vector<44x32xf32> to vector<44x1xf32>
    %c7_151 = arith.constant 7 : index
    %c0_152 = arith.constant 0 : index
    %c0_153 = arith.constant 0 : index
    %330 = vector.load %arg5[%c7_151, %c0_152, %c0_153] : memref<8x44x44xf32, #tpu.memory_space<vmem>>, vector<1x44x44xf32>
    %331 = vector.shape_cast %330 : vector<1x44x44xf32> to vector<44x44xf32>
    %332 = vector.broadcast %329 : vector<44x1xf32> to vector<44x44xf32>
    %333 = arith.mulf %332, %331 : vector<44x44xf32>
    %334 = arith.addf %328, %333 : vector<44x44xf32>
    %335 = vector.extract_strided_slice %18 {offsets = [0, 23], sizes = [44, 1], strides = [1, 1]} : vector<44x32xf32> to vector<44x1xf32>
    %c7_154 = arith.constant 7 : index
    %c0_155 = arith.constant 0 : index
    %c0_156 = arith.constant 0 : index
    %336 = vector.load %arg6[%c7_154, %c0_155, %c0_156] : memref<8x44x44xf32, #tpu.memory_space<vmem>>, vector<1x44x44xf32>
    %337 = vector.shape_cast %336 : vector<1x44x44xf32> to vector<44x44xf32>
    %338 = vector.broadcast %335 : vector<44x1xf32> to vector<44x44xf32>
    %339 = arith.mulf %338, %337 : vector<44x44xf32>
    %340 = arith.addf %334, %339 : vector<44x44xf32>
    %341 = vector.extract_strided_slice %19 {offsets = [0, 16], sizes = [44, 8], strides = [1, 1]} : vector<44x32xbf16> to vector<44x8xbf16>
    %342 = vector.extract_strided_slice %20 {offsets = [0, 16], sizes = [44, 8], strides = [1, 1]} : vector<44x32xbf16> to vector<44x8xbf16>
    %cst_157 = arith.constant dense<0.000000e+00> : vector<44x44xf32>
    %343 = tpu.matmul %341, %342, %cst_157 {dimension_numbers = #tpu.dot_dimension_numbers<[1], [1], [0], [0], [0, 0, 1, 0], [], []>} : vector<44x8xbf16>, vector<44x8xbf16>, vector<44x44xf32> -> vector<44x44xf32>
    %344 = arith.addf %343, %340 : vector<44x44xf32>
    %cst_158 = arith.constant dense<0xFF800000> : vector<44xf32>
    %345 = vector.multi_reduction <maximumf>, %344, %cst_158 [1] : vector<44x44xf32> to vector<44xf32>
    %346 = vector.shape_cast %345 : vector<44xf32> to vector<44x1xf32>
    %347 = vector.broadcast %346 : vector<44x1xf32> to vector<44x44xf32>
    %348 = arith.subf %344, %347 : vector<44x44xf32>
    %349 = math.exp %348 : vector<44x44xf32>
    %cst_159 = arith.constant dense<0.000000e+00> : vector<44xf32>
    %350 = vector.multi_reduction <add>, %349, %cst_159 [1] : vector<44x44xf32> to vector<44xf32>
    %351 = vector.shape_cast %350 : vector<44xf32> to vector<44x1xf32>
    %352 = tpu.reciprocal %351 {approx = true} : vector<44x1xf32> -> vector<44x1xf32>
    %353 = vector.broadcast %352 : vector<44x1xf32> to vector<44x44xf32>
    %354 = arith.mulf %349, %353 : vector<44x44xf32>
    %355 = arith.truncf %354 : vector<44x44xf32> to vector<44x44xbf16>
    %356 = vector.extract_strided_slice %21 {offsets = [0, 16], sizes = [44, 8], strides = [1, 1]} : vector<44x32xbf16> to vector<44x8xbf16>
    %cst_160 = arith.constant dense<0.000000e+00> : vector<44x8xf32>
    %357 = tpu.matmul %355, %356, %cst_160 {dimension_numbers = #tpu.dot_dimension_numbers<[1], [0], [0], [1], [0, 0, 1, 1], [], []>} : vector<44x44xbf16>, vector<44x8xbf16>, vector<44x8xf32> -> vector<44x8xf32>
    %358 = vector.extract_strided_slice %6 {offsets = [0, 24], sizes = [44, 1], strides = [1, 1]} : vector<44x32xf32> to vector<44x1xf32>
    %c0_161 = arith.constant 0 : index
    %c0_162 = arith.constant 0 : index
    %c0_163 = arith.constant 0 : index
    %359 = vector.load %arg5[%c0_161, %c0_162, %c0_163] : memref<8x44x44xf32, #tpu.memory_space<vmem>>, vector<1x44x44xf32>
    %360 = vector.shape_cast %359 : vector<1x44x44xf32> to vector<44x44xf32>
    %361 = vector.broadcast %358 : vector<44x1xf32> to vector<44x44xf32>
    %362 = arith.mulf %361, %360 : vector<44x44xf32>
    %363 = vector.extract_strided_slice %18 {offsets = [0, 24], sizes = [44, 1], strides = [1, 1]} : vector<44x32xf32> to vector<44x1xf32>
    %c0_164 = arith.constant 0 : index
    %c0_165 = arith.constant 0 : index
    %c0_166 = arith.constant 0 : index
    %364 = vector.load %arg6[%c0_164, %c0_165, %c0_166] : memref<8x44x44xf32, #tpu.memory_space<vmem>>, vector<1x44x44xf32>
    %365 = vector.shape_cast %364 : vector<1x44x44xf32> to vector<44x44xf32>
    %366 = vector.broadcast %363 : vector<44x1xf32> to vector<44x44xf32>
    %367 = arith.mulf %366, %365 : vector<44x44xf32>
    %368 = arith.addf %362, %367 : vector<44x44xf32>
    %369 = vector.extract_strided_slice %6 {offsets = [0, 25], sizes = [44, 1], strides = [1, 1]} : vector<44x32xf32> to vector<44x1xf32>
    %c1_167 = arith.constant 1 : index
    %c0_168 = arith.constant 0 : index
    %c0_169 = arith.constant 0 : index
    %370 = vector.load %arg5[%c1_167, %c0_168, %c0_169] : memref<8x44x44xf32, #tpu.memory_space<vmem>>, vector<1x44x44xf32>
    %371 = vector.shape_cast %370 : vector<1x44x44xf32> to vector<44x44xf32>
    %372 = vector.broadcast %369 : vector<44x1xf32> to vector<44x44xf32>
    %373 = arith.mulf %372, %371 : vector<44x44xf32>
    %374 = arith.addf %368, %373 : vector<44x44xf32>
    %375 = vector.extract_strided_slice %18 {offsets = [0, 25], sizes = [44, 1], strides = [1, 1]} : vector<44x32xf32> to vector<44x1xf32>
    %c1_170 = arith.constant 1 : index
    %c0_171 = arith.constant 0 : index
    %c0_172 = arith.constant 0 : index
    %376 = vector.load %arg6[%c1_170, %c0_171, %c0_172] : memref<8x44x44xf32, #tpu.memory_space<vmem>>, vector<1x44x44xf32>
    %377 = vector.shape_cast %376 : vector<1x44x44xf32> to vector<44x44xf32>
    %378 = vector.broadcast %375 : vector<44x1xf32> to vector<44x44xf32>
    %379 = arith.mulf %378, %377 : vector<44x44xf32>
    %380 = arith.addf %374, %379 : vector<44x44xf32>
    %381 = vector.extract_strided_slice %6 {offsets = [0, 26], sizes = [44, 1], strides = [1, 1]} : vector<44x32xf32> to vector<44x1xf32>
    %c2_173 = arith.constant 2 : index
    %c0_174 = arith.constant 0 : index
    %c0_175 = arith.constant 0 : index
    %382 = vector.load %arg5[%c2_173, %c0_174, %c0_175] : memref<8x44x44xf32, #tpu.memory_space<vmem>>, vector<1x44x44xf32>
    %383 = vector.shape_cast %382 : vector<1x44x44xf32> to vector<44x44xf32>
    %384 = vector.broadcast %381 : vector<44x1xf32> to vector<44x44xf32>
    %385 = arith.mulf %384, %383 : vector<44x44xf32>
    %386 = arith.addf %380, %385 : vector<44x44xf32>
    %387 = vector.extract_strided_slice %18 {offsets = [0, 26], sizes = [44, 1], strides = [1, 1]} : vector<44x32xf32> to vector<44x1xf32>
    %c2_176 = arith.constant 2 : index
    %c0_177 = arith.constant 0 : index
    %c0_178 = arith.constant 0 : index
    %388 = vector.load %arg6[%c2_176, %c0_177, %c0_178] : memref<8x44x44xf32, #tpu.memory_space<vmem>>, vector<1x44x44xf32>
    %389 = vector.shape_cast %388 : vector<1x44x44xf32> to vector<44x44xf32>
    %390 = vector.broadcast %387 : vector<44x1xf32> to vector<44x44xf32>
    %391 = arith.mulf %390, %389 : vector<44x44xf32>
    %392 = arith.addf %386, %391 : vector<44x44xf32>
    %393 = vector.extract_strided_slice %6 {offsets = [0, 27], sizes = [44, 1], strides = [1, 1]} : vector<44x32xf32> to vector<44x1xf32>
    %c3_179 = arith.constant 3 : index
    %c0_180 = arith.constant 0 : index
    %c0_181 = arith.constant 0 : index
    %394 = vector.load %arg5[%c3_179, %c0_180, %c0_181] : memref<8x44x44xf32, #tpu.memory_space<vmem>>, vector<1x44x44xf32>
    %395 = vector.shape_cast %394 : vector<1x44x44xf32> to vector<44x44xf32>
    %396 = vector.broadcast %393 : vector<44x1xf32> to vector<44x44xf32>
    %397 = arith.mulf %396, %395 : vector<44x44xf32>
    %398 = arith.addf %392, %397 : vector<44x44xf32>
    %399 = vector.extract_strided_slice %18 {offsets = [0, 27], sizes = [44, 1], strides = [1, 1]} : vector<44x32xf32> to vector<44x1xf32>
    %c3_182 = arith.constant 3 : index
    %c0_183 = arith.constant 0 : index
    %c0_184 = arith.constant 0 : index
    %400 = vector.load %arg6[%c3_182, %c0_183, %c0_184] : memref<8x44x44xf32, #tpu.memory_space<vmem>>, vector<1x44x44xf32>
    %401 = vector.shape_cast %400 : vector<1x44x44xf32> to vector<44x44xf32>
    %402 = vector.broadcast %399 : vector<44x1xf32> to vector<44x44xf32>
    %403 = arith.mulf %402, %401 : vector<44x44xf32>
    %404 = arith.addf %398, %403 : vector<44x44xf32>
    %405 = vector.extract_strided_slice %6 {offsets = [0, 28], sizes = [44, 1], strides = [1, 1]} : vector<44x32xf32> to vector<44x1xf32>
    %c4_185 = arith.constant 4 : index
    %c0_186 = arith.constant 0 : index
    %c0_187 = arith.constant 0 : index
    %406 = vector.load %arg5[%c4_185, %c0_186, %c0_187] : memref<8x44x44xf32, #tpu.memory_space<vmem>>, vector<1x44x44xf32>
    %407 = vector.shape_cast %406 : vector<1x44x44xf32> to vector<44x44xf32>
    %408 = vector.broadcast %405 : vector<44x1xf32> to vector<44x44xf32>
    %409 = arith.mulf %408, %407 : vector<44x44xf32>
    %410 = arith.addf %404, %409 : vector<44x44xf32>
    %411 = vector.extract_strided_slice %18 {offsets = [0, 28], sizes = [44, 1], strides = [1, 1]} : vector<44x32xf32> to vector<44x1xf32>
    %c4_188 = arith.constant 4 : index
    %c0_189 = arith.constant 0 : index
    %c0_190 = arith.constant 0 : index
    %412 = vector.load %arg6[%c4_188, %c0_189, %c0_190] : memref<8x44x44xf32, #tpu.memory_space<vmem>>, vector<1x44x44xf32>
    %413 = vector.shape_cast %412 : vector<1x44x44xf32> to vector<44x44xf32>
    %414 = vector.broadcast %411 : vector<44x1xf32> to vector<44x44xf32>
    %415 = arith.mulf %414, %413 : vector<44x44xf32>
    %416 = arith.addf %410, %415 : vector<44x44xf32>
    %417 = vector.extract_strided_slice %6 {offsets = [0, 29], sizes = [44, 1], strides = [1, 1]} : vector<44x32xf32> to vector<44x1xf32>
    %c5_191 = arith.constant 5 : index
    %c0_192 = arith.constant 0 : index
    %c0_193 = arith.constant 0 : index
    %418 = vector.load %arg5[%c5_191, %c0_192, %c0_193] : memref<8x44x44xf32, #tpu.memory_space<vmem>>, vector<1x44x44xf32>
    %419 = vector.shape_cast %418 : vector<1x44x44xf32> to vector<44x44xf32>
    %420 = vector.broadcast %417 : vector<44x1xf32> to vector<44x44xf32>
    %421 = arith.mulf %420, %419 : vector<44x44xf32>
    %422 = arith.addf %416, %421 : vector<44x44xf32>
    %423 = vector.extract_strided_slice %18 {offsets = [0, 29], sizes = [44, 1], strides = [1, 1]} : vector<44x32xf32> to vector<44x1xf32>
    %c5_194 = arith.constant 5 : index
    %c0_195 = arith.constant 0 : index
    %c0_196 = arith.constant 0 : index
    %424 = vector.load %arg6[%c5_194, %c0_195, %c0_196] : memref<8x44x44xf32, #tpu.memory_space<vmem>>, vector<1x44x44xf32>
    %425 = vector.shape_cast %424 : vector<1x44x44xf32> to vector<44x44xf32>
    %426 = vector.broadcast %423 : vector<44x1xf32> to vector<44x44xf32>
    %427 = arith.mulf %426, %425 : vector<44x44xf32>
    %428 = arith.addf %422, %427 : vector<44x44xf32>
    %429 = vector.extract_strided_slice %6 {offsets = [0, 30], sizes = [44, 1], strides = [1, 1]} : vector<44x32xf32> to vector<44x1xf32>
    %c6_197 = arith.constant 6 : index
    %c0_198 = arith.constant 0 : index
    %c0_199 = arith.constant 0 : index
    %430 = vector.load %arg5[%c6_197, %c0_198, %c0_199] : memref<8x44x44xf32, #tpu.memory_space<vmem>>, vector<1x44x44xf32>
    %431 = vector.shape_cast %430 : vector<1x44x44xf32> to vector<44x44xf32>
    %432 = vector.broadcast %429 : vector<44x1xf32> to vector<44x44xf32>
    %433 = arith.mulf %432, %431 : vector<44x44xf32>
    %434 = arith.addf %428, %433 : vector<44x44xf32>
    %435 = vector.extract_strided_slice %18 {offsets = [0, 30], sizes = [44, 1], strides = [1, 1]} : vector<44x32xf32> to vector<44x1xf32>
    %c6_200 = arith.constant 6 : index
    %c0_201 = arith.constant 0 : index
    %c0_202 = arith.constant 0 : index
    %436 = vector.load %arg6[%c6_200, %c0_201, %c0_202] : memref<8x44x44xf32, #tpu.memory_space<vmem>>, vector<1x44x44xf32>
    %437 = vector.shape_cast %436 : vector<1x44x44xf32> to vector<44x44xf32>
    %438 = vector.broadcast %435 : vector<44x1xf32> to vector<44x44xf32>
    %439 = arith.mulf %438, %437 : vector<44x44xf32>
    %440 = arith.addf %434, %439 : vector<44x44xf32>
    %441 = vector.extract_strided_slice %6 {offsets = [0, 31], sizes = [44, 1], strides = [1, 1]} : vector<44x32xf32> to vector<44x1xf32>
    %c7_203 = arith.constant 7 : index
    %c0_204 = arith.constant 0 : index
    %c0_205 = arith.constant 0 : index
    %442 = vector.load %arg5[%c7_203, %c0_204, %c0_205] : memref<8x44x44xf32, #tpu.memory_space<vmem>>, vector<1x44x44xf32>
    %443 = vector.shape_cast %442 : vector<1x44x44xf32> to vector<44x44xf32>
    %444 = vector.broadcast %441 : vector<44x1xf32> to vector<44x44xf32>
    %445 = arith.mulf %444, %443 : vector<44x44xf32>
    %446 = arith.addf %440, %445 : vector<44x44xf32>
    %447 = vector.extract_strided_slice %18 {offsets = [0, 31], sizes = [44, 1], strides = [1, 1]} : vector<44x32xf32> to vector<44x1xf32>
    %c7_206 = arith.constant 7 : index
    %c0_207 = arith.constant 0 : index
    %c0_208 = arith.constant 0 : index
    %448 = vector.load %arg6[%c7_206, %c0_207, %c0_208] : memref<8x44x44xf32, #tpu.memory_space<vmem>>, vector<1x44x44xf32>
    %449 = vector.shape_cast %448 : vector<1x44x44xf32> to vector<44x44xf32>
    %450 = vector.broadcast %447 : vector<44x1xf32> to vector<44x44xf32>
    %451 = arith.mulf %450, %449 : vector<44x44xf32>
    %452 = arith.addf %446, %451 : vector<44x44xf32>
    %453 = vector.extract_strided_slice %19 {offsets = [0, 24], sizes = [44, 8], strides = [1, 1]} : vector<44x32xbf16> to vector<44x8xbf16>
    %454 = vector.extract_strided_slice %20 {offsets = [0, 24], sizes = [44, 8], strides = [1, 1]} : vector<44x32xbf16> to vector<44x8xbf16>
    %cst_209 = arith.constant dense<0.000000e+00> : vector<44x44xf32>
    %455 = tpu.matmul %453, %454, %cst_209 {dimension_numbers = #tpu.dot_dimension_numbers<[1], [1], [0], [0], [0, 0, 1, 0], [], []>} : vector<44x8xbf16>, vector<44x8xbf16>, vector<44x44xf32> -> vector<44x44xf32>
    %456 = arith.addf %455, %452 : vector<44x44xf32>
    %cst_210 = arith.constant dense<0xFF800000> : vector<44xf32>
    %457 = vector.multi_reduction <maximumf>, %456, %cst_210 [1] : vector<44x44xf32> to vector<44xf32>
    %458 = vector.shape_cast %457 : vector<44xf32> to vector<44x1xf32>
    %459 = vector.broadcast %458 : vector<44x1xf32> to vector<44x44xf32>
    %460 = arith.subf %456, %459 : vector<44x44xf32>
    %461 = math.exp %460 : vector<44x44xf32>
    %cst_211 = arith.constant dense<0.000000e+00> : vector<44xf32>
    %462 = vector.multi_reduction <add>, %461, %cst_211 [1] : vector<44x44xf32> to vector<44xf32>
    %463 = vector.shape_cast %462 : vector<44xf32> to vector<44x1xf32>
    %464 = tpu.reciprocal %463 {approx = true} : vector<44x1xf32> -> vector<44x1xf32>
    %465 = vector.broadcast %464 : vector<44x1xf32> to vector<44x44xf32>
    %466 = arith.mulf %461, %465 : vector<44x44xf32>
    %467 = arith.truncf %466 : vector<44x44xf32> to vector<44x44xbf16>
    %468 = vector.extract_strided_slice %21 {offsets = [0, 24], sizes = [44, 8], strides = [1, 1]} : vector<44x32xbf16> to vector<44x8xbf16>
    %cst_212 = arith.constant dense<0.000000e+00> : vector<44x8xf32>
    %469 = tpu.matmul %467, %468, %cst_212 {dimension_numbers = #tpu.dot_dimension_numbers<[1], [0], [0], [1], [0, 0, 1, 1], [], []>} : vector<44x44xbf16>, vector<44x8xbf16>, vector<44x8xf32> -> vector<44x8xf32>
    %470 = tpu.concatenate %133, %245, %357, %469 in 1 : vector<44x8xf32>, vector<44x8xf32>, vector<44x8xf32>, vector<44x8xf32> -> vector<44x32xf32>
    %c0_213 = arith.constant 0 : index
    %c0_214 = arith.constant 0 : index
    %471 = vector.load %arg7[%c0_213, %c0_214] : memref<1x32xf32, #tpu.memory_space<vmem>>, vector<1x32xf32>
    %c0_215 = arith.constant 0 : index
    %c0_216 = arith.constant 0 : index
    %472 = vector.load %arg8[%c0_215, %c0_216] : memref<1x32xf32, #tpu.memory_space<vmem>>, vector<1x32xf32>
    %cst_217 = arith.constant dense<0.000000e+00> : vector<44xf32>
    %473 = vector.multi_reduction <add>, %470, %cst_217 [1] : vector<44x32xf32> to vector<44xf32>
    %474 = vector.shape_cast %473 : vector<44xf32> to vector<44x1xf32>
    %cst_218 = arith.constant 3.200000e+01 : f32
    %475 = vector.broadcast %cst_218 : f32 to vector<44x1xf32>
    %476 = arith.divf %474, %475 : vector<44x1xf32>
    %477 = vector.broadcast %476 : vector<44x1xf32> to vector<44x32xf32>
    %478 = arith.subf %470, %477 : vector<44x32xf32>
    %479 = arith.mulf %478, %478 : vector<44x32xf32>
    %cst_219 = arith.constant dense<0.000000e+00> : vector<44xf32>
    %480 = vector.multi_reduction <add>, %479, %cst_219 [1] : vector<44x32xf32> to vector<44xf32>
    %481 = vector.shape_cast %480 : vector<44xf32> to vector<44x1xf32>
    %cst_220 = arith.constant 3.200000e+01 : f32
    %482 = vector.broadcast %cst_220 : f32 to vector<44x1xf32>
    %483 = arith.divf %481, %482 : vector<44x1xf32>
    %cst_221 = arith.constant 9.99999974E-6 : f32
    %484 = vector.broadcast %cst_221 : f32 to vector<44x1xf32>
    %485 = arith.addf %483, %484 : vector<44x1xf32>
    %486 = math.rsqrt %485 : vector<44x1xf32>
    %487 = vector.broadcast %486 : vector<44x1xf32> to vector<44x32xf32>
    %488 = arith.mulf %478, %487 : vector<44x32xf32>
    %489 = vector.broadcast %471 : vector<1x32xf32> to vector<44x32xf32>
    %490 = arith.mulf %488, %489 : vector<44x32xf32>
    %491 = vector.broadcast %472 : vector<1x32xf32> to vector<44x32xf32>
    %492 = arith.addf %490, %491 : vector<44x32xf32>
    %493 = arith.addf %1, %492 : vector<44x32xf32>
    %c0_222 = arith.constant 0 : index
    %c0_223 = arith.constant 0 : index
    %494 = vector.load %arg9[%c0_222, %c0_223] : memref<1x32xf32, #tpu.memory_space<vmem>>, vector<1x32xf32>
    %c0_224 = arith.constant 0 : index
    %c0_225 = arith.constant 0 : index
    %495 = vector.load %arg10[%c0_224, %c0_225] : memref<1x32xf32, #tpu.memory_space<vmem>>, vector<1x32xf32>
    %cst_226 = arith.constant dense<0.000000e+00> : vector<44xf32>
    %496 = vector.multi_reduction <add>, %493, %cst_226 [1] : vector<44x32xf32> to vector<44xf32>
    %497 = vector.shape_cast %496 : vector<44xf32> to vector<44x1xf32>
    %cst_227 = arith.constant 3.200000e+01 : f32
    %498 = vector.broadcast %cst_227 : f32 to vector<44x1xf32>
    %499 = arith.divf %497, %498 : vector<44x1xf32>
    %500 = vector.broadcast %499 : vector<44x1xf32> to vector<44x32xf32>
    %501 = arith.subf %493, %500 : vector<44x32xf32>
    %502 = arith.mulf %501, %501 : vector<44x32xf32>
    %cst_228 = arith.constant dense<0.000000e+00> : vector<44xf32>
    %503 = vector.multi_reduction <add>, %502, %cst_228 [1] : vector<44x32xf32> to vector<44xf32>
    %504 = vector.shape_cast %503 : vector<44xf32> to vector<44x1xf32>
    %cst_229 = arith.constant 3.200000e+01 : f32
    %505 = vector.broadcast %cst_229 : f32 to vector<44x1xf32>
    %506 = arith.divf %504, %505 : vector<44x1xf32>
    %cst_230 = arith.constant 9.99999974E-6 : f32
    %507 = vector.broadcast %cst_230 : f32 to vector<44x1xf32>
    %508 = arith.addf %506, %507 : vector<44x1xf32>
    %509 = math.rsqrt %508 : vector<44x1xf32>
    %510 = vector.broadcast %509 : vector<44x1xf32> to vector<44x32xf32>
    %511 = arith.mulf %501, %510 : vector<44x32xf32>
    %512 = vector.broadcast %494 : vector<1x32xf32> to vector<44x32xf32>
    %513 = arith.mulf %511, %512 : vector<44x32xf32>
    %514 = vector.broadcast %495 : vector<1x32xf32> to vector<44x32xf32>
    %515 = arith.addf %513, %514 : vector<44x32xf32>
    %516 = arith.truncf %515 : vector<44x32xf32> to vector<44x32xbf16>
    %c0_231 = arith.constant 0 : index
    %c0_232 = arith.constant 0 : index
    %517 = vector.load %arg11[%c0_231, %c0_232] : memref<32x128xbf16, #tpu.memory_space<vmem>>, vector<32x128xbf16>
    %cst_233 = arith.constant dense<0.000000e+00> : vector<44x128xf32>
    %518 = tpu.matmul %516, %517, %cst_233 {dimension_numbers = #tpu.dot_dimension_numbers<[1], [0], [0], [1], [0, 0, 1, 1], [], []>} : vector<44x32xbf16>, vector<32x128xbf16>, vector<44x128xf32> -> vector<44x128xf32>
    %c0_234 = arith.constant 0 : index
    %c0_235 = arith.constant 0 : index
    %519 = vector.load %arg12[%c0_234, %c0_235] : memref<1x128xf32, #tpu.memory_space<vmem>>, vector<1x128xf32>
    %520 = vector.broadcast %519 : vector<1x128xf32> to vector<44x128xf32>
    %521 = arith.addf %518, %520 : vector<44x128xf32>
    %cst_236 = arith.constant 5.000000e-01 : f32
    %522 = vector.broadcast %cst_236 : f32 to vector<44x128xf32>
    %523 = arith.mulf %522, %521 : vector<44x128xf32>
    %cst_237 = arith.constant 4.471500e-02 : f32
    %524 = vector.broadcast %cst_237 : f32 to vector<44x128xf32>
    %525 = arith.mulf %524, %521 : vector<44x128xf32>
    %526 = arith.mulf %525, %521 : vector<44x128xf32>
    %527 = arith.mulf %526, %521 : vector<44x128xf32>
    %528 = arith.addf %521, %527 : vector<44x128xf32>
    %cst_238 = arith.constant 0.797884583 : f32
    %529 = vector.broadcast %cst_238 : f32 to vector<44x128xf32>
    %530 = arith.mulf %529, %528 : vector<44x128xf32>
    %531 = math.tanh %530 : vector<44x128xf32>
    %cst_239 = arith.constant 1.000000e+00 : f32
    %532 = vector.broadcast %cst_239 : f32 to vector<44x128xf32>
    %533 = arith.addf %532, %531 : vector<44x128xf32>
    %534 = arith.mulf %523, %533 : vector<44x128xf32>
    %535 = arith.truncf %534 : vector<44x128xf32> to vector<44x128xbf16>
    %c0_240 = arith.constant 0 : index
    %c0_241 = arith.constant 0 : index
    %536 = vector.load %arg13[%c0_240, %c0_241] : memref<128x32xbf16, #tpu.memory_space<vmem>>, vector<128x32xbf16>
    %cst_242 = arith.constant dense<0.000000e+00> : vector<44x32xf32>
    %537 = tpu.matmul %535, %536, %cst_242 {dimension_numbers = #tpu.dot_dimension_numbers<[1], [0], [0], [1], [0, 0, 1, 1], [], []>} : vector<44x128xbf16>, vector<128x32xbf16>, vector<44x32xf32> -> vector<44x32xf32>
    %c0_243 = arith.constant 0 : index
    %c0_244 = arith.constant 0 : index
    %538 = vector.load %arg14[%c0_243, %c0_244] : memref<1x32xf32, #tpu.memory_space<vmem>>, vector<1x32xf32>
    %539 = vector.broadcast %538 : vector<1x32xf32> to vector<44x32xf32>
    %540 = arith.addf %537, %539 : vector<44x32xf32>
    %541 = arith.addf %515, %540 : vector<44x32xf32>
    %c0_245 = arith.constant 0 : index
    %c0_246 = arith.constant 0 : index
    %542 = vector.load %arg15[%c0_245, %c0_246] : memref<1x32xf32, #tpu.memory_space<vmem>>, vector<1x32xf32>
    %c0_247 = arith.constant 0 : index
    %c0_248 = arith.constant 0 : index
    %543 = vector.load %arg16[%c0_247, %c0_248] : memref<1x32xf32, #tpu.memory_space<vmem>>, vector<1x32xf32>
    %cst_249 = arith.constant dense<0.000000e+00> : vector<44xf32>
    %544 = vector.multi_reduction <add>, %541, %cst_249 [1] : vector<44x32xf32> to vector<44xf32>
    %545 = vector.shape_cast %544 : vector<44xf32> to vector<44x1xf32>
    %cst_250 = arith.constant 3.200000e+01 : f32
    %546 = vector.broadcast %cst_250 : f32 to vector<44x1xf32>
    %547 = arith.divf %545, %546 : vector<44x1xf32>
    %548 = vector.broadcast %547 : vector<44x1xf32> to vector<44x32xf32>
    %549 = arith.subf %541, %548 : vector<44x32xf32>
    %550 = arith.mulf %549, %549 : vector<44x32xf32>
    %cst_251 = arith.constant dense<0.000000e+00> : vector<44xf32>
    %551 = vector.multi_reduction <add>, %550, %cst_251 [1] : vector<44x32xf32> to vector<44xf32>
    %552 = vector.shape_cast %551 : vector<44xf32> to vector<44x1xf32>
    %cst_252 = arith.constant 3.200000e+01 : f32
    %553 = vector.broadcast %cst_252 : f32 to vector<44x1xf32>
    %554 = arith.divf %552, %553 : vector<44x1xf32>
    %cst_253 = arith.constant 9.99999974E-6 : f32
    %555 = vector.broadcast %cst_253 : f32 to vector<44x1xf32>
    %556 = arith.addf %554, %555 : vector<44x1xf32>
    %557 = math.rsqrt %556 : vector<44x1xf32>
    %558 = vector.broadcast %557 : vector<44x1xf32> to vector<44x32xf32>
    %559 = arith.mulf %549, %558 : vector<44x32xf32>
    %560 = vector.broadcast %542 : vector<1x32xf32> to vector<44x32xf32>
    %561 = arith.mulf %559, %560 : vector<44x32xf32>
    %562 = vector.broadcast %543 : vector<1x32xf32> to vector<44x32xf32>
    %563 = arith.addf %561, %562 : vector<44x32xf32>
    %c0_254 = arith.constant 0 : index
    %c0_255 = arith.constant 0 : index
    %c0_256 = arith.constant 0 : index
    %564 = vector.load %arg17[%c0_254, %c0_255, %c0_256] : memref<1x44x32xf32, #tpu.memory_space<vmem>>, vector<1x44x32xf32>
    %565 = vector.shape_cast %564 : vector<1x44x32xf32> to vector<44x32xf32>
    %566 = vector.shape_cast %563 : vector<44x32xf32> to vector<1x44x32xf32>
    tpu.vector_store %arg17[%c0_254, %c0_255, %c0_256], %566 {strides = array<i32>} : memref<1x44x32xf32, #tpu.memory_space<vmem>>, vector<1x44x32xf32>,
    return
  }
  func.func @transform_0(%arg0: i32) -> (i32, i32, i32) {
    %c0_i32 = arith.constant 0 : i32
    %c0_i32_0 = arith.constant 0 : i32
    %c0_i32_1 = arith.constant 0 : i32
    return %arg0, %c0_i32, %c0_i32_0 : i32, i32, i32
  }
  func.func @transform_1(%arg0: i32) -> (i32, i32) {
    %c0_i32 = arith.constant 0 : i32
    %c0_i32_0 = arith.constant 0 : i32
    %c0_i32_1 = arith.constant 0 : i32
    return %c0_i32, %c0_i32_0 : i32, i32
  }
  func.func @transform_2(%arg0: i32) -> (i32, i32) {
    %c0_i32 = arith.constant 0 : i32
    %c0_i32_0 = arith.constant 0 : i32
    %c0_i32_1 = arith.constant 0 : i32
    return %c0_i32, %c0_i32_0 : i32, i32
  }
  func.func @transform_3(%arg0: i32) -> (i32, i32) {
    %c0_i32 = arith.constant 0 : i32
    %c0_i32_0 = arith.constant 0 : i32
    %c0_i32_1 = arith.constant 0 : i32
    return %c0_i32, %c0_i32_0 : i32, i32
  }
  func.func @transform_4(%arg0: i32) -> (i32, i32, i32) {
    %c0_i32 = arith.constant 0 : i32
    %c0_i32_0 = arith.constant 0 : i32
    %c0_i32_1 = arith.constant 0 : i32
    %c0_i32_2 = arith.constant 0 : i32
    return %c0_i32, %c0_i32_0, %c0_i32_1 : i32, i32, i32
  }
  func.func @transform_5(%arg0: i32) -> (i32, i32, i32) {
    %c0_i32 = arith.constant 0 : i32
    %c0_i32_0 = arith.constant 0 : i32
    %c0_i32_1 = arith.constant 0 : i32
    %c0_i32_2 = arith.constant 0 : i32
    return %c0_i32, %c0_i32_0, %c0_i32_1 : i32, i32, i32
  }
  func.func @transform_6(%arg0: i32) -> (i32, i32) {
    %c0_i32 = arith.constant 0 : i32
    %c0_i32_0 = arith.constant 0 : i32
    %c0_i32_1 = arith.constant 0 : i32
    return %c0_i32, %c0_i32_0 : i32, i32
  }
  func.func @transform_7(%arg0: i32) -> (i32, i32) {
    %c0_i32 = arith.constant 0 : i32
    %c0_i32_0 = arith.constant 0 : i32
    %c0_i32_1 = arith.constant 0 : i32
    return %c0_i32, %c0_i32_0 : i32, i32
  }
  func.func @transform_8(%arg0: i32) -> (i32, i32) {
    %c0_i32 = arith.constant 0 : i32
    %c0_i32_0 = arith.constant 0 : i32
    %c0_i32_1 = arith.constant 0 : i32
    return %c0_i32, %c0_i32_0 : i32, i32
  }
  func.func @transform_9(%arg0: i32) -> (i32, i32) {
    %c0_i32 = arith.constant 0 : i32
    %c0_i32_0 = arith.constant 0 : i32
    %c0_i32_1 = arith.constant 0 : i32
    return %c0_i32, %c0_i32_0 : i32, i32
  }
  func.func @transform_10(%arg0: i32) -> (i32, i32) {
    %c0_i32 = arith.constant 0 : i32
    %c0_i32_0 = arith.constant 0 : i32
    %c0_i32_1 = arith.constant 0 : i32
    return %c0_i32, %c0_i32_0 : i32, i32
  }
  func.func @transform_11(%arg0: i32) -> (i32, i32) {
    %c0_i32 = arith.constant 0 : i32
    %c0_i32_0 = arith.constant 0 : i32
    %c0_i32_1 = arith.constant 0 : i32
    return %c0_i32, %c0_i32_0 : i32, i32
  }
  func.func @transform_12(%arg0: i32) -> (i32, i32) {
    %c0_i32 = arith.constant 0 : i32
    %c0_i32_0 = arith.constant 0 : i32
    %c0_i32_1 = arith.constant 0 : i32
    return %c0_i32, %c0_i32_0 : i32, i32
  }
  func.func @transform_13(%arg0: i32) -> (i32, i32) {
    %c0_i32 = arith.constant 0 : i32
    %c0_i32_0 = arith.constant 0 : i32
    %c0_i32_1 = arith.constant 0 : i32
    return %c0_i32, %c0_i32_0 : i32, i32
  }
  func.func @transform_14(%arg0: i32) -> (i32, i32) {
    %c0_i32 = arith.constant 0 : i32
    %c0_i32_0 = arith.constant 0 : i32
    %c0_i32_1 = arith.constant 0 : i32
    return %c0_i32, %c0_i32_0 : i32, i32
  }
  func.func @transform_15(%arg0: i32) -> (i32, i32) {
    %c0_i32 = arith.constant 0 : i32
    %c0_i32_0 = arith.constant 0 : i32
    %c0_i32_1 = arith.constant 0 : i32
    return %c0_i32, %c0_i32_0 : i32, i32
  }
  func.func @transform_16(%arg0: i32) -> (i32, i32, i32) {
    %c0_i32 = arith.constant 0 : i32
    %c0_i32_0 = arith.constant 0 : i32
    %c0_i32_1 = arith.constant 0 : i32
    return %arg0, %c0_i32, %c0_i32_0 : i32, i32, i32
  }
}

</mosaic_0001>

<bundles_post_ra>
// kernel: tpu_custom_call.1
= control target key start
LH: loop header
LB: loop body
LE: loop exit
PB: predicated region body
PF: predicated region fallthrough
CT: control target
= control target key end

     0   :  { %s5663_s21 = smov 0   ;;  %s9358_s0 = inlined_call_operand.vmem [shape: f32[2,44,32], index: 0, kind: input, shape index: {}]   ;;  %s9359_s1 = inlined_call_operand.vmem [shape: bf16[32,32], index: 1, kind: input, shape index: {}]   ;;  %s9360_s2 = inlined_call_operand.vmem [shape: bf16[32,32], index: 2, kind: input, shape index: {}]   ;;  %s9361_s3 = inlined_call_operand.vmem [shape: bf16[32,32], index: 3, kind: input, shape index: {}]   ;;  %s9362_s4 = inlined_call_operand.vmem [shape: f32[8,44,44], index: 4, kind: input, shape index: {}]   ;;  %s9363_s5 = inlined_call_operand.vmem [shape: f32[8,44,44], index: 5, kind: input, shape index: {}]   ;;  %s9364_s6 = inlined_call_operand.vmem [shape: f32[1,32], index: 6, kind: input, shape index: {}]   ;;  %s9365_s7 = inlined_call_operand.vmem [shape: f32[1,32], index: 7, kind: input, shape index: {}]   ;;  %s9366_s8 = inlined_call_operand.vmem [shape: f32[1,32], index: 8, kind: input, shape index: {}]   ;;  %s9367_s9 = inlined_call_operand.vmem [shape: f32[1,32], index: 9, kind: input, shape index: {}]   ;;  %s9368_s10 = inlined_call_operand.vmem [shape: bf16[32,128], index: 10, kind: input, shape index: {}]   ;;  %s9369_s11 = inlined_call_operand.vmem [shape: f32[1,128], index: 11, kind: input, shape index: {}]   ;;  %s9370_s12 = inlined_call_operand.vmem [shape: bf16[128,32], index: 12, kind: input, shape index: {}]   ;;  %s9371_s13 = inlined_call_operand.vmem [shape: f32[1,32], index: 13, kind: input, shape index: {}]   ;;  %s9372_s14 = inlined_call_operand.vmem [shape: f32[1,32], index: 14, kind: input, shape index: {}]   ;;  %s9373_s15 = inlined_call_operand.vmem [shape: f32[1,32], index: 15, kind: input, shape index: {}]   ;;  %s9374_s16 = inlined_call_operand.vmem [shape: f32[2,44,32], index: 16, kind: output, shape index: {}]  }
   0x1   :  { %9543 = sst [smem:[#allocation115_spill]] %s9358_s0 }
   0x2 LB: > { %s4710_s22 = sadd.s32 4294967295, %s5536_s21   ;;  %p4714_p0 = scmp.ge.s32.totalorder %s5536_s21, 1  ;;  %s5536_s21 = sphi %s5663_s21, %s26_s21  }
   0x3   : > { %p462_p1 = scmp.lt.s32.totalorder %s5536_s21, 3 }
   0x5   : > { %p463_p2 = pnand %p4714_p0, %p462_p1 }
   0x7   : > { %466 = sbr.rel (%p463_p2) target bundleno = 3909 (0xf45), region = 84 }
   0xc   : > { %v4917_v0 = vld [vmem:[%s9359_s1 + $0x8] sm:$0xff]  ;;  %p512_p3 = scmp.lt.s32.totalorder %s4710_s22, 1  ;;  %v4916_v2 = vld [vmem:[%s9359_s1] sm:$0xff]  ;;  %s9544_s19 = sld [smem:[#allocation115_spill]]  ;;  %vm548_vm0 = vcmask 261120   ;;  %v9389_v13 = vmov 3   ;;  %v668_v29 = vlaneseq }
   0xd   : > { %v4919_v1 = vld [vmem:[%s9360_s2 + $0x8] sm:$0xff]  ;;  %564 = vmatpush.bf16.msra.mxu0 %v4917_v0  ;;  %v4918_v3 = vld [vmem:[%s9360_s2] sm:$0xff]  ;;  %4932 = vmatpush.bf16.msra.mxu2 %v4917_v0  ;;  %v9387_v14 = vmov 2   ;;  %v9381_v15 = vmov 1   ;;  %v9401_v21 = vmov 6   ;;  %v9391_v22 = vmov 5  }
   0xe   : > { %4934 = vmatpush.bf16.msra.mxu3 %v4919_v1  ;;  %s10092_s22 = smov (!%p512_p3, %s4710_s22), 1  ;;  %610 = vmatpush.bf16.msra.mxu1 %v4919_v1  ;;  %v9377_v23 = vmov 4   ;;  %vm720_vm1 = vcmask 1043456   ;;  %v9385_v30 = vmov 0   ;;  %v9379_v31 = vmov 7   ;;  %s5555_s18 = smov 120  }
   0xf   : > { %s4936_s0 = smul.u32 48, %s10092_s22  ;;  %4987 = vset.pattern.permute.xlu2 %v9389_v13  ;;  %4986 = vset.pattern.permute.xlu1 %v9387_v14  ;;  %v5742_v32 = vshrl.u32 %v668_v29, 7  ;;  %v5749_v37 = vand.u32 127, %v668_v29  ;;  %v5546_v48 = vmov 0.0   ;;  %vm701_vm3 = vcmask 359424   ;;  %s5562_s28 = smov 112  }
  0x10   : > { %4985 = vset.pattern.permute.xlu0 %v9381_v15  ;;  %vm1498_vm4 = vcmask 64512   ;;  %vm1556_vm10 = vcmask 355328   ;;  %vm1637_vm11 = vcmask 1045504   ;;  %vm3954_vm12 = vcmask 130048  }
  0x11   : > { %565 = vmatpush.bf16.msra.mxu0 %v4916_v2  ;;  %4933 = vmatpush.bf16.msra.mxu2 %v4916_v2  ;;  %v677_v38 = vadd.s32 1, %v5742_v32  ;;  %v670_v42 = vadd.s32 8, %v5742_v32  ;;  %vm3961_vm13 = vcmask 195584   ;;  %vm3985_vm14 = vcmask 257024   ;;  %s9321_s25 = scalar_lea.vmem %s9374_s16, %s4936_s0 }
  0x12   : > { %4935 = vmatpush.bf16.msra.mxu3 %v4918_v3  ;;  %s5691_s20 = scalar_lea.vmem %s9544_s19, %s4936_s0  ;;  %611 = vmatpush.bf16.msra.mxu1 %v4918_v3  ;;  %s5576_s19 = smov 16  }
  0x13   : > { %v523_v4 = vld [vmem:[%s5691_s20] sm:$0xff]  ;;  %v524_v5 = vld [vmem:[%s5691_s20 + $0x8] sm:$0xff]  ;;  %v525_v6 = vld [vmem:[%s5691_s20 + $0x10] sm:$0xff]  ;;  %vm683_vm2 = vcmp.eq.s32.totalorder %v5749_v37, %v677_v38  ;;  %v678_v51 = vadd.s32 1, %v670_v42  ;;  %v9383_v42 = vmov 8  }
  0x14   : > { %v5696_v7 = vpack.c.bf16 %v524_v5, %v523_v4  ;;  %v526_v8 = vld [vmem:[%s5691_s20 + $0x18] sm:$0xff]  ;;  %v527_v9 = vld [vmem:[%s5691_s20 + $0x20] sm:$0xff]  ;;  %v528_v10 = vld [vmem:[%s5691_s20 + $0x28] sm:$0xf]  ;;  %v4750_v49 = vsel %vm683_vm2, 1.0, %v5546_v48  ;;  %v671_v4 = vadd.s32 16, %v5742_v32 }
  0x15   : > { %v5701_v11 = vpack.c.bf16 %v526_v8, %v525_v6  ;;  %v5703_v12 = vpack.c.bf16 %v528_v10, %v527_v9  ;;  %vm684_vm5 = vcmp.eq.s32.totalorder %v5749_v37, %v678_v51 }
  0x16   : > { %9545 = vst [vmem:[#allocation2_spill] sm:$0xff] %v5696_v7  ;;  %4725 = vmatmul.msk.bf16.vlgmr.msra.gmra.mxu0 %vm548_vm0, %v5696_v7  ;;  %4736 = vmatmul.msk.bf16.vlgmr.msra.gmra.mxu1 %vm548_vm0, %v5696_v7  ;;  %v4751_v60 = vsel %vm684_vm5, 1.0, %v5546_v48  ;;  %v679_v6 = vadd.s32 1, %v671_v4 }
  0x17   : > { %9546 = vst [vmem:[#allocation3_spill] sm:$0xff] %v5701_v11  ;;  %4737 = vmatmul.msk.bf16.vlgmr.msra.gmra.mxu3 %vm548_vm0, %v5701_v11  ;;  %4727 = vmatmul.msk.bf16.vlgmr.msra.gmra.mxu2 %vm548_vm0, %v5703_v12 }
  0x18   : > { %9547 = vst [vmem:[#allocation4_spill] sm:$0xff] %v5703_v12  ;;  %vm685_vm6 = vcmp.eq.s32.totalorder %v5749_v37, %v679_v6 }
  0x19   : > { %v4752_v10 = vsel %vm685_vm6, 1.0, %v5546_v48 }
  0x26   : > { %4726 = vmatmul.msk.bf16.gmra.mxu0 %vm548_vm0, %v5701_v11 }
  0x27   : > { %4738 = vmatmul.msk.bf16.gmra.mxu3 %vm548_vm0, %v5703_v12  ;;  %v9595_v12 = vmov 4  }
  0x93   : > { %v567_v16 = vpop.f32.mrf.mxu0  ;;  %v613_v39 = vpop.f32.mrf.mxu1 }
  0x94   : > { %v5720_v17 = vmul.f32 0.17677669, %v567_v16  ;;  %v765_v58 = vpack.c.bf16 %v613_v39, %v613_v39 }
  0x96   : > { %9548 = vst [vmem:[#allocation5_spill] sm:$0xff] %v5720_v17  ;;  %1046 = vperm.xlu2 %4987, %v5720_v17   ;;  %960 = vperm.xlu1 %4986, %v5720_v17   ;;  %v1489_v61 = vunpack.c.l.b16 %v765_v58  ;;  %v759_v3 = vpack.c.bf16 %v5720_v17, %v5720_v17 }
  0x97   : > { %874 = vperm.xlu0 %4985, %v5720_v17  }
  0x98   : > { %v1474_v8 = vunpack.c.l.b16 %v759_v3 }
  0x9a   : > { %v618_v18 = vpop.f32.mrf.mxu3  ;;  %v577_v19 = vpop.f32.mrf.mxu2 }
  0x9b   : > { %v569_v20 = vpop.f32.mrf.mxu0  ;;  %v5731_v26 = vmul.f32 0.17677669, %v577_v19  ;;  %v767_v44 = vpack.c.bf16 %v618_v18, %v618_v18  ;;  %v615_v55 = vpop.f32.mrf.mxu1 }
  0x9c   : > { %v5754_v41 = vmul.f32 0.17677669, %v569_v20  ;;  %v766_v59 = vpack.c.bf16 %v615_v55, %v615_v55  ;;  %v674_v55 = vadd.s32 40, %v5742_v32 }
  0x9d   : > { %9549 = vst [vmem:[#allocation6_spill] sm:$0xff] %v5731_v26  ;;  %v1491_v52 = vunpack.c.l.b16 %v767_v44  ;;  %v763_v29 = vpack.c.bf16 %v5731_v26, %v5731_v26 }
  0x9e   : > { %4990 = vset.pattern.permute.xlu2 %v9401_v21  ;;  %4989 = vset.pattern.permute.xlu1 %v9391_v22  ;;  %9553 = vst [vmem:[#allocation10_spill] sm:$0xff] %v5754_v41  ;;  %v1490_v62 = vunpack.c.l.b16 %v766_v59  ;;  %v760_v2 = vpack.c.bf16 %v5754_v41, %v5754_v41  ;;  %v682_v58 = vadd.s32 1, %v674_v55 }
  0x9f   : > { %4988 = vset.pattern.permute.xlu0 %v9377_v23  ;;  %1304 = vperm.xlu2 %4990, %v5720_v17   ;;  %v1478_v38 = vunpack.c.l.b16 %v763_v29 }
  0xa0   : > { %1218 = vperm.xlu1 %4989, %v5720_v17   ;;  %1132 = vperm.xlu0 %4988, %v5720_v17   ;;  %v5785_v0 = vpack.c.b16 %v1490_v62, %v1489_v61  ;;  %v1475_v5 = vunpack.c.l.b16 %v760_v2  ;;  %vm688_vm9 = vcmp.eq.s32.totalorder %v5749_v37, %v682_v58 }
  0xa1   : > { %v4755_v59 = vsel %vm688_vm9, 1.0, %v5546_v48 }
  0xa2   : > { %v620_v24 = vpop.f32.mrf.mxu3  ;;  %v579_v25 = vpop.f32.mrf.mxu2  ;;  %9556 = vst [vmem:[#allocation13_spill] sm:$0xff] %v5785_v0  ;;  %v1509_v1 = vsel %vm1498_vm4, %v5785_v0, 0  ;;  %v5806_v9 = vpack.c.b16 %v1475_v5, %v1474_v8  ;;  %v9375_v5 = vmov 9   ;;  %v9593_v0 = vmov 5  }
  0xa3   : > { %v572_v27 = vpop.f32.mrf.mxu0  ;;  %v5733_v28 = vmul.f32 0.17677669, %v579_v25  ;;  %v768_v45 = vpack.c.bf16 %v620_v24, %v620_v24  ;;  %v672_v25 = vadd.s32 24, %v5742_v32 }
  0xa4   : > { %v5745_v35 = vmul.f32 0.17677669, %v572_v27  ;;  %9557 = vst [vmem:[#allocation14_spill] sm:$0xff] %v5806_v9 }
  0xa5   : > { %9550 = vst [vmem:[#allocation7_spill] sm:$0xff] %v5733_v28  ;;  %4756 = vmatpush.msk.msrb.mxu3 %vm720_vm1, %v5733_v28  ;;  %v1492_v53 = vunpack.c.l.b16 %v768_v45  ;;  %v680_v27 = vadd.s32 1, %v672_v25  ;;  %v673_v45 = vadd.s32 32, %v5742_v32 }
  0xa6   : > { %9551 = vst [vmem:[#allocation8_spill] sm:$0xff] %v5745_v35  ;;  %v761_v16 = vpack.c.bf16 %v5745_v35, %v5745_v35 }
  0xa7   : > { %4992 = vset.pattern.permute.xlu2 %v9385_v30  ;;  %735 = vmatpush.msrb.mxu3 %v5731_v26  ;;  %v5774_v57 = vpack.c.b16 %v1492_v53, %v1491_v52  ;;  %vm686_vm7 = vcmp.eq.s32.totalorder %v5749_v37, %v680_v27 }
  0xa8   : > { %4995 = vset.pattern.permute.xlu1 %v9389_v13  ;;  %4991 = vset.pattern.permute.xlu0 %v9379_v31  ;;  %v1476_v19 = vunpack.c.l.b16 %v761_v16 }
  0xa9   : > { %805 = vperm.xlu2 %4992, %v5731_v26   ;;  %1062 = vperm.xlu1 %4995, %v5731_v26   ;;  %9555 = vst [vmem:[#allocation12_spill] sm:$0xff] %v5774_v57  ;;  %v1512_v63 = vsel %vm1498_vm4, %v5774_v57, 0  ;;  %v9591_v57 = vmov 1  }
  0xaa   : > { %1390 = vperm.xlu0 %4991, %v5720_v17   ;;  %v623_v33 = vpop.f32.mrf.mxu3 }
  0xab   : > { %v574_v34 = vpop.f32.mrf.mxu0  ;;  %v769_v40 = vpack.c.bf16 %v623_v33, %v623_v33  ;;  %v764_v33 = vpack.c.bf16 %v5733_v28, %v5733_v28 }
  0xac   : > { %v5747_v36 = vmul.f32 0.17677669, %v574_v34  ;;  %v4753_v34 = vsel %vm686_vm7, 1.0, %v5546_v48 }
  0xad   : > { %v1493_v46 = vunpack.c.l.b16 %v769_v40  ;;  %v1479_v39 = vunpack.c.l.b16 %v764_v33 }
  0xae   : > { %9552 = vst [vmem:[#allocation9_spill] sm:$0xff] %v5747_v36  ;;  %736 = vmatpush.msrb.mxu3 %v5747_v36  ;;  %v762_v18 = vpack.c.bf16 %v5747_v36, %v5747_v36 }
  0xaf   : > { %v5847_v40 = vpack.c.b16 %v1479_v39, %v1478_v38 }
  0xb0   : > { %737 = vmatpush.msrb.mxu3 %v5745_v35  ;;  %v1477_v20 = vunpack.c.l.b16 %v762_v18 }
  0xb1   : > { %4993 = vset.pattern.permute.xlu2 %v9381_v15  ;;  %4998 = vset.pattern.permute.xlu1 %v9401_v21  ;;  %9559 = vst [vmem:[#allocation16_spill] sm:$0xff] %v5847_v40 }
  0xb2   : > { %5002 = vset.pattern.permute.xlu0 %v9389_v13  ;;  %v625_v43 = vpop.f32.mrf.mxu3  ;;  %890 = vperm.xlu2 %4993, %v5731_v26   ;;  %v5826_v24 = vpack.c.b16 %v1477_v20, %v1476_v19 }
  0xb3   : > { %v770_v47 = vpack.c.bf16 %v625_v43, %v625_v43  ;;  %1320 = vperm.xlu1 %4998, %v5731_v26   ;;  %1050 = vperm.xlu0 %5002, %v5754_v41  }
  0xb4   : > { %738 = vmatpush.msrb.mxu3 %v5754_v41  ;;  %9558 = vst [vmem:[#allocation15_spill] sm:$0xff] %v5826_v24 }
  0xb5   : > { %v1494_v50 = vunpack.c.l.b16 %v770_v47 }
  0xb6   : > { %739 = vmatpush.msrb.mxu3 %v5720_v17 }
  0xb7   : > { %v5767_v54 = vpack.c.b16 %v1494_v50, %v1493_v46  ;;  %4757 = vmatmul.msk.f32.vlgmr.msrb.gmra.mxu3 %vm701_vm3, %v4750_v49  ;;  %v681_v46 = vadd.s32 1, %v673_v45 }
  0xb9   : > { %9554 = vst [vmem:[#allocation11_spill] sm:$0xff] %v5767_v54  ;;  %v1515_v56 = vsel %vm1498_vm4, %v5767_v54, 0  ;;  %vm687_vm8 = vcmp.eq.s32.totalorder %v5749_v37, %v681_v46  ;;  %v9589_v54 = vmov 2  }
  0xba   : > { %1522 = vmatpush.bf16.xpose.msrb.mxu0 %v1515_v56  ;;  %4994 = vset.pattern.permute.xlu2 %v9387_v14  ;;  %v4754_v47 = vsel %vm687_vm8, 1.0, %v5546_v48 }
  0xbb   : > { %5000 = vset.pattern.permute.xlu1 %v9381_v15  ;;  %5005 = vset.pattern.permute.xlu0 %v9401_v21 }
  0xbc   : > { %976 = vperm.xlu2 %4994, %v5731_v26   ;;  %1308 = vperm.xlu0 %5005, %v5754_v41  }
  0xbd   : > { %878 = vperm.xlu1 %5000, %v5754_v41  }
  0xbf   : > { %4758 = vmatmul.msk.f32.gmra.mxu3 %vm701_vm3, %v4751_v60 }
  0xc2   : > { %1523 = vmatpush.bf16.xpose.msrb.mxu0 %v1512_v63 }
  0xc4   : > { %4996 = vset.pattern.permute.xlu2 %v9377_v23  ;;  %5008 = vset.pattern.permute.xlu0 %v9381_v15 }
  0xc5   : > { %5003 = vset.pattern.permute.xlu1 %v9377_v23  ;;  %1148 = vperm.xlu2 %4996, %v5731_v26  }
  0xc6   : > { %894 = vperm.xlu0 %5008, %v5733_v28   ;;  %1136 = vperm.xlu1 %5003, %v5754_v41  }
  0xc7   : > { %4759 = vmatmul.msk.f32.gmra.mxu3 %vm701_vm3, %v4752_v10 }
  0xca   : > { %1524 = vmatpush.bf16.xpose.msrb.mxu0 %v1509_v1 }
  0xcd   : > { %4997 = vset.pattern.permute.xlu2 %v9391_v22 }
  0xce   : > { %5011 = vset.pattern.permute.xlu0 %v9377_v23  ;;  %5006 = vset.pattern.permute.xlu1 %v9379_v31 }
  0xcf   : > { %1234 = vperm.xlu2 %4997, %v5731_v26   ;;  %1152 = vperm.xlu0 %5011, %v5733_v28  }
  0xd0   : > { %1394 = vperm.xlu1 %5006, %v5754_v41   ;;  %4760 = vmatmul.msk.f32.gmra.mxu3 %vm701_vm3, %v4753_v34 }
  0xd1   : > { %4847 = vmatmul.msk.bf16.vlgmr.msrb.gmra.mxu0 %vm1498_vm4, %v5806_v9 }
  0xd7   : > { %4999 = vset.pattern.permute.xlu2 %v9379_v31  ;;  %5014 = vset.pattern.permute.xlu0 %v9379_v31 }
  0xd8   : > { %5009 = vset.pattern.permute.xlu1 %v9387_v14  ;;  %1406 = vperm.xlu2 %4999, %v5731_v26  }
  0xd9   : > { %1410 = vperm.xlu0 %5014, %v5733_v28   ;;  %980 = vperm.xlu1 %5009, %v5733_v28  }
  0xda   : > { %4761 = vmatmul.msk.f32.gmra.mxu3 %vm701_vm3, %v4754_v47 }
  0xe0   : > { %5001 = vset.pattern.permute.xlu2 %v9387_v14 }
  0xe1   : > { %5017 = vset.pattern.permute.xlu0 %v9387_v14  ;;  %5012 = vset.pattern.permute.xlu1 %v9391_v22 }
  0xe2   : > { %964 = vperm.xlu2 %5001, %v5754_v41   ;;  %1238 = vperm.xlu1 %5012, %v5733_v28  }
  0xe3   : > { %968 = vperm.xlu0 %5017, %v5745_v35   ;;  %4848 = vmatmul.msk.bf16.gmra.mxu0 %vm1498_vm4, %v5826_v24 }
  0xe4   : > { %4762 = vmatmul.msk.f32.gmra.mxu3 %vm701_vm3, %v4755_v59 }
  0xea   : > { %5004 = vset.pattern.permute.xlu2 %v9391_v22  ;;  %5015 = vset.pattern.permute.xlu1 %v9385_v30 }
  0xeb   : > { %5020 = vset.pattern.permute.xlu0 %v9391_v22  ;;  %1222 = vperm.xlu2 %5004, %v5754_v41  }
  0xec   : > { %1226 = vperm.xlu0 %5020, %v5745_v35   ;;  %795 = vperm.xlu1 %5015, %v5745_v35  }
  0xf0   : > { %v5854_v43 = vpop.permute.xlu2 %1046 }
  0xf3   : > { %5007 = vset.pattern.permute.xlu2 %v9385_v30  ;;  %4849 = vmatmul.msk.bf16.gmra.mxu0 %vm1498_vm4, %v5847_v40 }
  0xf4   : > { %5021 = vset.pattern.permute.xlu0 %v9383_v42  ;;  %5018 = vset.pattern.permute.xlu1 %v9389_v13 }
  0xf5   : > { %809 = vperm.xlu2 %5007, %v5733_v28   ;;  %1666 = vperm.xlu0 %5021, %v5720_v17  }
  0xf6   : > { %1054 = vperm.xlu1 %5018, %v5745_v35  }
  0xf9   : > { %v5863_v44 = vpop.permute.xlu2 %1304 }
  0xfd   : > { %5010 = vset.pattern.permute.xlu2 %v9389_v13  ;;  %5022 = vset.pattern.permute.xlu0 %v9385_v30 }
  0xfe   : > { %5023 = vset.pattern.permute.xlu1 %v9383_v42  ;;  %1066 = vperm.xlu2 %5010, %v5733_v28  }
  0xff   : > { %785 = vperm.xlu0 %5022, %v5720_v17   ;;  %1670 = vperm.xlu1 %5023, %v5754_v41  }
 0x103   : > { %v5877_v50 = vpop.permute.xlu2 %805 }
 0x104   : > { %9560 = vst [vmem:[#allocation17_spill] sm:$0xff] %v5877_v50  ;;  %v4765_v50 = vld [vmem:[%s9362_s4 + $0x40] sm:$0xff] }
 0x106   : > { %5013 = vset.pattern.permute.xlu2 %v9401_v21 }
 0x107   : > { %790 = vperm.xlu0 %5022, %v5754_v41   ;;  %5024 = vset.pattern.permute.xlu1 %v9401_v21 }
 0x108   : > { %1324 = vperm.xlu2 %5013, %v5733_v28   ;;  %1312 = vperm.xlu1 %5024, %v5745_v35   ;;  %v5875_v49 = vpop.permute.xlu1 %960 }
 0x109   : > { %v5954_v10 = vpop.permute.xlu0 %874 }
 0x10c   : > { %v5886_v52 = vpop.permute.xlu2 %890 }
 0x10d   : > { %9561 = vst [vmem:[#allocation18_spill] sm:$0xff] %v5886_v52 }
 0x110   : > { %5016 = vset.pattern.permute.xlu2 %v9381_v15  ;;  %5027 = vset.pattern.permute.xlu1 %v9385_v30 }
 0x111   : > { %882 = vperm.xlu2 %5016, %v5745_v35   ;;  %800 = vperm.xlu1 %5027, %v5747_v36  }
 0x112   : > { %v5884_v51 = vpop.permute.xlu1 %1218  ;;  %v5967_v19 = vpop.permute.xlu0 %1132 }
 0x116   : > { %v5895_v56 = vpop.permute.xlu2 %976 }
 0x117   : > { %9563 = vst [vmem:[#allocation20_spill] sm:$0xff] %v5895_v56  ;;  %v779_v56 = vld [vmem:[%s9362_s4 + $0x10] sm:$0xff] }
 0x119   : > { %5019 = vset.pattern.permute.xlu2 %v9377_v23  ;;  %5028 = vset.pattern.permute.xlu1 %v9381_v15 }
 0x11a   : > { %1140 = vperm.xlu2 %5019, %v5745_v35   ;;  %886 = vperm.xlu1 %5028, %v5747_v36  }
 0x11b   : > { %v5892_v53 = vpop.permute.xlu1 %1062 }
 0x11c   : > { %9562 = vst [vmem:[#allocation19_spill] sm:$0xff] %v5892_v53  ;;  %v5980_v27 = vpop.permute.xlu0 %1390 }
 0x11f   : > { %v5906_v32 = vpop.permute.xlu2 %1148 }
 0x120   : > { %9565 = vst [vmem:[#allocation22_spill] sm:$0xff] %v5906_v32  ;;  %v5549_v32 = vmov 10  }
 0x122   : > { %5025 = vset.pattern.permute.xlu2 %v9379_v31  ;;  %5029 = vset.pattern.permute.xlu1 %v9387_v14 }
 0x123   : > { %1398 = vperm.xlu2 %5025, %v5745_v35   ;;  %972 = vperm.xlu1 %5029, %v5747_v36  }
 0x125   : > { %v5904_v60 = vpop.permute.xlu1 %1320  ;;  %v5995_v38 = vpop.permute.xlu0 %1050 }
 0x126   : > { %9564 = vst [vmem:[#allocation21_spill] sm:$0xff] %v5904_v60  ;;  %v9607_v60 = vmov 9  }
 0x129   : > { %v5914_v48 = vpop.permute.xlu2 %1234 }
 0x12a   : > { %9566 = vst [vmem:[#allocation23_spill] sm:$0xff] %v5914_v48 }
 0x12b   : > { %5026 = vset.pattern.permute.xlu2 %v9383_v42  ;;  %5031 = vset.pattern.permute.xlu1 %v9377_v23 }
 0x12c   : > { %1674 = vperm.xlu2 %5026, %v5745_v35   ;;  %1144 = vperm.xlu1 %5031, %v5747_v36  }
 0x12e   : > { %v6009_v46 = vpop.permute.xlu0 %1308 }
 0x12f   : > { %v5912_v37 = vpop.permute.xlu1 %878 }
 0x132   : > { %v5924_v63 = vpop.permute.xlu2 %1406 }
 0x133   : > { %9568 = vst [vmem:[#allocation25_spill] sm:$0xff] %v5924_v63  ;;  %v9605_v63 = vmov 6  }
 0x134   : > { %5030 = vset.pattern.permute.xlu2 %v9389_v13  ;;  %5032 = vset.pattern.permute.xlu1 %v9391_v22 }
 0x135   : > { %1058 = vperm.xlu2 %5030, %v5747_v36   ;;  %1230 = vperm.xlu1 %5032, %v5747_v36  }
 0x138   : > { %v5920_v61 = vpop.permute.xlu1 %1136  ;;  %v6022_v58 = vpop.permute.xlu0 %894 }
 0x139   : > { %9578 = vst [vmem:[#allocation35_spill] sm:$0xff] %v6022_v58 }
 0x13a   : > { %v5922_v62 = vpop.f32.mrf.mxu3 }
 0x13b   : > { %9567 = vst [vmem:[#allocation24_spill] sm:$0xff] %v5922_v62  ;;  %826 = vperm.xlu0 %5022, %v5922_v62  }
 0x13c   : > { %v5935_v2 = vpop.permute.xlu2 %964 }
 0x13d   : > { %5033 = vset.pattern.permute.xlu2 %v9401_v21  ;;  %5034 = vset.pattern.permute.xlu1 %v9379_v31 }
 0x13e   : > { %1316 = vperm.xlu2 %5033, %v5747_v36   ;;  %1402 = vperm.xlu1 %5034, %v5747_v36  }
 0x142   : > { %v5931_v1 = vpop.permute.xlu1 %1394  ;;  %v5950_v6 = vpop.f32.mrf.mxu3 }
 0x143   : > { %5040 = vset.pattern.permute.xlu0 %v9389_v13  ;;  %9570 = vst [vmem:[#allocation27_spill] sm:$0xff] %v5950_v6 }
 0x144   : > { %1089 = vperm.xlu0 %5040, %v5922_v62  }
 0x145   : > { %v5945_v4 = vpop.permute.xlu2 %1222 }
 0x146   : > { %5036 = vset.pattern.permute.xlu2 %v9383_v42  ;;  %5035 = vset.pattern.permute.xlu1 %v9383_v42 }
 0x147   : > { %1682 = vperm.xlu2 %5036, %v5731_v26   ;;  %1678 = vperm.xlu1 %5035, %v5747_v36  }
 0x14a   : > { %v5988_v33 = vpop.f32.mrf.mxu3 }
 0x14b   : > { %v5941_v3 = vpop.permute.xlu1 %980  ;;  %9575 = vst [vmem:[#allocation32_spill] sm:$0xff] %v5988_v33 }
 0x14c   : > { %9569 = vst [vmem:[#allocation26_spill] sm:$0xff] %v5941_v3  ;;  %5043 = vset.pattern.permute.xlu0 %v9401_v21 }
 0x14d   : > { %1347 = vperm.xlu0 %5043, %v5922_v62  }
 0x14f   : > { %5037 = vset.pattern.permute.xlu2 %v9375_v5  ;;  %1686 = vperm.xlu1 %5035, %v5733_v28   ;;  %v5961_v16 = vpop.permute.xlu2 %809 }
 0x150   : > { %1732 = vperm.xlu2 %5037, %v5720_v17   ;;  %9572 = vst [vmem:[#allocation29_spill] sm:$0xff] %v5961_v16 }
 0x153   : > { %v6024_v59 = vpop.f32.mrf.mxu3 }
 0x154   : > { %v5952_v8 = vpop.permute.xlu1 %1238  ;;  %9579 = vst [vmem:[#allocation36_spill] sm:$0xff] %v6024_v59 }
 0x155   : > { %9571 = vst [vmem:[#allocation28_spill] sm:$0xff] %v5952_v8  ;;  %5048 = vset.pattern.permute.xlu0 %v9387_v14 }
 0x156   : > { %1007 = vperm.xlu0 %5048, %v5950_v6  }
 0x157   : > { %5038 = vset.pattern.permute.xlu1 %v9381_v15 }
 0x158   : > { %5039 = vset.pattern.permute.xlu2 %v9387_v14  ;;  %917 = vperm.xlu1 %5038, %v5922_v62   ;;  %v5974_v20 = vpop.permute.xlu2 %1066 }
 0x159   : > { %1003 = vperm.xlu2 %5039, %v5922_v62   ;;  %9573 = vst [vmem:[#allocation30_spill] sm:$0xff] %v5974_v20 }
 0x15e   : > { %v5964_v18 = vpop.permute.xlu1 %795  ;;  %5051 = vset.pattern.permute.xlu0 %v9391_v22 }
 0x15f   : > { %1265 = vperm.xlu0 %5051, %v5950_v6  }
 0x160   : > { %5041 = vset.pattern.permute.xlu1 %v9377_v23 }
 0x161   : > { %5042 = vset.pattern.permute.xlu2 %v9391_v22  ;;  %1175 = vperm.xlu1 %5041, %v5922_v62  }
 0x162   : > { %1261 = vperm.xlu2 %5042, %v5922_v62   ;;  %v5986_v29 = vpop.permute.xlu2 %1324 }
 0x163   : > { %9574 = vst [vmem:[#allocation31_spill] sm:$0xff] %v5986_v29  ;;  %v9599_v29 = vmov 7  }
 0x167   : > { %5054 = vset.pattern.permute.xlu0 %v9383_v42 }
 0x168   : > { %v5977_v25 = vpop.permute.xlu1 %1054  ;;  %1700 = vperm.xlu0 %5054, %v5950_v6  }
 0x169   : > { %5044 = vset.pattern.permute.xlu1 %v9379_v31 }
 0x16a   : > { %5045 = vset.pattern.permute.xlu2 %v9383_v42  ;;  %1433 = vperm.xlu1 %5044, %v5922_v62  }
 0x16b   : > { %1696 = vperm.xlu2 %5045, %v5922_v62   ;;  %v6000_v39 = vpop.permute.xlu2 %882 }
 0x170   : > { %5056 = vset.pattern.permute.xlu0 %v9381_v15 }
 0x171   : > { %v5991_v34 = vpop.permute.xlu1 %1670  ;;  %925 = vperm.xlu0 %5056, %v5988_v33  }
 0x172   : > { %9576 = vst [vmem:[#allocation33_spill] sm:$0xff] %v5991_v34  ;;  %5046 = vset.pattern.permute.xlu1 %v9385_v30  ;;  %v9587_v34 = vmov 8  }
 0x173   : > { %5047 = vset.pattern.permute.xlu2 %v9381_v15  ;;  %831 = vperm.xlu1 %5046, %v5950_v6  }
 0x174   : > { %921 = vperm.xlu2 %5047, %v5950_v6   ;;  %v6012_v47 = vpop.permute.xlu2 %1140 }
 0x179   : > { %5059 = vset.pattern.permute.xlu0 %v9377_v23 }
 0x17a   : > { %v6003_v45 = vpop.permute.xlu1 %1312  ;;  %1183 = vperm.xlu0 %5059, %v5988_v33  }
 0x17b   : > { %5049 = vset.pattern.permute.xlu1 %v9389_v13 }
 0x17c   : > { %5050 = vset.pattern.permute.xlu2 %v9377_v23  ;;  %1093 = vperm.xlu1 %5049, %v5950_v6  }
 0x17d   : > { %1179 = vperm.xlu2 %5050, %v5950_v6   ;;  %v6026_v5 = vpop.permute.xlu2 %1398 }
 0x182   : > { %5062 = vset.pattern.permute.xlu0 %v9379_v31 }
 0x183   : > { %v6015_v55 = vpop.permute.xlu1 %800  ;;  %1441 = vperm.xlu0 %5062, %v5988_v33  }
 0x184   : > { %9577 = vst [vmem:[#allocation34_spill] sm:$0xff] %v6015_v55  ;;  %5052 = vset.pattern.permute.xlu1 %v9401_v21  ;;  %v4771_v55 = vld [vmem:[%s9363_s5 + $0x40] sm:$0xff] }
 0x185   : > { %5053 = vset.pattern.permute.xlu2 %v9379_v31  ;;  %1351 = vperm.xlu1 %5052, %v5950_v6   ;;  %v6036_v31 = vpop.permute.xlu0 %1152 }
 0x186   : > { %1437 = vperm.xlu2 %5053, %v5950_v6   ;;  %9581 = vst [vmem:[#allocation38_spill] sm:$0xff] %v6036_v31  ;;  %v6039_v15 = vpop.permute.xlu2 %1674 }
 0x187   : > { %9582 = vst [vmem:[#allocation39_spill] sm:$0xff] %v6039_v15 }
 0x18b   : > { %5064 = vset.pattern.permute.xlu0 %v9385_v30 }
 0x18c   : > { %v6029_v23 = vpop.permute.xlu1 %886  ;;  %841 = vperm.xlu0 %5064, %v6024_v59  }
 0x18d   : > { %9580 = vst [vmem:[#allocation37_spill] sm:$0xff] %v6029_v23  ;;  %5057 = vset.pattern.permute.xlu1 %v9387_v14 }
 0x18e   : > { %5055 = vset.pattern.permute.xlu2 %v9385_v30  ;;  %1011 = vperm.xlu1 %5057, %v5988_v33   ;;  %v6048_v30 = vpop.permute.xlu0 %1410 }
 0x18f   : > { %836 = vperm.xlu2 %5055, %v5988_v33   ;;  %9584 = vst [vmem:[#allocation41_spill] sm:$0xff] %v6048_v30  ;;  %v6054_v15 = vpop.permute.xlu2 %1058 }
 0x190   : > { %9586 = vst [vmem:[#allocation43_spill] sm:$0xff] %v6054_v15 }
 0x194   : > { %5067 = vset.pattern.permute.xlu0 %v9389_v13 }
 0x195   : > { %v6041_v42 = vpop.permute.xlu1 %972  ;;  %1101 = vperm.xlu0 %5067, %v6024_v59  }
 0x196   : > { %9583 = vst [vmem:[#allocation40_spill] sm:$0xff] %v6041_v42  ;;  %5060 = vset.pattern.permute.xlu1 %v9391_v22  ;;  %v6062_v22 = vpop.permute.xlu0 %968 }
 0x197   : > { %1269 = vperm.xlu1 %5060, %v5988_v33   ;;  %5058 = vset.pattern.permute.xlu2 %v9389_v13  ;;  %v6060_v13 = vpop.f32.mrf.mxu3 }
 0x198   : > { %1097 = vperm.xlu2 %5058, %v5988_v33   ;;  %9588 = vst [vmem:[#allocation44_spill] sm:$0xff] %v6060_v13  ;;  %v6069_v24 = vpop.permute.xlu2 %1316 }
 0x199   : > { %9592 = vst [vmem:[#allocation46_spill] sm:$0xff] %v6069_v24 }
 0x19d   : > { %5070 = vset.pattern.permute.xlu0 %v9401_v21 }
 0x19e   : > { %v6051_v14 = vpop.permute.xlu1 %1144  ;;  %1359 = vperm.xlu0 %5070, %v6024_v59  }
 0x19f   : > { %9585 = vst [vmem:[#allocation42_spill] sm:$0xff] %v6051_v14  ;;  %5063 = vset.pattern.permute.xlu1 %v9587_v34 }
 0x1a0   : > { %1704 = vperm.xlu1 %5063, %v5988_v33   ;;  %5061 = vset.pattern.permute.xlu2 %v9401_v21  ;;  %v6074_v21 = vpop.permute.xlu0 %1226 }
 0x1a1   : > { %1355 = vperm.xlu2 %5061, %v5988_v33   ;;  %v6083_v11 = vpop.permute.xlu2 %1682 }
 0x1a2   : > { %9596 = vst [vmem:[#allocation48_spill] sm:$0xff] %v6083_v11  ;;  %v6098_v11 = vpop.f32.mrf.mxu3 }
 0x1a3   : > { %9601 = vst [vmem:[#allocation52_spill] sm:$0xff] %v6098_v11 }
 0x1a6   : > { %5075 = vset.pattern.permute.xlu0 %v9589_v54 }
 0x1a7   : > { %v6065_v40 = vpop.permute.xlu1 %1230  ;;  %1019 = vperm.xlu0 %5075, %v6060_v13  }
 0x1a8   : > { %9590 = vst [vmem:[#allocation45_spill] sm:$0xff] %v6065_v40  ;;  %5065 = vset.pattern.permute.xlu1 %v9591_v57  ;;  %v6087_v7 = vpop.permute.xlu0 %1666 }
 0x1a9   : > { %5066 = vset.pattern.permute.xlu2 %v9589_v54  ;;  %929 = vperm.xlu1 %5065, %v6024_v59   ;;  %9597 = vst [vmem:[#allocation49_spill] sm:$0xff] %v6087_v7  ;;  %v9603_v7 = vmov 0  }
 0x1aa   : > { %1015 = vperm.xlu2 %5066, %v6024_v59   ;;  %v6096_v8 = vpop.permute.xlu2 %1732 }
 0x1ab   : > { %9600 = vst [vmem:[#allocation51_spill] sm:$0xff] %v6096_v8 }
 0x1af   : > { %5078 = vset.pattern.permute.xlu0 %v9593_v0 }
 0x1b0   : > { %v6077_v9 = vpop.permute.xlu1 %1402  ;;  %1277 = vperm.xlu0 %5078, %v6060_v13  }
 0x1b1   : > { %9594 = vst [vmem:[#allocation47_spill] sm:$0xff] %v6077_v9  ;;  %5068 = vset.pattern.permute.xlu1 %v9595_v12 }
 0x1b2   : > { %5069 = vset.pattern.permute.xlu2 %v9593_v0  ;;  %1187 = vperm.xlu1 %5068, %v6024_v59  }
 0x1b3   : > { %1273 = vperm.xlu2 %5069, %v6024_v59   ;;  %v6110_v20 = vpop.permute.xlu2 %1003 }
 0x1b8   : > { %5081 = vset.pattern.permute.xlu0 %v9587_v34 }
 0x1b9   : > { %v6089_v30 = vpop.permute.xlu1 %1678  ;;  %1712 = vperm.xlu0 %5081, %v6060_v13  }
 0x1ba   : > { %9598 = vst [vmem:[#allocation50_spill] sm:$0xff] %v6089_v30  ;;  %5071 = vset.pattern.permute.xlu1 %v9599_v29  ;;  %v6104_v30 = vpop.permute.xlu0 %785 }
 0x1bb   : > { %5072 = vset.pattern.permute.xlu2 %v9587_v34  ;;  %1445 = vperm.xlu1 %5071, %v6024_v59  }
 0x1bc   : > { %1708 = vperm.xlu2 %5072, %v6024_v59  }
 0x1c1   : > { %v6100_v31 = vpop.permute.xlu1 %1686  ;;  %5083 = vset.pattern.permute.xlu0 %v9591_v57 }
 0x1c2   : > { %9602 = vst [vmem:[#allocation53_spill] sm:$0xff] %v6100_v31  ;;  %937 = vperm.xlu0 %5083, %v6098_v11   ;;  %v9604_v31 = vmov 3   ;;  %v6117_v3 = vpop.permute.xlu0 %790 }
 0x1c3   : > { %5073 = vset.pattern.permute.xlu1 %v9603_v7 }
 0x1c4   : > { %5074 = vset.pattern.permute.xlu2 %v9591_v57  ;;  %846 = vperm.xlu1 %5073, %v6060_v13   ;;  %v6122_v57 = vpop.permute.xlu2 %1261 }
 0x1c5   : > { %933 = vperm.xlu2 %5074, %v6060_v13  }
 0x1ca   : > { %v6112_v8 = vpop.permute.xlu1 %917  ;;  %5086 = vset.pattern.permute.xlu0 %v9595_v12  ;;  %v6128_v16 = vpop.permute.xlu0 %826 }
 0x1cb   : > { %1195 = vperm.xlu0 %5086, %v6098_v11  }
 0x1cc   : > { %5076 = vset.pattern.permute.xlu1 %v9604_v31 }
 0x1cd   : > { %5077 = vset.pattern.permute.xlu2 %v9595_v12  ;;  %1105 = vperm.xlu1 %5076, %v6060_v13   ;;  %v6134_v12 = vpop.permute.xlu2 %1696 }
 0x1ce   : > { %1191 = vperm.xlu2 %5077, %v6060_v13   ;;  %9606 = vst [vmem:[#allocation54_spill] sm:$0xff] %v6134_v12 }
 0x1d2   : > { %v6137_v9 = vpop.permute.xlu0 %1089 }
 0x1d3   : > { %5089 = vset.pattern.permute.xlu0 %v9599_v29  ;;  %v6125_v58 = vpop.permute.xlu1 %1175 }
 0x1d4   : > { %1453 = vperm.xlu0 %5089, %v6098_v11  }
 0x1d5   : > { %5079 = vset.pattern.permute.xlu1 %v9605_v63 }
 0x1d6   : > { %5080 = vset.pattern.permute.xlu2 %v9599_v29  ;;  %1363 = vperm.xlu1 %5079, %v6060_v13   ;;  %v6146_v29 = vpop.permute.xlu2 %921 }
 0x1d7   : > { %1449 = vperm.xlu2 %5080, %v6060_v13  }
 0x1da   : > { %v6149_v12 = vpop.permute.xlu0 %1347 }
 0x1dc   : > { %5090 = vset.pattern.permute.xlu0 %v9607_v60  ;;  %v6140_v48 = vpop.permute.xlu1 %1433 }
 0x1dd   : > { %1736 = vperm.xlu0 %5090, %v5754_v41  }
 0x1de   : > { %5084 = vset.pattern.permute.xlu1 %v9589_v54 }
 0x1df   : > { %5082 = vset.pattern.permute.xlu2 %v9603_v7  ;;  %1023 = vperm.xlu1 %5084, %v6098_v11   ;;  %v6158_v7 = vpop.permute.xlu2 %1179 }
 0x1e0   : > { %851 = vperm.xlu2 %5082, %v6098_v11  }
 0x1e2   : > { %v6161_v54 = vpop.permute.xlu0 %1007 }
 0x1e5   : > { %1768 = vperm.xlu0 %5090, %v5922_v62   ;;  %v6152_v24 = vpop.permute.xlu1 %831 }
 0x1e7   : > { %5087 = vset.pattern.permute.xlu1 %v9593_v0 }
 0x1e8   : > { %1281 = vperm.xlu1 %5087, %v6098_v11   ;;  %5085 = vset.pattern.permute.xlu2 %v9604_v31  ;;  %v6169_v31 = vpop.permute.xlu2 %1437 }
 0x1e9   : > { %1109 = vperm.xlu2 %5085, %v6098_v11  }
 0x1ea   : > { %v6173_v40 = vpop.permute.xlu0 %1265 }
 0x1ed   : > { %1780 = vperm.xlu0 %5090, %v6024_v59  }
 0x1ee   : > { %v6165_v0 = vpop.permute.xlu1 %1093 }
 0x1f0   : > { %5091 = vset.pattern.permute.xlu1 %v9607_v60  ;;  %v837_v14 = vpop.permute.xlu2 %836 }
 0x1f1   : > { %1740 = vperm.xlu1 %5091, %v5745_v35   ;;  %5088 = vset.pattern.permute.xlu2 %v9605_v63  ;;  %v820_v63 = vld [vmem:[%s9363_s5 + $0x10] sm:$0xff] }
 0x1f2   : > { %1367 = vperm.xlu2 %5088, %v6098_v11   ;;  %v6188_v15 = vpop.permute.xlu0 %1700  ;;  %v856_v52 = vmul.f32 %v837_v14, %v820_v63  ;;  %v899_v14 = vmul.f32 %v4765_v50, %v6000_v39 }
 0x1f3   : > { %9608 = vst [vmem:[#allocation55_spill] sm:$0xff] %v6188_v15 }
 0x1f5   : > { %5095 = vset.pattern.permute.xlu0 %v5549_v32 }
 0x1f6   : > { %1804 = vperm.xlu0 %5095, %v5720_v17  }
 0x1f7   : > { %v6176_v53 = vpop.permute.xlu1 %1351 }
 0x1f9   : > { %1748 = vperm.xlu1 %5091, %v5731_v26  }
 0x1fa   : > { %5092 = vset.pattern.permute.xlu2 %v9607_v60  ;;  %v926_v63 = vpop.permute.xlu0 %925 }
 0x1fb   : > { %1744 = vperm.xlu2 %5092, %v5747_v36  }
 0x1fe   : > { %1824 = vperm.xlu0 %5095, %v5733_v28  }
 0x200   : > { %v1012_v42 = vpop.permute.xlu1 %1011 }
 0x201   : > { %5093 = vset.pattern.permute.xlu1 %v9587_v34  ;;  %v814_v34 = vmul.f32 %v5964_v18, %v779_v56  ;;  %v942_v56 = vmul.f32 %v4771_v55, %v926_v63  ;;  %v5550_v55 = vmov 11  }
 0x202   : > { %1716 = vperm.xlu1 %5093, %v6098_v11  }
 0x203   : > { %1752 = vperm.xlu2 %5092, %v5733_v28   ;;  %v862_v23 = vadd.f32 %v856_v52, %v814_v34  ;;  %v4777_v52 = vld [vmem:[%s9362_s4 + $0x70] sm:$0xff] }
 0x204   : > { %v985_v50 = vmul.f32 %v4777_v52, %v6062_v22  ;;  %v4795_v22 = vld [vmem:[%s9363_s5 + $0xa0] sm:$0xff] }
 0x205   : > { %v905_v15 = vadd.f32 %v899_v14, %v862_v23  ;;  %v4789_v14 = vld [vmem:[%s9362_s4 + $0xa0] sm:$0xff] }
 0x206   : > { %1848 = vperm.xlu0 %5095, %v5988_v33  }
 0x207   : > { %v948_v34 = vadd.f32 %v942_v56, %v905_v15  ;;  %v1071_v15 = vmul.f32 %v4789_v14, %v5977_v25  ;;  %v1184_v14 = vpop.permute.xlu0 %1183 }
 0x209   : > { %v1270_v18 = vpop.permute.xlu1 %1269  ;;  %v991_v39 = vadd.f32 %v985_v50, %v948_v34  ;;  %v4801_v34 = vld [vmem:[%s9362_s4 + $0xd0] sm:$0xff] }
 0x20a   : > { %5094 = vset.pattern.permute.xlu1 %v9607_v60  ;;  %v4783_v60 = vld [vmem:[%s9363_s5 + $0x70] sm:$0xff]  ;;  %v1157_v50 = vmul.f32 %v4801_v34, %v6012_v47 }
 0x20b   : > { %1772 = vperm.xlu1 %5094, %v5950_v6   ;;  %1776 = vperm.xlu2 %5092, %v5988_v33   ;;  %v1028_v23 = vmul.f32 %v4783_v60, %v1012_v42  ;;  %v1098_v42 = vpop.permute.xlu2 %1097 }
 0x20c   : > { %v1114_v60 = vmul.f32 %v4795_v22, %v1098_v42  ;;  %v4819_v42 = vld [vmem:[%s9363_s5 + $0x100] sm:$0xff] }
 0x20d   : > { %v1034_v63 = vadd.f32 %v1028_v23, %v991_v39  ;;  %v4807_v23 = vld [vmem:[%s9363_s5 + $0xd0] sm:$0xff] }
 0x20e   : > { %1860 = vperm.xlu0 %5095, %v6098_v11  }
 0x20f   : > { %v1077_v52 = vadd.f32 %v1071_v15, %v1034_v63  ;;  %v1200_v63 = vmul.f32 %v4807_v23, %v1184_v14  ;;  %v4813_v15 = vld [vmem:[%s9362_s4 + $0x100] sm:$0xff]  ;;  %v4831_v14 = vld [vmem:[%s9363_s5 + $0x130] sm:$0xff] }
 0x210   : > { %v1243_v47 = vmul.f32 %v4813_v15, %v6074_v21  ;;  %v818_v21 = vld [vmem:[%s9363_s5] sm:$0xff] }
 0x211   : > { %v1120_v25 = vadd.f32 %v1114_v60, %v1077_v52  ;;  %v1286_v60 = vmul.f32 %v4819_v42, %v1270_v18 }
 0x212   : > { %v6218_v56 = vpop.permute.xlu1 %1704 }
 0x213   : > { %1784 = vperm.xlu1 %5094, %v6060_v13   ;;  %1788 = vperm.xlu2 %5092, %v6098_v11   ;;  %v1356_v18 = vpop.permute.xlu2 %1355 }
 0x214   : > { %v1372_v42 = vmul.f32 %v4831_v14, %v1356_v18  ;;  %v778_v18 = vld [vmem:[%s9362_s4 + $0x8] sm:$0xff] }
 0x216   : > { %5100 = vset.pattern.permute.xlu0 %v5550_v55 }
 0x217   : > { %1884 = vperm.xlu0 %5100, %v5745_v35  }
 0x21b   : > { %5096 = vset.pattern.permute.xlu1 %v5549_v32  ;;  %5097 = vset.pattern.permute.xlu2 %v5549_v32  ;;  %v1163_v32 = vadd.f32 %v1157_v50, %v1120_v25  ;;  %v6233_v39 = vpop.permute.xlu1 %929  ;;  %v6248_v25 = vpop.f32.mrf.mxu0  ;;  %v4825_v50 = vld [vmem:[%s9362_s4 + $0x130] sm:$0xff] }
 0x21c   : > { %1808 = vperm.xlu1 %5096, %v5754_v41   ;;  %1812 = vperm.xlu2 %5097, %v5745_v35  }
 0x21d   : > { %v1206_v22 = vadd.f32 %v1200_v63, %v1163_v32  ;;  %v1329_v32 = vmul.f32 %v4825_v50, %v6003_v45  ;;  %v854_v63 = vmul.f32 %v6128_v16, %v818_v21  ;;  %v4763_v45 = vld [vmem:[%s9362_s4 + $0x30] sm:$0xff]  ;;  %v4837_v16 = vld [vmem:[%s9362_s4 + $0x160] sm:$0xff]  ;;  %v819_v50 = vld [vmem:[%s9363_s5 + $0x8] sm:$0xff] }
 0x21e   : > { %v897_v14 = vmul.f32 %v4763_v45, %v5954_v10 }
 0x21f   : > { %1916 = vperm.xlu0 %5100, %v5950_v6   ;;  %v1249_v52 = vadd.f32 %v1243_v47, %v1206_v22  ;;  %v777_v22 = vld [vmem:[%s9362_s4] sm:$0xff] }
 0x220   : > { %v812_v47 = vmul.f32 %v6104_v30, %v777_v22  ;;  %v1415_v22 = vmul.f32 %v4837_v16, %v6026_v5  ;;  %v4775_v5 = vld [vmem:[%s9362_s4 + $0x60] sm:$0xff] }
 0x221   : > { %v1292_v23 = vadd.f32 %v1286_v60, %v1249_v52  ;;  %v4769_v52 = vld [vmem:[%s9363_s5 + $0x30] sm:$0xff] }
 0x222   : > { %v860_v60 = vadd.f32 %v854_v63, %v812_v47  ;;  %v940_v63 = vmul.f32 %v4769_v52, %v6112_v8  ;;  %v813_v47 = vmul.f32 %v6117_v3, %v778_v18  ;;  %v1442_v3 = vpop.permute.xlu0 %1441 }
 0x223   : > { %v1335_v15 = vadd.f32 %v1329_v32, %v1292_v23  ;;  %v6281_v21 = vpop.f32.mrf.mxu0  ;;  %v855_v32 = vmul.f32 %v6152_v24, %v819_v50  ;;  %v4764_v24 = vld [vmem:[%s9362_s4 + $0x38] sm:$0xff] }
 0x224   : > { %1816 = vperm.xlu1 %5096, %v5747_v36   ;;  %1820 = vperm.xlu2 %5097, %v5731_v26   ;;  %v6246_v34 = vpop.permute.xlu1 %1187  ;;  %v898_v52 = vmul.f32 %v4764_v24, %v5912_v37 }
 0x225   : > { %v1378_v23 = vadd.f32 %v1372_v42, %v1335_v15  ;;  %v4843_v15 = vld [vmem:[%s9363_s5 + $0x160] sm:$0xff]  ;;  %v903_v42 = vadd.f32 %v897_v14, %v860_v60  ;;  %v861_v8 = vadd.f32 %v855_v32, %v813_v47  ;;  %v983_v60 = vmul.f32 %v4775_v5, %v5875_v49  ;;  %v4776_v49 = vld [vmem:[%s9362_s4 + $0x68] sm:$0xff] }
 0x226   : > { %v1458_v16 = vmul.f32 %v4843_v15, %v1442_v3  ;;  %v4787_v15 = vld [vmem:[%s9362_s4 + $0x90] sm:$0xff] }
 0x227   : > { %v1421_v10 = vadd.f32 %v1415_v22, %v1378_v23  ;;  %v946_v45 = vadd.f32 %v940_v63, %v903_v42  ;;  %v4781_v23 = vld [vmem:[%s9363_s5 + $0x60] sm:$0xff]  ;;  %v904_v32 = vadd.f32 %v898_v52, %v861_v8  ;;  %v4793_v8 = vld [vmem:[%s9363_s5 + $0x90] sm:$0xff] }
 0x228   : > { %v1026_v37 = vmul.f32 %v4781_v23, %v6110_v20  ;;  %v4782_v20 = vld [vmem:[%s9363_s5 + $0x68] sm:$0xff] }
 0x229   : > { %v1464_v50 = vadd.f32 %v1458_v16, %v1421_v10  ;;  %v989_v14 = vadd.f32 %v983_v60, %v946_v45  ;;  %v1069_v10 = vmul.f32 %v4787_v15, %v5854_v43  ;;  %v1027_v16 = vmul.f32 %v4782_v20, %v6161_v54  ;;  %v4788_v43 = vld [vmem:[%s9362_s4 + $0x98] sm:$0xff]  ;;  %v4799_v60 = vld [vmem:[%s9362_s4 + $0xc0] sm:$0xff] }
 0x22a   : > { %v1070_v54 = vmul.f32 %v4788_v43, %v5995_v38  ;;  %v1155_v23 = vmul.f32 %v4799_v60, %v5967_v19  ;;  %v4800_v38 = vld [vmem:[%s9362_s4 + $0xc8] sm:$0xff]  ;;  %v5551_v43 = vmov 12  }
 0x22b   : > { %v1531_v22 = vpop.f32.mrf.mxu0  ;;  %v1032_v42 = vadd.f32 %v1026_v37, %v989_v14  ;;  %v4805_v14 = vld [vmem:[%s9363_s5 + $0xc0] sm:$0xff]  ;;  %v4811_v37 = vld [vmem:[%s9362_s4 + $0xf0] sm:$0xff] }
 0x22c   : > { %1840 = vperm.xlu1 %5096, %v5922_v62   ;;  %1844 = vperm.xlu2 %5097, %v5950_v6   ;;  %v6319_v47 = vadd.f32 %v1531_v22, %v1464_v50  ;;  %v1198_v19 = vmul.f32 %v4805_v14, %v6125_v58  ;;  %v4817_v58 = vld [vmem:[%s9363_s5 + $0xf0] sm:$0xff] }
 0x22d   : > { %v6279_v30 = vpop.permute.xlu1 %1445  ;;  %v1075_v45 = vadd.f32 %v1069_v10, %v1032_v42  ;;  %v4806_v10 = vld [vmem:[%s9363_s5 + $0xc8] sm:$0xff] }
 0x22e   : > { %v1547_v5 = vsel %vm701_vm3, %v6319_v47, -inf }
 0x234   : > { %1852 = vperm.xlu1 %5096, %v6024_v59   ;;  %1856 = vperm.xlu2 %5097, %v6060_v13  }
 0x236   : > { %v6312_v18 = vpop.permute.xlu1 %846 }
 0x23c   : > { %5098 = vset.pattern.permute.xlu1 %v5550_v55  ;;  %5099 = vset.pattern.permute.xlu2 %v5550_v55  ;;  %v4770_v55 = vld [vmem:[%s9363_s5 + $0x38] sm:$0xff] }
 0x23d   : > { %1876 = vperm.xlu1 %5098, %v5720_v17   ;;  %1880 = vperm.xlu2 %5099, %v5754_v41   ;;  %v941_v63 = vmul.f32 %v4770_v55, %v6146_v29  ;;  %v984_v29 = vmul.f32 %v4776_v49, %v5935_v2  ;;  %v1112_v2 = vmul.f32 %v4793_v8, %v6137_v9  ;;  %v4794_v9 = vld [vmem:[%s9363_s5 + $0x98] sm:$0xff] }
 0x23e   : > { %v1113_v49 = vmul.f32 %v4794_v9, %v6165_v0  ;;  %v1241_v0 = vmul.f32 %v4811_v37, %v5884_v51  ;;  %v1284_v51 = vmul.f32 %v4817_v58, %v6122_v57 }
 0x23f   : > { %v947_v24 = vadd.f32 %v941_v63, %v904_v32  ;;  %v6341_v52 = vpop.permute.xlu1 %1105  ;;  %v1118_v50 = vadd.f32 %v1112_v2, %v1075_v45  ;;  %v6353_v32 = vpop.permute.xlu2 %1015  ;;  %v4823_v45 = vld [vmem:[%s9362_s4 + $0x120] sm:$0xff] }
 0x241   : > { %v990_v3 = vadd.f32 %v984_v29, %v947_v24  ;;  %v1161_v63 = vadd.f32 %v1155_v23, %v1118_v50  ;;  %v1156_v29 = vmul.f32 %v4800_v38, %v5920_v61  ;;  %v4812_v61 = vld [vmem:[%s9362_s4 + $0xf8] sm:$0xff]  ;;  %v4829_v50 = vld [vmem:[%s9363_s5 + $0x120] sm:$0xff] }
 0x242   : > { %v1242_v60 = vmul.f32 %v4812_v61, %v5945_v4  ;;  %v4824_v4 = vld [vmem:[%s9362_s4 + $0x128] sm:$0xff] }
 0x243   : > { %v1033_v55 = vadd.f32 %v1027_v16, %v990_v3  ;;  %v1204_v24 = vadd.f32 %v1198_v19, %v1161_v63  ;;  %v1199_v3 = vmul.f32 %v4806_v10, %v6158_v7  ;;  %v1327_v7 = vmul.f32 %v4823_v45, %v5863_v44  ;;  %v4841_v19 = vld [vmem:[%s9363_s5 + $0x150] sm:$0xff] }
 0x244   : > { %v1370_v44 = vmul.f32 %v4829_v50, %v6149_v12  ;;  %v4830_v12 = vld [vmem:[%s9363_s5 + $0x128] sm:$0xff] }
 0x245   : > { %1888 = vperm.xlu1 %5098, %v5747_v36   ;;  %1892 = vperm.xlu2 %5099, %v5731_v26   ;;  %v1076_v22 = vadd.f32 %v1070_v54, %v1033_v55  ;;  %v4818_v55 = vld [vmem:[%s9363_s5 + $0xf8] sm:$0xff] }
 0x246   : > { %v1285_v9 = vmul.f32 %v4818_v55, %v6173_v40  ;;  %v1328_v40 = vmul.f32 %v4824_v4, %v6009_v46  ;;  %v4836_v46 = vld [vmem:[%s9362_s4 + $0x158] sm:$0xff]  ;;  %v9609_v55 = vld [vmem:[#allocation34_spill] sm:$0xff] }
 0x247   : > { %v1119_v15 = vadd.f32 %v1113_v49, %v1076_v22  ;;  %v6377_v8 = vpop.permute.xlu2 %1273  ;;  %v4835_v22 = vld [vmem:[%s9362_s4 + $0x150] sm:$0xff] }
 0x248   : > { %v6367_v42 = vpop.permute.xlu1 %1363  ;;  %v1413_v38 = vmul.f32 %v4835_v22, %v5980_v27  ;;  %v1456_v27 = vmul.f32 %v4841_v19, %v6140_v48  ;;  %v6488_v19 = vld [vmem:[%s9362_s4 + $0x78] sm:$0xff] }
 0x249   : > { %1548 = vmax.xlane.f32.xlu0 %v1547_v5  ;;  %v1162_v20 = vadd.f32 %v1156_v29, %v1119_v15  ;;  %v1247_v5 = vadd.f32 %v1241_v0, %v1204_v24  ;;  %v1371_v29 = vmul.f32 %v4830_v12, %v6176_v53  ;;  %v6483_v12 = vld [vmem:[%s9362_s4 + $0x20] sm:$0xff]  ;;  %9613 = vst [vmem:[#allocation56_spill] sm:$0xff] %v6488_v19 }
 0x24b   : > { %v1205_v16 = vadd.f32 %v1199_v3, %v1162_v20  ;;  %v1290_v2 = vadd.f32 %v1284_v51, %v1247_v5  ;;  %v1414_v20 = vmul.f32 %v4836_v46, %v5931_v1  ;;  %v4842_v5 = vld [vmem:[%s9363_s5 + $0x158] sm:$0xff] }
 0x24c   : > { %v1457_v61 = vmul.f32 %v4842_v5, %v6169_v31  ;;  %v6453_v31 = vld [vmem:[%s9362_s4 + $0x18] sm:$0xff] }
 0x24d   : > { %1896 = vperm.xlu1 %5098, %v5733_v28   ;;  %1912 = vperm.xlu2 %5099, %v5922_v62   ;;  %v1248_v54 = vadd.f32 %v1242_v60, %v1205_v16  ;;  %v1333_v23 = vadd.f32 %v1327_v7, %v1290_v2  ;;  %v6445_v16 = vld [vmem:[%s9363_s5 + $0x18] sm:$0xff]  ;;  %v815_v50 = vmul.f32 %v9609_v55, %v6453_v31  ;;  %v6530_v55 = vld [vmem:[%s9363_s5 + $0x50] sm:$0xff] }
 0x24e   : > { %v6512_v5 = vld [vmem:[%s9363_s5 + $0x78] sm:$0xff]  ;;  %9622 = vst [vmem:[#allocation59_spill] sm:$0xff] %v6530_v55 }
 0x24f   : > { %v6404_v14 = vpop.permute.xlu2 %1708  ;;  %v1291_v63 = vadd.f32 %v1285_v9, %v1248_v54  ;;  %v1376_v49 = vadd.f32 %v1370_v44, %v1333_v23  ;;  %v9410_v23 = vmov 13   ;;  %v6471_v9 = vld [vmem:[%s9363_s5 + $0x48] sm:$0xff]  ;;  %v9611_v44 = vld [vmem:[#allocation37_spill] sm:$0xff]  ;;  %9619 = vst [vmem:[#allocation58_spill] sm:$0xff] %v6512_v5 }
 0x250   : > { %9612 = vst [vmem:[#allocation37_spill] sm:$0xff] %v6483_v12 }
 0x251   : > { %v6394_v57 = vpop.permute.xlu1 %1023  ;;  %v1334_v37 = vadd.f32 %v1328_v40, %v1291_v63  ;;  %v1419_v15 = vadd.f32 %v1413_v38, %v1376_v49  ;;  %v943_v63 = vmul.f32 %v6471_v9, %v6233_v39 }
 0x253   : > { %v1377_v0 = vadd.f32 %v1371_v29, %v1334_v37  ;;  %v1462_v10 = vadd.f32 %v1456_v27, %v1419_v15  ;;  %v6493_v37 = vld [vmem:[%s9363_s5 + $0x20] sm:$0xff]  ;;  %v9615_v29 = vld [vmem:[#allocation17_spill] sm:$0xff]  ;;  %v9616_v27 = vld [vmem:[#allocation40_spill] sm:$0xff] }
 0x254   : > { %9614 = vst [vmem:[#allocation57_spill] sm:$0xff] %v6493_v37  ;;  %v858_v15 = vmul.f32 %v6312_v18, %v6493_v37  ;;  %v816_v46 = vmul.f32 %v9615_v29, %v6483_v12 }
 0x255   : > { %1924 = vperm.xlu2 %5099, %v6024_v59   ;;  %v1420_v3 = vadd.f32 %v1414_v20, %v1377_v0  ;;  %v6432_v53 = vadd.f32 %v6248_v25, %v1462_v10  ;;  %v842_v25 = vpop.permute.xlu0 %841  ;;  %v986_v0 = vmul.f32 %v6488_v19, %v9616_v27  ;;  %v6507_v20 = vld [vmem:[%s9362_s4 + $0x50] sm:$0xff] }
 0x256   : > { %v857_v60 = vmul.f32 %v842_v25, %v6445_v16  ;;  %9618 = vst [vmem:[#allocation40_spill] sm:$0xff] %v6507_v20 }
 0x257   : > { %v934_v58 = vpop.permute.xlu2 %933  ;;  %v1463_v48 = vadd.f32 %v1457_v61, %v1420_v3  ;;  %v1541_v45 = vsel %vm701_vm3, %v6432_v53, -inf  ;;  %v864_v3 = vadd.f32 %v858_v15, %v816_v46  ;;  %v9620_v61 = vld [vmem:[#allocation18_spill] sm:$0xff]  ;;  %v9626_v46 = vld [vmem:[#allocation20_spill] sm:$0xff] }
 0x258   : > { %v863_v4 = vadd.f32 %v857_v60, %v815_v50  ;;  %v6523_v60 = vld [vmem:[%s9362_s4 + $0xa8] sm:$0xff] }
 0x259   : > { %v6448_v2 = vadd.f32 %v6281_v21, %v1463_v48  ;;  %v6466_v21 = vld [vmem:[%s9362_s4 + $0x48] sm:$0xff]  ;;  %v901_v48 = vmul.f32 %v6507_v20, %v9620_v61  ;;  %9621 = vst [vmem:[#allocation18_spill] sm:$0xff] %v6523_v60 }
 0x25a   : > { %v6419_v24 = vpop.permute.xlu1 %1281  ;;  %v900_v22 = vmul.f32 %v6466_v21, %v9611_v44  ;;  %v9623_v44 = vld [vmem:[#allocation43_spill] sm:$0xff] }
 0x25b   : > { %v1544_v7 = vsel %vm701_vm3, %v6448_v2, -inf }
 0x25c   : > { %v906_v38 = vadd.f32 %v900_v22, %v863_v4  ;;  %v907_v4 = vadd.f32 %v901_v48, %v864_v3  ;;  %v944_v22 = vmul.f32 %v6530_v55, %v934_v58 }
 0x25d   : > { %1928 = vperm.xlu0 %5100, %v6060_v13   ;;  %5101 = vset.pattern.permute.xlu2 %v5551_v43  ;;  %v1102_v40 = vpop.permute.xlu0 %1101 }
 0x25e   : > { %v949_v39 = vadd.f32 %v943_v63, %v906_v38  ;;  %v6540_v63 = vld [vmem:[%s9362_s4 + $0x80] sm:$0xff]  ;;  %v6545_v38 = vld [vmem:[%s9363_s5 + $0xa8] sm:$0xff]  ;;  %v950_v15 = vadd.f32 %v944_v22, %v907_v4 }
 0x25f   : > { %v6440_v1 = vpop.permute.xlu2 %1191  ;;  %9624 = vst [vmem:[#allocation43_spill] sm:$0xff] %v6540_v63  ;;  %v987_v27 = vmul.f32 %v6540_v63, %v9626_v46  ;;  %v1115_v58 = vmul.f32 %v6545_v38, %v1102_v40  ;;  %v9629_v40 = vld [vmem:[#allocation42_spill] sm:$0xff] }
 0x260   : > { %v992_v18 = vadd.f32 %v986_v0, %v949_v39  ;;  %9625 = vst [vmem:[#allocation60_spill] sm:$0xff] %v6545_v38  ;;  %v6555_v0 = vld [vmem:[%s9362_s4 + $0xd8] sm:$0xff] }
 0x261   : > { %9627 = vst [vmem:[#allocation20_spill] sm:$0xff] %v6555_v0  ;;  %v993_v61 = vadd.f32 %v987_v27, %v950_v15  ;;  %v9632_v15 = vld [vmem:[#allocation19_spill] sm:$0xff] }
 0x263   : > { %v6435_v51 = vpop.permute.xlu1 %1740 }
 0x265   : > { %5102 = vset.pattern.permute.xlu0 %v5551_v43 }
 0x266   : > { %1952 = vperm.xlu0 %5102, %v5754_v41  }
 0x267   : > { %v6478_v49 = vpop.permute.xlu2 %1449 }
 0x26b   : > { %v6460_v54 = vpop.permute.xlu1 %1748 }
 0x26c   : > { %9610 = vst [vmem:[#allocation34_spill] sm:$0xff] %v6460_v54 }
 0x26e   : > { %1984 = vperm.xlu0 %5102, %v5922_v62  }
 0x26f   : > { %v6518_v25 = vpop.permute.xlu2 %851 }
 0x274   : > { %v6502_v10 = vpop.permute.xlu1 %1716 }
 0x275   : > { %9617 = vst [vmem:[#allocation17_spill] sm:$0xff] %v6502_v10 }
 0x276   : > { %1996 = vperm.xlu0 %5102, %v6024_v59  }
 0x277   : > { %1542 = vmax.xlane.f32.xlu1 %v1541_v45  ;;  %v1029_v45 = vmul.f32 %v6512_v5, %v6353_v32  ;;  %v1072_v32 = vmul.f32 %v6523_v60, %v9623_v44  ;;  %v6562_v48 = vpop.permute.xlu2 %1109  ;;  %v6573_v44 = vld [vmem:[%s9362_s4 + $0xb0] sm:$0xff] }
 0x278   : > { %9630 = vst [vmem:[#allocation42_spill] sm:$0xff] %v6573_v44  ;;  %v1073_v46 = vmul.f32 %v6573_v44, %v9632_v15 }
 0x279   : > { %v1035_v50 = vadd.f32 %v1029_v45, %v992_v18  ;;  %v6560_v18 = vld [vmem:[%s9363_s5 + $0x80] sm:$0xff] }
 0x27a   : > { %9628 = vst [vmem:[#allocation61_spill] sm:$0xff] %v6560_v18 }
 0x27b   : > { %v1078_v39 = vadd.f32 %v1072_v32, %v1035_v50  ;;  %v1158_v50 = vmul.f32 %v6555_v0, %v9629_v40  ;;  %v6578_v32 = vld [vmem:[%s9363_s5 + $0xd8] sm:$0xff]  ;;  %v6594_v40 = vld [vmem:[%s9363_s5 + $0xb0] sm:$0xff] }
 0x27c   : > { %9631 = vst [vmem:[#allocation62_spill] sm:$0xff] %v6578_v32  ;;  %v1201_v27 = vmul.f32 %v6578_v32, %v6246_v34  ;;  %v1116_v15 = vmul.f32 %v6594_v40, %v6341_v52 }
 0x27d   : > { %v6547_v29 = vpop.permute.xlu1 %1772  ;;  %v1121_v3 = vadd.f32 %v1115_v58, %v1078_v39  ;;  %9635 = vst [vmem:[#allocation64_spill] sm:$0xff] %v6594_v40  ;;  %v6628_v40 = vld [vmem:[%s9363_s5 + $0xe0] sm:$0xff] }
 0x27e   : > { %1545 = vmax.xlane.f32.xlu2 %v1544_v7  ;;  %5104 = vset.pattern.permute.xlu0 %v9410_v23  ;;  %v6525_v7 = vpop.permute.xlu0 %1359  ;;  %9641 = vst [vmem:[#allocation66_spill] sm:$0xff] %v6628_v40 }
 0x27f   : > { %2020 = vperm.xlu0 %5104, %v5720_v17   ;;  %v1164_v22 = vadd.f32 %v1158_v50, %v1121_v3  ;;  %v9412_v50 = vmov 14   ;;  %v6601_v23 = vpop.permute.xlu2 %1367 }
 0x281   : > { %v1207_v3 = vadd.f32 %v1201_v27, %v1164_v22  ;;  %v6608_v22 = vld [vmem:[%s9362_s4 + $0xe0] sm:$0xff] }
 0x282   : > { %v9639_v27 = vld [vmem:[#allocation22_spill] sm:$0xff] }
 0x285   : > { %v6584_v58 = vpop.permute.xlu1 %1784 }
 0x286   : > { %v1020_v45 = vpop.permute.xlu0 %1019  ;;  %9633 = vst [vmem:[#allocation19_spill] sm:$0xff] %v6584_v58 }
 0x287   : > { %2040 = vperm.xlu0 %5104, %v5733_v28   ;;  %v1030_v4 = vmul.f32 %v6560_v18, %v1020_v45  ;;  %v6589_v45 = vld [vmem:[%s9362_s4 + $0x108] sm:$0xff] }
 0x288   : > { %9634 = vst [vmem:[#allocation63_spill] sm:$0xff] %v6589_v45 }
 0x289   : > { %v1036_v39 = vadd.f32 %v1030_v4, %v993_v61  ;;  %v9636_v4 = vld [vmem:[#allocation45_spill] sm:$0xff] }
 0x28a   : > { %v1244_v34 = vmul.f32 %v6589_v45, %v9636_v4  ;;  %9637 = vst [vmem:[#allocation45_spill] sm:$0xff] %v6608_v22  ;;  %v1159_v4 = vmul.f32 %v6608_v22, %v9639_v27 }
 0x28b   : > { %v1079_v61 = vadd.f32 %v1073_v46, %v1036_v39  ;;  %v6613_v39 = vld [vmem:[%s9363_s5 + $0x108] sm:$0xff] }
 0x28c   : > { %9638 = vst [vmem:[#allocation65_spill] sm:$0xff] %v6613_v39  ;;  %v1250_v46 = vadd.f32 %v1244_v34, %v1207_v3 }
 0x28d   : > { %v1122_v52 = vadd.f32 %v1116_v15, %v1079_v61  ;;  %v9642_v61 = vld [vmem:[#allocation46_spill] sm:$0xff]  ;;  %v6640_v15 = vld [vmem:[%s9362_s4 + $0x110] sm:$0xff] }
 0x28e   : > { %v6630_v3 = vpop.permute.xlu1 %1808  ;;  %9643 = vst [vmem:[#allocation46_spill] sm:$0xff] %v6640_v15 }
 0x28f   : > { %2064 = vperm.xlu0 %5104, %v5988_v33   ;;  %v1165_v32 = vadd.f32 %v1159_v4, %v1122_v52  ;;  %v6647_v4 = vpop.permute.xlu2 %1744 }
 0x290   : > { %1920 = vperm.xlu1 %5098, %v5988_v33  }
 0x296   : > { %1948 = vperm.xlu2 %5101, %v5720_v17  }
 0x297   : > { %2076 = vperm.xlu0 %5104, %v6098_v11  }
 0x298   : > { %1932 = vperm.xlu1 %5098, %v6098_v11  }
 0x29f   : > { %5109 = vset.pattern.permute.xlu0 %v9412_v50  ;;  %v6623_v50 = vld [vmem:[%s9362_s4 + $0x138] sm:$0xff] }
 0x2a0   : > { %5103 = vset.pattern.permute.xlu1 %v5551_v43  ;;  %2100 = vperm.xlu0 %5109, %v5745_v35   ;;  %v1287_v43 = vmul.f32 %v6613_v39, %v6377_v8  ;;  %9640 = vst [vmem:[#allocation22_spill] sm:$0xff] %v6623_v50  ;;  %v1330_v34 = vmul.f32 %v6623_v50, %v9642_v61  ;;  %v6661_v50 = vld [vmem:[%s9363_s5 + $0x110] sm:$0xff] }
 0x2a1   : > { %1956 = vperm.xlu1 %5103, %v5745_v35   ;;  %v1202_v8 = vmul.f32 %v6628_v40, %v6440_v1  ;;  %v6656_v40 = vld [vmem:[%s9362_s4 + $0x168] sm:$0xff]  ;;  %9647 = vst [vmem:[#allocation68_spill] sm:$0xff] %v6661_v50 }
 0x2a2   : > { %v1293_v45 = vadd.f32 %v1287_v43, %v1250_v46  ;;  %v6645_v46 = vld [vmem:[%s9363_s5 + $0x138] sm:$0xff]  ;;  %v9645_v43 = vld [vmem:[#allocation23_spill] sm:$0xff] }
 0x2a3   : > { %9644 = vst [vmem:[#allocation67_spill] sm:$0xff] %v6645_v46  ;;  %v1208_v27 = vadd.f32 %v1202_v8, %v1165_v32  ;;  %v1245_v61 = vmul.f32 %v6640_v15, %v9645_v43  ;;  %v1373_v1 = vmul.f32 %v6645_v46, %v6525_v7  ;;  %v9648_v8 = vld [vmem:[#allocation47_spill] sm:$0xff]  ;;  %v6666_v15 = vpop.permute.xlu1 %1816  ;;  %v6671_v7 = vld [vmem:[%s9362_s4 + $0x140] sm:$0xff] }
 0x2a4   : > { %v1336_v52 = vadd.f32 %v1330_v34, %v1293_v45  ;;  %9646 = vst [vmem:[#allocation23_spill] sm:$0xff] %v6656_v40  ;;  %v1278_v34 = vpop.permute.xlu0 %1277  ;;  %v1416_v22 = vmul.f32 %v6656_v40, %v9648_v8  ;;  %v6676_v46 = vld [vmem:[%s9363_s5 + $0x168] sm:$0xff]  ;;  %v6682_v8 = vpop.permute.xlu2 %1752 }
 0x2a5   : > { %v1251_v32 = vadd.f32 %v1245_v61, %v1208_v27  ;;  %v1288_v43 = vmul.f32 %v6661_v50, %v1278_v34  ;;  %9649 = vst [vmem:[#allocation47_spill] sm:$0xff] %v6671_v7  ;;  %v9651_v61 = vld [vmem:[#allocation21_spill] sm:$0xff]  ;;  %v1459_v34 = vmul.f32 %v6676_v46, %v6279_v30  ;;  %v6687_v50 = vld [vmem:[%s9363_s5 + $0x140] sm:$0xff]  ;;  %v6699_v30 = vld [vmem:[%s9363_s5 + $0x28] sm:$0xf] }
 0x2a6   : > { %v1379_v45 = vadd.f32 %v1373_v1, %v1336_v52  ;;  %9650 = vst [vmem:[#allocation69_spill] sm:$0xff] %v6676_v46  ;;  %v1331_v1 = vmul.f32 %v6671_v7, %v9651_v61  ;;  %v1374_v44 = vmul.f32 %v6687_v50, %v6367_v42  ;;  %v6710_v42 = vld [vmem:[%s9362_s4 + $0x28] sm:$0xf] }
 0x2a7   : > { %v1294_v27 = vadd.f32 %v1288_v43, %v1251_v32  ;;  %9652 = vst [vmem:[#allocation21_spill] sm:$0xff] %v6682_v8 }
 0x2a8   : > { %2132 = vperm.xlu0 %5109, %v5950_v6   ;;  %v1422_v52 = vadd.f32 %v1416_v22, %v1379_v45  ;;  %9653 = vst [vmem:[#allocation70_spill] sm:$0xff] %v6687_v50  ;;  %v6694_v22 = vld [vmem:[%s9362_s4 + $0x170] sm:$0xff]  ;;  %v1533_v45 = vpop.f32.mrf.mxu0  ;;  %v6730_v50 = vld [vmem:[%s9362_s4 + $0x58] sm:$0xf] }
 0x2a9   : > { %v1337_v39 = vadd.f32 %v1331_v1, %v1294_v27  ;;  %9654 = vst [vmem:[#allocation71_spill] sm:$0xff] %v6694_v22 }
 0x2aa   : > { %v1465_v40 = vadd.f32 %v1459_v34, %v1422_v52  ;;  %9655 = vst [vmem:[#allocation72_spill] sm:$0xff] %v6699_v30  ;;  %v9656_v52 = vld [vmem:[#allocation25_spill] sm:$0xff]  ;;  %v6717_v34 = vld [vmem:[%s9363_s5 + $0x170] sm:$0xff] }
 0x2ab   : > { %v1380_v32 = vadd.f32 %v1374_v44, %v1337_v39  ;;  %v6701_v43 = vpop.permute.xlu1 %1840  ;;  %v1417_v27 = vmul.f32 %v6694_v22, %v9656_v52  ;;  %9657 = vst [vmem:[#allocation25_spill] sm:$0xff] %v6710_v42  ;;  %v859_v44 = vmul.f32 %v6518_v25, %v6699_v30  ;;  %v9660_v52 = vld [vmem:[#allocation29_spill] sm:$0xff]  ;;  %v1460_v46 = vmul.f32 %v6717_v34, %v6478_v49  ;;  %v6749_v49 = vld [vmem:[%s9362_s4 + $0x88] sm:$0xf] }
 0x2ac   : > { %v6703_v61 = vadd.f32 %v1533_v45, %v1465_v40  ;;  %v6712_v1 = vpop.permute.xlu0 %1712  ;;  %9659 = vst [vmem:[#allocation74_spill] sm:$0xff] %v6717_v34  ;;  %v6721_v39 = vpop.permute.xlu2 %1776  ;;  %v817_v22 = vmul.f32 %v9660_v52, %v6710_v42  ;;  %v6737_v25 = vld [vmem:[%s9363_s5 + $0x58] sm:$0xf] }
 0x2ad   : > { %9658 = vst [vmem:[#allocation73_spill] sm:$0xff] %v6712_v1  ;;  %v1423_v40 = vadd.f32 %v1417_v27, %v1380_v32  ;;  %v9663_v27 = vld [vmem:[#allocation35_spill] sm:$0xff] }
 0x2ae   : > { %v1550_v45 = vsel %vm701_vm3, %v6703_v61, -inf  ;;  %9661 = vst [vmem:[#allocation29_spill] sm:$0xff] %v6730_v50  ;;  %v865_v7 = vadd.f32 %v859_v44, %v817_v22  ;;  %v902_v18 = vmul.f32 %v6730_v50, %v9663_v27  ;;  %v6767_v27 = vld [vmem:[%s9362_s4 + $0xb8] sm:$0xf] }
 0x2af   : > { %9662 = vst [vmem:[#allocation75_spill] sm:$0xff] %v6737_v25  ;;  %v1466_v32 = vadd.f32 %v1460_v46, %v1423_v40  ;;  %v6754_v46 = vld [vmem:[%s9363_s5 + $0x88] sm:$0xf] }
 0x2b0   : > { %v1536_v63 = vpop.f32.mrf.mxu0  ;;  %v908_v8 = vadd.f32 %v902_v18, %v865_v7  ;;  %9665 = vst [vmem:[#allocation76_spill] sm:$0xff] %v6749_v49  ;;  %v9668_v7 = vld [vmem:[#allocation26_spill] sm:$0xff]  ;;  %v1031_v40 = vmul.f32 %v6754_v46, %v6394_v57 }
 0x2b1   : > { %v6744_v38 = vadd.f32 %v1536_v63, %v1466_v32  ;;  %9666 = vst [vmem:[#allocation77_spill] sm:$0xff] %v6754_v46  ;;  %v988_v63 = vmul.f32 %v6749_v49, %v9668_v7  ;;  %v6776_v7 = vld [vmem:[%s9363_s5 + $0xb8] sm:$0xf]  ;;  %v9678_v46 = vld [vmem:[#allocation28_spill] sm:$0xff] }
 0x2b2   : > { %9669 = vst [vmem:[#allocation26_spill] sm:$0xff] %v6767_v27 }
 0x2b3   : > { %v1553_v18 = vsel %vm701_vm3, %v6744_v38, -inf }
 0x2b4   : > { %v938_v52 = vpop.permute.xlu0 %937  ;;  %v6756_v22 = vpop.permute.xlu2 %1788 }
 0x2b5   : > { %v945_v0 = vmul.f32 %v6737_v25, %v938_v52  ;;  %9667 = vst [vmem:[#allocation78_spill] sm:$0xff] %v6756_v22 }
 0x2b7   : > { %v951_v44 = vadd.f32 %v945_v0, %v908_v8  ;;  %v9670_v0 = vld [vmem:[#allocation30_spill] sm:$0xff] }
 0x2b8   : > { %v1074_v8 = vmul.f32 %v6767_v27, %v9670_v0  ;;  %9671 = vst [vmem:[#allocation30_spill] sm:$0xff] %v6776_v7 }
 0x2b9   : > { %v994_v32 = vadd.f32 %v988_v63, %v951_v44  ;;  %v1117_v44 = vmul.f32 %v6776_v7, %v6562_v48 }
 0x2bb   : > { %v1037_v34 = vadd.f32 %v1031_v40, %v994_v32  ;;  %v9674_v32 = vld [vmem:[#allocation38_spill] sm:$0xff] }
 0x2bc   : > { %v6778_v49 = vpop.permute.xlu2 %1812  ;;  %v1196_v48 = vpop.permute.xlu0 %1195 }
 0x2bd   : > { %v1080_v57 = vadd.f32 %v1074_v8, %v1037_v34  ;;  %v6795_v34 = vld [vmem:[%s9363_s5 + $0xe8] sm:$0xf] }
 0x2be   : > { %9675 = vst [vmem:[#allocation38_spill] sm:$0xff] %v6795_v34  ;;  %v1203_v27 = vmul.f32 %v6795_v34, %v1196_v48 }
 0x2bf   : > { %1551 = vmax.xlane.f32.xlu2 %v1550_v45  ;;  %v6741_v45 = vpop.permute.xlu1 %1852  ;;  %v1123_v63 = vadd.f32 %v1117_v44, %v1080_v57  ;;  %v6803_v57 = vld [vmem:[%s9362_s4 + $0x118] sm:$0xf] }
 0x2c0   : > { %9664 = vst [vmem:[#allocation35_spill] sm:$0xff] %v6741_v45 }
 0x2c1   : > { %9677 = vst [vmem:[#allocation82_spill] sm:$0xff] %v6803_v57 }
 0x2c4   : > { %v6797_v7 = vpop.permute.xlu2 %1820 }
 0x2c5   : > { %9676 = vst [vmem:[#allocation81_spill] sm:$0xff] %v6797_v7 }
 0x2c7   : > { %v6769_v52 = vpop.permute.xlu1 %1876 }
 0x2cb   : > { %1554 = vmax.xlane.f32.xlu1 %v1553_v18  ;;  %v6785_v18 = vld [vmem:[%s9362_s4 + $0xe8] sm:$0xf] }
 0x2cc   : > { %9672 = vst [vmem:[#allocation79_spill] sm:$0xff] %v6785_v18  ;;  %v1160_v0 = vmul.f32 %v6785_v18, %v9674_v32  ;;  %v1246_v32 = vmul.f32 %v6803_v57, %v9678_v46  ;;  %v6810_v18 = vld [vmem:[%s9363_s5 + $0x118] sm:$0xf]  ;;  %v9682_v57 = vld [vmem:[#allocation31_spill] sm:$0xff] }
 0x2cd   : > { %9679 = vst [vmem:[#allocation28_spill] sm:$0xff] %v6810_v18  ;;  %v1289_v48 = vmul.f32 %v6810_v18, %v6419_v24 }
 0x2ce   : > { %v1166_v8 = vadd.f32 %v1160_v0, %v1123_v63 }
 0x2cf   : > { %v6788_v40 = vpop.permute.xlu1 %1888 }
 0x2d0   : > { %9673 = vst [vmem:[#allocation80_spill] sm:$0xff] %v6788_v40  ;;  %v1209_v44 = vadd.f32 %v1203_v27, %v1166_v8  ;;  %v6820_v27 = vld [vmem:[%s9362_s4 + $0x148] sm:$0xf]  ;;  %v6822_v8 = vpop.permute.xlu2 %1844 }
 0x2d1   : > { %9681 = vst [vmem:[#allocation84_spill] sm:$0xff] %v6820_v27  ;;  %v1332_v34 = vmul.f32 %v6820_v27, %v9682_v57  ;;  %v9686_v27 = vld [vmem:[#allocation41_spill] sm:$0xff] }
 0x2d2   : > { %v1252_v0 = vadd.f32 %v1246_v32, %v1209_v44  ;;  %v6829_v44 = vld [vmem:[%s9363_s5 + $0x148] sm:$0xf] }
 0x2d3   : > { %9683 = vst [vmem:[#allocation31_spill] sm:$0xff] %v6829_v44  ;;  %v1375_v18 = vmul.f32 %v6829_v44, %v6601_v23  ;;  %v1454_v23 = vpop.permute.xlu0 %1453  ;;  %v9688_v44 = vmov 13  }
 0x2d4   : > { %v1295_v46 = vadd.f32 %v1289_v48, %v1252_v0  ;;  %v6838_v0 = vld [vmem:[%s9362_s4 + $0x178] sm:$0xf] }
 0x2d5   : > { %9684 = vst [vmem:[#allocation85_spill] sm:$0xff] %v6838_v0 }
 0x2d7   : > { %1960 = vperm.xlu2 %5101, %v5747_v36   ;;  %v6812_v63 = vpop.permute.xlu1 %1896 }
 0x2d8   : > { %9680 = vst [vmem:[#allocation83_spill] sm:$0xff] %v6812_v63  ;;  %v1338_v63 = vadd.f32 %v1332_v34, %v1295_v46  ;;  %v6840_v48 = vpop.permute.xlu2 %1856  ;;  %v1418_v34 = vmul.f32 %v6838_v0, %v9686_v27 }
 0x2d9   : > { %9685 = vst [vmem:[#allocation86_spill] sm:$0xff] %v6840_v48  ;;  %v5554_v48 = vmov 15  }
 0x2da   : > { %v1381_v57 = vadd.f32 %v1375_v18, %v1338_v63  ;;  %v1538_v63 = vpop.f32.mrf.mxu0 }
 0x2dc   : > { %v1424_v46 = vadd.f32 %v1418_v34, %v1381_v57  ;;  %v4921_v34 = vld [vmem:[%s9361_s3 + $0x8] sm:$0xff] }
 0x2dd   : > { %650 = vmatpush.bf16.msrb.mxu2 %v4921_v34  ;;  %v9693_v34 = vmov 14  }
 0x2e0   : > { %v6855_v27 = vpop.permute.xlu2 %1880 }
 0x2e4   : > { %1964 = vperm.xlu1 %5103, %v5731_v26  }
 0x2ea   : > { %v1543_v32 = vpop.xlane.xlu1 %1542 }
 0x2eb   : > { %v1560_v24 = vsub.f32 %v6432_v53, %v1543_v32  ;;  %v6847_v53 = vld [vmem:[%s9363_s5 + $0x178] sm:$0xf] }
 0x2ec   : > { %1988 = vperm.xlu1 %5103, %v5950_v6   ;;  %9687 = vst [vmem:[#allocation41_spill] sm:$0xff] %v6847_v53 }
 0x2ed   : > { %v1566_v25 = vmul.f32 1.442695, %v1560_v24  ;;  %v1461_v24 = vmul.f32 %v6847_v53, %v1454_v23  ;;  %v6869_v23 = vpop.permute.xlu2 %1892 }
 0x2ee   : > { %9689 = vst [vmem:[#allocation87_spill] sm:$0xff] %v6869_v23  ;;  %v9694_v23 = vld [vmem:[#allocation4_spill] sm:$0xff] }
 0x2ef   : > { %5234 = vpow2.f32 %v1566_v25  ;;  %v1467_v18 = vadd.f32 %v1461_v24, %v1424_v46  ;;  %v4920_v46 = vld [vmem:[%s9361_s3] sm:$0xff] }
 0x2f0   : > { %651 = vmatpush.bf16.msrb.mxu2 %v4920_v46  ;;  %v9690_v24 = vld [vmem:[#allocation2_spill] sm:$0xff] }
 0x2f1   : > { %v6857_v0 = vadd.f32 %v1538_v63, %v1467_v18  ;;  %v6878_v18 = vpop.permute.xlu0 %1736 }
 0x2f3   : > { %v1557_v57 = vsel %vm1556_vm10, %v6857_v0, -inf  ;;  %4747 = vmatmul.msk.bf16.vlgmr.msrb.gmra.mxu2 %vm548_vm0, %v9690_v24 }
 0x2f4   : > { %2000 = vperm.xlu1 %5103, %v6060_v13  }
 0x2f5   : > { %v6850_v32 = vpop.eup %5234 }
 0x2f6   : > { %v1578_v25 = vsel %vm701_vm3, %v6850_v32, 0.0 }
 0x2f7   : > { %1579 = vadd.xlane.f32.xlu0 %v1578_v25  ;;  %v6876_v25 = vpop.permute.xlu2 %1912 }
 0x2f9   : > { %v6888_v46 = vpop.permute.xlu0 %1768 }
 0x2fc   : > { %5105 = vset.pattern.permute.xlu1 %v9688_v44 }
 0x2fd   : > { %2024 = vperm.xlu1 %5105, %v5754_v41  }
 0x2ff   : > { %v6881_v63 = vpop.permute.xlu2 %1924 }
 0x300   : > { %1558 = vmax.xlane.f32.xlu2 %v1557_v57  ;;  %9691 = vst [vmem:[#allocation2_spill] sm:$0xff] %v6881_v63  ;;  %v9692_v57 = vld [vmem:[#allocation3_spill] sm:$0xff] }
 0x301   : > { %v6893_v53 = vpop.permute.xlu0 %1780 }
 0x302   : > { %v6914_v58 = vpop.permute.xlu1 %1920 }
 0x303   : > { %4748 = vmatmul.msk.bf16.gmra.mxu2 %vm548_vm0, %v9692_v57  ;;  %9696 = vst [vmem:[#allocation4_spill] sm:$0xff] %v6914_v58 }
 0x305   : > { %2032 = vperm.xlu1 %5105, %v5747_v36  }
 0x307   : > { %v1546_v24 = vpop.xlane.xlu2 %1545 }
 0x309   : > { %v6902_v7 = vpop.permute.xlu0 %1804 }
 0x30b   : > { %2144 = vperm.xlu0 %5109, %v6060_v13  }
 0x30d   : > { %2056 = vperm.xlu1 %5105, %v5922_v62  }
 0x30f   : > { %v6897_v22 = vpop.permute.xlu2 %1948 }
 0x311   : > { %v6909_v55 = vpop.permute.xlu0 %1824 }
 0x312   : > { %9695 = vst [vmem:[#allocation3_spill] sm:$0xff] %v6909_v55 }
 0x313   : > { %4749 = vmatmul.msk.bf16.gmra.mxu2 %vm548_vm0, %v9694_v23  ;;  %5111 = vset.pattern.permute.xlu0 %v5554_v48 }
 0x315   : > { %2068 = vperm.xlu1 %5105, %v6024_v59  }
 0x318   : > { %1968 = vperm.xlu2 %5101, %v5733_v28  }
 0x31d   : > { %5107 = vset.pattern.permute.xlu1 %v9693_v34 }
 0x31e   : > { %2092 = vperm.xlu1 %5107, %v5720_v17  }
 0x320   : > { %1992 = vperm.xlu2 %5101, %v5988_v33  }
 0x326   : > { %2104 = vperm.xlu1 %5107, %v5747_v36  }
 0x328   : > { %2004 = vperm.xlu2 %5101, %v6098_v11  }
 0x32e   : > { %2112 = vperm.xlu1 %5107, %v5733_v28  }
 0x330   : > { %5106 = vset.pattern.permute.xlu2 %v9688_v44 }
 0x331   : > { %2028 = vperm.xlu2 %5106, %v5745_v35  }
 0x332   : > { %v1552_v57 = vpop.xlane.xlu2 %1551 }
 0x333   : > { %v1563_v50 = vsub.f32 %v6703_v61, %v1552_v57  ;;  %v6920_v61 = vpop.permute.xlu1 %1932 }
 0x334   : > { %9697 = vst [vmem:[#allocation88_spill] sm:$0xff] %v6920_v61 }
 0x335   : > { %v1572_v63 = vmul.f32 1.442695, %v1563_v50  ;;  %v6917_v50 = vpop.permute.xlu0 %1848 }
 0x336   : > { %2136 = vperm.xlu1 %5107, %v5988_v33  }
 0x337   : > { %5236 = vpow2.f32 %v1572_v63 }
 0x339   : > { %2036 = vperm.xlu2 %5106, %v5731_v26  }
 0x33b   : > { %v6927_v57 = vpop.permute.xlu1 %1956 }
 0x33c   : > { %9699 = vst [vmem:[#allocation90_spill] sm:$0xff] %v6927_v57 }
 0x33d   : > { %v6907_v23 = vpop.eup %5236  ;;  %v6922_v63 = vpop.permute.xlu0 %1860 }
 0x33e   : > { %2148 = vperm.xlu1 %5107, %v6098_v11   ;;  %v1587_v44 = vsel %vm701_vm3, %v6907_v23, 0.0  ;;  %9698 = vst [vmem:[#allocation89_spill] sm:$0xff] %v6922_v63 }
 0x33f   : > { %1588 = vadd.xlane.f32.xlu0 %v1587_v44  ;;  %v1561_v44 = vsub.f32 %v6448_v2, %v1546_v24  ;;  %v9701_v24 = vld [vmem:[#allocation14_spill] sm:$0xff] }
 0x341   : > { %2060 = vperm.xlu2 %5106, %v5950_v6   ;;  %v1568_v55 = vmul.f32 1.442695, %v1561_v44 }
 0x343   : > { %v1555_v61 = vpop.xlane.xlu1 %1554  ;;  %5238 = vpow2.f32 %v1568_v55 }
 0x345   : > { %v6931_v42 = vpop.permute.xlu0 %1884 }
 0x346   : > { %5112 = vset.pattern.permute.xlu1 %v5554_v48 }
 0x349   : > { %2072 = vperm.xlu2 %5106, %v6060_v13  }
 0x351   : > { %5108 = vset.pattern.permute.xlu2 %v9693_v34  ;;  %v6936_v34 = vpop.eup %5238 }
 0x352   : > { %2096 = vperm.xlu2 %5108, %v5754_v41   ;;  %v1581_v2 = vsel %vm701_vm3, %v6936_v34, 0.0 }
 0x353   : > { %2168 = vperm.xlu0 %5111, %v5754_v41   ;;  %v6938_v41 = vpop.permute.xlu0 %1916 }
 0x356   : > { %v6940_v63 = vpop.permute.xlu1 %1964 }
 0x357   : > { %9700 = vst [vmem:[#allocation91_spill] sm:$0xff] %v6940_v63 }
 0x35a   : > { %2108 = vperm.xlu2 %5108, %v5731_v26  }
 0x35b   : > { %2200 = vperm.xlu0 %5111, %v5922_v62   ;;  %v1549_v55 = vpop.xlane.xlu0 %1548 }
 0x35e   : > { %v6947_v44 = vpop.permute.xlu1 %1988 }
 0x362   : > { %2128 = vperm.xlu2 %5108, %v5922_v62   ;;  %v9702_v62 = vld [vmem:[#allocation13_spill] sm:$0xff] }
 0x363   : > { %2212 = vperm.xlu0 %5111, %v6024_v59   ;;  %v6952_v63 = vpop.permute.xlu0 %1928 }
 0x364   : > { %9703 = vst [vmem:[#allocation92_spill] sm:$0xff] %v6952_v63 }
 0x366   : > { %v6954_v10 = vpop.permute.xlu1 %2000 }
 0x367   : > { %9704 = vst [vmem:[#allocation93_spill] sm:$0xff] %v6954_v10 }
 0x368   : > { %1582 = vadd.xlane.f32.xlu1 %v1581_v2 }
 0x36a   : > { %2140 = vperm.xlu2 %5108, %v6024_v59  }
 0x36b   : > { %2235 = vrot.lane.b32.xlu0 %v9701_v24, %s5555_s18  ;;  %v6956_v2 = vpop.permute.xlu0 %1952  ;;  %v6961_v24 = vpop.permute.xlu2 %1960 }
 0x36c   : > { %9706 = vst [vmem:[#allocation95_spill] sm:$0xff] %v6961_v24 }
 0x36f   : > { %v6959_v59 = vpop.permute.xlu1 %2024 }
 0x370   : > { %9705 = vst [vmem:[#allocation94_spill] sm:$0xff] %v6959_v59 }
 0x372   : > { %5110 = vset.pattern.permute.xlu2 %v5554_v48  ;;  %v1562_v48 = vsub.f32 %v6319_v47, %v1549_v55 }
 0x373   : > { %2164 = vperm.xlu2 %5110, %v5720_v17   ;;  %2241 = vrot.lane.b32.xlu0 %v9702_v62, %s5555_s18  ;;  %v6963_v30 = vpop.permute.xlu0 %1984  ;;  %v6969_v20 = vpop.xlane.xlu2 %1558 }
 0x374   : > { %v1570_v63 = vmul.f32 1.442695, %v1562_v48  ;;  %v1564_v48 = vsub.f32 %v6744_v38, %v1555_v61 }
 0x376   : > { %v653_v17 = vpop.f32.mrf.mxu2  ;;  %5240 = vpow2.f32 %v1570_v63  ;;  %v1574_v60 = vmul.f32 1.442695, %v1564_v48 }
 0x377   : > { %v6967_v62 = vpop.permute.xlu1 %2032  ;;  %v771_v59 = vpack.c.bf16 %v653_v17, %v653_v17 }
 0x378   : > { %9707 = vst [vmem:[#allocation96_spill] sm:$0xff] %v6967_v62  ;;  %5242 = vpow2.f32 %v1574_v60 }
 0x37b   : > { %v6971_v10 = vpop.permute.xlu0 %1996  ;;  %v6977_v24 = vpop.permute.xlu2 %1968 }
 0x37c   : > { %9708 = vst [vmem:[#allocation97_spill] sm:$0xff] %v6971_v10  ;;  %v6975_v12 = vpop.eup %5240 }
 0x37d   : > { %9709 = vst [vmem:[#allocation98_spill] sm:$0xff] %v6977_v24 }
 0x37f   : > { %v6973_v54 = vpop.permute.xlu1 %2056 }
 0x381   : > { %2172 = vperm.xlu1 %5112, %v5745_v35   ;;  %v655_v35 = vpop.f32.mrf.mxu2 }
 0x382   : > { %v772_v58 = vpack.c.bf16 %v655_v35, %v655_v35 }
 0x383   : > { %v6981_v55 = vpop.permute.xlu0 %2020  ;;  %v6986_v63 = vpop.permute.xlu2 %1992 }
 0x384   : > { %9711 = vst [vmem:[#allocation100_spill] sm:$0xff] %v6986_v63 }
 0x387   : > { %v6984_v62 = vpop.permute.xlu1 %2068 }
 0x388   : > { %9710 = vst [vmem:[#allocation99_spill] sm:$0xff] %v6984_v62 }
 0x389   : > { %2180 = vperm.xlu1 %5112, %v5731_v26   ;;  %v1584_v26 = vsel %vm701_vm3, %v6975_v12, 0.0  ;;  %v658_v47 = vpop.f32.mrf.mxu2 }
 0x38a   : > { %v773_v61 = vpack.c.bf16 %v658_v47, %v658_v47  ;;  %v1617_v47 = vunpack.c.l.b16 %v771_v59 }
 0x38b   : > { %v6988_v40 = vpop.permute.xlu0 %2040  ;;  %v6992_v37 = vpop.permute.xlu2 %2004 }
 0x38c   : > { %9712 = vst [vmem:[#allocation101_spill] sm:$0xff] %v6988_v40 }
 0x38d   : > { %9713 = vst [vmem:[#allocation102_spill] sm:$0xff] %v6992_v37 }
 0x390   : > { %v6990_v1 = vpop.permute.xlu1 %2092 }
 0x391   : > { %v660_v10 = vpop.f32.mrf.mxu2 }
 0x392   : > { %v774_v48 = vpack.c.bf16 %v660_v10, %v660_v10 }
 0x393   : > { %v6996_v57 = vpop.permute.xlu0 %2064  ;;  %v7003_v45 = vpop.permute.xlu2 %2028 }
 0x394   : > { %9714 = vst [vmem:[#allocation103_spill] sm:$0xff] %v6996_v57  ;;  %v1619_v57 = vunpack.c.l.b16 %v773_v61 }
 0x398   : > { %v7001_v60 = vpop.permute.xlu1 %2104 }
 0x399   : > { %v663_v24 = vpop.f32.mrf.mxu2 }
 0x39a   : > { %v775_v5 = vpack.c.bf16 %v663_v24, %v663_v24  ;;  %v1620_v24 = vunpack.c.l.b16 %v774_v48 }
 0x39b   : > { %v7019_v35 = vpop.permute.xlu2 %2036 }
 0x39c   : > { %1585 = vadd.xlane.f32.xlu2 %v1584_v26  ;;  %v6994_v26 = vpop.eup %5242  ;;  %v1621_v62 = vunpack.c.l.b16 %v775_v5  ;;  %v7012_v5 = vpack.c.b16 %v1620_v24, %v1619_v57 }
 0x39d   : > { %v1590_v38 = vsel %vm701_vm3, %v6994_v26, 0.0 }
 0x39e   : > { %9717 = vst [vmem:[#allocation106_spill] sm:$0xff] %v7012_v5 }
 0x3a1   : > { %v665_v40 = vpop.f32.mrf.mxu2 }
 0x3a2   : > { %v776_v63 = vpack.c.bf16 %v665_v40, %v665_v40  ;;  %v7014_v40 = vpop.permute.xlu1 %2112 }
 0x3a3   : > { %9718 = vst [vmem:[#allocation107_spill] sm:$0xff] %v7014_v40  ;;  %v7026_v59 = vpop.permute.xlu2 %2060 }
 0x3a4   : > { %v1622_v37 = vunpack.c.l.b16 %v776_v63 }
 0x3a6   : > { %v7005_v19 = vpack.c.b16 %v1622_v37, %v1621_v62 }
 0x3a8   : > { %9715 = vst [vmem:[#allocation104_spill] sm:$0xff] %v7005_v19  ;;  %v1639_v10 = vsel %vm1637_vm11, %v7005_v19, 0  ;;  %v9723_v19 = vld [vmem:[#allocation12_spill] sm:$0xff] }
 0x3a9   : > { %1646 = vmatpush.bf16.msrb.mxu1 %v1639_v10  ;;  %v9722_v10 = vld [vmem:[#allocation15_spill] sm:$0xff] }
 0x3aa   : > { %v7024_v37 = vpop.permute.xlu1 %2136 }
 0x3ab   : > { %v7036_v63 = vpop.permute.xlu2 %2072 }
 0x3ac   : > { %9721 = vst [vmem:[#allocation110_spill] sm:$0xff] %v7036_v63 }
 0x3ad   : > { %1647 = vmatpush.bf16.msrb.mxu1 %v7012_v5 }
 0x3b2   : > { %v7033_v57 = vpop.permute.xlu1 %2148 }
 0x3b3   : > { %1591 = vadd.xlane.f32.xlu1 %v1590_v38  ;;  %v7007_v38 = vpop.permute.xlu0 %2076  ;;  %9720 = vst [vmem:[#allocation109_spill] sm:$0xff] %v7033_v57 }
 0x3b4   : > { %2176 = vperm.xlu2 %5110, %v5747_v36   ;;  %9716 = vst [vmem:[#allocation105_spill] sm:$0xff] %v7007_v38  ;;  %v1618_v36 = vunpack.c.l.b16 %v772_v58 }
 0x3b6   : > { %v7016_v17 = vpack.c.b16 %v1618_v36, %v1617_v47  ;;  %v1565_v36 = vsub.f32 %v6857_v0, %v6969_v20  ;;  %v7040_v47 = vpop.permute.xlu2 %2096 }
 0x3b8   : > { %9719 = vst [vmem:[#allocation108_spill] sm:$0xff] %v7016_v17  ;;  %1648 = vmatpush.bf16.msrb.mxu1 %v7016_v17  ;;  %v1576_v48 = vmul.f32 1.442695, %v1565_v36 }
 0x3bb   : > { %v7022_v62 = vpop.permute.xlu0 %2100 }
 0x3bc   : > { %2184 = vperm.xlu2 %5110, %v5733_v28  }
 0x3c3   : > { %v7029_v58 = vpop.permute.xlu0 %2132 }
 0x3cb   : > { %v1580_v61 = vpop.xlane.xlu0 %1579 }
 0x3cc   : > { %2204 = vperm.xlu1 %5112, %v5950_v6   ;;  %5244 = vrcp.f32 %v1580_v61 }
 0x3cd   : > { %5246 = vpow2.f32 %v1576_v48  ;;  %v7048_v48 = vpop.permute.xlu2 %2108 }
 0x3ce   : > { %9724 = vst [vmem:[#allocation111_spill] sm:$0xff] %v7048_v48 }
 0x3d2   : > { %v5245_v28 = vpop.eup %5244 }
 0x3d3   : > { %v5247_v6 = vpop.eup %5246  ;;  %v1602_v0 = vmul.f32 %v5245_v28, %v6850_v32  ;;  %v7055_v28 = vpop.permute.xlu0 %2144 }
 0x3d4   : > { %2216 = vperm.xlu1 %5112, %v6060_v13   ;;  %v1593_v36 = vsel %vm1556_vm10, %v5247_v6, 0.0  ;;  %9725 = vst [vmem:[#allocation112_spill] sm:$0xff] %v7055_v28 }
 0x3db   : > { %v1583_v24 = vpop.xlane.xlu1 %1582 }
 0x3dc   : > { %5248 = vrcp.f32 %v1583_v24  ;;  %2237 = vrot.lane.b32.xlu1 %v9722_v10, %s5555_s18  ;;  %v7050_v24 = vpop.permute.xlu2 %2128 }
 0x3e2   : > { %v5249_v20 = vpop.eup %5248 }
 0x3e3   : > { %v1603_v13 = vmul.f32 %v5249_v20, %v6936_v34  ;;  %v1589_v34 = vpop.xlane.xlu0 %1588  ;;  %v9726_v20 = vld [vmem:[#allocation16_spill] sm:$0xff] }
 0x3e4   : > { %2243 = vrot.lane.b32.xlu1 %v9723_v19, %s5555_s18  ;;  %v7052_v10 = vpop.permute.xlu2 %2140  ;;  %5250 = vrcp.f32 %v1589_v34 }
 0x3e5   : > { %1594 = vadd.xlane.f32.xlu2 %v1593_v36  ;;  %v1608_v61 = vpack.c.bf16 %v1603_v13, %v1602_v0  ;;  %v9727_v36 = vld [vmem:[#allocation11_spill] sm:$0xff] }
 0x3e7   : > { %4850 = vmatmul.msk.bf16.vlgmr.msrb.gmra.mxu1 %vm701_vm3, %v1608_v61 }
 0x3ea   : > { %v5251_v0 = vpop.eup %5250 }
 0x3eb   : > { %v7075_v40 = vpop.permute.xlu0 %2168 }
 0x3ec   : > { %v7058_v32 = vpop.permute.xlu2 %2164 }
 0x3fd   : > { %2208 = vperm.xlu2 %5110, %v5988_v33   ;;  %v1605_v33 = vmul.f32 %v5251_v0, %v6907_v23 }
 0x405   : > { %2220 = vperm.xlu2 %5110, %v6098_v11   ;;  %v7067_v11 = vpop.permute.xlu1 %2172 }
 0x40d   : > { %2239 = vrot.lane.b32.xlu2 %v9726_v20, %s5555_s18  ;;  %v7071_v20 = vpop.permute.xlu1 %2180 }
 0x40e   : > { %9728 = vst [vmem:[#allocation113_spill] sm:$0xff] %v7071_v20 }
 0x40f   : > { %v1586_v13 = vpop.xlane.xlu2 %1585 }
 0x410   : > { %5252 = vrcp.f32 %v1586_v13 }
 0x415   : > { %2245 = vrot.lane.b32.xlu2 %v9727_v36, %s5555_s18 }
 0x416   : > { %v5253_v61 = vpop.eup %5252 }
 0x417   : > { %v1604_v19 = vmul.f32 %v5253_v61, %v6975_v12  ;;  %v7069_v17 = vpop.permute.xlu2 %2176  ;;  %v7083_v61 = vpop.permute.xlu0 %2200 }
 0x419   : > { %v1609_v5 = vpack.c.bf16 %v1605_v33, %v1604_v19 }
 0x41b   : > { %4851 = vmatmul.msk.bf16.gmra.mxu1 %vm701_vm3, %v1609_v5 }
 0x41f   : > { %v7073_v34 = vpop.permute.xlu2 %2184  ;;  %v7089_v38 = vpop.permute.xlu0 %2212 }
 0x420   : > { %9729 = vst [vmem:[#allocation114_spill] sm:$0xff] %v7073_v34 }
 0x426   : > { %v1592_v13 = vpop.xlane.xlu1 %1591 }
 0x427   : > { %5254 = vrcp.f32 %v1592_v13  ;;  %v2236_v63 = vpop.permute.xlu0 %2235 }
 0x42d   : > { %v5255_v36 = vpop.eup %5254 }
 0x42e   : > { %v1606_v19 = vmul.f32 %v5255_v36, %v6994_v26 }
 0x42f   : > { %v2242_v36 = vpop.permute.xlu0 %2241 }
 0x43e   : > { %v7077_v23 = vpop.permute.xlu1 %2204 }
 0x446   : > { %v7087_v13 = vpop.permute.xlu1 %2216 }
 0x44e   : > { %v2238_v20 = vpop.permute.xlu1 %2237 }
 0x456   : > { %v2244_v26 = vpop.permute.xlu1 %2243 }
 0x458   : > { %v1595_v57 = vpop.xlane.xlu2 %1594 }
 0x459   : > { %5256 = vrcp.f32 %v1595_v57 }
 0x45f   : > { %v5257_v12 = vpop.eup %5256 }
 0x460   : > { %v7079_v33 = vpop.permute.xlu2 %2208  ;;  %v1607_v5 = vmul.f32 %v5257_v12, %v5247_v6  ;;  %v2260_v6 = vsel %vm1498_vm4, %v2244_v26, 0  ;;  %v2257_v12 = vsel %vm1498_vm4, %v2242_v36, 0 }
 0x462   : > { %v1610_v0 = vpack.c.bf16 %v1607_v5, %v1606_v19  ;;  %v5381_v5 = vld [vmem:[%s9362_s4] sm:$0xff] }
 0x464   : > { %4852 = vmatmul.msk.bf16.gmra.mxu1 %vm701_vm3, %v1610_v0  ;;  %v9731_v0 = vld [vmem:[#allocation49_spill] sm:$0xff] }
 0x465   : > { %v1689_v26 = vmul.f32 %v5381_v5, %v9731_v0  ;;  %v5385_v0 = vld [vmem:[%s9363_s5 + $0x60] sm:$0xff] }
 0x468   : > { %v7085_v34 = vpop.permute.xlu2 %2220 }
 0x470   : > { %v2240_v57 = vpop.permute.xlu2 %2239 }
 0x478   : > { %v2246_v28 = vpop.permute.xlu2 %2245 }
 0x479   : > { %v2263_v48 = vsel %vm1498_vm4, %v2246_v28, 0  ;;  %v5380_v28 = vld [vmem:[%s9363_s5] sm:$0xff] }
 0x47a   : > { %2270 = vmatpush.bf16.xpose.msra.mxu2 %v2263_v48  ;;  %v9730_v48 = vld [vmem:[#allocation54_spill] sm:$0xff] }
 0x47b   : > { %v1719_v19 = vmul.f32 %v5380_v28, %v9730_v48  ;;  %v5384_v48 = vld [vmem:[%s9362_s4 + $0x60] sm:$0xff] }
 0x47c   : > { %v1827_v5 = vmul.f32 %v5384_v48, %v6902_v7 }
 0x482   : > { %2271 = vmatpush.bf16.xpose.msra.mxu2 %v2260_v6  ;;  %v1725_v6 = vadd.f32 %v1719_v19, %v1689_v26  ;;  %v1863_v26 = vmul.f32 %v5385_v0, %v6701_v43  ;;  %v5389_v43 = vld [vmem:[%s9362_s4 + $0x38] sm:$0xff] }
 0x483   : > { %v1756_v48 = vmul.f32 %v5389_v43, %v6878_v18  ;;  %v5392_v18 = vld [vmem:[%s9363_s5 + $0x90] sm:$0xff]  ;;  %v9735_v43 = vld [vmem:[#allocation39_spill] sm:$0xff] }
 0x48a   : > { %2272 = vmatpush.bf16.xpose.msra.mxu2 %v2257_v12 }
 0x491   : > { %4853 = vmatmul.msk.bf16.vlgmr.msra.gmra.mxu2 %vm1498_vm4, %v2236_v63  ;;  %v5382_v63 = vld [vmem:[%s9362_s4 + $0x30] sm:$0xff] }
 0x4a1   : > { %4854 = vmatmul.msk.bf16.gmra.mxu2 %vm1498_vm4, %v2238_v20  ;;  %v9732_v20 = vld [vmem:[#allocation51_spill] sm:$0xff] }
 0x4a2   : > { %v1755_v36 = vmul.f32 %v5382_v63, %v9732_v20  ;;  %v5386_v63 = vld [vmem:[%s9363_s5 + $0x8] sm:$0xff] }
 0x4a3   : > { %v9733_v20 = vld [vmem:[#allocation55_spill] sm:$0xff] }
 0x4a4   : > { %v1761_v28 = vadd.f32 %v1755_v36, %v1725_v6  ;;  %v5387_v36 = vld [vmem:[%s9362_s4 + $0x90] sm:$0xff] }
 0x4a5   : > { %v1899_v7 = vmul.f32 %v5387_v36, %v6769_v52  ;;  %v5391_v36 = vld [vmem:[%s9362_s4 + $0x68] sm:$0xff] }
 0x4b1   : > { %4855 = vmatmul.msk.bf16.gmra.mxu2 %vm1498_vm4, %v2240_v57  ;;  %v5383_v57 = vld [vmem:[%s9363_s5 + $0x30] sm:$0xff] }
 0x4b2   : > { %v1791_v12 = vmul.f32 %v5383_v57, %v6888_v46  ;;  %v1720_v46 = vmul.f32 %v5386_v63, %v9733_v20  ;;  %v5388_v57 = vld [vmem:[%s9362_s4 + $0x8] sm:$0xff] }
 0x4b4   : > { %v1797_v19 = vadd.f32 %v1791_v12, %v1761_v28  ;;  %v9734_v12 = vld [vmem:[#allocation33_spill] sm:$0xff] }
 0x4b5   : > { %v1690_v28 = vmul.f32 %v5388_v57, %v9734_v12  ;;  %v1828_v57 = vmul.f32 %v5391_v36, %v6630_v3  ;;  %v5399_v36 = vld [vmem:[%s9363_s5 + $0xc0] sm:$0xff] }
 0x4b6   : > { %v1833_v6 = vadd.f32 %v1827_v5, %v1797_v19  ;;  %v5390_v19 = vld [vmem:[%s9363_s5 + $0x38] sm:$0xff] }
 0x4b7   : > { %v1726_v5 = vadd.f32 %v1720_v46, %v1690_v28  ;;  %v1792_v52 = vmul.f32 %v5390_v19, %v6547_v29  ;;  %v5393_v46 = vld [vmem:[%s9362_s4 + $0xc0] sm:$0xff]  ;;  %v5395_v28 = vld [vmem:[%s9362_s4 + $0x10] sm:$0xff] }
 0x4b8   : > { %v1869_v0 = vadd.f32 %v1863_v26, %v1833_v6  ;;  %v1935_v26 = vmul.f32 %v5392_v18, %v6876_v25  ;;  %v1971_v29 = vmul.f32 %v5393_v46, %v6897_v22  ;;  %v5394_v6 = vld [vmem:[%s9363_s5 + $0x10] sm:$0xff]  ;;  %v1691_v25 = vmul.f32 %v5395_v28, %v9735_v43  ;;  %v5400_v18 = vld [vmem:[%s9363_s5 + $0x40] sm:$0xff] }
 0x4b9   : > { %v1762_v20 = vadd.f32 %v1756_v48, %v1726_v5  ;;  %v5396_v48 = vld [vmem:[%s9362_s4 + $0x40] sm:$0xff]  ;;  %v1758_v28 = vmul.f32 %v6466_v21, %v6647_v4  ;;  %v5404_v43 = vld [vmem:[%s9363_s5 + $0x70] sm:$0xff] }
 0x4ba   : > { %v1905_v63 = vadd.f32 %v1899_v7, %v1869_v0  ;;  %v1721_v7 = vmul.f32 %v5394_v6, %v6218_v56  ;;  %v1757_v22 = vmul.f32 %v5396_v48, %v6435_v51  ;;  %v5397_v56 = vld [vmem:[%s9363_s5 + $0x68] sm:$0xff]  ;;  %v2007_v51 = vmul.f32 %v5399_v36, %v6963_v30  ;;  %v5402_v30 = vld [vmem:[%s9362_s4 + $0xf0] sm:$0xff]  ;;  %v5407_v4 = vld [vmem:[%s9362_s4 + $0x120] sm:$0xff] }
 0x4bb   : > { %v1798_v12 = vadd.f32 %v1792_v52, %v1762_v20  ;;  %v1864_v52 = vmul.f32 %v5397_v56, %v6822_v8  ;;  %v9737_v36 = vld [vmem:[#allocation56_spill] sm:$0xff] }
 0x4bc   : > { %v1941_v3 = vadd.f32 %v1935_v26, %v1905_v63  ;;  %v1727_v19 = vadd.f32 %v1721_v7, %v1691_v25  ;;  %v5398_v63 = vld [vmem:[%s9362_s4 + $0x98] sm:$0xff]  ;;  %v1793_v26 = vmul.f32 %v5400_v18, %v6721_v39  ;;  %v5403_v39 = vld [vmem:[%s9363_s5 + $0xf0] sm:$0xff]  ;;  %v1865_v25 = vmul.f32 %v5404_v43, %v6917_v50 }
 0x4bd   : > { %v1834_v0 = vadd.f32 %v1828_v57, %v1798_v12  ;;  %v1900_v20 = vmul.f32 %v5398_v63, %v6855_v27  ;;  %v5401_v27 = vld [vmem:[%s9362_s4 + $0x70] sm:$0xff]  ;;  %v2043_v12 = vmul.f32 %v5402_v30, %v6981_v55  ;;  %v5405_v55 = vld [vmem:[%s9363_s5 + $0x98] sm:$0xff]  ;;  %v9741_v30 = vld [vmem:[#allocation58_spill] sm:$0xff] }
 0x4be   : > { %v1977_v5 = vadd.f32 %v1971_v29, %v1941_v3  ;;  %v1763_v57 = vadd.f32 %v1757_v22, %v1727_v19  ;;  %v1722_v29 = vmul.f32 %v6404_v14, %v6445_v16  ;;  %v1829_v6 = vmul.f32 %v5401_v27, %v6778_v49  ;;  %v9736_v14 = vld [vmem:[#allocation50_spill] sm:$0xff] }
 0x4bf   : > { %v1870_v8 = vadd.f32 %v1864_v52, %v1834_v0  ;;  %v2079_v3 = vmul.f32 %v5403_v39, %v6973_v54  ;;  %v1692_v16 = vmul.f32 %v9736_v14, %v6453_v31  ;;  %v1936_v48 = vmul.f32 %v5405_v55, %v6938_v41  ;;  %v5406_v31 = vld [vmem:[%s9362_s4 + $0xc8] sm:$0xff]  ;;  %v5408_v41 = vld [vmem:[%s9362_s4 + $0xa0] sm:$0xff]  ;;  %v5414_v39 = vld [vmem:[%s9362_s4 + $0xd0] sm:$0xff] }
 0x4c0   : > { %v2013_v46 = vadd.f32 %v2007_v51, %v1977_v5  ;;  %v1799_v49 = vadd.f32 %v1793_v26, %v1763_v57  ;;  %v1972_v54 = vmul.f32 %v5406_v31, %v6956_v2  ;;  %v2115_v22 = vmul.f32 %v5407_v4, %v6990_v1  ;;  %v5409_v2 = vld [vmem:[%s9363_s5 + $0xc8] sm:$0xff]  ;;  %v5410_v1 = vld [vmem:[%s9363_s5 + $0x120] sm:$0xff]  ;;  %v9738_v57 = vld [vmem:[#allocation4_spill] sm:$0xff] }
 0x4c1   : > { %v1906_v7 = vadd.f32 %v1900_v20, %v1870_v8  ;;  %v1728_v50 = vadd.f32 %v1722_v29, %v1692_v16  ;;  %v1794_v0 = vmul.f32 %v6471_v9, %v6893_v53  ;;  %v1901_v19 = vmul.f32 %v5408_v41, %v6931_v42  ;;  %v5411_v42 = vld [vmem:[%s9363_s5 + $0xa0] sm:$0xff]  ;;  %v9745_v31 = vld [vmem:[#allocation80_spill] sm:$0xff] }
 0x4c2   : > { %v2049_v21 = vadd.f32 %v2043_v12, %v2013_v46  ;;  %v1835_v5 = vadd.f32 %v1829_v6, %v1799_v49  ;;  %v2008_v52 = vmul.f32 %v5409_v2, %v6947_v44  ;;  %v2151_v9 = vmul.f32 %v5410_v1, %v7050_v24  ;;  %v5412_v44 = vld [vmem:[%s9362_s4 + $0xf8] sm:$0xff]  ;;  %v9739_v8 = vld [vmem:[#allocation94_spill] sm:$0xff]  ;;  %v5413_v24 = vld [vmem:[%s9362_s4 + $0x150] sm:$0xff] }
 0x4c3   : > { %v1942_v56 = vadd.f32 %v1936_v48, %v1906_v7  ;;  %v1764_v53 = vadd.f32 %v1758_v28, %v1728_v50  ;;  %v1830_v51 = vmul.f32 %v9737_v36, %v6666_v15  ;;  %v1937_v18 = vmul.f32 %v5411_v42, %v9738_v57  ;;  %v9740_v7 = vld [vmem:[#allocation35_spill] sm:$0xff]  ;;  %v5415_v28 = vld [vmem:[%s9363_s5 + $0xf8] sm:$0xff]  ;;  %v5416_v50 = vld [vmem:[%s9363_s5 + $0xd0] sm:$0xff] }
 0x4c4   : > { %v2085_v63 = vadd.f32 %v2079_v3, %v2049_v21  ;;  %v1871_v20 = vadd.f32 %v1865_v25, %v1835_v5  ;;  %v2044_v46 = vmul.f32 %v5412_v44, %v9739_v8  ;;  %v2187_v15 = vmul.f32 %v5413_v24, %v7058_v32  ;;  %v9742_v3 = vld [vmem:[#allocation90_spill] sm:$0xff]  ;;  %v9743_v32 = vld [vmem:[#allocation57_spill] sm:$0xff]  ;;  %v9749_v2 = vld [vmem:[#allocation48_spill] sm:$0xff] }
 0x4c5   : > { %v1978_v26 = vadd.f32 %v1972_v54, %v1942_v56  ;;  %v1800_v27 = vadd.f32 %v1794_v0, %v1764_v53  ;;  %v1866_v12 = vmul.f32 %v9741_v30, %v9740_v7  ;;  %v1973_v14 = vmul.f32 %v5414_v39, %v9742_v3  ;;  %v9744_v25 = vld [vmem:[#allocation73_spill] sm:$0xff]  ;;  %v9746_v54 = vld [vmem:[#allocation18_spill] sm:$0xff]  ;;  %v9747_v0 = vld [vmem:[#allocation100_spill] sm:$0xff] }
 0x4c6   : > { %v2121_v29 = vadd.f32 %v2115_v22, %v2085_v63  ;;  %v1907_v6 = vadd.f32 %v1901_v19, %v1871_v20  ;;  %v2080_v49 = vmul.f32 %v5415_v28, %v7026_v59  ;;  %v1723_v55 = vmul.f32 %v9744_v25, %v9743_v32  ;;  %v5417_v59 = vld [vmem:[%s9362_s4 + $0x128] sm:$0xff]  ;;  %v9748_v56 = vld [vmem:[#allocation37_spill] sm:$0xff]  ;;  %v9750_v63 = vld [vmem:[#allocation34_spill] sm:$0xff] }
 0x4c7   : > { %v2014_v16 = vadd.f32 %v2008_v52, %v1978_v26  ;;  %v1836_v48 = vadd.f32 %v1830_v51, %v1800_v27  ;;  %v1902_v21 = vmul.f32 %v9746_v54, %v9745_v31  ;;  %v2009_v5 = vmul.f32 %v5416_v50, %v9747_v0  ;;  %v9751_v1 = vld [vmem:[#allocation40_spill] sm:$0xff]  ;;  %v9753_v20 = vld [vmem:[#allocation17_spill] sm:$0xff]  ;;  %v5418_v57 = vld [vmem:[%s9362_s4 + $0x100] sm:$0xff] }
 0x4c8   : > { %v2157_v43 = vadd.f32 %v2151_v9, %v2121_v29  ;;  %v1943_v4 = vadd.f32 %v1937_v18, %v1907_v6  ;;  %v2116_v41 = vmul.f32 %v5417_v59, %v7040_v47  ;;  %v1693_v52 = vmul.f32 %v9749_v2, %v9748_v56  ;;  %v9752_v53 = vld [vmem:[#allocation72_spill] sm:$0xff]  ;;  %v9754_v8 = vld [vmem:[#allocation25_spill] sm:$0xff]  ;;  %v9757_v27 = vld [vmem:[#allocation59_spill] sm:$0xff] }
 0x4c9   : > { %v2050_v22 = vadd.f32 %v2044_v46, %v2014_v16  ;;  %v1759_v9 = vmul.f32 %v9751_v1, %v9750_v63  ;;  %v1724_v36 = vmul.f32 %v9753_v20, %v9752_v53  ;;  %v1872_v51 = vadd.f32 %v1866_v12, %v1836_v48  ;;  %v5419_v47 = vld [vmem:[%s9363_s5 + $0x150] sm:$0xff]  ;;  %v9755_v46 = vld [vmem:[#allocation53_spill] sm:$0xff]  ;;  %v5420_v25 = vld [vmem:[%s9363_s5 + $0x128] sm:$0xff] }
 0x4ca   : > { %v2193_v19 = vadd.f32 %v2187_v15, %v2157_v43  ;;  %v1979_v42 = vadd.f32 %v1973_v14, %v1943_v4  ;;  %v2045_v18 = vmul.f32 %v5418_v57, %v7003_v45  ;;  %v2223_v44 = vmul.f32 %v5419_v47, %v7083_v61  ;;  %v9756_v15 = vld [vmem:[#allocation19_spill] sm:$0xff]  ;;  %v9758_v14 = vld [vmem:[#allocation2_spill] sm:$0xff]  ;;  %v9759_v16 = vld [vmem:[#allocation60_spill] sm:$0xff] }
 0x4cb   : > { %v2086_v26 = vadd.f32 %v2080_v49, %v2050_v22  ;;  %v1694_v29 = vmul.f32 %v9755_v46, %v9754_v8  ;;  %v1729_v24 = vadd.f32 %v1723_v55, %v1693_v52  ;;  %v1795_v6 = vmul.f32 %v9757_v27, %v9756_v15  ;;  %v9760_v49 = vld [vmem:[#allocation95_spill] sm:$0xff]  ;;  %v9761_v43 = vld [vmem:[#allocation20_spill] sm:$0xff]  ;;  %v5421_v31 = vld [vmem:[%s9362_s4 + $0x158] sm:$0xff] }
 0x4cc   : > { %v1908_v7 = vadd.f32 %v1902_v21, %v1872_v51  ;;  %v2015_v30 = vadd.f32 %v2009_v5, %v1979_v42  ;;  %v2229_v39 = vadd.f32 %v2223_v44, %v2193_v19  ;;  %v1938_v28 = vmul.f32 %v9759_v16, %v9758_v14  ;;  %v9762_v4 = vld [vmem:[#allocation21_spill] sm:$0xff]  ;;  %v5422_v59 = vld [vmem:[%s9363_s5 + $0x100] sm:$0xff]  ;;  %v9766_v1 = vld [vmem:[#allocation43_spill] sm:$0xff] }
 0x4cd   : > { %v2122_v12 = vadd.f32 %v2116_v41, %v2086_v26  ;;  %v1765_v3 = vadd.f32 %v1759_v9, %v1729_v24  ;;  %v1730_v45 = vadd.f32 %v1724_v36, %v1694_v29  ;;  %v1974_v32 = vmul.f32 %v9761_v43, %v9760_v49  ;;  %v9763_v22 = vld [vmem:[#allocation29_spill] sm:$0xff]  ;;  %v9764_v41 = vld [vmem:[#allocation103_spill] sm:$0xff]  ;;  %v9767_v53 = vld [vmem:[#allocation86_spill] sm:$0xff] }
 0x4ce   : > { %v2152_v55 = vmul.f32 %v5420_v25, %v7029_v58  ;;  %v2051_v48 = vadd.f32 %v2045_v18, %v2015_v30  ;;  %v2188_v54 = vmul.f32 %v5421_v31, %v7075_v40  ;;  %v1760_v50 = vmul.f32 %v9763_v22, %v9762_v4  ;;  %v5423_v56 = vld [vmem:[%s9363_s5 + $0x158] sm:$0xff]  ;;  %v9769_v42 = vld [vmem:[#allocation78_spill] sm:$0xff]  ;;  %v9770_v57 = vld [vmem:[#allocation75_spill] sm:$0xff] }
 0x4cf   : > { %v1801_v0 = vadd.f32 %v1795_v6, %v1765_v3  ;;  %v1944_v5 = vadd.f32 %v1938_v28, %v1908_v7  ;;  %v2081_v58 = vmul.f32 %v5422_v59, %v9764_v41  ;;  %v2224_v40 = vmul.f32 %v5423_v56, %v7077_v23  ;;  %v9765_v63 = vld [vmem:[#allocation81_spill] sm:$0xff]  ;;  %v9771_v8 = vld [vmem:[#allocation87_spill] sm:$0xff]  ;;  %v9772_v23 = vld [vmem:[#allocation42_spill] sm:$0xff] }
 0x4d0   : > { %v2158_v19 = vadd.f32 %v2152_v55, %v2122_v12  ;;  %v1766_v52 = vadd.f32 %v1760_v50, %v1730_v45  ;;  %v1831_v9 = vmul.f32 %v9766_v1, %v9765_v63  ;;  %v9768_v20 = vld [vmem:[#allocation61_spill] sm:$0xff]  ;;  %v1796_v18 = vmul.f32 %v9770_v57, %v9769_v42  ;;  %v9774_v24 = vld [vmem:[#allocation62_spill] sm:$0xff]  ;;  %v9775_v27 = vld [vmem:[#allocation96_spill] sm:$0xff] }
 0x4d1   : > { %v1867_v36 = vmul.f32 %v9768_v20, %v9767_v53  ;;  %v1980_v51 = vadd.f32 %v1974_v32, %v1944_v5  ;;  %v2087_v26 = vadd.f32 %v2081_v58, %v2051_v48  ;;  %v1903_v46 = vmul.f32 %v9772_v23, %v9771_v8  ;;  %v9773_v29 = vld [vmem:[#allocation97_spill] sm:$0xff]  ;;  %v9776_v6 = vld [vmem:[#allocation63_spill] sm:$0xff]  ;;  %v9778_v12 = vld [vmem:[#allocation76_spill] sm:$0xff] }
 0x4d2   : > { %v2194_v47 = vadd.f32 %v2188_v54, %v2158_v19  ;;  %v1837_v44 = vadd.f32 %v1831_v9, %v1801_v0  ;;  %v2010_v15 = vmul.f32 %v9774_v24, %v9773_v29  ;;  %v2046_v7 = vmul.f32 %v9776_v6, %v9775_v27  ;;  %v9777_v30 = vld [vmem:[#allocation3_spill] sm:$0xff]  ;;  %v5424_v3 = vld [vmem:[%s9362_s4 + $0x130] sm:$0xff]  ;;  %v9782_v54 = vld [vmem:[#allocation65_spill] sm:$0xff] }
 0x4d3   : > { %v2117_v45 = vmul.f32 %v5424_v3, %v7022_v62  ;;  %v5425_v14 = vld [vmem:[%s9363_s5 + $0x130] sm:$0xff]  ;;  %v1802_v49 = vadd.f32 %v1796_v18, %v1766_v52  ;;  %v9781_v31 = vld [vmem:[#allocation99_spill] sm:$0xff]  ;;  %v5426_v62 = vld [vmem:[%s9362_s4 + $0x160] sm:$0xff] }
 0x4d4   : > { %v2153_v16 = vmul.f32 %v5425_v14, %v7024_v37  ;;  %v2230_v28 = vadd.f32 %v2224_v40, %v2194_v47  ;;  %v1873_v43 = vadd.f32 %v1867_v36, %v1837_v44  ;;  %v9779_v32 = vld [vmem:[#allocation92_spill] sm:$0xff]  ;;  %v2016_v55 = vadd.f32 %v2010_v15, %v1980_v51  ;;  %v9783_v37 = vld [vmem:[#allocation89_spill] sm:$0xff]  ;;  %v9785_v58 = vld [vmem:[#allocation91_spill] sm:$0xff] }
 0x4d5   : > { %v2082_v4 = vmul.f32 %v9782_v54, %v9781_v31  ;;  %v2123_v22 = vadd.f32 %v2117_v45, %v2087_v26  ;;  %v2189_v50 = vmul.f32 %v5426_v62, %v7067_v11  ;;  %v9784_v5 = vld [vmem:[#allocation77_spill] sm:$0xff]  ;;  %v5427_v1 = vld [vmem:[%s9363_s5 + $0x160] sm:$0xff]  ;;  %v9788_v20 = vld [vmem:[#allocation83_spill] sm:$0xff] }
 0x4d6   : > { %v1868_v59 = vmul.f32 %v9784_v5, %v9783_v37  ;;  %v1909_v41 = vadd.f32 %v1903_v46, %v1873_v43  ;;  %v9786_v19 = vld [vmem:[#allocation45_spill] sm:$0xff]  ;;  %v2052_v40 = vadd.f32 %v2046_v7, %v2016_v55  ;;  %v2225_v11 = vmul.f32 %v5427_v1, %v7079_v33  ;;  %v9789_v36 = vld [vmem:[#allocation26_spill] sm:$0xff]  ;;  %v9792_v47 = vld [vmem:[#allocation67_spill] sm:$0xff] }
 0x4d7   : > { %v1975_v56 = vmul.f32 %v9786_v19, %v9785_v58  ;;  %v2159_v63 = vadd.f32 %v2153_v16, %v2123_v22  ;;  %v1904_v51 = vmul.f32 %v9789_v36, %v9788_v20  ;;  %v9790_v57 = vld [vmem:[#allocation93_spill] sm:$0xff]  ;;  %v9791_v18 = vld [vmem:[#allocation66_spill] sm:$0xff]  ;;  %v2154_v44 = vmul.f32 %v9792_v47, %v7052_v10  ;;  %v9793_v46 = vld [vmem:[#allocation88_spill] sm:$0xff] }
 0x4d8   : > { %v2011_v26 = vmul.f32 %v9791_v18, %v9790_v57  ;;  %v9794_v33 = vld [vmem:[#allocation30_spill] sm:$0xff]  ;;  %v9796_v7 = vld [vmem:[#allocation23_spill] sm:$0xff]  ;;  %v9805_v5 = vld [vmem:[#allocation69_spill] sm:$0xff] }
 0x4d9   : > { %v2195_v8 = vadd.f32 %v2189_v50, %v2159_v63  ;;  %v1940_v29 = vmul.f32 %v9794_v33, %v9793_v46  ;;  %v9795_v27 = vld [vmem:[#allocation46_spill] sm:$0xff]  ;;  %v9798_v16 = vld [vmem:[#allocation79_spill] sm:$0xff]  ;;  %v9808_v63 = vld [vmem:[#allocation112_spill] sm:$0xff] }
 0x4da   : > { %v2047_v6 = vmul.f32 %v9795_v27, %v7019_v35  ;;  %v9797_v14 = vld [vmem:[#allocation98_spill] sm:$0xff]  ;;  %v9803_v54 = vld [vmem:[#allocation111_spill] sm:$0xff] }
 0x4db   : > { %v1976_v10 = vmul.f32 %v9798_v16, %v9797_v14  ;;  %v9801_v55 = vld [vmem:[#allocation102_spill] sm:$0xff] }
 0x4dc   : > { %v9809_v1 = vld [vmem:[#allocation70_spill] sm:$0xff] }
 0x4dd   : > { %v9812_v57 = vld [vmem:[#allocation74_spill] sm:$0xff] }
 0x4de   : > { %v2227_v18 = vmul.f32 %v9812_v57, %v7087_v13  ;;  %v9825_v57 = vld [vmem:[#allocation6_spill] sm:$0xff] }
 0x514   : > { %v2274_v61 = vpop.f32.mrf.mxu2 }
 0x515   : > { %v7295_v21 = vadd.f32 %v2274_v61, %v2229_v39  ;;  %v1832_v39 = vmul.f32 %v9778_v12, %v9777_v30  ;;  %v9780_v61 = vld [vmem:[#allocation64_spill] sm:$0xff]  ;;  %v2190_v30 = vmul.f32 %v9796_v7, %v7069_v17  ;;  %v2231_v12 = vadd.f32 %v2225_v11, %v2195_v8 }
 0x516   : > { %v1939_v25 = vmul.f32 %v9780_v61, %v9779_v32  ;;  %v2155_v11 = vmul.f32 %v9809_v1, %v9808_v63  ;;  %v9816_v8 = vld [vmem:[#allocation84_spill] sm:$0xff] }
 0x517   : > { %v2289_v2 = vsel %vm701_vm3, %v7295_v21, -inf  ;;  %v1838_v53 = vadd.f32 %v1832_v39, %v1802_v49  ;;  %v9800_v49 = vld [vmem:[#allocation68_spill] sm:$0xff] }
 0x518   : > { %2290 = vmax.xlane.f32.xlu0 %v2289_v2  ;;  %v9787_v2 = vld [vmem:[#allocation22_spill] sm:$0xff]  ;;  %v1945_v42 = vadd.f32 %v1939_v25, %v1909_v41 }
 0x519   : > { %v2118_v52 = vmul.f32 %v9787_v2, %v7001_v60  ;;  %v2088_v60 = vadd.f32 %v2082_v4, %v2052_v40  ;;  %v1874_v23 = vadd.f32 %v1868_v59, %v1838_v53  ;;  %v9804_v4 = vld [vmem:[#allocation47_spill] sm:$0xff]  ;;  %v2226_v59 = vmul.f32 %v9805_v5, %v7089_v38  ;;  %v9806_v40 = vld [vmem:[#allocation101_spill] sm:$0xff]  ;;  %v9807_v2 = vld [vmem:[#allocation82_spill] sm:$0xff] }
 0x51a   : > { %v1981_v24 = vadd.f32 %v1975_v56, %v1945_v42  ;;  %v2119_v17 = vmul.f32 %v9804_v4, %v9803_v54  ;;  %v9811_v53 = vld [vmem:[#allocation71_spill] sm:$0xff]  ;;  %v5556_v5 = vmov 16  }
 0x51b   : > { %v2124_v15 = vadd.f32 %v2118_v52, %v2088_v60  ;;  %v1910_v39 = vadd.f32 %v1904_v51, %v1874_v23  ;;  %v2048_v52 = vmul.f32 %v9807_v2, %v9806_v40  ;;  %v9814_v60 = vld [vmem:[#allocation28_spill] sm:$0xff]  ;;  %5113 = vset.pattern.permute.xlu0 %v5556_v5  ;;  %5114 = vset.pattern.permute.xlu1 %v5556_v5 }
 0x51c   : > { %v2276_v48 = vpop.f32.mrf.mxu2  ;;  %v2017_v3 = vadd.f32 %v2011_v26, %v1981_v24  ;;  %v9813_v26 = vld [vmem:[#allocation105_spill] sm:$0xff]  ;;  %v9818_v24 = vld [vmem:[#allocation31_spill] sm:$0xff]  ;;  %5115 = vset.pattern.permute.xlu2 %v5556_v5 }
 0x51d   : > { %v7339_v0 = vadd.f32 %v2276_v48, %v2230_v28  ;;  %v9799_v28 = vld [vmem:[#allocation110_spill] sm:$0xff]  ;;  %v2160_v32 = vadd.f32 %v2154_v44, %v2124_v15  ;;  %v1946_v25 = vadd.f32 %v1940_v29, %v1910_v39  ;;  %v2084_v47 = vmul.f32 %v9814_v60, %v9813_v26  ;;  %v9815_v44 = vld [vmem:[#allocation107_spill] sm:$0xff]  ;;  %v9817_v29 = vld [vmem:[#allocation109_spill] sm:$0xff] }
 0x51e   : > { %v2083_v43 = vmul.f32 %v9800_v49, %v9799_v28  ;;  %v9802_v48 = vld [vmem:[#allocation38_spill] sm:$0xff]  ;;  %v2053_v35 = vadd.f32 %v2047_v6, %v2017_v3  ;;  %v2120_v23 = vmul.f32 %v9816_v8, %v9815_v44  ;;  %v2156_v15 = vmul.f32 %v9818_v24, %v9817_v29  ;;  %v9828_v26 = vld [vmem:[#allocation27_spill] sm:$0xff]  ;;  %v9829_v60 = vld [vmem:[#allocation8_spill] sm:$0xff] }
 0x51f   : > { %v2292_v9 = vsel %vm701_vm3, %v7339_v0, -inf  ;;  %v2012_v31 = vmul.f32 %v9802_v48, %v9801_v55  ;;  %v2196_v22 = vadd.f32 %v2190_v30, %v2160_v32  ;;  %v1982_v50 = vadd.f32 %v1976_v10, %v1946_v25  ;;  %v9819_v30 = vld [vmem:[#allocation114_spill] sm:$0xff]  ;;  %v9831_v44 = vld [vmem:[#allocation44_spill] sm:$0xff]  ;;  %v9832_v8 = vld [vmem:[#allocation7_spill] sm:$0xff] }
 0x520   : > { %2293 = vmax.xlane.f32.xlu1 %v2292_v9  ;;  %v2089_v37 = vadd.f32 %v2083_v43, %v2053_v35  ;;  %v9810_v9 = vld [vmem:[#allocation113_spill] sm:$0xff]  ;;  %v9835_v29 = vld [vmem:[#allocation36_spill] sm:$0xff] }
 0x521   : > { %v2018_v41 = vadd.f32 %v2012_v31, %v1982_v50  ;;  %v2232_v19 = vadd.f32 %v2226_v59, %v2196_v22  ;;  %v2191_v20 = vmul.f32 %v9811_v53, %v9810_v9  ;;  %v9836_v24 = vld [vmem:[#allocation52_spill] sm:$0xff]  ;;  %v9846_v5 = vld [vmem:[#allocation13_spill] sm:$0xff] }
 0x522   : > { %v2125_v58 = vadd.f32 %v2119_v17, %v2089_v37 }
 0x523   : > { %v2054_v51 = vadd.f32 %v2048_v52, %v2018_v41 }
 0x524   : > { %v2279_v45 = vpop.f32.mrf.mxu2  ;;  %v2161_v42 = vadd.f32 %v2155_v11, %v2125_v58 }
 0x525   : > { %v2280_v61 = vadd.f32 %v2279_v45, %v2231_v12  ;;  %v2090_v33 = vadd.f32 %v2084_v47, %v2054_v51  ;;  %v9820_v12 = vld [vmem:[#allocation85_spill] sm:$0xff] }
 0x526   : > { %v2197_v46 = vadd.f32 %v2191_v20, %v2161_v42  ;;  %v2192_v13 = vmul.f32 %v9820_v12, %v9819_v30  ;;  %v9821_v45 = vld [vmem:[#allocation41_spill] sm:$0xff]  ;;  %v9824_v42 = vld [vmem:[#allocation106_spill] sm:$0xff] }
 0x527   : > { %v2295_v62 = vsel %vm701_vm3, %v2280_v61, -inf  ;;  %v2126_v7 = vadd.f32 %v2120_v23, %v2090_v33  ;;  %v2228_v14 = vmul.f32 %v9821_v45, %v7085_v34  ;;  %v9823_v51 = vld [vmem:[#allocation5_spill] sm:$0xff]  ;;  %v9833_v23 = vld [vmem:[#allocation24_spill] sm:$0xff] }
 0x528   : > { %2296 = vmax.xlane.f32.xlu2 %v2295_v62  ;;  %v2233_v27 = vadd.f32 %v2227_v18, %v2197_v46  ;;  %v9826_v18 = vld [vmem:[#allocation104_spill] sm:$0xff]  ;;  %v9830_v47 = vld [vmem:[#allocation9_spill] sm:$0xff]  ;;  %v5557_v46 = vmov 17  }
 0x529   : > { %v2162_v3 = vadd.f32 %v2156_v15, %v2126_v7  ;;  %v9834_v33 = vld [vmem:[#allocation32_spill] sm:$0xff]  ;;  %v5558_v15 = vmov 18  }
 0x52b   : > { %v2198_v10 = vadd.f32 %v2192_v13, %v2162_v3 }
 0x52c   : > { %v2281_v56 = vpop.f32.mrf.mxu2 }
 0x52d   : > { %v2282_v36 = vadd.f32 %v2281_v56, %v2232_v19  ;;  %v2234_v28 = vadd.f32 %v2228_v14, %v2198_v10  ;;  %v5560_v10 = vmov 20  }
 0x52f   : > { %v2298_v38 = vsel %vm701_vm3, %v2282_v36, -inf }
 0x530   : > { %2299 = vmax.xlane.f32.xlu0 %v2298_v38  ;;  %v9827_v38 = vld [vmem:[#allocation10_spill] sm:$0xff] }
 0x534   : > { %v2284_v6 = vpop.f32.mrf.mxu2 }
 0x535   : > { %v2285_v39 = vadd.f32 %v2284_v6, %v2233_v27  ;;  %v5559_v6 = vmov 19  }
 0x537   : > { %v2301_v16 = vsel %vm701_vm3, %v2285_v39, -inf }
 0x538   : > { %2302 = vmax.xlane.f32.xlu1 %v2301_v16 }
 0x53c   : > { %v2286_v49 = vpop.f32.mrf.mxu2 }
 0x53d   : > { %v2287_v43 = vadd.f32 %v2286_v49, %v2234_v28 }
 0x53f   : > { %v2304_v32 = vsel %vm1556_vm10, %v2287_v43, -inf }
 0x540   : > { %2305 = vmax.xlane.f32.xlu2 %v2304_v32 }
 0x58b   : > { %v2291_v25 = vpop.xlane.xlu0 %2290 }
 0x58c   : > { %v2307_v55 = vsub.f32 %v7295_v21, %v2291_v25 }
 0x58e   : > { %v2313_v48 = vmul.f32 1.442695, %v2307_v55 }
 0x590   : > { %5258 = vpow2.f32 %v2313_v48 }
 0x593   : > { %v2294_v31 = vpop.xlane.xlu1 %2293 }
 0x594   : > { %v2308_v35 = vsub.f32 %v7339_v0, %v2294_v31  ;;  %v9839_v31 = vld [vmem:[#allocation12_spill] sm:$0xff] }
 0x596   : > { %v7399_v54 = vpop.eup %5258  ;;  %v2315_v34 = vmul.f32 1.442695, %v2308_v35 }
 0x597   : > { %v2325_v4 = vsel %vm701_vm3, %v7399_v54, 0.0 }
 0x598   : > { %5260 = vpow2.f32 %v2315_v34  ;;  %2326 = vadd.xlane.f32.xlu0 %v2325_v4 }
 0x59b   : > { %v2297_v17 = vpop.xlane.xlu2 %2296 }
 0x59c   : > { %v2309_v22 = vsub.f32 %v2280_v61, %v2297_v17 }
 0x59e   : > { %v7403_v62 = vpop.eup %5260  ;;  %v2317_v50 = vmul.f32 1.442695, %v2309_v22 }
 0x59f   : > { %v2328_v21 = vsel %vm701_vm3, %v7403_v62, 0.0 }
 0x5a0   : > { %5262 = vpow2.f32 %v2317_v50  ;;  %2329 = vadd.xlane.f32.xlu1 %v2328_v21 }
 0x5a3   : > { %v2300_v37 = vpop.xlane.xlu0 %2299 }
 0x5a4   : > { %v2310_v0 = vsub.f32 %v2282_v36, %v2300_v37  ;;  %v9822_v36 = vld [vmem:[#allocation108_spill] sm:$0xff] }
 0x5a6   : > { %v7407_v59 = vpop.eup %5262  ;;  %v2319_v41 = vmul.f32 1.442695, %v2310_v0 }
 0x5a7   : > { %v2331_v61 = vsel %vm701_vm3, %v7407_v59, 0.0 }
 0x5a8   : > { %5264 = vpow2.f32 %v2319_v41  ;;  %2332 = vadd.xlane.f32.xlu2 %v2331_v61 }
 0x5ab   : > { %v2303_v58 = vpop.xlane.xlu1 %2302 }
 0x5ac   : > { %v2311_v19 = vsub.f32 %v2285_v39, %v2303_v58 }
 0x5ae   : > { %v7411_v56 = vpop.eup %5264  ;;  %v2321_v40 = vmul.f32 1.442695, %v2311_v19 }
 0x5af   : > { %v2334_v2 = vsel %vm701_vm3, %v7411_v56, 0.0 }
 0x5b0   : > { %5266 = vpow2.f32 %v2321_v40  ;;  %2335 = vadd.xlane.f32.xlu0 %v2334_v2 }
 0x5b3   : > { %v2306_v52 = vpop.xlane.xlu2 %2305 }
 0x5b4   : > { %v2312_v63 = vsub.f32 %v2287_v43, %v2306_v52 }
 0x5b6   : > { %v7415_v1 = vpop.eup %5266  ;;  %v2323_v11 = vmul.f32 1.442695, %v2312_v63 }
 0x5b7   : > { %v2337_v9 = vsel %vm701_vm3, %v7415_v1, 0.0 }
 0x5b8   : > { %5268 = vpow2.f32 %v2323_v11  ;;  %2338 = vadd.xlane.f32.xlu1 %v2337_v9 }
 0x5be   : > { %v7419_v53 = vpop.eup %5268 }
 0x5bf   : > { %v2340_v20 = vsel %vm1556_vm10, %v7419_v53, 0.0 }
 0x5c0   : > { %2341 = vadd.xlane.f32.xlu2 %v2340_v20 }
 0x5c4   : > { %2358 = vrot.lane.b32.xlu0 %v9822_v36, %s5555_s18  ;;  %v9883_v36 = vmov 24  }
 0x5cc   : > { %2403 = vperm.xlu0 %5113, %v9823_v51  }
 0x5d1   : > { %2360 = vrot.lane.b32.xlu1 %v9824_v42, %s5555_s18  ;;  %v9496_v42 = vmov 26  }
 0x5d4   : > { %2419 = vperm.xlu0 %5113, %v9825_v57  }
 0x5d8   : > { %2362 = vrot.lane.b32.xlu2 %v9826_v18, %s5555_s18  ;;  %s5561_s18 = smov 104  }
 0x5d9   : > { %2407 = vperm.xlu1 %5114, %v9827_v38  }
 0x5dc   : > { %2437 = vperm.xlu0 %5113, %v9828_v26  }
 0x5e0   : > { %2411 = vperm.xlu2 %5115, %v9829_v60  }
 0x5e1   : > { %2415 = vperm.xlu1 %5114, %v9830_v47  }
 0x5e4   : > { %2449 = vperm.xlu0 %5113, %v9831_v44  }
 0x5e8   : > { %2423 = vperm.xlu2 %5115, %v9832_v8  }
 0x5e9   : > { %2433 = vperm.xlu1 %5114, %v9833_v23  }
 0x5ec   : > { %5117 = vset.pattern.permute.xlu0 %v5557_v46 }
 0x5ed   : > { %2473 = vperm.xlu0 %5117, %v9827_v38  }
 0x5f0   : > { %2441 = vperm.xlu2 %5115, %v9834_v33  }
 0x5f1   : > { %2445 = vperm.xlu1 %5114, %v9835_v29  }
 0x5f5   : > { %2505 = vperm.xlu0 %5117, %v9833_v23  }
 0x5f8   : > { %2453 = vperm.xlu2 %5115, %v9836_v24  }
 0x5f9   : > { %5116 = vset.pattern.permute.xlu1 %v5557_v46 }
 0x5fa   : > { %2469 = vperm.xlu1 %5116, %v9823_v51  }
 0x5fd   : > { %2517 = vperm.xlu0 %5117, %v9835_v29  }
 0x600   : > { %5118 = vset.pattern.permute.xlu2 %v5557_v46 }
 0x601   : > { %2477 = vperm.xlu2 %5118, %v9829_v60  }
 0x602   : > { %2481 = vperm.xlu1 %5116, %v9830_v47  }
 0x605   : > { %5119 = vset.pattern.permute.xlu0 %v5558_v15 }
 0x606   : > { %2541 = vperm.xlu0 %5119, %v9823_v51  }
 0x609   : > { %2485 = vperm.xlu2 %5118, %v9825_v57  }
 0x60a   : > { %2489 = vperm.xlu1 %5116, %v9832_v8  }
 0x60b   : > { %v2327_v27 = vpop.xlane.xlu0 %2326 }
 0x60e   : > { %2561 = vperm.xlu0 %5119, %v9832_v8  }
 0x611   : > { %2509 = vperm.xlu2 %5118, %v9828_v26  }
 0x612   : > { %2513 = vperm.xlu1 %5116, %v9834_v33  }
 0x613   : > { %v2330_v12 = vpop.xlane.xlu1 %2329 }
 0x614   : > { %5270 = vrcp.f32 %v2330_v12 }
 0x615   : > { %5272 = vrcp.f32 %v2327_v27 }
 0x616   : > { %2585 = vperm.xlu0 %5119, %v9834_v33  }
 0x619   : > { %2521 = vperm.xlu2 %5118, %v9831_v44  }
 0x61a   : > { %2525 = vperm.xlu1 %5116, %v9836_v24   ;;  %v5271_v28 = vpop.eup %5270 }
 0x61b   : > { %v2333_v7 = vpop.xlane.xlu2 %2332  ;;  %v5273_v32 = vpop.eup %5272  ;;  %v2350_v25 = vmul.f32 %v5271_v28, %v7403_v62  ;;  %v9488_v28 = vmov 28  }
 0x61c   : > { %v2349_v48 = vmul.f32 %v5273_v32, %v7399_v54 }
 0x61e   : > { %2597 = vperm.xlu0 %5119, %v9836_v24   ;;  %v2355_v35 = vpack.c.bf16 %v2350_v25, %v2349_v48 }
 0x621   : > { %5120 = vset.pattern.permute.xlu2 %v5558_v15 }
 0x622   : > { %2545 = vperm.xlu2 %5120, %v9827_v38   ;;  %5121 = vset.pattern.permute.xlu1 %v5558_v15 }
 0x623   : > { %2549 = vperm.xlu1 %5121, %v9829_v60   ;;  %v2336_v30 = vpop.xlane.xlu0 %2335 }
 0x624   : > { %5274 = vrcp.f32 %v2336_v30 }
 0x625   : > { %5276 = vrcp.f32 %v2333_v7  ;;  %v9856_v7 = vld [vmem:[#allocation11_spill] sm:$0xff] }
 0x626   : > { %5124 = vset.pattern.permute.xlu0 %v5559_v6 }
 0x627   : > { %2621 = vperm.xlu0 %5124, %v9829_v60  }
 0x62a   : > { %2553 = vperm.xlu2 %5120, %v9830_v47   ;;  %v5275_v54 = vpop.eup %5274 }
 0x62b   : > { %2557 = vperm.xlu1 %5121, %v9825_v57   ;;  %v2339_v3 = vpop.xlane.xlu1 %2338  ;;  %v5277_v50 = vpop.eup %5276  ;;  %v2352_v21 = vmul.f32 %v5275_v54, %v7411_v56 }
 0x62c   : > { %v2351_v0 = vmul.f32 %v5277_v50, %v7407_v59  ;;  %v9849_v59 = vld [vmem:[#allocation15_spill] sm:$0xff] }
 0x62e   : > { %v2356_v41 = vpack.c.bf16 %v2352_v21, %v2351_v0 }
 0x62f   : > { %2653 = vperm.xlu0 %5124, %v9828_v26  }
 0x632   : > { %2577 = vperm.xlu2 %5120, %v9833_v23  }
 0x633   : > { %v2342_v13 = vpop.xlane.xlu2 %2341  ;;  %2581 = vperm.xlu1 %5121, %v9828_v26  }
 0x634   : > { %5278 = vrcp.f32 %v2342_v13 }
 0x635   : > { %5280 = vrcp.f32 %v2339_v3 }
 0x636   : > { %v2359_v39 = vpop.permute.xlu0 %2358 }
 0x637   : > { %2665 = vperm.xlu0 %5124, %v9831_v44  }
 0x63a   : > { %2589 = vperm.xlu2 %5120, %v9835_v29   ;;  %v5279_v56 = vpop.eup %5278 }
 0x63b   : > { %v2363_v45 = vpop.permute.xlu2 %2362  ;;  %2593 = vperm.xlu1 %5121, %v9831_v44   ;;  %v5281_v52 = vpop.eup %5280  ;;  %v2354_v63 = vmul.f32 %v5279_v56, %v7419_v53  ;;  %v9854_v53 = vld [vmem:[#allocation16_spill] sm:$0xff] }
 0x63c   : > { %v2376_v14 = vsel %vm1637_vm11, %v2363_v45, 0  ;;  %v2353_v9 = vmul.f32 %v5281_v52, %v7415_v1  ;;  %v9490_v1 = vmov 21   ;;  %v9492_v52 = vmov 25  }
 0x63d   : > { %2383 = vmatpush.bf16.msra.mxu3 %v2376_v14 }
 0x63e   : > { %v7469_v16 = vpop.permute.xlu0 %2403  ;;  %v2357_v20 = vpack.c.bf16 %v2354_v63, %v2353_v9 }
 0x63f   : > { %5126 = vset.pattern.permute.xlu0 %v5560_v10 }
 0x640   : > { %2689 = vperm.xlu0 %5126, %v9827_v38  }
 0x642   : > { %5122 = vset.pattern.permute.xlu2 %v5559_v6 }
 0x643   : > { %2613 = vperm.xlu2 %5122, %v9823_v51   ;;  %v7473_v49 = vpop.permute.xlu2 %2411  ;;  %5123 = vset.pattern.permute.xlu1 %v5559_v6  ;;  %v2361_v43 = vpop.permute.xlu1 %2360 }
 0x644   : > { %9837 = vst [vmem:[#allocation54_spill] sm:$0xff] %v7473_v49  ;;  %2617 = vperm.xlu1 %5123, %v9827_v38   ;;  %2384 = vmatpush.bf16.msra.mxu3 %v2361_v43 }
 0x646   : > { %v7477_v55 = vpop.permute.xlu0 %2419 }
 0x647   : > { %9838 = vst [vmem:[#allocation49_spill] sm:$0xff] %v7477_v55 }
 0x648   : > { %3717 = vrot.lane.b32.xlu0 %v9839_v31, %s5561_s18  ;;  %2385 = vmatpush.bf16.msra.mxu3 %v2359_v39 }
 0x64b   : > { %2625 = vperm.xlu2 %5122, %v9830_v47   ;;  %v7483_v34 = vpop.permute.xlu2 %2423  ;;  %v7485_v4 = vpop.permute.xlu1 %2407  ;;  %4856 = vmatmul.msk.bf16.vlgmr.msra.gmra.mxu3 %vm701_vm3, %v2355_v35 }
 0x64c   : > { %9840 = vst [vmem:[#allocation51_spill] sm:$0xff] %v7483_v34  ;;  %2629 = vperm.xlu1 %5123, %v9825_v57  }
 0x64d   : > { %9841 = vst [vmem:[#allocation55_spill] sm:$0xff] %v7485_v4  ;;  %v7848_v4 = vld [vmem:[%s9362_s4] sm:$0xff] }
 0x64e   : > { %v7489_v17 = vpop.permute.xlu0 %2437 }
 0x64f   : > { %9842 = vst [vmem:[#allocation33_spill] sm:$0xff] %v7489_v17 }
 0x650   : > { %2980 = vrot.lane.b32.xlu0 %v9839_v31, %s5562_s28  ;;  %v9494_v31 = vmov 24  }
 0x653   : > { %2633 = vperm.xlu2 %5122, %v9832_v8   ;;  %v7494_v22 = vpop.permute.xlu2 %2441  ;;  %v7496_v62 = vpop.permute.xlu1 %2415 }
 0x654   : > { %9843 = vst [vmem:[#allocation39_spill] sm:$0xff] %v7494_v22  ;;  %2649 = vperm.xlu1 %5123, %v9833_v23  }
 0x655   : > { %9844 = vst [vmem:[#allocation50_spill] sm:$0xff] %v7496_v62 }
 0x656   : > { %v7500_v37 = vpop.permute.xlu0 %2449 }
 0x657   : > { %9845 = vst [vmem:[#allocation56_spill] sm:$0xff] %v7500_v37  ;;  %v9500_v37 = vmov 31  }
 0x658   : > { %2978 = vrot.lane.b32.xlu0 %v9846_v5, %s5562_s28 }
 0x65b   : > { %2657 = vperm.xlu2 %5122, %v9834_v33   ;;  %v7506_v61 = vpop.permute.xlu2 %2453  ;;  %v7508_v58 = vpop.permute.xlu1 %2433  ;;  %4857 = vmatmul.msk.bf16.gmra.mxu3 %vm701_vm3, %v2356_v41 }
 0x65c   : > { %9847 = vst [vmem:[#allocation4_spill] sm:$0xff] %v7506_v61  ;;  %2661 = vperm.xlu1 %5123, %v9835_v29  }
 0x65f   : > { %v7512_v19 = vpop.permute.xlu0 %2473 }
 0x660   : > { %9848 = vst [vmem:[#allocation94_spill] sm:$0xff] %v7512_v19  ;;  %3711 = vrot.lane.b32.xlu0 %v9849_v59, %s5561_s18 }
 0x663   : > { %2669 = vperm.xlu2 %5122, %v9836_v24   ;;  %v7517_v40 = vpop.permute.xlu2 %2477  ;;  %v7519_v2 = vpop.permute.xlu1 %2445 }
 0x664   : > { %9850 = vst [vmem:[#allocation35_spill] sm:$0xff] %v7517_v40  ;;  %5125 = vset.pattern.permute.xlu1 %v5560_v10  ;;  %v9914_v40 = vmov 22  }
 0x665   : > { %9851 = vst [vmem:[#allocation58_spill] sm:$0xff] %v7519_v2  ;;  %2685 = vperm.xlu1 %5125, %v9823_v51  }
 0x667   : > { %v7523_v11 = vpop.permute.xlu0 %2505 }
 0x668   : > { %2729 = vperm.xlu0 %5126, %v9834_v33  }
 0x66b   : > { %5127 = vset.pattern.permute.xlu2 %v5560_v10  ;;  %v7527_v46 = vpop.permute.xlu2 %2485  ;;  %4858 = vmatmul.msk.bf16.gmra.mxu3 %vm701_vm3, %v2357_v20  ;;  %v9863_v10 = vld [vmem:[#allocation14_spill] sm:$0xff] }
 0x66c   : > { %9852 = vst [vmem:[#allocation90_spill] sm:$0xff] %v7527_v46  ;;  %2693 = vperm.xlu2 %5127, %v9829_v60   ;;  %v7531_v15 = vpop.permute.xlu1 %2469 }
 0x66d   : > { %2697 = vperm.xlu1 %5125, %v9830_v47  }
 0x66f   : > { %v7534_v27 = vpop.permute.xlu0 %2517 }
 0x670   : > { %9853 = vst [vmem:[#allocation57_spill] sm:$0xff] %v7534_v27  ;;  %2976 = vrot.lane.b32.xlu0 %v9854_v53, %s5562_s28  ;;  %v9910_v27 = vmov 30  }
 0x671   : > { %5128 = vset.pattern.permute.xlu0 %v9490_v1 }
 0x673   : > { %v7539_v6 = vpop.permute.xlu2 %2509 }
 0x674   : > { %9855 = vst [vmem:[#allocation73_spill] sm:$0xff] %v7539_v6  ;;  %3719 = vrot.lane.b32.xlu2 %v9856_v7, %s5561_s18  ;;  %v7543_v30 = vpop.permute.xlu1 %2481  ;;  %v7840_v6 = vld [vmem:[%s9363_s5] sm:$0xff] }
 0x675   : > { %9857 = vst [vmem:[#allocation80_spill] sm:$0xff] %v7543_v30  ;;  %2701 = vperm.xlu1 %5125, %v9825_v57  }
 0x678   : > { %2757 = vperm.xlu0 %5128, %v9823_v51   ;;  %v7547_v12 = vpop.permute.xlu0 %2541 }
 0x67b   : > { %v7549_v13 = vpop.permute.xlu2 %2521 }
 0x67c   : > { %9858 = vst [vmem:[#allocation18_spill] sm:$0xff] %v7549_v13  ;;  %2982 = vrot.lane.b32.xlu2 %v9856_v7, %s5562_s28  ;;  %v7553_v39 = vpop.permute.xlu1 %2489 }
 0x67d   : > { %9859 = vst [vmem:[#allocation100_spill] sm:$0xff] %v7553_v39  ;;  %3715 = vrot.lane.b32.xlu1 %v9846_v5, %s5561_s18 }
 0x680   : > { %2777 = vperm.xlu0 %5128, %v9832_v8   ;;  %v7558_v3 = vpop.permute.xlu0 %2561 }
 0x681   : > { %9860 = vst [vmem:[#allocation37_spill] sm:$0xff] %v7558_v3 }
 0x683   : > { %v7560_v45 = vpop.permute.xlu2 %2545 }
 0x684   : > { %9861 = vst [vmem:[#allocation48_spill] sm:$0xff] %v7560_v45  ;;  %2705 = vperm.xlu2 %5127, %v9832_v8   ;;  %v7563_v14 = vpop.permute.xlu1 %2513 }
 0x685   : > { %9862 = vst [vmem:[#allocation34_spill] sm:$0xff] %v7563_v14  ;;  %3709 = vrot.lane.b32.xlu1 %v9863_v10, %s5561_s18 }
 0x688   : > { %5167 = vset.pattern.permute.xlu0 %v9488_v28  ;;  %v7568_v43 = vpop.permute.xlu0 %2585 }
 0x689   : > { %9864 = vst [vmem:[#allocation40_spill] sm:$0xff] %v7568_v43  ;;  %3434 = vperm.xlu0 %5167, %v9830_v47   ;;  %v9508_v43 = vmov 23  }
 0x68b   : > { %v7571_v32 = vpop.permute.xlu2 %2553 }
 0x68c   : > { %9865 = vst [vmem:[#allocation72_spill] sm:$0xff] %v7571_v32  ;;  %2721 = vperm.xlu2 %5127, %v9833_v23   ;;  %v7574_v25 = vpop.permute.xlu1 %2525 }
 0x68d   : > { %9866 = vst [vmem:[#allocation17_spill] sm:$0xff] %v7574_v25  ;;  %2972 = vrot.lane.b32.xlu1 %v9863_v10, %s5562_s28 }
 0x690   : > { %v7578_v48 = vpop.permute.xlu0 %2597 }
 0x691   : > { %9867 = vst [vmem:[#allocation25_spill] sm:$0xff] %v7578_v48  ;;  %5168 = vset.pattern.permute.xlu0 %v9494_v31 }
 0x692   : > { %3140 = vperm.xlu0 %5168, %v9823_v51  }
 0x693   : > { %v7582_v35 = vpop.permute.xlu2 %2577 }
 0x694   : > { %2725 = vperm.xlu2 %5127, %v9828_v26  }
 0x695   : > { %2974 = vrot.lane.b32.xlu1 %v9849_v59, %s5562_s28  ;;  %v7587_v54 = vpop.permute.xlu1 %2549 }
 0x696   : > { %9868 = vst [vmem:[#allocation53_spill] sm:$0xff] %v7587_v54  ;;  %v9912_v54 = vmov 31  }
 0x699   : > { %v7589_v50 = vpop.permute.xlu0 %2621 }
 0x69a   : > { %9869 = vst [vmem:[#allocation19_spill] sm:$0xff] %v7589_v50  ;;  %3178 = vperm.xlu0 %5168, %v9834_v33  }
 0x69b   : > { %v7592_v21 = vpop.permute.xlu2 %2589 }
 0x69c   : > { %9870 = vst [vmem:[#allocation59_spill] sm:$0xff] %v7592_v21  ;;  %3713 = vrot.lane.b32.xlu2 %v9854_v53, %s5561_s18 }
 0x69d   : > { %2733 = vperm.xlu1 %5125, %v9835_v29   ;;  %v7597_v0 = vpop.permute.xlu1 %2557 }
 0x69e   : > { %9871 = vst [vmem:[#allocation2_spill] sm:$0xff] %v7597_v0 }
 0x6a1   : > { %v7599_v5 = vpop.permute.xlu0 %2653 }
 0x6a2   : > { %9872 = vst [vmem:[#allocation60_spill] sm:$0xff] %v7599_v5  ;;  %3186 = vperm.xlu0 %5168, %v9831_v44  }
 0x6a3   : > { %v7602_v41 = vpop.permute.xlu2 %2613 }
 0x6a4   : > { %2737 = vperm.xlu2 %5127, %v9831_v44  }
 0x6a5   : > { %2741 = vperm.xlu1 %5125, %v9836_v24   ;;  %v7606_v59 = vpop.permute.xlu1 %2581 }
 0x6a6   : > { %9873 = vst [vmem:[#allocation95_spill] sm:$0xff] %v7606_v59 }
 0x6a9   : > { %v7608_v56 = vpop.permute.xlu0 %2665 }
 0x6aa   : > { %9874 = vst [vmem:[#allocation20_spill] sm:$0xff] %v7608_v56  ;;  %5173 = vset.pattern.permute.xlu0 %v9492_v52 }
 0x6ab   : > { %v7611_v63 = vpop.permute.xlu2 %2625  ;;  %3210 = vperm.xlu0 %5173, %v9827_v38  }
 0x6ac   : > { %9875 = vst [vmem:[#allocation21_spill] sm:$0xff] %v7611_v63  ;;  %5129 = vset.pattern.permute.xlu2 %v9490_v1  ;;  %v9504_v63 = vmov 30  }
 0x6ad   : > { %2761 = vperm.xlu2 %5129, %v9827_v38   ;;  %5130 = vset.pattern.permute.xlu1 %v9490_v1  ;;  %v7617_v9 = vpop.permute.xlu1 %2593 }
 0x6ae   : > { %9876 = vst [vmem:[#allocation29_spill] sm:$0xff] %v7617_v9  ;;  %2765 = vperm.xlu1 %5130, %v9829_v60   ;;  %v9498_v9 = vmov 27  }
 0x6b2   : > { %v7620_v20 = vpop.permute.xlu0 %2689 }
 0x6b3   : > { %9877 = vst [vmem:[#allocation103_spill] sm:$0xff] %v7620_v20  ;;  %v7622_v53 = vpop.permute.xlu2 %2633  ;;  %3218 = vperm.xlu0 %5173, %v9830_v47  }
 0x6b4   : > { %9878 = vst [vmem:[#allocation81_spill] sm:$0xff] %v7622_v53 }
 0x6b5   : > { %2769 = vperm.xlu2 %5129, %v9830_v47  }
 0x6b6   : > { %2773 = vperm.xlu1 %5130, %v9825_v57   ;;  %v7627_v7 = vpop.permute.xlu1 %2617 }
 0x6b7   : > { %9879 = vst [vmem:[#allocation43_spill] sm:$0xff] %v7627_v7 }
 0x6ba   : > { %v3718_v10 = vpop.permute.xlu0 %3717 }
 0x6bb   : > { %v7629_v28 = vpop.permute.xlu2 %2657  ;;  %3258 = vperm.xlu0 %5173, %v9831_v44  }
 0x6bc   : > { %9880 = vst [vmem:[#allocation86_spill] sm:$0xff] %v7629_v28 }
 0x6bd   : > { %2793 = vperm.xlu2 %5129, %v9833_v23  }
 0x6be   : > { %2797 = vperm.xlu1 %5130, %v9828_v26   ;;  %v7634_v1 = vpop.permute.xlu1 %2629 }
 0x6bf   : > { %9881 = vst [vmem:[#allocation61_spill] sm:$0xff] %v7634_v1 }
 0x6c2   : > { %v2981_v52 = vpop.permute.xlu0 %2980 }
 0x6c3   : > { %v7636_v31 = vpop.permute.xlu2 %2669  ;;  %5181 = vset.pattern.permute.xlu0 %v9496_v42 }
 0x6c4   : > { %9882 = vst [vmem:[#allocation78_spill] sm:$0xff] %v7636_v31  ;;  %3314 = vperm.xlu0 %5181, %v9833_v23   ;;  %v9886_v31 = vmov 25  }
 0x6c5   : > { %5131 = vset.pattern.permute.xlu2 %v9883_v36 }
 0x6c6   : > { %3144 = vperm.xlu2 %5131, %v9827_v38   ;;  %5132 = vset.pattern.permute.xlu1 %v9883_v36  ;;  %v7643_v18 = vpop.permute.xlu1 %2649 }
 0x6c7   : > { %3170 = vperm.xlu1 %5132, %v9833_v23  }
 0x6ca   : > { %v2979_v56 = vpop.permute.xlu0 %2978 }
 0x6cb   : > { %v7646_v53 = vpop.permute.xlu2 %2693  ;;  %v2994_v61 = vsel %vm1498_vm4, %v2979_v56, 0  ;;  %v9895_v56 = vmov 28  }
 0x6cc   : > { %9884 = vst [vmem:[#allocation75_spill] sm:$0xff] %v7646_v53  ;;  %3298 = vperm.xlu0 %5181, %v9832_v8  }
 0x6ce   : > { %3174 = vperm.xlu2 %5131, %v9828_v26   ;;  %v7650_v42 = vpop.permute.xlu1 %2661 }
 0x6cf   : > { %9885 = vst [vmem:[#allocation87_spill] sm:$0xff] %v7650_v42  ;;  %5133 = vset.pattern.permute.xlu1 %v9886_v31 }
 0x6d0   : > { %3206 = vperm.xlu1 %5133, %v9823_v51  }
 0x6d2   : > { %v7654_v48 = vpop.permute.xlu0 %3711 }
 0x6d3   : > { %v3720_v1 = vpop.permute.xlu2 %3719 }
 0x6d4   : > { %v3737_v3 = vsel %vm1498_vm4, %v3720_v1, 0  ;;  %5185 = vset.pattern.permute.xlu0 %v9498_v9  ;;  %v3734_v1 = vsel %vm1498_vm4, %v3718_v10, 0  ;;  %v9892_v10 = vmov 27  }
 0x6d5   : > { %3744 = vmatpush.bf16.xpose.msrb.mxu2 %v3737_v3  ;;  %3390 = vperm.xlu0 %5185, %v9828_v26   ;;  %v9888_v3 = vmov 26  }
 0x6d6   : > { %5134 = vset.pattern.permute.xlu2 %v9886_v31 }
 0x6d7   : > { %3242 = vperm.xlu2 %5134, %v9833_v23   ;;  %v7661_v0 = vpop.permute.xlu1 %2685 }
 0x6d8   : > { %3246 = vperm.xlu1 %5133, %v9828_v26  }
 0x6da   : > { %v7664_v25 = vpop.permute.xlu0 %2729 }
 0x6db   : > { %9887 = vst [vmem:[#allocation42_spill] sm:$0xff] %v7664_v25  ;;  %v2983_v13 = vpop.permute.xlu2 %2982 }
 0x6dc   : > { %v3000_v39 = vsel %vm1498_vm4, %v2983_v13, 0  ;;  %v2997_v13 = vsel %vm1498_vm4, %v2981_v52, 0 }
 0x6dd   : > { %3007 = vmatpush.bf16.xpose.msra.mxu0 %v3000_v39  ;;  %3358 = vperm.xlu0 %5185, %v9829_v60  }
 0x6de   : > { %3745 = vmatpush.bf16.xpose.msrb.mxu2 %v3734_v1 }
 0x6df   : > { %5135 = vset.pattern.permute.xlu2 %v9888_v3  ;;  %v7670_v9 = vpop.permute.xlu1 %2697 }
 0x6e0   : > { %9889 = vst [vmem:[#allocation97_spill] sm:$0xff] %v7670_v9  ;;  %3278 = vperm.xlu2 %5135, %v9823_v51   ;;  %5136 = vset.pattern.permute.xlu1 %v9888_v3 }
 0x6e1   : > { %3282 = vperm.xlu1 %5136, %v9827_v38  }
 0x6e2   : > { %v7675_v46 = vpop.permute.xlu0 %2976 }
 0x6e3   : > { %v7677_v34 = vpop.permute.xlu2 %2705 }
 0x6e4   : > { %9890 = vst [vmem:[#allocation62_spill] sm:$0xff] %v7677_v34 }
 0x6e5   : > { %3370 = vperm.xlu0 %5185, %v9832_v8   ;;  %3008 = vmatpush.bf16.xpose.msra.mxu0 %v2997_v13 }
 0x6e7   : > { %v7681_v39 = vpop.permute.xlu1 %2701 }
 0x6e8   : > { %9891 = vst [vmem:[#allocation96_spill] sm:$0xff] %v7681_v39  ;;  %3318 = vperm.xlu2 %5135, %v9828_v26  }
 0x6e9   : > { %5137 = vset.pattern.permute.xlu1 %v9892_v10 }
 0x6ea   : > { %3350 = vperm.xlu1 %5137, %v9823_v51   ;;  %v7686_v1 = vpop.permute.xlu0 %2757 }
 0x6eb   : > { %v7688_v55 = vpop.permute.xlu2 %2721 }
 0x6ed   : > { %3402 = vperm.xlu0 %5185, %v9831_v44   ;;  %3009 = vmatpush.bf16.xpose.msra.mxu0 %v2994_v61 }
 0x6ef   : > { %v3716_v52 = vpop.permute.xlu1 %3715 }
 0x6f0   : > { %5138 = vset.pattern.permute.xlu2 %v9892_v10  ;;  %v3731_v13 = vsel %vm1498_vm4, %v3716_v52, 0 }
 0x6f1   : > { %3354 = vperm.xlu2 %5138, %v9827_v38   ;;  %3746 = vmatpush.bf16.xpose.msrb.mxu2 %v3731_v13 }
 0x6f2   : > { %3386 = vperm.xlu1 %5137, %v9833_v23   ;;  %v7696_v34 = vpop.permute.xlu0 %2777 }
 0x6f3   : > { %9893 = vst [vmem:[#allocation63_spill] sm:$0xff] %v7696_v34  ;;  %v7698_v39 = vpop.permute.xlu2 %2725  ;;  %v9502_v34 = vmov 29  }
 0x6f4   : > { %9894 = vst [vmem:[#allocation3_spill] sm:$0xff] %v7698_v39 }
 0x6f5   : > { %5200 = vset.pattern.permute.xlu0 %v9500_v37 }
 0x6f6   : > { %3686 = vperm.xlu0 %5200, %v9835_v29  }
 0x6f7   : > { %v3710_v61 = vpop.permute.xlu1 %3709 }
 0x6f8   : > { %4865 = vmatmul.msk.bf16.vlgmr.msrb.gmra.mxu2 %vm1498_vm4, %v3710_v61 }
 0x6f9   : > { %5139 = vset.pattern.permute.xlu2 %v9895_v56 }
 0x6fa   : > { %3422 = vperm.xlu2 %5139, %v9823_v51   ;;  %5140 = vset.pattern.permute.xlu1 %v9895_v56 }
 0x6fb   : > { %v3714_v52 = vpop.permute.xlu2 %3713  ;;  %3426 = vperm.xlu1 %5140, %v9827_v38   ;;  %v7707_v13 = vpop.permute.xlu0 %3434 }
 0x6fc   : > { %9896 = vst [vmem:[#allocation76_spill] sm:$0xff] %v7707_v13 }
 0x6fe   : > { %5201 = vset.pattern.permute.xlu0 %v9502_v34 }
 0x6ff   : > { %v2973_v37 = vpop.permute.xlu1 %2972  ;;  %3530 = vperm.xlu0 %5201, %v9833_v23  }
 0x700   : > { %4859 = vmatmul.msk.bf16.vlgmr.msra.gmra.mxu0 %vm1498_vm4, %v2973_v37 }
 0x702   : > { %5141 = vset.pattern.permute.xlu2 %v9883_v36 }
 0x703   : > { %3148 = vperm.xlu2 %5141, %v9829_v60   ;;  %v7714_v61 = vpop.permute.xlu2 %2737  ;;  %5142 = vset.pattern.permute.xlu1 %v9883_v36 }
 0x704   : > { %9897 = vst [vmem:[#allocation92_spill] sm:$0xff] %v7714_v61  ;;  %3152 = vperm.xlu1 %5142, %v9830_v47   ;;  %v7718_v9 = vpop.permute.xlu0 %3140 }
 0x705   : > { %v3163_v17 = vmul.f32 %v7848_v4, %v7718_v9  ;;  %v7868_v9 = vld [vmem:[%s9363_s5 + $0x30] sm:$0xff] }
 0x707   : > { %v2975_v42 = vpop.permute.xlu1 %2974  ;;  %3546 = vperm.xlu0 %5201, %v9831_v44  }
 0x708   : > { %4866 = vmatmul.msk.bf16.gmra.mxu2 %vm1498_vm4, %v7654_v48 }
 0x70b   : > { %3182 = vperm.xlu2 %5141, %v9835_v29   ;;  %v7724_v37 = vpop.permute.xlu2 %2761 }
 0x70c   : > { %9898 = vst [vmem:[#allocation64_spill] sm:$0xff] %v7724_v37  ;;  %5143 = vset.pattern.permute.xlu1 %v9895_v56  ;;  %v7727_v34 = vpop.permute.xlu0 %3178 }
 0x70d   : > { %9899 = vst [vmem:[#allocation99_spill] sm:$0xff] %v7727_v34  ;;  %3458 = vperm.xlu1 %5143, %v9833_v23  }
 0x70f   : > { %v7730_v61 = vpop.permute.xlu1 %2733  ;;  %5211 = vset.pattern.permute.xlu0 %v9504_v63 }
 0x710   : > { %9900 = vst [vmem:[#allocation65_spill] sm:$0xff] %v7730_v61  ;;  %3570 = vperm.xlu0 %5211, %v9827_v38   ;;  %4860 = vmatmul.msk.bf16.gmra.mxu0 %vm1498_vm4, %v2975_v42  ;;  %v9904_v42 = vmov 29  }
 0x713   : > { %5144 = vset.pattern.permute.xlu2 %v9895_v56  ;;  %v7736_v48 = vpop.permute.xlu2 %2769 }
 0x714   : > { %9901 = vst [vmem:[#allocation89_spill] sm:$0xff] %v7736_v48  ;;  %3462 = vperm.xlu2 %5144, %v9828_v26   ;;  %v7739_v25 = vpop.permute.xlu0 %3186 }
 0x715   : > { %9902 = vst [vmem:[#allocation77_spill] sm:$0xff] %v7739_v25  ;;  %5145 = vset.pattern.permute.xlu1 %v9886_v31 }
 0x716   : > { %3214 = vperm.xlu1 %5145, %v9829_v60  }
 0x717   : > { %v7743_v61 = vpop.permute.xlu1 %2741 }
 0x718   : > { %9903 = vst [vmem:[#allocation91_spill] sm:$0xff] %v7743_v61  ;;  %3610 = vperm.xlu0 %5211, %v9834_v33   ;;  %4867 = vmatmul.msk.bf16.gmra.mxu2 %vm1498_vm4, %v3714_v52 }
 0x71b   : > { %v7747_v63 = vpop.permute.xlu2 %2793 }
 0x71c   : > { %5146 = vset.pattern.permute.xlu2 %v9904_v42 }
 0x71d   : > { %3494 = vperm.xlu2 %5146, %v9823_v51   ;;  %v7751_v48 = vpop.permute.xlu0 %3210 }
 0x71e   : > { %5147 = vset.pattern.permute.xlu1 %v9904_v42 }
 0x71f   : > { %3498 = vperm.xlu1 %5147, %v9827_v38  }
 0x720   : > { %v7755_v21 = vpop.permute.xlu1 %2765  ;;  %3622 = vperm.xlu0 %5211, %v9836_v24   ;;  %4861 = vmatmul.msk.bf16.gmra.mxu0 %vm1498_vm4, %v7675_v46 }
 0x721   : > { %9905 = vst [vmem:[#allocation45_spill] sm:$0xff] %v7755_v21  ;;  %v9506_v21 = vmov 22  }
 0x723   : > { %v7760_v52 = vpop.permute.xlu2 %3144 }
 0x725   : > { %5148 = vset.pattern.permute.xlu2 %v9886_v31  ;;  %v7763_v61 = vpop.permute.xlu0 %3218 }
 0x726   : > { %9906 = vst [vmem:[#allocation22_spill] sm:$0xff] %v7763_v61  ;;  %3250 = vperm.xlu2 %5148, %v9834_v33  }
 0x727   : > { %5149 = vset.pattern.permute.xlu1 %v9886_v31 }
 0x728   : > { %3254 = vperm.xlu1 %5149, %v9835_v29   ;;  %v7768_v53 = vpop.permute.xlu1 %2773  ;;  %5214 = vset.pattern.permute.xlu0 %v9506_v21 }
 0x729   : > { %9907 = vst [vmem:[#allocation83_spill] sm:$0xff] %v7768_v53  ;;  %2833 = vperm.xlu0 %5214, %v9827_v38  }
 0x72b   : > { %v7772_v46 = vpop.permute.xlu2 %3174 }
 0x72d   : > { %v7775_v37 = vpop.permute.xlu0 %3258 }
 0x72e   : > { %5150 = vset.pattern.permute.xlu2 %v9904_v42  ;;  %9908 = vst [vmem:[#allocation26_spill] sm:$0xff] %v7775_v37 }
 0x72f   : > { %3534 = vperm.xlu2 %5150, %v9828_v26  }
 0x730   : > { %5151 = vset.pattern.permute.xlu1 %v9888_v3  ;;  %v7779_v32 = vpop.permute.xlu1 %2797 }
 0x731   : > { %9909 = vst [vmem:[#allocation93_spill] sm:$0xff] %v7779_v32  ;;  %3286 = vperm.xlu1 %5151, %v9829_v60   ;;  %2865 = vperm.xlu0 %5214, %v9833_v23  }
 0x733   : > { %v7783_v53 = vpop.permute.xlu2 %3242 }
 0x736   : > { %v7787_v21 = vpop.permute.xlu0 %3314 }
 0x737   : > { %5152 = vset.pattern.permute.xlu2 %v9888_v3 }
 0x738   : > { %3290 = vperm.xlu2 %5152, %v9830_v47  }
 0x739   : > { %5153 = vset.pattern.permute.xlu1 %v9910_v27  ;;  %v3171_v28 = vpop.permute.xlu1 %3170  ;;  %2845 = vperm.xlu0 %5214, %v9825_v57  }
 0x73a   : > { %3566 = vperm.xlu1 %5153, %v9823_v51   ;;  %v3193_v19 = vmul.f32 %v7840_v6, %v3171_v28 }
 0x73b   : > { %v3279_v32 = vpop.permute.xlu2 %3278 }
 0x73c   : > { %v3199_v28 = vadd.f32 %v3193_v19, %v3163_v17 }
 0x73e   : > { %v7795_v20 = vpop.permute.xlu0 %3298 }
 0x73f   : > { %9911 = vst [vmem:[#allocation66_spill] sm:$0xff] %v7795_v20 }
 0x740   : > { %3322 = vperm.xlu2 %5152, %v9834_v33  }
 0x741   : > { %2885 = vperm.xlu0 %5214, %v9836_v24  }
 0x742   : > { %5154 = vset.pattern.permute.xlu1 %v9888_v3  ;;  %v3207_v39 = vpop.permute.xlu1 %3206 }
 0x743   : > { %v7797_v50 = vpop.permute.xlu2 %3318  ;;  %3326 = vperm.xlu1 %5154, %v9835_v29  }
 0x747   : > { %v7810_v62 = vpop.permute.xlu0 %3390 }
 0x748   : > { %5155 = vset.pattern.permute.xlu2 %v9910_v27 }
 0x749   : > { %3602 = vperm.xlu2 %5155, %v9833_v23   ;;  %5222 = vset.pattern.permute.xlu0 %v9508_v43 }
 0x74a   : > { %v7803_v5 = vpop.permute.xlu1 %3246  ;;  %2941 = vperm.xlu0 %5222, %v9828_v26  }
 0x74b   : > { %v7806_v30 = vpop.permute.xlu2 %3354  ;;  %5156 = vset.pattern.permute.xlu1 %v9910_v27 }
 0x74c   : > { %3606 = vperm.xlu1 %5156, %v9828_v26  }
 0x74f   : > { %v7821_v7 = vpop.permute.xlu0 %3358 }
 0x750   : > { %9913 = vst [vmem:[#allocation67_spill] sm:$0xff] %v7821_v7 }
 0x751   : > { %5157 = vset.pattern.permute.xlu2 %v9892_v10 }
 0x752   : > { %3362 = vperm.xlu2 %5157, %v9830_v47   ;;  %2909 = vperm.xlu0 %5222, %v9829_v60  }
 0x753   : > { %v7815_v2 = vpop.permute.xlu1 %3282 }
 0x754   : > { %v7817_v43 = vpop.permute.xlu2 %3422  ;;  %5158 = vset.pattern.permute.xlu1 %v9912_v54 }
 0x755   : > { %3638 = vperm.xlu1 %5158, %v9823_v51  }
 0x757   : > { %v7830_v49 = vpop.permute.xlu0 %3370 }
 0x758   : > { %9915 = vst [vmem:[#allocation88_spill] sm:$0xff] %v7830_v49  ;;  %v7855_v49 = vld [vmem:[%s9362_s4 + $0x30] sm:$0xff] }
 0x759   : > { %v3229_v20 = vmul.f32 %v7855_v49, %v3207_v39  ;;  %v3265_v39 = vmul.f32 %v7868_v9, %v7783_v53 }
 0x75a   : > { %5159 = vset.pattern.permute.xlu2 %v9912_v54  ;;  %2949 = vperm.xlu0 %5222, %v9835_v29  }
 0x75b   : > { %3642 = vperm.xlu2 %5159, %v9827_v38   ;;  %v3235_v37 = vadd.f32 %v3229_v20, %v3199_v28  ;;  %v7879_v20 = vld [vmem:[%s9362_s4 + $0x60] sm:$0xff] }
 0x75c   : > { %v3351_v14 = vpop.permute.xlu1 %3350  ;;  %v3301_v28 = vmul.f32 %v7879_v20, %v3279_v32 }
 0x75d   : > { %v7826_v59 = vpop.permute.xlu2 %3148  ;;  %5160 = vset.pattern.permute.xlu1 %v9914_v40  ;;  %v3271_v19 = vadd.f32 %v3265_v39, %v3235_v37  ;;  %v7895_v37 = vld [vmem:[%s9362_s4 + $0x8] sm:$0xff]  ;;  %v7902_v39 = vld [vmem:[%s9363_s5 + $0x60] sm:$0xff] }
 0x75e   : > { %2829 = vperm.xlu1 %5160, %v9823_v51   ;;  %9920 = vst [vmem:[#allocation79_spill] sm:$0xff] %v7895_v37  ;;  %v3164_v32 = vmul.f32 %v7895_v37, %v7760_v52 }
 0x75f   : > { %v7859_v13 = vpop.permute.xlu0 %3402  ;;  %v3307_v61 = vadd.f32 %v3301_v28, %v3271_v19  ;;  %v7909_v19 = vld [vmem:[%s9362_s4 + $0x90] sm:$0xff] }
 0x760   : > { %9917 = vst [vmem:[#allocation46_spill] sm:$0xff] %v7859_v13  ;;  %v7885_v13 = vld [vmem:[%s9363_s5 + $0x8] sm:$0xff]  ;;  %v3373_v28 = vmul.f32 %v7909_v19, %v3351_v14 }
 0x761   : > { %9918 = vst [vmem:[#allocation23_spill] sm:$0xff] %v7885_v13  ;;  %v3194_v53 = vmul.f32 %v7885_v13, %v7772_v46  ;;  %v3337_v46 = vmul.f32 %v7902_v39, %v7787_v21 }
 0x762   : > { %2953 = vperm.xlu0 %5222, %v9831_v44  }
 0x763   : > { %5161 = vset.pattern.permute.xlu2 %v9892_v10  ;;  %v3200_v37 = vadd.f32 %v3194_v53, %v3164_v32 }
 0x764   : > { %3394 = vperm.xlu2 %5161, %v9834_v33   ;;  %v3387_v45 = vpop.permute.xlu1 %3386 }
 0x765   : > { %v7835_v22 = vpop.permute.xlu2 %3182 }
 0x766   : > { %9916 = vst [vmem:[#allocation30_spill] sm:$0xff] %v7835_v22  ;;  %5162 = vset.pattern.permute.xlu1 %v9892_v10  ;;  %v7918_v22 = vld [vmem:[%s9363_s5 + $0x90] sm:$0xff] }
 0x767   : > { %3398 = vperm.xlu1 %5162, %v9835_v29   ;;  %v3409_v21 = vmul.f32 %v7918_v22, %v3387_v45 }
 0x768   : > { %v7889_v7 = vpop.permute.xlu0 %3686 }
 0x769   : > { %9919 = vst [vmem:[#allocation98_spill] sm:$0xff] %v7889_v7  ;;  %v3343_v7 = vadd.f32 %v3337_v46, %v3307_v61  ;;  %v7933_v61 = vld [vmem:[%s9363_s5 + $0x38] sm:$0xff]  ;;  %v7940_v46 = vld [vmem:[%s9362_s4 + $0x68] sm:$0xff] }
 0x76a   : > { %5225 = vset.pattern.permute.xlu0 %v9912_v54  ;;  %9923 = vst [vmem:[#allocation102_spill] sm:$0xff] %v7933_v61  ;;  %v3266_v45 = vmul.f32 %v7933_v61, %v7803_v5 }
 0x76b   : > { %v3379_v53 = vadd.f32 %v3373_v28, %v3343_v7  ;;  %9924 = vst [vmem:[#allocation38_spill] sm:$0xff] %v7940_v46  ;;  %v9925_v7 = vmov 23  }
 0x76c   : > { %5163 = vset.pattern.permute.xlu2 %v9912_v54 }
 0x76d   : > { %3674 = vperm.xlu2 %5163, %v9833_v23   ;;  %v7863_v25 = vpop.permute.xlu1 %3426  ;;  %v3415_v34 = vadd.f32 %v3409_v21, %v3379_v53 }
 0x76e   : > { %v7872_v17 = vpop.permute.xlu2 %3462 }
 0x76f   : > { %5164 = vset.pattern.permute.xlu1 %v9912_v54 }
 0x770   : > { %3678 = vperm.xlu1 %5164, %v9828_v26  }
 0x775   : > { %5165 = vset.pattern.permute.xlu2 %v9914_v40 }
 0x776   : > { %2869 = vperm.xlu2 %5165, %v9828_v26   ;;  %v7913_v13 = vpop.permute.xlu1 %3152  ;;  %v7926_v26 = vld [vmem:[%s9362_s4 + $0x38] sm:$0xff] }
 0x777   : > { %9921 = vst [vmem:[#allocation110_spill] sm:$0xff] %v7913_v13  ;;  %v3495_v52 = vpop.permute.xlu2 %3494  ;;  %v3230_v14 = vmul.f32 %v7926_v26, %v7751_v48  ;;  %v3302_v13 = vmul.f32 %v7940_v46, %v7815_v2  ;;  %v7956_v2 = vld [vmem:[%s9363_s5 + $0xc0] sm:$0xff] }
 0x778   : > { %5166 = vset.pattern.permute.xlu1 %v9895_v56  ;;  %9922 = vst [vmem:[#allocation68_spill] sm:$0xff] %v7926_v26  ;;  %v7947_v26 = vld [vmem:[%s9362_s4 + $0xc0] sm:$0xff] }
 0x779   : > { %3430 = vperm.xlu1 %5166, %v9829_v60   ;;  %v3236_v32 = vadd.f32 %v3230_v14, %v3200_v37  ;;  %v3445_v5 = vmul.f32 %v7947_v26, %v7817_v43  ;;  %v3531_v37 = vpop.permute.xlu0 %3530  ;;  %v7965_v43 = vld [vmem:[%s9363_s5 + $0x68] sm:$0xff] }
 0x77a   : > { %9926 = vst [vmem:[#allocation111_spill] sm:$0xff] %v7965_v43 }
 0x77b   : > { %v3272_v48 = vadd.f32 %v3266_v45, %v3236_v32  ;;  %v3451_v61 = vadd.f32 %v3445_v5, %v3415_v34  ;;  %v7972_v34 = vld [vmem:[%s9362_s4 + $0xf0] sm:$0xff] }
 0x77d   : > { %v3308_v14 = vadd.f32 %v3302_v13, %v3272_v48  ;;  %v3517_v13 = vmul.f32 %v7972_v34, %v3495_v52  ;;  %v7979_v48 = vld [vmem:[%s9363_s5 + $0xf0] sm:$0xff] }
 0x77e   : > { %5169 = vset.pattern.permute.xlu2 %v9925_v7  ;;  %v3553_v5 = vmul.f32 %v7979_v48, %v3531_v37 }
 0x77f   : > { %2901 = vperm.xlu2 %5169, %v9823_v51   ;;  %v3459_v28 = vpop.permute.xlu1 %3458  ;;  %v3338_v51 = vmul.f32 %v7965_v43, %v7797_v50  ;;  %v7985_v50 = vld [vmem:[%s9362_s4 + $0x98] sm:$0xff] }
 0x780   : > { %v3481_v21 = vmul.f32 %v7956_v2, %v3459_v28  ;;  %v7959_v45 = vpop.permute.xlu2 %3250  ;;  %9927 = vst [vmem:[#allocation47_spill] sm:$0xff] %v7985_v50  ;;  %v3374_v52 = vmul.f32 %v7985_v50, %v7806_v30 }
 0x781   : > { %5170 = vset.pattern.permute.xlu1 %v9925_v7  ;;  %v3344_v32 = vadd.f32 %v3338_v51, %v3308_v14  ;;  %v8000_v51 = vld [vmem:[%s9363_s5 + $0x98] sm:$0xff] }
 0x782   : > { %v3487_v53 = vadd.f32 %v3481_v21, %v3451_v61  ;;  %2905 = vperm.xlu1 %5170, %v9827_v38   ;;  %v7995_v21 = vpop.permute.xlu0 %3546  ;;  %9930 = vst [vmem:[#allocation82_spill] sm:$0xff] %v8000_v51  ;;  %v3410_v30 = vmul.f32 %v8000_v51, %v7810_v62 }
 0x783   : > { %v3380_v38 = vadd.f32 %v3374_v52, %v3344_v32  ;;  %9929 = vst [vmem:[#allocation101_spill] sm:$0xff] %v7995_v21 }
 0x784   : > { %v3523_v28 = vadd.f32 %v3517_v13, %v3487_v53  ;;  %v8007_v13 = vld [vmem:[%s9362_s4 + $0xc8] sm:$0xff] }
 0x785   : > { %9931 = vst [vmem:[#allocation112_spill] sm:$0xff] %v8007_v13  ;;  %v3446_v53 = vmul.f32 %v8007_v13, %v7863_v25  ;;  %v3416_v32 = vadd.f32 %v3410_v30, %v3380_v38  ;;  %v2456_v13 = vmul.f32 %v7840_v6, %v7508_v58  ;;  %v2528_v58 = vmul.f32 %v7868_v9, %v7523_v11 }
 0x786   : > { %v7989_v61 = vadd.f32 %v3553_v5, %v3523_v28  ;;  %v8016_v28 = vld [vmem:[%s9363_s5 + $0xc8] sm:$0xff]  ;;  %v2564_v6 = vmul.f32 %v7879_v20, %v7547_v12  ;;  %v2672_v12 = vmul.f32 %v7918_v22, %v7643_v18  ;;  %v2708_v20 = vmul.f32 %v7947_v26, %v7661_v0 }
 0x787   : > { %5171 = vset.pattern.permute.xlu2 %v9883_v36  ;;  %v3452_v5 = vadd.f32 %v3446_v53, %v3416_v32  ;;  %9932 = vst [vmem:[#allocation70_spill] sm:$0xff] %v8016_v28  ;;  %v3482_v62 = vmul.f32 %v8016_v28, %v7872_v17  ;;  %v8033_v17 = vld [vmem:[%s9363_s5 + $0xf8] sm:$0xff]  ;;  %v2780_v0 = vmul.f32 %v7972_v34, %v7686_v1 }
 0x788   : > { %9928 = vst [vmem:[#allocation69_spill] sm:$0xff] %v7989_v61  ;;  %3156 = vperm.xlu2 %5171, %v9825_v57   ;;  %v7993_v14 = vpop.permute.xlu1 %3214 }
 0x789   : > { %v3535_v37 = vpop.permute.xlu2 %3534  ;;  %v3488_v21 = vadd.f32 %v3482_v62, %v3452_v5  ;;  %9934 = vst [vmem:[#allocation71_spill] sm:$0xff] %v8033_v17  ;;  %v8040_v5 = vld [vmem:[%s9362_s4 + $0x128] sm:$0xff] }
 0x78a   : > { %5172 = vset.pattern.permute.xlu1 %v9883_v36  ;;  %v8024_v36 = vld [vmem:[%s9362_s4 + $0xf8] sm:$0xff]  ;;  %v3571_v30 = vpop.permute.xlu0 %3570  ;;  %v3554_v53 = vmul.f32 %v8033_v17, %v3535_v37  ;;  %9935 = vst [vmem:[#allocation74_spill] sm:$0xff] %v8040_v5  ;;  %v9944_v17 = vmov 21  }
 0x78b   : > { %3160 = vperm.xlu1 %5172, %v9832_v8   ;;  %9933 = vst [vmem:[#allocation113_spill] sm:$0xff] %v8024_v36  ;;  %v3590_v62 = vmul.f32 %v8040_v5, %v3571_v30 }
 0x790   : > { %3190 = vperm.xlu2 %5171, %v9836_v24  }
 0x791   : > { %v3499_v52 = vpop.permute.xlu1 %3498 }
 0x792   : > { %v3518_v25 = vmul.f32 %v8024_v36, %v3499_v52  ;;  %v8027_v38 = vpop.permute.xlu2 %3290 }
 0x793   : > { %5174 = vset.pattern.permute.xlu1 %v9895_v56 }
 0x794   : > { %v3524_v32 = vadd.f32 %v3518_v25, %v3488_v21  ;;  %3466 = vperm.xlu1 %5174, %v9834_v33  }
 0x796   : > { %v3560_v52 = vadd.f32 %v3554_v53, %v3524_v32 }
 0x798   : > { %5175 = vset.pattern.permute.xlu2 %v9895_v56  ;;  %v8044_v36 = vadd.f32 %v3590_v62, %v3560_v52 }
 0x799   : > { %3470 = vperm.xlu2 %5175, %v9835_v29  }
 0x79a   : > { %9936 = vst [vmem:[#allocation105_spill] sm:$0xff] %v8044_v36  ;;  %v8047_v61 = vpop.permute.xlu2 %3322  ;;  %v8049_v37 = vpop.permute.xlu1 %3254 }
 0x79c   : > { %5176 = vset.pattern.permute.xlu1 %v9925_v7 }
 0x79d   : > { %2937 = vperm.xlu1 %5176, %v9833_v23  }
 0x7a1   : > { %5177 = vset.pattern.permute.xlu2 %v9886_v31 }
 0x7a2   : > { %3222 = vperm.xlu2 %5177, %v9825_v57  }
 0x7a3   : > { %v8055_v21 = vpop.permute.xlu2 %3602  ;;  %v8057_v25 = vpop.permute.xlu1 %3286 }
 0x7a4   : > { %9937 = vst [vmem:[#allocation28_spill] sm:$0xff] %v8055_v21  ;;  %v8118_v21 = vpop.permute.xlu0 %3610 }
 0x7a5   : > { %5178 = vset.pattern.permute.xlu1 %v9886_v31 }
 0x7a6   : > { %3226 = vperm.xlu1 %5178, %v9832_v8  }
 0x7aa   : > { %5179 = vset.pattern.permute.xlu2 %v9904_v42 }
 0x7ab   : > { %3502 = vperm.xlu2 %5179, %v9829_v60  }
 0x7ac   : > { %v8063_v30 = vpop.permute.xlu2 %3362  ;;  %v8065_v53 = vpop.permute.xlu1 %3566 }
 0x7ad   : > { %9938 = vst [vmem:[#allocation107_spill] sm:$0xff] %v8065_v53  ;;  %v2492_v53 = vmul.f32 %v7855_v49, %v7531_v15  ;;  %v2636_v15 = vmul.f32 %v7909_v19, %v7602_v41  ;;  %v2744_v41 = vmul.f32 %v7956_v2, %v7688_v55  ;;  %v8175_v2 = vld [vmem:[%s9362_s4 + $0x120] sm:$0xff] }
 0x7ae   : > { %5180 = vset.pattern.permute.xlu1 %v9904_v42 }
 0x7af   : > { %3506 = vperm.xlu1 %5180, %v9830_v47  }
 0x7b3   : > { %5182 = vset.pattern.permute.xlu2 %v9886_v31 }
 0x7b4   : > { %3262 = vperm.xlu2 %5182, %v9836_v24  }
 0x7b5   : > { %v8071_v23 = vpop.permute.xlu2 %3642  ;;  %v8073_v32 = vpop.permute.xlu1 %3326 }
 0x7b6   : > { %9939 = vst [vmem:[#allocation84_spill] sm:$0xff] %v8071_v23 }
 0x7b7   : > { %3538 = vperm.xlu1 %5180, %v9834_v33  }
 0x7bc   : > { %5183 = vset.pattern.permute.xlu2 %v9904_v42 }
 0x7bd   : > { %3542 = vperm.xlu2 %5183, %v9835_v29  }
 0x7be   : > { %v8078_v62 = vpop.permute.xlu2 %3394  ;;  %v8080_v52 = vpop.permute.xlu1 %3606 }
 0x7bf   : > { %9940 = vst [vmem:[#allocation109_spill] sm:$0xff] %v8080_v52  ;;  %5184 = vset.pattern.permute.xlu1 %v9888_v3 }
 0x7c0   : > { %3294 = vperm.xlu1 %5184, %v9825_v57  }
 0x7c5   : > { %5186 = vset.pattern.permute.xlu2 %v9910_v27 }
 0x7c6   : > { %3574 = vperm.xlu2 %5186, %v9829_v60  }
 0x7c7   : > { %v8086_v31 = vpop.permute.xlu2 %3674  ;;  %v8088_v23 = vpop.permute.xlu1 %3638 }
 0x7c8   : > { %9941 = vst [vmem:[#allocation31_spill] sm:$0xff] %v8086_v31  ;;  %5187 = vset.pattern.permute.xlu1 %v9910_v27 }
 0x7c9   : > { %9942 = vst [vmem:[#allocation114_spill] sm:$0xff] %v8088_v23  ;;  %3578 = vperm.xlu1 %5187, %v9830_v47  }
 0x7ce   : > { %5188 = vset.pattern.permute.xlu2 %v9888_v3 }
 0x7cf   : > { %3330 = vperm.xlu2 %5188, %v9831_v44  }
 0x7d0   : > { %v8094_v36 = vpop.permute.xlu2 %2869  ;;  %v2830_v52 = vpop.permute.xlu1 %2829 }
 0x7d1   : > { %9943 = vst [vmem:[#allocation85_spill] sm:$0xff] %v8094_v36  ;;  %5189 = vset.pattern.permute.xlu1 %v9888_v3 }
 0x7d2   : > { %3334 = vperm.xlu1 %5189, %v9836_v24  }
 0x7d7   : > { %5190 = vset.pattern.permute.xlu2 %v9910_v27 }
 0x7d8   : > { %3614 = vperm.xlu2 %5190, %v9835_v29  }
 0x7d9   : > { %v8100_v31 = vpop.permute.xlu2 %2901  ;;  %v8102_v5 = vpop.permute.xlu1 %3398 }
 0x7da   : > { %5191 = vset.pattern.permute.xlu1 %v9944_v17 }
 0x7db   : > { %2801 = vperm.xlu1 %5191, %v9834_v33  }
 0x7e0   : > { %5192 = vset.pattern.permute.xlu2 %v9944_v17 }
 0x7e1   : > { %2805 = vperm.xlu2 %5192, %v9835_v29  }
 0x7e2   : > { %v8108_v36 = vpop.permute.xlu2 %3156  ;;  %v8110_v3 = vpop.permute.xlu1 %3678 }
 0x7e3   : > { %9945 = vst [vmem:[#allocation41_spill] sm:$0xff] %v8110_v3  ;;  %5193 = vset.pattern.permute.xlu1 %v9892_v10  ;;  %v2426_v3 = vmul.f32 %v7848_v4, %v7469_v16  ;;  %v8140_v16 = vpop.permute.xlu0 %3622  ;;  %v2600_v4 = vmul.f32 %v7902_v39, %v7582_v35 }
 0x7e4   : > { %3366 = vperm.xlu1 %5193, %v9825_v57   ;;  %9946 = vst [vmem:[#allocation5_spill] sm:$0xff] %v8140_v16 }
 0x7e5   : > { %v2462_v51 = vadd.f32 %v2456_v13, %v2426_v3 }
 0x7e7   : > { %v2498_v50 = vadd.f32 %v2492_v53, %v2462_v51  ;;  %v2852_v51 = vmul.f32 %v8175_v2, %v2830_v52  ;;  %v8192_v52 = vld [vmem:[%s9363_s5 + $0x120] sm:$0xff] }
 0x7e9   : > { %5194 = vset.pattern.permute.xlu2 %v9912_v54  ;;  %v2534_v49 = vadd.f32 %v2528_v58, %v2498_v50 }
 0x7ea   : > { %3646 = vperm.xlu2 %5194, %v9829_v60   ;;  %v8116_v23 = vpop.permute.xlu2 %3190 }
 0x7eb   : > { %v8120_v28 = vpop.permute.xlu1 %3430  ;;  %v8161_v19 = vpop.permute.xlu0 %2833 }
 0x7ec   : > { %5195 = vset.pattern.permute.xlu1 %v9912_v54 }
 0x7ed   : > { %3650 = vperm.xlu1 %5195, %v9830_v47  }
 0x7f2   : > { %5196 = vset.pattern.permute.xlu2 %v9914_v40 }
 0x7f3   : > { %2837 = vperm.xlu2 %5196, %v9829_v60   ;;  %v8132_v43 = vpop.permute.xlu2 %3470  ;;  %v2570_v60 = vadd.f32 %v2564_v6, %v2534_v49  ;;  %v9947_v6 = vld [vmem:[#allocation99_spill] sm:$0xff] }
 0x7f4   : > { %v8138_v46 = vpop.permute.xlu1 %2905 }
 0x7f5   : > { %5197 = vset.pattern.permute.xlu1 %v9914_v40  ;;  %v2606_v11 = vadd.f32 %v2600_v4, %v2570_v60  ;;  %v8213_v4 = vld [vmem:[%s9362_s4 + $0x40] sm:$0xff] }
 0x7f6   : > { %2841 = vperm.xlu1 %5197, %v9830_v47   ;;  %v3231_v60 = vmul.f32 %v8213_v4, %v7993_v14 }
 0x7f7   : > { %v2642_v9 = vadd.f32 %v2636_v15, %v2606_v11 }
 0x7f9   : > { %v2678_v39 = vadd.f32 %v2672_v12, %v2642_v9 }
 0x7fb   : > { %5198 = vset.pattern.permute.xlu2 %v9892_v10  ;;  %v2714_v18 = vadd.f32 %v2708_v20, %v2678_v39  ;;  %v2816_v10 = vmul.f32 %v7979_v48, %v7747_v63  ;;  %v2866_v63 = vpop.permute.xlu0 %2865  ;;  %v8185_v48 = vld [vmem:[%s9362_s4 + $0x10] sm:$0xff] }
 0x7fc   : > { %3406 = vperm.xlu2 %5198, %v9836_v24   ;;  %v8154_v50 = vpop.permute.xlu2 %3222  ;;  %v3165_v53 = vmul.f32 %v8185_v48, %v7826_v59  ;;  %v2888_v3 = vmul.f32 %v8192_v52, %v2866_v63  ;;  %v8206_v59 = vld [vmem:[%s9363_s5 + $0x10] sm:$0xff] }
 0x7fd   : > { %v8156_v35 = vpop.permute.xlu1 %3160  ;;  %v2750_v22 = vadd.f32 %v2744_v41, %v2714_v18  ;;  %v3195_v49 = vmul.f32 %v8206_v59, %v9947_v6  ;;  %v8223_v20 = vld [vmem:[%s9363_s5 + $0x150] sm:$0xff]  ;;  %v3011_v18 = vpop.f32.mrf.mxu0 }
 0x7fe   : > { %5199 = vset.pattern.permute.xlu1 %v9912_v54 }
 0x7ff   : > { %3682 = vperm.xlu1 %5199, %v9834_v33   ;;  %v2786_v55 = vadd.f32 %v2780_v0, %v2750_v22  ;;  %v3201_v12 = vadd.f32 %v3195_v49, %v3165_v53  ;;  %v8231_v22 = vld [vmem:[%s9363_s5 + $0x40] sm:$0xff]  ;;  %v8270_v49 = vld [vmem:[%s9363_s5 + $0x18] sm:$0xff] }
 0x800   : > { %v3267_v0 = vmul.f32 %v8231_v22, %v7959_v45 }
 0x801   : > { %v2822_v1 = vadd.f32 %v2816_v10, %v2786_v55  ;;  %v3237_v14 = vadd.f32 %v3231_v60, %v3201_v12  ;;  %v8238_v10 = vld [vmem:[%s9362_s4 + $0x70] sm:$0xff]  ;;  %v9950_v60 = vld [vmem:[#allocation30_spill] sm:$0xff] }
 0x802   : > { %v3303_v55 = vmul.f32 %v8238_v10, %v8057_v25  ;;  %v8256_v25 = vld [vmem:[%s9362_s4 + $0x18] sm:$0xff]  ;;  %v8277_v12 = vld [vmem:[%s9362_s4 + $0xa0] sm:$0xff] }
 0x803   : > { %v2858_v34 = vadd.f32 %v2852_v51, %v2822_v1  ;;  %v3273_v1 = vadd.f32 %v3267_v0, %v3237_v14  ;;  %v9952_v0 = vld [vmem:[#allocation22_spill] sm:$0xff] }
 0x804   : > { %5202 = vset.pattern.permute.xlu2 %v9914_v40 }
 0x805   : > { %2873 = vperm.xlu2 %5202, %v9834_v33   ;;  %v8170_v26 = vpop.permute.xlu2 %3502  ;;  %v2894_v15 = vadd.f32 %v2888_v3, %v2858_v34  ;;  %v3309_v45 = vadd.f32 %v3303_v55, %v3273_v1  ;;  %v9949_v3 = vld [vmem:[#allocation110_spill] sm:$0xff]  ;;  %v8299_v1 = vld [vmem:[%s9363_s5 + $0x48] sm:$0xff] }
 0x806   : > { %v8178_v13 = vpop.permute.xlu1 %3466 }
 0x807   : > { %5203 = vset.pattern.permute.xlu1 %v9914_v40 }
 0x808   : > { %2877 = vperm.xlu1 %5203, %v9835_v29   ;;  %v8198_v29 = vld [vmem:[%s9362_s4 + $0x150] sm:$0xff] }
 0x809   : > { %v2924_v58 = vmul.f32 %v8198_v29, %v8100_v31 }
 0x80b   : > { %v2930_v9 = vadd.f32 %v2924_v58, %v2894_v15  ;;  %v3166_v58 = vmul.f32 %v8256_v25, %v9949_v3  ;;  %v3196_v15 = vmul.f32 %v8270_v49, %v9950_v60 }
 0x80d   : > { %5204 = vset.pattern.permute.xlu2 %v9895_v56  ;;  %v3202_v14 = vadd.f32 %v3196_v15, %v3166_v58 }
 0x80e   : > { %3438 = vperm.xlu2 %5204, %v9825_v57   ;;  %v8218_v31 = vpop.permute.xlu2 %3262 }
 0x80f   : > { %v2938_v11 = vpop.permute.xlu1 %2937 }
 0x810   : > { %v2960_v39 = vmul.f32 %v8223_v20, %v2938_v11  ;;  %5205 = vset.pattern.permute.xlu1 %v9895_v56 }
 0x811   : > { %3442 = vperm.xlu1 %5205, %v9832_v8  }
 0x812   : > { %v2966_v41 = vadd.f32 %v2960_v39, %v2930_v9  ;;  %v9951_v9 = vld [vmem:[#allocation67_spill] sm:$0xff] }
 0x813   : > { %v3375_v39 = vmul.f32 %v8277_v12, %v9951_v9  ;;  %v8323_v9 = vld [vmem:[%s9362_s4 + $0x78] sm:$0xff] }
 0x814   : > { %v8242_v51 = vadd.f32 %v3011_v18, %v2966_v41  ;;  %v8292_v18 = vld [vmem:[%s9362_s4 + $0x48] sm:$0xff] }
 0x815   : > { %v3232_v55 = vmul.f32 %v8292_v18, %v9952_v0  ;;  %v8337_v0 = vld [vmem:[%s9362_s4 + $0x100] sm:$0xff] }
 0x816   : > { %9948 = vst [vmem:[#allocation6_spill] sm:$0xff] %v8242_v51  ;;  %5206 = vset.pattern.permute.xlu2 %v9925_v7  ;;  %v3026_v63 = vsel %vm701_vm3, %v8242_v51, -inf }
 0x817   : > { %2913 = vperm.xlu2 %5206, %v9830_v47   ;;  %v8248_v34 = vpop.permute.xlu2 %3542  ;;  %3027 = vmax.xlane.f32.xlu0 %v3026_v63  ;;  %v8263_v47 = vld [vmem:[%s9363_s5 + $0x70] sm:$0xff]  ;;  %v3268_v63 = vmul.f32 %v8299_v1, %v8049_v37 }
 0x818   : > { %v8250_v53 = vpop.permute.xlu1 %3226  ;;  %v3339_v6 = vmul.f32 %v8263_v47, %v8047_v61  ;;  %v8284_v61 = vld [vmem:[%s9363_s5 + $0xa0] sm:$0xff]  ;;  %v8315_v37 = vld [vmem:[%s9363_s5 + $0xd0] sm:$0xff] }
 0x819   : > { %3474 = vperm.xlu1 %5205, %v9831_v44   ;;  %v3411_v41 = vmul.f32 %v8284_v61, %v8078_v62  ;;  %v3483_v15 = vmul.f32 %v8315_v37, %v8178_v13 }
 0x81a   : > { %v3345_v11 = vadd.f32 %v3339_v6, %v3309_v45  ;;  %v3238_v6 = vadd.f32 %v3232_v55, %v3202_v14  ;;  %v8330_v14 = vld [vmem:[%s9363_s5 + $0x78] sm:$0xff]  ;;  %v3519_v55 = vmul.f32 %v8337_v0, %v8170_v26  ;;  %v8353_v26 = vld [vmem:[%s9363_s5 + $0x100] sm:$0xff] }
 0x81b   : > { %v3340_v13 = vmul.f32 %v8330_v14, %v8073_v32 }
 0x81c   : > { %v3381_v45 = vadd.f32 %v3375_v39, %v3345_v11  ;;  %v3274_v11 = vadd.f32 %v3268_v63, %v3238_v6  ;;  %v3304_v39 = vmul.f32 %v8323_v9, %v8027_v38  ;;  %v8345_v38 = vld [vmem:[%s9362_s4 + $0x20] sm:$0xff] }
 0x81d   : > { %9953 = vst [vmem:[#allocation10_spill] sm:$0xff] %v8345_v38  ;;  %v3167_v32 = vmul.f32 %v8345_v38, %v8108_v36  ;;  %v9955_v36 = vld [vmem:[#allocation77_spill] sm:$0xff] }
 0x81e   : > { %v3417_v60 = vadd.f32 %v3411_v41, %v3381_v45 }
 0x81f   : > { %5207 = vset.pattern.permute.xlu2 %v9895_v56  ;;  %v8306_v56 = vld [vmem:[%s9362_s4 + $0xd0] sm:$0xff] }
 0x820   : > { %v3447_v62 = vmul.f32 %v8306_v56, %v8120_v28  ;;  %3478 = vperm.xlu2 %5207, %v9836_v24   ;;  %v3575_v3 = vpop.permute.xlu2 %3574 }
 0x821   : > { %5208 = vset.pattern.permute.xlu1 %v9925_v7  ;;  %v3507_v58 = vpop.permute.xlu1 %3506 }
 0x822   : > { %2945 = vperm.xlu1 %5208, %v9834_v33   ;;  %v3453_v28 = vadd.f32 %v3447_v62, %v3417_v60  ;;  %v3310_v33 = vadd.f32 %v3304_v39, %v3274_v11 }
 0x824   : > { %v3489_v41 = vadd.f32 %v3483_v15, %v3453_v28  ;;  %v3346_v62 = vadd.f32 %v3340_v13, %v3310_v33  ;;  %v8360_v15 = vld [vmem:[%s9363_s5 + $0x20] sm:$0xff]  ;;  %v8367_v28 = vld [vmem:[%s9362_s4 + $0x50] sm:$0xff] }
 0x825   : > { %9954 = vst [vmem:[#allocation27_spill] sm:$0xff] %v8360_v15  ;;  %v3197_v11 = vmul.f32 %v8360_v15, %v9955_v36  ;;  %v3233_v39 = vmul.f32 %v8367_v28, %v8154_v50  ;;  %v8389_v50 = vld [vmem:[%s9362_s4 + $0x130] sm:$0xff] }
 0x826   : > { %v3525_v6 = vadd.f32 %v3519_v55, %v3489_v41  ;;  %9956 = vst [vmem:[#allocation8_spill] sm:$0xff] %v8367_v28  ;;  %v8382_v41 = vld [vmem:[%s9363_s5 + $0xa8] sm:$0xff]  ;;  %v3591_v55 = vmul.f32 %v8389_v50, %v3575_v3  ;;  %v8404_v3 = vld [vmem:[%s9363_s5 + $0x50] sm:$0xff] }
 0x827   : > { %v3412_v33 = vmul.f32 %v8382_v41, %v8102_v5  ;;  %v3203_v36 = vadd.f32 %v3197_v11, %v3167_v32  ;;  %9957 = vst [vmem:[#allocation9_spill] sm:$0xff] %v8404_v3  ;;  %v9958_v32 = vld [vmem:[#allocation26_spill] sm:$0xff] }
 0x828   : > { %5209 = vset.pattern.permute.xlu2 %v9904_v42 }
 0x829   : > { %3510 = vperm.xlu2 %5209, %v9825_v57   ;;  %v3331_v63 = vpop.permute.xlu2 %3330  ;;  %v3539_v45 = vpop.permute.xlu1 %3538  ;;  %v3239_v5 = vadd.f32 %v3233_v39, %v3203_v36  ;;  %v8440_v36 = vld [vmem:[%s9363_s5 + $0x80] sm:$0xff] }
 0x82a   : > { %v3555_v60 = vmul.f32 %v8353_v26, %v3539_v45  ;;  %5210 = vset.pattern.permute.xlu1 %v9904_v42  ;;  %v8375_v42 = vld [vmem:[%s9362_s4 + $0xa8] sm:$0xff]  ;;  %9961 = vst [vmem:[#allocation7_spill] sm:$0xff] %v8440_v36 }
 0x82b   : > { %3514 = vperm.xlu1 %5210, %v9832_v8   ;;  %v3376_v13 = vmul.f32 %v8375_v42, %v8063_v30  ;;  %v8395_v30 = vld [vmem:[%s9363_s5 + $0x130] sm:$0xff] }
 0x82c   : > { %v3561_v45 = vadd.f32 %v3555_v60, %v3525_v6  ;;  %v3627_v51 = vmul.f32 %v8395_v30, %v8118_v21  ;;  %v3269_v6 = vmul.f32 %v8404_v3, %v9958_v32  ;;  %v8412_v21 = vld [vmem:[%s9362_s4 + $0xd8] sm:$0xff] }
 0x82d   : > { %v3382_v28 = vadd.f32 %v3376_v13, %v3346_v62  ;;  %v9959_v62 = vld [vmem:[#allocation76_spill] sm:$0xff]  ;;  %v8426_v13 = vld [vmem:[%s9362_s4 + $0x80] sm:$0xff] }
 0x82e   : > { %v3597_v38 = vadd.f32 %v3591_v55, %v3561_v45  ;;  %v3448_v60 = vmul.f32 %v8412_v21, %v9959_v62  ;;  %v3275_v39 = vadd.f32 %v3269_v6, %v3239_v5  ;;  %9960 = vst [vmem:[#allocation44_spill] sm:$0xff] %v8426_v13  ;;  %v8433_v45 = vld [vmem:[%s9362_s4 + $0x108] sm:$0xff]  ;;  %v3341_v5 = vmul.f32 %v8440_v36, %v3331_v63 }
 0x82f   : > { %v3418_v15 = vadd.f32 %v3412_v33, %v3382_v28 }
 0x830   : > { %v8399_v16 = vadd.f32 %v3627_v51, %v3597_v38  ;;  %v8419_v51 = vld [vmem:[%s9363_s5 + $0xd8] sm:$0xff] }
 0x831   : > { %3550 = vperm.xlu2 %5209, %v9836_v24   ;;  %v3484_v38 = vmul.f32 %v8419_v51, %v8132_v43  ;;  %v3454_v55 = vadd.f32 %v3448_v60, %v3418_v15  ;;  %v3520_v43 = vmul.f32 %v8433_v45, %v3507_v58  ;;  %v8446_v15 = vld [vmem:[%s9362_s4 + $0x28] sm:$0xf] }
 0x832   : > { %v3615_v11 = vpop.permute.xlu2 %3614  ;;  %v3295_v28 = vpop.permute.xlu1 %3294  ;;  %9962 = vst [vmem:[#allocation24_spill] sm:$0xff] %v8446_v15  ;;  %v3168_v62 = vmul.f32 %v8446_v15, %v8156_v35  ;;  %v8468_v35 = vld [vmem:[%s9363_s5 + $0x108] sm:$0xff]  ;;  %v9988_v15 = vld [vmem:[#allocation102_spill] sm:$0xff] }
 0x833   : > { %v3305_v33 = vmul.f32 %v8426_v13, %v3295_v28  ;;  %5212 = vset.pattern.permute.xlu1 %v9910_v27  ;;  %v3490_v6 = vadd.f32 %v3484_v38, %v3454_v55  ;;  %v8453_v28 = vld [vmem:[%s9363_s5 + $0x28] sm:$0xf]  ;;  %v8460_v38 = vld [vmem:[%s9362_s4 + $0x58] sm:$0xf] }
 0x834   : > { %3582 = vperm.xlu1 %5212, %v9825_v57   ;;  %9963 = vst [vmem:[#allocation32_spill] sm:$0xff] %v8453_v28  ;;  %v3198_v63 = vmul.f32 %v8453_v28, %v8116_v23 }
 0x835   : > { %v3311_v32 = vadd.f32 %v3305_v33, %v3275_v39  ;;  %v3526_v60 = vadd.f32 %v3520_v43, %v3490_v6  ;;  %9964 = vst [vmem:[#allocation36_spill] sm:$0xff] %v8460_v38  ;;  %v3234_v39 = vmul.f32 %v8460_v38, %v8250_v53  ;;  %v3556_v33 = vmul.f32 %v8468_v35, %v8248_v34  ;;  %v8478_v53 = vld [vmem:[%s9362_s4 + $0x138] sm:$0xff] }
 0x836   : > { %v3204_v23 = vadd.f32 %v3198_v63, %v3168_v62  ;;  %v8485_v34 = vld [vmem:[%s9363_s5 + $0x138] sm:$0xff] }
 0x837   : > { %v3347_v58 = vadd.f32 %v3341_v5, %v3311_v32  ;;  %v3562_v5 = vadd.f32 %v3556_v33, %v3526_v60  ;;  %v3628_v6 = vmul.f32 %v8485_v34, %v3615_v11  ;;  %v8491_v60 = vld [vmem:[%s9363_s5 + $0x58] sm:$0xf] }
 0x838   : > { %v3240_v32 = vadd.f32 %v3234_v39, %v3204_v23  ;;  %9965 = vst [vmem:[#allocation52_spill] sm:$0xff] %v8491_v60  ;;  %v3270_v63 = vmul.f32 %v8491_v60, %v8218_v31  ;;  %v8499_v39 = vld [vmem:[%s9362_s4 + $0x88] sm:$0xf]  ;;  %v9967_v23 = vld [vmem:[#allocation66_spill] sm:$0xff]  ;;  %v9987_v38 = vld [vmem:[#allocation73_spill] sm:$0xff] }
 0x839   : > { %5213 = vset.pattern.permute.xlu2 %v9910_v27  ;;  %9966 = vst [vmem:[#allocation12_spill] sm:$0xff] %v8499_v39  ;;  %v3306_v11 = vmul.f32 %v8499_v39, %v9967_v23  ;;  %v2529_v28 = vmul.f32 %v9988_v15, %v9987_v38 }
 0x83a   : > { %3586 = vperm.xlu2 %5213, %v9832_v8  }
 0x83b   : > { %v8473_v55 = vpop.permute.xlu2 %2805  ;;  %v3579_v43 = vpop.permute.xlu1 %3578 }
 0x83c   : > { %v3592_v27 = vmul.f32 %v8478_v53, %v3579_v43  ;;  %3618 = vperm.xlu1 %5212, %v9831_v44   ;;  %v3276_v43 = vadd.f32 %v3270_v63, %v3240_v32  ;;  %v8510_v32 = vld [vmem:[%s9363_s5 + $0x88] sm:$0xf]  ;;  %v9970_v63 = vld [vmem:[#allocation88_spill] sm:$0xff] }
 0x83d   : > { %9968 = vst [vmem:[#allocation13_spill] sm:$0xff] %v8510_v32 }
 0x83e   : > { %v3598_v62 = vadd.f32 %v3592_v27, %v3562_v5  ;;  %v3312_v31 = vadd.f32 %v3306_v11, %v3276_v43 }
 0x840   : > { %v3634_v33 = vadd.f32 %v3628_v6, %v3598_v62  ;;  %v8517_v62 = vld [vmem:[%s9362_s4 + $0xb8] sm:$0xf] }
 0x841   : > { %9969 = vst [vmem:[#allocation15_spill] sm:$0xff] %v8517_v62  ;;  %v3378_v23 = vmul.f32 %v8517_v62, %v9970_v63  ;;  %v8547_v62 = vld [vmem:[%s9363_s5 + $0xb0] sm:$0xff] }
 0x842   : > { %5215 = vset.pattern.permute.xlu2 %v9944_v17  ;;  %9973 = vst [vmem:[#allocation14_spill] sm:$0xff] %v8547_v62 }
 0x843   : > { %2809 = vperm.xlu2 %5215, %v9831_v44  }
 0x844   : > { %v8504_v5 = vpop.permute.xlu2 %3646  ;;  %5216 = vset.pattern.permute.xlu1 %v9944_v17  ;;  %v3335_v27 = vpop.permute.xlu1 %3334 }
 0x845   : > { %v3342_v6 = vmul.f32 %v8510_v32, %v3335_v27  ;;  %2813 = vperm.xlu1 %5216, %v9836_v24   ;;  %v9974_v32 = vld [vmem:[#allocation46_spill] sm:$0xff] }
 0x846   : > { %v3413_v36 = vmul.f32 %v8547_v62, %v9974_v32  ;;  %v9986_v62 = vld [vmem:[#allocation68_spill] sm:$0xff] }
 0x847   : > { %v3348_v17 = vadd.f32 %v3342_v6, %v3312_v31  ;;  %v8535_v6 = vld [vmem:[%s9363_s5 + $0xb8] sm:$0xf] }
 0x848   : > { %9971 = vst [vmem:[#allocation16_spill] sm:$0xff] %v8535_v6 }
 0x849   : > { %v3384_v39 = vadd.f32 %v3378_v23, %v3348_v17  ;;  %v8541_v23 = vld [vmem:[%s9362_s4 + $0xb0] sm:$0xff] }
 0x84a   : > { %9972 = vst [vmem:[#allocation11_spill] sm:$0xff] %v8541_v23 }
 0x84b   : > { %5217 = vset.pattern.permute.xlu2 %v9912_v54 }
 0x84c   : > { %3654 = vperm.xlu2 %5217, %v9825_v57  }
 0x84d   : > { %v8523_v43 = vpop.permute.xlu2 %2837  ;;  %5218 = vset.pattern.permute.xlu1 %v9912_v54  ;;  %v8526_v11 = vpop.permute.xlu1 %2801 }
 0x84e   : > { %3658 = vperm.xlu1 %5218, %v9832_v8  }
 0x854   : > { %5219 = vset.pattern.permute.xlu2 %v9914_v40 }
 0x855   : > { %2849 = vperm.xlu2 %5219, %v9832_v8  }
 0x856   : > { %v3407_v27 = vpop.permute.xlu2 %3406  ;;  %3690 = vperm.xlu1 %5218, %v9831_v44   ;;  %v3367_v31 = vpop.permute.xlu1 %3366 }
 0x857   : > { %v3414_v63 = vmul.f32 %v8535_v6, %v3407_v27  ;;  %v3377_v17 = vmul.f32 %v8541_v23, %v3367_v31  ;;  %v8562_v6 = vld [vmem:[%s9362_s4 + $0x168] sm:$0xff] }
 0x858   : > { %9976 = vst [vmem:[#allocation110_spill] sm:$0xff] %v8562_v6 }
 0x859   : > { %v8551_v13 = vadd.f32 %v3414_v63, %v3384_v39  ;;  %v3383_v60 = vadd.f32 %v3377_v17, %v3347_v58  ;;  %v8583_v63 = vld [vmem:[%s9362_s4 + $0xe0] sm:$0xff]  ;;  %v9981_v17 = vld [vmem:[#allocation33_spill] sm:$0xff] }
 0x85a   : > { %9980 = vst [vmem:[#allocation22_spill] sm:$0xff] %v8583_v63 }
 0x85b   : > { %9975 = vst [vmem:[#allocation99_spill] sm:$0xff] %v8551_v13  ;;  %v3419_v3 = vadd.f32 %v3413_v36, %v3383_v60  ;;  %v9978_v36 = vld [vmem:[#allocation98_spill] sm:$0xff] }
 0x85d   : > { %5220 = vset.pattern.permute.xlu2 %v9912_v54  ;;  %v8568_v54 = vld [vmem:[%s9363_s5 + $0x168] sm:$0xff] }
 0x85e   : > { %3694 = vperm.xlu2 %5220, %v9836_v24   ;;  %5221 = vset.pattern.permute.xlu1 %v9914_v40  ;;  %9977 = vst [vmem:[#allocation30_spill] sm:$0xff] %v8568_v54  ;;  %v3700_v40 = vmul.f32 %v8568_v54, %v9978_v36 }
 0x85f   : > { %v8556_v27 = vpop.permute.xlu2 %2873  ;;  %2881 = vperm.xlu1 %5221, %v9831_v44   ;;  %v3651_v31 = vpop.permute.xlu1 %3650 }
 0x860   : > { %v3664_v39 = vmul.f32 %v8562_v6, %v3651_v31  ;;  %v9982_v31 = vld [vmem:[#allocation23_spill] sm:$0xff]  ;;  %v10002_v6 = vld [vmem:[#allocation58_spill] sm:$0xff] }
 0x862   : > { %v3670_v58 = vadd.f32 %v3664_v39, %v3634_v33  ;;  %v2457_v39 = vmul.f32 %v9982_v31, %v9981_v17  ;;  %v9991_v17 = vld [vmem:[#allocation38_spill] sm:$0xff] }
 0x863   : > { %v9993_v31 = vld [vmem:[#allocation54_spill] sm:$0xff] }
 0x864   : > { %v8572_v60 = vadd.f32 %v3700_v40, %v3670_v58  ;;  %v9984_v40 = vld [vmem:[#allocation79_spill] sm:$0xff]  ;;  %v9985_v58 = vld [vmem:[#allocation94_spill] sm:$0xff] }
 0x866   : > { %9979 = vst [vmem:[#allocation67_spill] sm:$0xff] %v8572_v60  ;;  %5223 = vset.pattern.permute.xlu2 %v9925_v7  ;;  %v9989_v60 = vld [vmem:[#allocation39_spill] sm:$0xff] }
 0x867   : > { %2917 = vperm.xlu2 %5223, %v9825_v57   ;;  %5224 = vset.pattern.permute.xlu1 %v9925_v7  ;;  %v9983_v57 = vld [vmem:[#allocation55_spill] sm:$0xff]  ;;  %v2458_v54 = vmul.f32 %v8206_v59, %v9989_v60 }
 0x868   : > { %v3439_v44 = vpop.permute.xlu2 %3438  ;;  %2921 = vperm.xlu1 %5224, %v9832_v8   ;;  %v8578_v32 = vpop.permute.xlu1 %2841  ;;  %v2427_v7 = vmul.f32 %v9984_v40, %v9983_v57  ;;  %v2493_v8 = vmul.f32 %v9986_v62, %v9985_v58  ;;  %v2428_v57 = vmul.f32 %v8185_v48, %v9993_v31  ;;  %v9994_v40 = vld [vmem:[#allocation35_spill] sm:$0xff]  ;;  %v10001_v31 = vld [vmem:[#allocation53_spill] sm:$0xff] }
 0x869   : > { %v3449_v33 = vmul.f32 %v8583_v63, %v3439_v44  ;;  %v9990_v63 = vld [vmem:[#allocation48_spill] sm:$0xff]  ;;  %v2494_v62 = vmul.f32 %v8213_v4, %v9994_v40  ;;  %v9996_v59 = vld [vmem:[#allocation95_spill] sm:$0xff]  ;;  %v2566_v4 = vmul.f32 %v8238_v10, %v10001_v31 }
 0x86a   : > { %v2463_v23 = vadd.f32 %v2457_v39, %v2427_v7  ;;  %v9997_v60 = vld [vmem:[#allocation111_spill] sm:$0xff]  ;;  %v9998_v7 = vld [vmem:[#allocation34_spill] sm:$0xff]  ;;  %v10007_v10 = vld [vmem:[#allocation40_spill] sm:$0xff] }
 0x86b   : > { %v8588_v36 = vadd.f32 %v3449_v33, %v3419_v3  ;;  %v2565_v3 = vmul.f32 %v9991_v17, %v9990_v63  ;;  %v8601_v33 = vpop.permute.xlu0 %2845  ;;  %v2530_v63 = vmul.f32 %v8231_v22, %v9998_v7  ;;  %v10000_v17 = vld [vmem:[#allocation47_spill] sm:$0xff] }
 0x86c   : > { %v2499_v44 = vadd.f32 %v2493_v8, %v2463_v23  ;;  %9992 = vst [vmem:[#allocation77_spill] sm:$0xff] %v8601_v33  ;;  %v2464_v23 = vadd.f32 %v2458_v54, %v2428_v57  ;;  %v9999_v8 = vld [vmem:[#allocation43_spill] sm:$0xff]  ;;  %v10004_v57 = vld [vmem:[#allocation80_spill] sm:$0xff] }
 0x86d   : > { %v2637_v33 = vmul.f32 %v10000_v17, %v9999_v8  ;;  %v2495_v22 = vmul.f32 %v8292_v18, %v10004_v57  ;;  %v10008_v7 = vld [vmem:[#allocation107_spill] sm:$0xff]  ;;  %v10011_v17 = vld [vmem:[#allocation112_spill] sm:$0xff] }
 0x86e   : > { %v2535_v38 = vadd.f32 %v2529_v28, %v2499_v44  ;;  %v2500_v48 = vadd.f32 %v2494_v62, %v2464_v23  ;;  %v2459_v28 = vmul.f32 %v8270_v49, %v10002_v6  ;;  %v3589_v49 = vmul.f32 %v8175_v2, %v10008_v7  ;;  %v10010_v8 = vld [vmem:[#allocation103_spill] sm:$0xff]  ;;  %v10015_v2 = vld [vmem:[#allocation69_spill] sm:$0xff] }
 0x86f   : > { %2957 = vperm.xlu2 %5223, %v9836_v24   ;;  %v2601_v24 = vmul.f32 %v9997_v60, %v9996_v59  ;;  %v10003_v59 = vld [vmem:[#allocation50_spill] sm:$0xff]  ;;  %v10012_v31 = vld [vmem:[#allocation3_spill] sm:$0xff] }
 0x870   : > { %v2571_v58 = vadd.f32 %v2565_v3, %v2535_v38  ;;  %v2536_v13 = vadd.f32 %v2530_v63, %v2500_v48  ;;  %v2429_v54 = vmul.f32 %v8256_v25, %v10003_v59  ;;  %v10005_v3 = vld [vmem:[#allocation60_spill] sm:$0xff]  ;;  %v10006_v38 = vld [vmem:[#allocation82_spill] sm:$0xff]  ;;  %v10009_v63 = vld [vmem:[#allocation19_spill] sm:$0xff]  ;;  %v2709_v48 = vmul.f32 %v10011_v17, %v10010_v8  ;;  %v3748_v59 = vpop.f32.mrf.mxu2 }
 0x871   : > { %v8607_v39 = vpop.permute.xlu2 %2913  ;;  %v8609_v15 = vpop.permute.xlu1 %3682  ;;  %v2673_v60 = vmul.f32 %v10006_v38, %v10005_v3  ;;  %v2638_v18 = vmul.f32 %v8277_v12, %v10009_v63  ;;  %v3595_v3 = vadd.f32 %v3589_v49, %v10015_v2  ;;  %v10016_v38 = vld [vmem:[#allocation57_spill] sm:$0xff]  ;;  %v10023_v17 = vld [vmem:[#allocation59_spill] sm:$0xff] }
 0x872   : > { %9995 = vst [vmem:[#allocation26_spill] sm:$0xff] %v8607_v39  ;;  %v2607_v40 = vadd.f32 %v2601_v24, %v2571_v58  ;;  %v2572_v39 = vadd.f32 %v2566_v4, %v2536_v13  ;;  %v2602_v24 = vmul.f32 %v8263_v47, %v10007_v10  ;;  %v2465_v6 = vadd.f32 %v2459_v28, %v2429_v54  ;;  %v10013_v4 = vld [vmem:[#allocation70_spill] sm:$0xff]  ;;  %v10018_v54 = vld [vmem:[#allocation64_spill] sm:$0xff] }
 0x873   : > { %v8635_v13 = vpop.permute.xlu0 %2885  ;;  %v10014_v47 = vld [vmem:[#allocation86_spill] sm:$0xff]  ;;  %v2531_v28 = vmul.f32 %v8299_v1, %v10016_v38  ;;  %v2603_v1 = vmul.f32 %v8330_v14, %v10023_v17 }
 0x874   : > { %v2643_v44 = vadd.f32 %v2637_v33, %v2607_v40  ;;  %v2608_v33 = vadd.f32 %v2602_v24, %v2572_v39  ;;  %v2501_v58 = vadd.f32 %v2495_v22, %v2465_v6  ;;  %v2745_v40 = vmul.f32 %v10013_v4, %v10012_v31  ;;  %v10017_v39 = vld [vmem:[#allocation72_spill] sm:$0xff]  ;;  %v10019_v22 = vld [vmem:[#allocation113_spill] sm:$0xff]  ;;  %v10020_v24 = vld [vmem:[#allocation75_spill] sm:$0xff] }
 0x875   : > { %v2674_v57 = vmul.f32 %v8284_v61, %v10014_v47  ;;  %v2710_v7 = vmul.f32 %v8306_v56, %v10020_v24  ;;  %v10021_v6 = vld [vmem:[#allocation28_spill] sm:$0xff]  ;;  %v10022_v61 = vld [vmem:[#allocation114_spill] sm:$0xff]  ;;  %v10032_v24 = vld [vmem:[#allocation85_spill] sm:$0xff] }
 0x876   : > { %v2679_v25 = vadd.f32 %v2673_v60, %v2643_v44  ;;  %v2567_v44 = vmul.f32 %v8323_v9, %v10017_v39  ;;  %v2781_v60 = vmul.f32 %v10019_v22, %v10018_v54  ;;  %v2644_v10 = vadd.f32 %v2638_v18, %v2608_v33  ;;  %v10024_v9 = vld [vmem:[#allocation93_spill] sm:$0xff]  ;;  %v10026_v47 = vld [vmem:[#allocation42_spill] sm:$0xff] }
 0x877   : > { %v3625_v63 = vmul.f32 %v8192_v52, %v10021_v6  ;;  %v3661_v49 = vmul.f32 %v8198_v29, %v10022_v61  ;;  %v2537_v8 = vadd.f32 %v2531_v28, %v2501_v58  ;;  %v2746_v33 = vmul.f32 %v8315_v37, %v10026_v47  ;;  %v10027_v52 = vld [vmem:[#allocation21_spill] sm:$0xff]  ;;  %v10028_v58 = vld [vmem:[#allocation74_spill] sm:$0xff]  ;;  %v5504_v37 = vld [vmem:[%s9363_s5 + $0x128] sm:$0xff] }
 0x878   : > { %v2715_v12 = vadd.f32 %v2709_v48, %v2679_v25  ;;  %v10025_v25 = vld [vmem:[#allocation71_spill] sm:$0xff]  ;;  %v2680_v4 = vadd.f32 %v2674_v57, %v2644_v10  ;;  %v2639_v38 = vmul.f32 %v8375_v42, %v10027_v52  ;;  %v2853_v28 = vmul.f32 %v10028_v58, %v8161_v19  ;;  %v10029_v39 = vld [vmem:[#allocation45_spill] sm:$0xff] }
 0x879   : > { %v2817_v48 = vmul.f32 %v10025_v25, %v10024_v9  ;;  %v3631_v18 = vadd.f32 %v3625_v63, %v3595_v3  ;;  %v2573_v2 = vadd.f32 %v2567_v44, %v2537_v8  ;;  %v10030_v3 = vld [vmem:[#allocation109_spill] sm:$0xff]  ;;  %v10031_v10 = vld [vmem:[#allocation87_spill] sm:$0xff]  ;;  %v2889_v19 = vmul.f32 %v5504_v37, %v10032_v24 }
 0x87a   : > { %v8627_v62 = vpop.permute.xlu2 %3478  ;;  %v8629_v23 = vpop.permute.xlu1 %2877  ;;  %v2751_v31 = vadd.f32 %v2745_v40, %v2715_v12  ;;  %v2716_v40 = vadd.f32 %v2710_v7, %v2680_v4  ;;  %v2782_v12 = vmul.f32 %v8337_v0, %v10029_v39  ;;  %v3626_v54 = vmul.f32 %v5504_v37, %v10030_v3  ;;  %v10033_v7 = vld [vmem:[#allocation31_spill] sm:$0xff]  ;;  %v10034_v8 = vld [vmem:[#allocation97_spill] sm:$0xff] }
 0x87b   : > { %v2942_v57 = vpop.permute.xlu0 %2941  ;;  %v3667_v44 = vadd.f32 %v3661_v49, %v3631_v18  ;;  %v2609_v22 = vadd.f32 %v2603_v1, %v2573_v2  ;;  %v2675_v42 = vmul.f32 %v8382_v41, %v10031_v10  ;;  %v3697_v63 = vmul.f32 %v8223_v20, %v10033_v7  ;;  %v5505_v41 = vld [vmem:[%s9362_s4 + $0x158] sm:$0xff]  ;;  %v8714_v10 = vld [vmem:[%s9362_s4 + $0x110] sm:$0xff] }
 0x87c   : > { %v2787_v29 = vadd.f32 %v2781_v60, %v2751_v31  ;;  %v2752_v6 = vadd.f32 %v2746_v33, %v2716_v40  ;;  %v2818_v0 = vmul.f32 %v8353_v26, %v8526_v11  ;;  %v2711_v17 = vmul.f32 %v8412_v21, %v10034_v8  ;;  %v3750_v31 = vpop.f32.mrf.mxu2  ;;  %v10035_v25 = vld [vmem:[#allocation105_spill] sm:$0xff]  ;;  %v10037_v33 = vld [vmem:[#allocation84_spill] sm:$0xff] }
 0x87d   : > { %v2645_v61 = vadd.f32 %v2639_v38, %v2609_v22  ;;  %v2925_v1 = vmul.f32 %v5505_v41, %v8138_v46  ;;  %v3703_v4 = vadd.f32 %v3697_v63, %v3667_v44  ;;  %v10036_v47 = vld [vmem:[#allocation65_spill] sm:$0xff]  ;;  %v3662_v18 = vmul.f32 %v5505_v41, %v10037_v33  ;;  %v3013_v22 = vpop.f32.mrf.mxu0  ;;  %v5511_v41 = vld [vmem:[%s9363_s5 + $0x160] sm:$0xff] }
 0x87e   : > { %v2823_v60 = vadd.f32 %v2817_v48, %v2787_v29  ;;  %v2788_v9 = vadd.f32 %v2782_v12, %v2752_v6  ;;  %v3632_v48 = vadd.f32 %v3626_v54, %v10035_v25  ;;  %v2747_v26 = vmul.f32 %v8419_v51, %v10036_v47  ;;  %v5506_v21 = vld [vmem:[%s9363_s5 + $0x158] sm:$0xff]  ;;  %v8702_v51 = vld [vmem:[%s9363_s5 + $0xe0] sm:$0xff]  ;;  %v8751_v47 = vld [vmem:[%s9362_s4 + $0xe8] sm:$0xf] }
 0x87f   : > { %v2681_v20 = vadd.f32 %v2675_v42, %v2645_v61  ;;  %v10038_v2 = vld [vmem:[#allocation41_spill] sm:$0xff]  ;;  %v2854_v37 = vmul.f32 %v8389_v50, %v8523_v43  ;;  %v2890_v3 = vmul.f32 %v8395_v30, %v8556_v27  ;;  %v8709_v54 = vadd.f32 %v3748_v59, %v3703_v4  ;;  %v8723_v59 = vld [vmem:[%s9363_s5 + $0x110] sm:$0xff] }
 0x880   : > { %v2859_v49 = vadd.f32 %v2853_v28, %v2823_v60  ;;  %v3698_v52 = vmul.f32 %v5506_v21, %v10038_v2  ;;  %v2824_v38 = vadd.f32 %v2818_v0, %v2788_v9  ;;  %v10039_v58 = vld [vmem:[#allocation89_spill] sm:$0xff]  ;;  %v3668_v12 = vadd.f32 %v3662_v18, %v3632_v48  ;;  %v10042_v18 = vld [vmem:[#allocation110_spill] sm:$0xff] }
 0x881   : > { %v2717_v46 = vadd.f32 %v2711_v17, %v2681_v20  ;;  %v2783_v28 = vmul.f32 %v8433_v45, %v10039_v58  ;;  %v2961_v45 = vmul.f32 %v5506_v21, %v2942_v57  ;;  %v2819_v30 = vmul.f32 %v8468_v35, %v8473_v55  ;;  %v10040_v57 = vld [vmem:[#allocation101_spill] sm:$0xff] }
 0x882   : > { %v2895_v11 = vadd.f32 %v2889_v19, %v2859_v49  ;;  %v3704_v50 = vadd.f32 %v3698_v52, %v3668_v12  ;;  %v2860_v43 = vadd.f32 %v2854_v37, %v2824_v38  ;;  %v3557_v6 = vmul.f32 %v8723_v59, %v10040_v57  ;;  %v10044_v37 = vld [vmem:[#allocation30_spill] sm:$0xff] }
 0x883   : > { %v8664_v56 = vpop.permute.xlu1 %3442  ;;  %v3511_v14 = vpop.permute.xlu2 %3510  ;;  %v2753_v44 = vadd.f32 %v2747_v26, %v2717_v46  ;;  %v2855_v35 = vmul.f32 %v8478_v53, %v8578_v32  ;;  %v3763_v55 = vsel %vm701_vm3, %v8709_v54, -inf }
 0x884   : > { %v2931_v40 = vadd.f32 %v2925_v1, %v2895_v11  ;;  %v3521_v42 = vmul.f32 %v8714_v10, %v3511_v14  ;;  %v2910_v19 = vpop.permute.xlu0 %2909  ;;  %v2896_v0 = vadd.f32 %v2890_v3, %v2860_v43  ;;  %v3753_v61 = vpop.f32.mrf.mxu2  ;;  %v3699_v1 = vmul.f32 %v5511_v41, %v8609_v15 }
 0x885   : > { %v2789_v27 = vadd.f32 %v2783_v28, %v2753_v44  ;;  %v8743_v9 = vadd.f32 %v3750_v31, %v3704_v50  ;;  %v3450_v15 = vmul.f32 %v8751_v47, %v8664_v56  ;;  %v3016_v11 = vpop.f32.mrf.mxu0 }
 0x886   : > { %v2967_v14 = vadd.f32 %v2961_v45, %v2931_v40 }
 0x887   : > { %v2825_v49 = vadd.f32 %v2819_v30, %v2789_v27  ;;  %v3766_v31 = vsel %vm701_vm3, %v8743_v9, -inf }
 0x888   : > { %v8745_v32 = vadd.f32 %v3013_v22, %v2967_v14  ;;  %v10045_v22 = vld [vmem:[#allocation67_spill] sm:$0xff] }
 0x889   : > { %v2861_v48 = vadd.f32 %v2855_v35, %v2825_v49  ;;  %v10046_v35 = vld [vmem:[#allocation5_spill] sm:$0xff] }
 0x88a   : > { %v3029_v2 = vsel %vm701_vm3, %v8745_v32, -inf }
 0x88b   : > { %v3475_v29 = vpop.permute.xlu1 %3474  ;;  %v3551_v60 = vpop.permute.xlu2 %3550 }
 0x88c   : > { %v3485_v39 = vmul.f32 %v8702_v51, %v3475_v29  ;;  %v2950_v38 = vpop.permute.xlu0 %2949  ;;  %v10043_v29 = vld [vmem:[#allocation99_spill] sm:$0xff]  ;;  %v3755_v40 = vpop.f32.mrf.mxu2 }
 0x88d   : > { %v3456_v56 = vadd.f32 %v3450_v15, %v10043_v29  ;;  %v2963_v3 = vmul.f32 %v10044_v37, %v2950_v38  ;;  %v8777_v45 = vadd.f32 %v3755_v40, %v10045_v22  ;;  %v10058_v38 = vld [vmem:[#allocation36_spill] sm:$0xff]  ;;  %v10060_v37 = vld [vmem:[#allocation9_spill] sm:$0xff] }
 0x88e   : > { %v3491_v24 = vadd.f32 %v3485_v39, %v8588_v36  ;;  %v5510_v36 = vld [vmem:[%s9362_s4 + $0x160] sm:$0xff]  ;;  %v8771_v39 = vld [vmem:[%s9363_s5 + $0xe8] sm:$0xf]  ;;  %v10062_v22 = vld [vmem:[#allocation52_spill] sm:$0xff] }
 0x88f   : > { %v3663_v63 = vmul.f32 %v5510_v36, %v8504_v5  ;;  %v2926_v8 = vmul.f32 %v5510_v36, %v2910_v19  ;;  %v2891_v5 = vmul.f32 %v8485_v34, %v8629_v23  ;;  %v3486_v12 = vmul.f32 %v8771_v39, %v8627_v62  ;;  %v8790_v62 = vld [vmem:[%s9363_s5 + $0x118] sm:$0xf] }
 0x890   : > { %v3527_v7 = vadd.f32 %v3521_v42, %v3491_v24  ;;  %v8782_v24 = vld [vmem:[%s9362_s4 + $0x118] sm:$0xf]  ;;  %v3558_v43 = vmul.f32 %v8790_v62, %v3551_v60  ;;  %v3772_v57 = vsel %vm701_vm3, %v8777_v45, -inf  ;;  %v8808_v60 = vld [vmem:[%s9363_s5 + $0x148] sm:$0xf] }
 0x891   : > { %v3669_v25 = vadd.f32 %v3663_v63, %v8399_v16  ;;  %v2932_v4 = vadd.f32 %v2926_v8, %v2896_v0  ;;  %v2897_v34 = vadd.f32 %v2891_v5, %v2861_v48  ;;  %v10041_v16 = vld [vmem:[#allocation26_spill] sm:$0xff]  ;;  %v3492_v42 = vadd.f32 %v3486_v12, %v3456_v56 }
 0x892   : > { %3764 = vmax.xlane.f32.xlu1 %v3763_v55  ;;  %v8735_v17 = vadd.f32 %v3557_v6, %v3527_v7  ;;  %v2927_v21 = vmul.f32 %v10042_v18, %v10041_v16  ;;  %v3018_v6 = vpop.f32.mrf.mxu0  ;;  %v8798_v7 = vld [vmem:[%s9362_s4 + $0x148] sm:$0xf]  ;;  %v3630_v55 = vmul.f32 %v8808_v60, %v10046_v35  ;;  %v10055_v16 = vld [vmem:[#allocation90_spill] sm:$0xff]  ;;  %v10056_v18 = vld [vmem:[#allocation8_spill] sm:$0xff] }
 0x893   : > { %v3705_v26 = vadd.f32 %v3699_v1, %v3669_v25  ;;  %v10048_v25 = vld [vmem:[#allocation27_spill] sm:$0xff]  ;;  %v10059_v12 = vld [vmem:[#allocation18_spill] sm:$0xff] }
 0x894   : > { %v2946_v53 = vpop.permute.xlu1 %2945  ;;  %v3587_v33 = vpop.permute.xlu2 %3586  ;;  %v2933_v46 = vadd.f32 %v2927_v21, %v2897_v34  ;;  %v10052_v34 = vld [vmem:[#allocation10_spill] sm:$0xff]  ;;  %v2496_v21 = vmul.f32 %v10056_v18, %v10055_v16 }
 0x895   : > { %v2962_v20 = vmul.f32 %v5511_v41, %v2946_v53  ;;  %v8766_v28 = vadd.f32 %v3753_v61, %v3705_v26  ;;  %v3594_v14 = vmul.f32 %v8798_v7, %v3587_v33  ;;  %v10047_v53 = vld [vmem:[#allocation56_spill] sm:$0xff]  ;;  %v10051_v26 = vld [vmem:[#allocation49_spill] sm:$0xff] }
 0x896   : > { %v2969_v30 = vadd.f32 %v2963_v3, %v2933_v46  ;;  %v2460_v48 = vmul.f32 %v10048_v25, %v10047_v53  ;;  %v2532_v3 = vmul.f32 %v10060_v37, %v10059_v12 }
 0x897   : > { %v2968_v23 = vadd.f32 %v2962_v20, %v2932_v4  ;;  %v3769_v50 = vsel %vm701_vm3, %v8766_v28, -inf  ;;  %v10049_v4 = vld [vmem:[#allocation4_spill] sm:$0xff] }
 0x898   : > { %3767 = vmax.xlane.f32.xlu2 %v3766_v31  ;;  %v8803_v0 = vadd.f32 %v3018_v6, %v2969_v30  ;;  %v10050_v20 = vld [vmem:[#allocation32_spill] sm:$0xff]  ;;  %v10053_v31 = vld [vmem:[#allocation51_spill] sm:$0xff]  ;;  %v10063_v30 = vld [vmem:[#allocation2_spill] sm:$0xff] }
 0x899   : > { %v8761_v52 = vadd.f32 %v3016_v11, %v2968_v23  ;;  %v2461_v15 = vmul.f32 %v10050_v20, %v10049_v4  ;;  %v2430_v23 = vmul.f32 %v10052_v34, %v10051_v26  ;;  %v10054_v11 = vld [vmem:[#allocation24_spill] sm:$0xff]  ;;  %v10070_v4 = vld [vmem:[#allocation11_spill] sm:$0xff] }
 0x89a   : > { %3030 = vmax.xlane.f32.xlu1 %v3029_v2  ;;  %v3035_v41 = vsel %vm701_vm3, %v8803_v0, -inf  ;;  %v2431_v33 = vmul.f32 %v10054_v11, %v10053_v31  ;;  %v10057_v2 = vld [vmem:[#allocation100_spill] sm:$0xff]  ;;  %v10072_v31 = vld [vmem:[#allocation13_spill] sm:$0xff] }
 0x89b   : > { %v3032_v58 = vsel %vm701_vm3, %v8761_v52, -inf  ;;  %v2497_v29 = vmul.f32 %v10058_v38, %v10057_v2  ;;  %v8853_v38 = vld [vmem:[%s9362_s4 + $0x178] sm:$0xf] }
 0x89c   : > { %3033 = vmax.xlane.f32.xlu0 %v3032_v58  ;;  %v2466_v58 = vadd.f32 %v2460_v48, %v2430_v23  ;;  %v2467_v40 = vadd.f32 %v2461_v15, %v2431_v33  ;;  %v10069_v48 = vld [vmem:[#allocation61_spill] sm:$0xff]  ;;  %v5518_v15 = vld [vmem:[%s9362_s4 + $0x140] sm:$0xff] }
 0x89d   : > { %v3515_v44 = vpop.permute.xlu1 %3514  ;;  %v8801_v36 = vpop.permute.xlu2 %2809  ;;  %v2640_v20 = vmul.f32 %v10070_v4, %v10069_v48  ;;  %v10071_v23 = vld [vmem:[#allocation25_spill] sm:$0xff]  ;;  %v10082_v48 = vld [vmem:[#allocation62_spill] sm:$0xff]  ;;  %v5522_v4 = vld [vmem:[%s9362_s4 + $0x170] sm:$0xff] }
 0x89e   : > { %v3522_v19 = vmul.f32 %v8782_v24, %v3515_v44  ;;  %v10061_v44 = vld [vmem:[#allocation17_spill] sm:$0xff]  ;;  %v2605_v11 = vmul.f32 %v10072_v31, %v10071_v23  ;;  %v10083_v31 = vld [vmem:[#allocation83_spill] sm:$0xff] }
 0x8a0   : > { %v3528_v27 = vadd.f32 %v3522_v19, %v3492_v42  ;;  %3770 = vmax.xlane.f32.xlu2 %v3769_v50  ;;  %v2533_v42 = vmul.f32 %v10062_v22, %v10061_v44  ;;  %v2502_v19 = vadd.f32 %v2496_v21, %v2466_v58  ;;  %v2503_v50 = vadd.f32 %v2497_v29, %v2467_v40  ;;  %v5519_v21 = vld [vmem:[%s9363_s5 + $0x140] sm:$0xff]  ;;  %v10074_v58 = vld [vmem:[#allocation15_spill] sm:$0xff] }
 0x8a2   : > { %v3564_v63 = vadd.f32 %v3558_v43, %v3528_v27  ;;  %3773 = vmax.xlane.f32.xlu1 %v3772_v57  ;;  %v10064_v43 = vld [vmem:[#allocation44_spill] sm:$0xff]  ;;  %v2538_v57 = vadd.f32 %v2532_v3, %v2502_v19  ;;  %v2539_v6 = vadd.f32 %v2533_v42, %v2503_v50  ;;  %v5521_v3 = vld [vmem:[%s9363_s5 + $0x178] sm:$0xf]  ;;  %v10076_v19 = vld [vmem:[#allocation14_spill] sm:$0xff] }
 0x8a3   : > { %v2568_v27 = vmul.f32 %v10064_v43, %v10063_v30  ;;  %v10075_v42 = vld [vmem:[#allocation20_spill] sm:$0xff]  ;;  %v10077_v30 = vld [vmem:[#allocation78_spill] sm:$0xff] }
 0x8a4   : > { %v3600_v61 = vadd.f32 %v3594_v14, %v3564_v63  ;;  %v10065_v14 = vld [vmem:[#allocation29_spill] sm:$0xff]  ;;  %v10066_v63 = vld [vmem:[#allocation7_spill] sm:$0xff]  ;;  %v2676_v50 = vmul.f32 %v10076_v19, %v10075_v42  ;;  %v10078_v43 = vld [vmem:[#allocation16_spill] sm:$0xff] }
 0x8a5   : > { %v2604_v35 = vmul.f32 %v10066_v63, %v10065_v14  ;;  %v2574_v25 = vadd.f32 %v2568_v27, %v2538_v57  ;;  %v2677_v27 = vmul.f32 %v10078_v43, %v10077_v30  ;;  %v10079_v57 = vld [vmem:[#allocation96_spill] sm:$0xff]  ;;  %v10086_v19 = vld [vmem:[#allocation77_spill] sm:$0xff] }
 0x8a6   : > { %v3583_v8 = vpop.permute.xlu1 %3582  ;;  %v3636_v49 = vadd.f32 %v3630_v55, %v3600_v61  ;;  %v3655_v1 = vpop.permute.xlu2 %3654  ;;  %v10067_v61 = vld [vmem:[#allocation37_spill] sm:$0xff] }
 0x8a7   : > { %v3758_v55 = vpop.f32.mrf.mxu2  ;;  %v3593_v26 = vmul.f32 %v5518_v15, %v3583_v8  ;;  %v2610_v33 = vadd.f32 %v2604_v35, %v2574_v25  ;;  %v10073_v8 = vld [vmem:[#allocation81_spill] sm:$0xff] }
 0x8a8   : > { %3036 = vmax.xlane.f32.xlu2 %v3035_v41  ;;  %v10068_v41 = vld [vmem:[#allocation12_spill] sm:$0xff]  ;;  %v2641_v40 = vmul.f32 %v10074_v58, %v10073_v8  ;;  %v2820_v8 = vmul.f32 %v8723_v59, %v8801_v36 }
 0x8a9   : > { %v2569_v53 = vmul.f32 %v10068_v41, %v10067_v61  ;;  %v2646_v12 = vadd.f32 %v2640_v20, %v2610_v33  ;;  %v3599_v37 = vadd.f32 %v3593_v26, %v8735_v17  ;;  %v10081_v41 = vld [vmem:[#allocation92_spill] sm:$0xff]  ;;  %v3665_v20 = vmul.f32 %v5522_v4, %v3655_v1 }
 0x8ab   : > { %v2575_v34 = vadd.f32 %v2569_v53, %v2539_v6  ;;  %v10080_v6 = vld [vmem:[#allocation22_spill] sm:$0xff]  ;;  %v2682_v17 = vadd.f32 %v2676_v50, %v2646_v12  ;;  %v2748_v53 = vmul.f32 %v8702_v51, %v10081_v41  ;;  %v2856_v50 = vmul.f32 %v5518_v15, %v10086_v19 }
 0x8ac   : > { %v2712_v14 = vmul.f32 %v10080_v6, %v10079_v57  ;;  %v2893_v15 = vmul.f32 %v8808_v60, %v8635_v13  ;;  %v10087_v60 = vld [vmem:[#allocation104_spill] sm:$0xff] }
 0x8ae   : > { %v3619_v5 = vpop.permute.xlu1 %3618  ;;  %v2718_v23 = vadd.f32 %v2712_v14, %v2682_v17 }
 0x8af   : > { %v8826_v56 = vpop.permute.xlu2 %2849  ;;  %v3629_v2 = vmul.f32 %v5519_v21, %v3619_v5  ;;  %v2611_v5 = vadd.f32 %v2605_v11, %v2575_v34  ;;  %v3760_v25 = vpop.f32.mrf.mxu2  ;;  %v2784_v11 = vmul.f32 %v8714_v10, %v10083_v31  ;;  %v10089_v31 = vld [vmem:[#allocation6_spill] sm:$0xff] }
 0x8b1   : > { %v3635_v63 = vadd.f32 %v3629_v2, %v3599_v37  ;;  %v2647_v61 = vadd.f32 %v2641_v40, %v2611_v5 }
 0x8b3   : > { %v2683_v34 = vadd.f32 %v2677_v27, %v2647_v61 }
 0x8b7   : > { %v8828_v46 = vpop.permute.xlu1 %2813 }
 0x8b8   : > { %v3695_v16 = vpop.permute.xlu2 %3694  ;;  %v2821_v5 = vmul.f32 %v8790_v62, %v8828_v46 }
 0x8b9   : > { %v3702_v44 = vmul.f32 %v5521_v3, %v3695_v16  ;;  %v10084_v16 = vld [vmem:[#allocation91_spill] sm:$0xff] }
 0x8ba   : > { %v2749_v51 = vmul.f32 %v8771_v39, %v10084_v16 }
 0x8c0   : > { %v3659_v18 = vpop.permute.xlu1 %3658 }
 0x8c1   : > { %v3666_v29 = vmul.f32 %v8853_v38, %v3659_v18  ;;  %v3671_v18 = vadd.f32 %v3665_v20, %v3635_v63  ;;  %v2918_v59 = vpop.permute.xlu2 %2917  ;;  %v3021_v63 = vpop.f32.mrf.mxu0 }
 0x8c2   : > { %v2928_v6 = vmul.f32 %v5522_v4, %v2918_v59 }
 0x8c3   : > { %v3672_v22 = vadd.f32 %v3666_v29, %v3636_v49  ;;  %v2713_v49 = vmul.f32 %v8751_v47, %v10082_v48  ;;  %v5523_v47 = vld [vmem:[%s9363_s5 + $0x170] sm:$0xff]  ;;  %v2754_v29 = vadd.f32 %v2748_v53, %v2718_v23 }
 0x8c5   : > { %v3708_v35 = vadd.f32 %v3702_v44, %v3672_v22  ;;  %v2719_v58 = vadd.f32 %v2713_v49, %v2683_v34  ;;  %v2790_v40 = vadd.f32 %v2784_v11, %v2754_v29  ;;  %v10085_v44 = vld [vmem:[#allocation63_spill] sm:$0xff] }
 0x8c6   : > { %v2785_v22 = vmul.f32 %v8782_v24, %v10085_v44  ;;  %v2857_v24 = vmul.f32 %v8798_v7, %v8826_v56 }
 0x8c7   : > { %v8875_v26 = vadd.f32 %v3760_v25, %v3708_v35  ;;  %v2755_v12 = vadd.f32 %v2749_v51, %v2719_v58  ;;  %v2826_v39 = vadd.f32 %v2820_v8, %v2790_v40 }
 0x8c8   : > { %v3691_v33 = vpop.permute.xlu1 %3690 }
 0x8c9   : > { %v3701_v2 = vmul.f32 %v5523_v47, %v3691_v33  ;;  %v3778_v1 = vsel %vm1556_vm10, %v8875_v26, -inf  ;;  %v2791_v36 = vadd.f32 %v2785_v22, %v2755_v12  ;;  %v2862_v43 = vadd.f32 %v2856_v50, %v2826_v39  ;;  %v2958_v17 = vpop.permute.xlu2 %2957  ;;  %v3023_v4 = vpop.f32.mrf.mxu0 }
 0x8ca   : > { %3779 = vmax.xlane.f32.xlu0 %v3778_v1  ;;  %v2965_v49 = vmul.f32 %v5521_v3, %v2958_v17 }
 0x8cb   : > { %v3707_v10 = vadd.f32 %v3701_v2, %v3671_v18  ;;  %v2827_v57 = vadd.f32 %v2821_v5, %v2791_v36 }
 0x8cd   : > { %v8888_v37 = vadd.f32 %v3758_v55, %v3707_v10  ;;  %v2954_v55 = vpop.permute.xlu0 %2953  ;;  %v2863_v35 = vadd.f32 %v2857_v24, %v2827_v57 }
 0x8ce   : > { %v2964_v62 = vmul.f32 %v5523_v47, %v2954_v55 }
 0x8cf   : > { %v3775_v42 = vsel %vm701_vm3, %v8888_v37, -inf }
 0x8d0   : > { %3776 = vmax.xlane.f32.xlu1 %v3775_v42  ;;  %v10090_v42 = vld [vmem:[#allocation106_spill] sm:$0xff] }
 0x8d1   : > { %v2882_v30 = vpop.permute.xlu1 %2881 }
 0x8d2   : > { %v2892_v27 = vmul.f32 %v5519_v21, %v2882_v30  ;;  %v2899_v21 = vadd.f32 %v2893_v15, %v2863_v35 }
 0x8d4   : > { %v2898_v14 = vadd.f32 %v2892_v27, %v2862_v43 }
 0x8d5   : > { %v3028_v34 = vpop.xlane.xlu0 %3027 }
 0x8d6   : > { %v2934_v46 = vadd.f32 %v2928_v6, %v2898_v14  ;;  %v3044_v11 = vsub.f32 %v10089_v31, %v3028_v34 }
 0x8d8   : > { %v2970_v61 = vadd.f32 %v2964_v62, %v2934_v46  ;;  %v3050_v16 = vmul.f32 1.442695, %v3044_v11 }
 0x8da   : > { %v2922_v41 = vpop.permute.xlu1 %2921  ;;  %v8901_v53 = vadd.f32 %v3021_v63, %v2970_v61 }
 0x8db   : > { %v2929_v25 = vmul.f32 %v8853_v38, %v2922_v41  ;;  %v10088_v38 = vld [vmem:[#allocation108_spill] sm:$0xff] }
 0x8dc   : > { %v3038_v48 = vsel %vm701_vm3, %v8901_v53, -inf }
 0x8dd   : > { %v2935_v7 = vadd.f32 %v2929_v25, %v2899_v21  ;;  %3039 = vmax.xlane.f32.xlu2 %v3038_v48  ;;  %v2387_v21 = vpop.f32.mrf.mxu3 }
 0x8df   : > { %v2971_v56 = vadd.f32 %v2965_v49, %v2935_v7 }
 0x8e1   : > { %v8906_v20 = vadd.f32 %v3023_v4, %v2971_v56 }
 0x8e3   : > { %v3041_v13 = vsel %vm1556_vm10, %v8906_v20, -inf }
 0x8e4   : > { %3042 = vmax.xlane.f32.xlu1 %v3041_v13 }
 0x8fd   : > { %3836 = vrot.lane.b32.xlu1 %v10087_v60, %s5561_s18 }
 0x905   : > { %v3765_v23 = vpop.xlane.xlu1 %3764  ;;  %3832 = vrot.lane.b32.xlu1 %v10088_v38, %s5561_s18 }
 0x906   : > { %v3781_v3 = vsub.f32 %v8709_v54, %v3765_v23 }
 0x908   : > { %v3787_v33 = vmul.f32 1.442695, %v3781_v3 }
 0x90a   : > { %5282 = vpow2.f32 %v3787_v33 }
 0x90b   : > { %v3768_v51 = vpop.xlane.xlu2 %3767  ;;  %5284 = vpow2.f32 %v3050_v16 }
 0x90c   : > { %v3782_v18 = vsub.f32 %v8743_v9, %v3768_v51 }
 0x90d   : > { %3095 = vrot.lane.b32.xlu1 %v10088_v38, %s5562_s28  ;;  %v3031_v47 = vpop.xlane.xlu1 %3030  ;;  %v2389_v38 = vpop.f32.mrf.mxu3 }
 0x90e   : > { %v3789_v2 = vmul.f32 1.442695, %v3782_v18  ;;  %v3045_v1 = vsub.f32 %v8745_v32, %v3031_v47 }
 0x90f   : > { %v3034_v39 = vpop.xlane.xlu0 %3033 }
 0x910   : > { %v8920_v29 = vpop.eup %5282  ;;  %5286 = vpow2.f32 %v3789_v2  ;;  %v3052_v8 = vmul.f32 1.442695, %v3045_v1  ;;  %v3046_v44 = vsub.f32 %v8761_v52, %v3034_v39 }
 0x911   : > { %v3799_v54 = vsel %vm701_vm3, %v8920_v29, 0.0  ;;  %v8924_v58 = vpop.eup %5284 }
 0x912   : > { %3800 = vadd.xlane.f32.xlu0 %v3799_v54  ;;  %5288 = vpow2.f32 %v3052_v8  ;;  %v3062_v32 = vsel %vm701_vm3, %v8924_v58, 0.0  ;;  %v3054_v22 = vmul.f32 1.442695, %v3046_v44 }
 0x913   : > { %v3771_v43 = vpop.xlane.xlu2 %3770 }
 0x914   : > { %5290 = vpow2.f32 %v3054_v22  ;;  %v3783_v57 = vsub.f32 %v8766_v28, %v3771_v43 }
 0x915   : > { %v3774_v27 = vpop.xlane.xlu1 %3773 }
 0x916   : > { %v8926_v10 = vpop.eup %5286  ;;  %v3784_v55 = vsub.f32 %v8777_v45, %v3774_v27  ;;  %v3791_v14 = vmul.f32 1.442695, %v3783_v57 }
 0x917   : > { %v3802_v9 = vsel %vm701_vm3, %v8926_v10, 0.0 }
 0x918   : > { %3803 = vadd.xlane.f32.xlu2 %v3802_v9  ;;  %v8932_v40 = vpop.eup %5288  ;;  %v3793_v6 = vmul.f32 1.442695, %v3784_v55 }
 0x919   : > { %v3065_v12 = vsel %vm701_vm3, %v8932_v40, 0.0 }
 0x91a   : > { %3063 = vadd.xlane.f32.xlu0 %v3062_v32  ;;  %v8939_v5 = vpop.eup %5290 }
 0x91b   : > { %v3068_v19 = vsel %vm701_vm3, %v8939_v5, 0.0  ;;  %v3037_v63 = vpop.xlane.xlu2 %3036 }
 0x91c   : > { %v3047_v62 = vsub.f32 %v8803_v0, %v3037_v63 }
 0x91e   : > { %v3056_v35 = vmul.f32 1.442695, %v3047_v62 }
 0x920   : > { %3066 = vadd.xlane.f32.xlu2 %v3065_v12 }
 0x92e   : > { %3099 = vrot.lane.b32.xlu0 %v10087_v60, %s5562_s28 }
 0x936   : > { %3097 = vrot.lane.b32.xlu0 %v10090_v42, %s5562_s28  ;;  %s5575_s28 = smov 24  }
 0x937   : > { %3069 = vadd.xlane.f32.xlu1 %v3068_v19 }
 0x938   : > { %3834 = vrot.lane.b32.xlu2 %v10090_v42, %s5561_s18  ;;  %s5574_s18 = smov 8  }
 0x93d   : > { %v3780_v50 = vpop.xlane.xlu0 %3779 }
 0x93e   : > { %v3786_v52 = vsub.f32 %v8875_v26, %v3780_v50 }
 0x940   : > { %v3797_v59 = vmul.f32 1.442695, %v3786_v52 }
 0x942   : > { %5292 = vpow2.f32 %v3797_v59 }
 0x943   : > { %v3777_v24 = vpop.xlane.xlu1 %3776  ;;  %5294 = vpow2.f32 %v3793_v6 }
 0x944   : > { %v3785_v26 = vsub.f32 %v8888_v37, %v3777_v24  ;;  %5296 = vpow2.f32 %v3791_v14 }
 0x946   : > { %v3795_v46 = vmul.f32 1.442695, %v3785_v26 }
 0x948   : > { %v8948_v36 = vpop.eup %5292  ;;  %5298 = vpow2.f32 %v3795_v46 }
 0x949   : > { %v3814_v30 = vsel %vm1556_vm10, %v8948_v36, 0.0  ;;  %v8956_v15 = vpop.eup %5294  ;;  %5300 = vpow2.f32 %v3056_v35 }
 0x94a   : > { %3815 = vadd.xlane.f32.xlu1 %v3814_v30  ;;  %v8958_v41 = vpop.eup %5296  ;;  %v3808_v37 = vsel %vm701_vm3, %v8956_v15, 0.0 }
 0x94b   : > { %v3805_v0 = vsel %vm701_vm3, %v8958_v41, 0.0 }
 0x94e   : > { %v8967_v49 = vpop.eup %5298 }
 0x94f   : > { %v8969_v7 = vpop.eup %5300 }
 0x950   : > { %v3040_v17 = vpop.xlane.xlu2 %3039  ;;  %v3071_v56 = vsel %vm701_vm3, %v8969_v7, 0.0 }
 0x951   : > { %v3048_v45 = vsub.f32 %v8901_v53, %v3040_v17  ;;  %v3811_v53 = vsel %vm701_vm3, %v8967_v49, 0.0 }
 0x953   : > { %v3058_v48 = vmul.f32 1.442695, %v3048_v45 }
 0x957   : > { %v3043_v61 = vpop.xlane.xlu1 %3042 }
 0x958   : > { %v3049_v28 = vsub.f32 %v8906_v20, %v3043_v61 }
 0x95a   : > { %v3060_v25 = vmul.f32 1.442695, %v3049_v28 }
 0x95c   : > { %5302 = vpow2.f32 %v3060_v25 }
 0x95d   : > { %5304 = vpow2.f32 %v3058_v48 }
 0x960   : > { %3809 = vadd.xlane.f32.xlu0 %v3808_v37 }
 0x961   : > { %3806 = vadd.xlane.f32.xlu2 %v3805_v0  ;;  %v1650_v0 = vpop.f32.mrf.mxu1 }
 0x962   : > { %v8975_v4 = vpop.eup %5302 }
 0x963   : > { %3882 = vrot.lane.b32.xlu1 %v2387_v21, %s5574_s18  ;;  %v8977_v20 = vpop.eup %5304  ;;  %v3077_v60 = vsel %vm1556_vm10, %v8975_v4, 0.0  ;;  %v2392_v21 = vpop.f32.mrf.mxu3 }
 0x964   : > { %v3074_v23 = vsel %vm701_vm3, %v8977_v20, 0.0 }
 0x968   : > { %3812 = vadd.xlane.f32.xlu0 %v3811_v53 }
 0x969   : > { %3072 = vadd.xlane.f32.xlu2 %v3071_v56  ;;  %v1652_v25 = vpop.f32.mrf.mxu1 }
 0x96f   : > { %v3837_v13 = vpop.permute.xlu1 %3836 }
 0x970   : > { %v3850_v34 = vsel %vm1637_vm11, %v3837_v13, 0  ;;  %3078 = vadd.xlane.f32.xlu0 %v3077_v60 }
 0x971   : > { %3857 = vmatpush.bf16.msrb.mxu3 %v3850_v34  ;;  %3075 = vadd.xlane.f32.xlu2 %v3074_v23  ;;  %v1655_v48 = vpop.f32.mrf.mxu1 }
 0x977   : > { %v3833_v2 = vpop.permute.xlu1 %3832 }
 0x985   : > { %v3801_v31 = vpop.xlane.xlu0 %3800 }
 0x989   : > { %3884 = vrot.lane.b32.xlu2 %v2389_v38, %s5574_s18 }
 0x98b   : > { %v3804_v3 = vpop.xlane.xlu2 %3803 }
 0x98c   : > { %5306 = vrcp.f32 %v3804_v3 }
 0x98d   : > { %5308 = vrcp.f32 %v3801_v31  ;;  %v3064_v33 = vpop.xlane.xlu0 %3063 }
 0x992   : > { %v5307_v16 = vpop.eup %5306 }
 0x993   : > { %v3067_v11 = vpop.xlane.xlu2 %3066  ;;  %v5309_v18 = vpop.eup %5308  ;;  %v3824_v47 = vmul.f32 %v5307_v16, %v8926_v10 }
 0x994   : > { %v3823_v1 = vmul.f32 %v5309_v18, %v8920_v29  ;;  %5310 = vrcp.f32 %v3067_v11  ;;  %v3096_v10 = vpop.permute.xlu1 %3095 }
 0x995   : > { %5312 = vrcp.f32 %v3064_v33 }
 0x996   : > { %v3829_v8 = vpack.c.bf16 %v3824_v47, %v3823_v1 }
 0x99a   : > { %v5311_v32 = vpop.eup %5310 }
 0x99b   : > { %v3835_v51 = vpop.permute.xlu2 %3834  ;;  %v5313_v39 = vpop.eup %5312  ;;  %v3087_v44 = vmul.f32 %v5311_v32, %v8932_v40 }
 0x99c   : > { %3858 = vmatpush.bf16.msrb.mxu3 %v3835_v51  ;;  %v3086_v22 = vmul.f32 %v5313_v39, %v8924_v58 }
 0x99e   : > { %v3092_v29 = vpack.c.bf16 %v3087_v44, %v3086_v22 }
 0x9a0   : > { %3859 = vmatpush.bf16.msrb.mxu3 %v3833_v2  ;;  %v3100_v54 = vpop.permute.xlu0 %3099 }
 0x9a1   : > { %v3113_v9 = vsel %vm1637_vm11, %v3100_v54, 0 }
 0x9a2   : > { %3120 = vmatpush.bf16.msra.mxu1 %v3113_v9 }
 0x9a3   : > { %4868 = vmatmul.msk.bf16.vlgmr.msrb.gmra.mxu3 %vm701_vm3, %v3829_v8 }
 0x9a8   : > { %v3098_v12 = vpop.permute.xlu0 %3097 }
 0x9a9   : > { %3121 = vmatpush.bf16.msra.mxu1 %v3098_v12 }
 0x9aa   : > { %v3070_v50 = vpop.xlane.xlu1 %3069 }
 0x9ad   : > { %3122 = vmatpush.bf16.msra.mxu1 %v3096_v10 }
 0x9b0   : > { %4862 = vmatmul.msk.bf16.vlgmr.msra.gmra.mxu1 %vm701_vm3, %v3092_v29 }
 0x9bd   : > { %v3816_v55 = vpop.xlane.xlu1 %3815 }
 0x9d3   : > { %v3810_v42 = vpop.xlane.xlu0 %3809 }
 0x9d4   : > { %5314 = vrcp.f32 %v3810_v42  ;;  %v3807_v19 = vpop.xlane.xlu2 %3806 }
 0x9d5   : > { %5316 = vrcp.f32 %v3807_v19  ;;  %v3883_v18 = vpop.permute.xlu1 %3882 }
 0x9d6   : > { %5318 = vrcp.f32 %v3070_v50  ;;  %v3948_v47 = vsel %vm1498_vm4, %v1650_v0, %v3883_v18  ;;  %v5577_v0 = vmov 32.0  }
 0x9da   : > { %v5315_v52 = vpop.eup %5314 }
 0x9db   : > { %v5317_v59 = vpop.eup %5316  ;;  %v3813_v30 = vpop.xlane.xlu0 %3812  ;;  %v3826_v43 = vmul.f32 %v5315_v52, %v8956_v15 }
 0x9dc   : > { %v3073_v27 = vpop.xlane.xlu2 %3072  ;;  %v3825_v40 = vmul.f32 %v5317_v59, %v8958_v41  ;;  %v5319_v57 = vpop.eup %5318 }
 0x9dd   : > { %5320 = vrcp.f32 %v3073_v27  ;;  %v3088_v14 = vmul.f32 %v5319_v57, %v8939_v5 }
 0x9de   : > { %v3830_v58 = vpack.c.bf16 %v3826_v43, %v3825_v40  ;;  %5322 = vrcp.f32 %v3813_v30 }
 0x9df   : > { %5324 = vrcp.f32 %v3816_v55 }
 0x9e0   : > { %4869 = vmatmul.msk.bf16.gmra.mxu3 %vm701_vm3, %v3830_v58 }
 0x9e3   : > { %v5321_v6 = vpop.eup %5320  ;;  %v3079_v63 = vpop.xlane.xlu0 %3078 }
 0x9e4   : > { %v3089_v24 = vmul.f32 %v5321_v6, %v8969_v7  ;;  %v3076_v26 = vpop.xlane.xlu2 %3075  ;;  %v5323_v46 = vpop.eup %5322  ;;  %5326 = vrcp.f32 %v3079_v63 }
 0x9e5   : > { %v5325_v35 = vpop.eup %5324  ;;  %5328 = vrcp.f32 %v3076_v26  ;;  %v3827_v61 = vmul.f32 %v5323_v46, %v8967_v49  ;;  %v2394_v7 = vpop.f32.mrf.mxu3 }
 0x9e6   : > { %v3093_v62 = vpack.c.bf16 %v3089_v24, %v3088_v14  ;;  %v3828_v15 = vmul.f32 %v5325_v35, %v8948_v36  ;;  %v9004_v49 = vpop.f32.mrf.mxu1  ;;  %5330 = vrcp.f32 %v5577_v0 }
 0x9e8   : > { %4863 = vmatmul.msk.bf16.gmra.mxu1 %vm701_vm3, %v3093_v62  ;;  %v3831_v41 = vpack.c.bf16 %v3828_v15, %v3827_v61 }
 0x9ea   : > { %v5327_v17 = vpop.eup %5326 }
 0x9eb   : > { %v5329_v28 = vpop.eup %5328  ;;  %v3091_v45 = vmul.f32 %v5327_v17, %v8975_v4 }
 0x9ec   : > { %v3090_v5 = vmul.f32 %v5329_v28, %v8977_v20  ;;  %v3885_v1 = vpop.permute.xlu2 %3884 }
 0x9ed   : > { %v2397_v36 = vpop.f32.mrf.mxu3  ;;  %v3949_v12 = vsel %vm1498_vm4, %v1652_v25, %v3885_v1 }
 0x9ee   : > { %v3094_v37 = vpack.c.bf16 %v3091_v45, %v3090_v5  ;;  %v9006_v53 = vpop.f32.mrf.mxu1 }
 0x9f0   : > { %4870 = vmatmul.msk.bf16.gmra.mxu3 %vm701_vm3, %v3831_v41 }
 0x9f5   : > { %v2399_v56 = vpop.f32.mrf.mxu3 }
 0x9f6   : > { %v9008_v13 = vpop.f32.mrf.mxu1 }
 0x9f8   : > { %4864 = vmatmul.msk.bf16.gmra.mxu1 %vm701_vm3, %v3094_v37 }
 0xa26   : > { %v3861_v60 = vpop.f32.mrf.mxu3 }
 0xa27   : > { %3930 = vrot.lane.b32.xlu1 %v3861_v60, %s5575_s28 }
 0xa2d   : > { %v3124_v4 = vpop.f32.mrf.mxu1 }
 0xa2e   : > { %v3863_v20 = vpop.f32.mrf.mxu3  ;;  %3906 = vrot.lane.b32.xlu0 %v3124_v4, %s5576_s19 }
 0xa2f   : > { %3888 = vrot.lane.b32.xlu1 %v2394_v7, %s5574_s18  ;;  %3932 = vrot.lane.b32.xlu2 %v3863_v20, %s5575_s28 }
 0xa35   : > { %v3126_v34 = vpop.f32.mrf.mxu1 }
 0xa36   : > { %3908 = vrot.lane.b32.xlu0 %v3126_v34, %s5576_s19 }
 0xa3e   : > { %3886 = vrot.lane.b32.xlu0 %v2392_v21, %s5574_s18  ;;  %v5331_v21 = vpop.eup %5330 }
 0xa3f   : > { %v3990_v25 = vmul.f32 32.0, %v5331_v21  ;;  %vm3994_vm15 = vweird.f32 %v5331_v21 }
 0xa63   : > { %v3866_v23 = vpop.f32.mrf.mxu3 }
 0xa64   : > { %3934 = vrot.lane.b32.xlu1 %v3866_v23, %s5575_s28 }
 0xa65   : > { %v3129_v38 = vpop.f32.mrf.mxu1 }
 0xa66   : > { %3910 = vrot.lane.b32.xlu2 %v3129_v38, %s5576_s19 }
 0xa6b   : > { %v3868_v3 = vpop.f32.mrf.mxu3 }
 0xa6c   : > { %3892 = vrot.lane.b32.xlu1 %v2399_v56, %s5574_s18 }
 0xa6d   : > { %v3131_v31 = vpop.f32.mrf.mxu1 }
 0xa6e   : > { %3912 = vrot.lane.b32.xlu0 %v3131_v31, %s5576_s19  ;;  %3936 = vrot.lane.b32.xlu2 %v3868_v3, %s5575_s28 }
 0xa73   : > { %v3871_v11 = vpop.f32.mrf.mxu3 }
 0xa74   : > { %3938 = vrot.lane.b32.xlu1 %v3871_v11, %s5575_s28 }
 0xa75   : > { %v3134_v33 = vpop.f32.mrf.mxu1 }
 0xa76   : > { %3890 = vrot.lane.b32.xlu0 %v2397_v36, %s5574_s18  ;;  %3914 = vrot.lane.b32.xlu2 %v3134_v33, %s5576_s19 }
 0xa7b   : > { %v3873_v16 = vpop.f32.mrf.mxu3 }
 0xa7d   : > { %v3136_v51 = vpop.f32.mrf.mxu1 }
 0xa7e   : > { %3940 = vrot.lane.b32.xlu2 %v3873_v16, %s5575_s28  ;;  %3916 = vrot.lane.b32.xlu0 %v3136_v51, %s5576_s19 }
 0xa89   : > { %v3933_v44 = vpop.permute.xlu2 %3932 }
 0xa99   : > { %v3931_v8 = vpop.permute.xlu1 %3930 }
 0xaa0   : > { %v3907_v2 = vpop.permute.xlu0 %3906 }
 0xaa1   : > { %v3955_v54 = vsel %vm3954_vm12, %v3948_v47, %v3907_v2  ;;  %v3889_v42 = vpop.permute.xlu1 %3888 }
 0xaa2   : > { %v3962_v9 = vsel %vm3961_vm13, %v3955_v54, %v3931_v8  ;;  %v3951_v58 = vsel %vm1498_vm4, %v9004_v49, %v3889_v42 }
 0xaa3   : > { %v3970_v32 = vsel %vm548_vm0, %v3962_v9, 0.0 }
 0xaa8   : > { %3971 = vadd.xlane.f32.xlu0 %v3970_v32  ;;  %v3909_v39 = vpop.permute.xlu0 %3908 }
 0xaa9   : > { %v3956_v10 = vsel %vm3954_vm12, %v3949_v12, %v3909_v39 }
 0xaaa   : > { %v3963_v22 = vsel %vm3961_vm13, %v3956_v10, %v3933_v44 }
 0xaab   : > { %v3973_v29 = vsel %vm548_vm0, %v3963_v22, 0.0 }
 0xaac   : > { %3974 = vadd.xlane.f32.xlu1 %v3973_v29 }
 0xab0   : > { %v3887_v19 = vpop.permute.xlu0 %3886 }
 0xab1   : > { %v3950_v52 = vsel %vm1498_vm4, %v1655_v48, %v3887_v19  ;;  %v3991_v48 = vsub.f32 1.0, %v3990_v25 }
 0xab3   : > { %v3992_v7 = vmul.f32 %v5331_v21, %v3991_v48 }
 0xab5   : > { %v3993_v49 = vadd.f32 %v5331_v21, %v3992_v7  ;;  %v5525_v7 = vld [vmem:[%s5691_s20 + $0x8] sm:$0xff] }
 0xab7   : > { %v9041_v36 = vsel %vm3994_vm15, %v5331_v21, %v3993_v49 }
 0xac0   : > { %v3911_v50 = vpop.permute.xlu2 %3910 }
 0xac1   : > { %v3957_v59 = vsel %vm3954_vm12, %v3950_v52, %v3911_v50 }
 0xac8   : > { %v3937_v40 = vpop.permute.xlu2 %3936 }
 0xad0   : > { %v3915_v63 = vpop.permute.xlu2 %3914 }
 0xad6   : > { %v3935_v30 = vpop.permute.xlu1 %3934 }
 0xad7   : > { %v3964_v43 = vsel %vm3961_vm13, %v3957_v59, %v3935_v30 }
 0xad8   : > { %v3976_v27 = vsel %vm548_vm0, %v3964_v43, 0.0  ;;  %v3941_v28 = vpop.permute.xlu2 %3940 }
 0xad9   : > { %3977 = vadd.xlane.f32.xlu2 %v3976_v27 }
 0xade   : > { %v3893_v55 = vpop.permute.xlu1 %3892 }
 0xadf   : > { %v3953_v17 = vsel %vm1498_vm4, %v9008_v13, %v3893_v55 }
 0xae0   : > { %v3913_v57 = vpop.permute.xlu0 %3912 }
 0xae1   : > { %v3958_v6 = vsel %vm3954_vm12, %v3951_v58, %v3913_v57 }
 0xae2   : > { %v3965_v14 = vsel %vm3961_vm13, %v3958_v6, %v3937_v40 }
 0xae3   : > { %v3979_v24 = vsel %vm548_vm0, %v3965_v14, 0.0 }
 0xae4   : > { %3980 = vadd.xlane.f32.xlu2 %v3979_v24 }
 0xae6   : > { %v3939_v46 = vpop.permute.xlu1 %3938 }
 0xae8   : > { %v3891_v26 = vpop.permute.xlu0 %3890 }
 0xae9   : > { %v3952_v62 = vsel %vm1498_vm4, %v9006_v53, %v3891_v26 }
 0xaea   : > { %v3959_v35 = vsel %vm3954_vm12, %v3952_v62, %v3915_v63  ;;  %v9080_v62 = vld [vmem:[%s9364_s6] ss:$0 sm:$0xff] }
 0xaeb   : > { %v3966_v61 = vsel %vm3961_vm13, %v3959_v35, %v3939_v46 }
 0xaec   : > { %v3982_v15 = vsel %vm548_vm0, %v3966_v61, 0.0 }
 0xaed   : > { %3983 = vadd.xlane.f32.xlu0 %v3982_v15  ;;  %v9085_v15 = vld [vmem:[%s9365_s7] ss:$0 sm:$0xff] }
 0xaf0   : > { %v3917_v41 = vpop.permute.xlu0 %3916 }
 0xaf1   : > { %v3960_v5 = vsel %vm3954_vm12, %v3953_v17, %v3917_v41 }
 0xaf2   : > { %v3967_v45 = vsel %vm3961_vm13, %v3960_v5, %v3941_v28 }
 0xaf3   : > { %v3986_v37 = vsel %vm3985_vm14, %v3967_v45, 0.0 }
 0xaf4   : > { %3987 = vadd.xlane.f32.xlu1 %v3986_v37  ;;  %v5524_v37 = vld [vmem:[%s5691_s20] sm:$0xff] }
 0xb1b   : > { %v3972_v53 = vpop.xlane.xlu0 %3971 }
 0xb1c   : > { %v3996_v56 = vmul.f32 %v9041_v36, %v3972_v53 }
 0xb1e   : > { %v4002_v13 = vsub.f32 %v3962_v9, %v3996_v56 }
 0xb1f   : > { %v3975_v60 = vpop.xlane.xlu1 %3974 }
 0xb20   : > { %v3997_v4 = vmul.f32 %v9041_v36, %v3975_v60  ;;  %v4008_v20 = vmul.f32 %v4002_v13, %v4002_v13 }
 0xb22   : > { %v9045_v34 = vsub.f32 %v3963_v22, %v3997_v4  ;;  %v4014_v23 = vsel %vm548_vm0, %v4008_v20, 0.0 }
 0xb23   : > { %4015 = vadd.xlane.f32.xlu2 %v4014_v23 }
 0xb24   : > { %v4009_v38 = vmul.f32 %v9045_v34, %v9045_v34 }
 0xb26   : > { %v4017_v3 = vsel %vm548_vm0, %v4009_v38, 0.0 }
 0xb27   : > { %4018 = vadd.xlane.f32.xlu0 %v4017_v3 }
 0xb4c   : > { %v3978_v31 = vpop.xlane.xlu2 %3977 }
 0xb4d   : > { %v3998_v11 = vmul.f32 %v9041_v36, %v3978_v31 }
 0xb4f   : > { %v9052_v33 = vsub.f32 %v3964_v43, %v3998_v11 }
 0xb51   : > { %v4010_v16 = vmul.f32 %v9052_v33, %v9052_v33 }
 0xb53   : > { %v4020_v51 = vsel %vm548_vm0, %v4010_v16, 0.0 }
 0xb54   : > { %4021 = vadd.xlane.f32.xlu1 %v4020_v51 }
 0xb57   : > { %v3981_v18 = vpop.xlane.xlu2 %3980 }
 0xb58   : > { %v3999_v47 = vmul.f32 %v9041_v36, %v3981_v18 }
 0xb5a   : > { %v9058_v2 = vsub.f32 %v3965_v14, %v3999_v47 }
 0xb5c   : > { %v4011_v1 = vmul.f32 %v9058_v2, %v9058_v2 }
 0xb5e   : > { %v4023_v54 = vsel %vm548_vm0, %v4011_v1, 0.0 }
 0xb5f   : > { %4024 = vadd.xlane.f32.xlu2 %v4023_v54 }
 0xb60   : > { %v3984_v8 = vpop.xlane.xlu0 %3983 }
 0xb61   : > { %v4000_v9 = vmul.f32 %v9041_v36, %v3984_v8 }
 0xb63   : > { %v9064_v32 = vsub.f32 %v3966_v61, %v4000_v9 }
 0xb65   : > { %v4012_v12 = vmul.f32 %v9064_v32, %v9064_v32 }
 0xb67   : > { %v3988_v39 = vpop.xlane.xlu1 %3987  ;;  %v4026_v44 = vsel %vm548_vm0, %v4012_v12, 0.0 }
 0xb68   : > { %v4001_v10 = vmul.f32 %v9041_v36, %v3988_v39  ;;  %4027 = vadd.xlane.f32.xlu0 %v4026_v44 }
 0xb6a   : > { %v9070_v22 = vsub.f32 %v3967_v45, %v4001_v10 }
 0xb6c   : > { %v4013_v29 = vmul.f32 %v9070_v22, %v9070_v22 }
 0xb6e   : > { %v4029_v42 = vsel %vm3985_vm14, %v4013_v29, 0.0 }
 0xb6f   : > { %4030 = vadd.xlane.f32.xlu1 %v4029_v42 }
 0xb96   : > { %v4016_v19 = vpop.xlane.xlu2 %4015 }
 0xb97   : > { %v4032_v50 = vmul.f32 %v4016_v19, %v9041_v36 }
 0xb99   : > { %v4038_v52 = vadd.f32 1e-05, %v4032_v50  ;;  %v5526_v50 = vld [vmem:[%s5691_s20 + $0x10] sm:$0xff] }
 0xb9a   : > { %v4019_v59 = vpop.xlane.xlu0 %4018 }
 0xb9b   : > { %5332 = vrsqrt.f32 %v4038_v52  ;;  %v4033_v30 = vmul.f32 %v4019_v59, %v9041_v36  ;;  %vm4050_vm2 = vweird.f32 %v4038_v52 }
 0xb9d   : > { %v4039_v43 = vadd.f32 1e-05, %v4033_v30 }
 0xb9f   : > { %5334 = vrsqrt.f32 %v4039_v43  ;;  %vm4060_vm5 = vweird.f32 %v4039_v43 }
 0xba1   : > { %v5333_v27 = vpop.eup %5332 }
 0xba2   : > { %v4045_v40 = vmul.f32 %v5333_v27, %v4038_v52  ;;  %vm4051_vm1 = vweird.f32 %v5333_v27 }
 0xba3   : > { %vm4052_vm3 = vmor %vm4050_vm2, %vm4051_vm1 }
 0xba4   : > { %v4046_v58 = vmul.f32 %v5333_v27, %v4045_v40 }
 0xba5   : > { %v5335_v55 = vpop.eup %5334 }
 0xba6   : > { %v4047_v57 = vmul.f32 0.5, %v4046_v58  ;;  %v4055_v6 = vmul.f32 %v5335_v55, %v4039_v43  ;;  %vm4061_vm4 = vweird.f32 %v5335_v55 }
 0xba7   : > { %vm4062_vm6 = vmor %vm4060_vm5, %vm4061_vm4 }
 0xba8   : > { %v4048_v14 = vsub.f32 1.5, %v4047_v57  ;;  %v4056_v24 = vmul.f32 %v5335_v55, %v4055_v6 }
 0xbaa   : > { %v4049_v63 = vmul.f32 %v5333_v27, %v4048_v14  ;;  %v4057_v26 = vmul.f32 0.5, %v4056_v24 }
 0xbac   : > { %v4053_v46 = vsel %vm4052_vm3, %v5333_v27, %v4049_v63  ;;  %v4058_v35 = vsub.f32 1.5, %v4057_v26 }
 0xbad   : > { %v4104_v61 = vmul.f32 %v4053_v46, %v4002_v13 }
 0xbae   : > { %v4059_v17 = vmul.f32 %v5335_v55, %v4058_v35  ;;  %v5527_v35 = vld [vmem:[%s5691_s20 + $0x18] sm:$0xff] }
 0xbaf   : > { %v4113_v41 = vmul.f32 %v9080_v62, %v4104_v61 }
 0xbb0   : > { %v4063_v28 = vsel %vm4062_vm6, %v5335_v55, %v4059_v17 }
 0xbb1   : > { %v4122_v5 = vadd.f32 %v9085_v15, %v4113_v41  ;;  %v4105_v45 = vmul.f32 %v4063_v28, %v9045_v34 }
 0xbb3   : > { %v9091_v0 = vadd.f32 %v5524_v37, %v4122_v5  ;;  %v4114_v21 = vmul.f32 %v9080_v62, %v4105_v45 }
 0xbb5   : > { %v4136_v25 = vsel %vm548_vm0, %v9091_v0, 0.0  ;;  %v4123_v48 = vadd.f32 %v9085_v15, %v4114_v21 }
 0xbb6   : > { %4137 = vadd.xlane.f32.xlu2 %v4136_v25 }
 0xbb7   : > { %v9098_v49 = vadd.f32 %v5525_v7, %v4123_v48  ;;  %v5528_v7 = vld [vmem:[%s5691_s20 + $0x20] sm:$0xff] }
 0xbb9   : > { %v4139_v53 = vsel %vm548_vm0, %v9098_v49, 0.0 }
 0xbba   : > { %4140 = vadd.xlane.f32.xlu0 %v4139_v53 }
 0xbc7   : > { %v4022_v56 = vpop.xlane.xlu1 %4021 }
 0xbc8   : > { %v4034_v13 = vmul.f32 %v4022_v56, %v9041_v36 }
 0xbca   : > { %v4040_v60 = vadd.f32 1e-05, %v4034_v13 }
 0xbcc   : > { %5336 = vrsqrt.f32 %v4040_v60  ;;  %vm4070_vm8 = vweird.f32 %v4040_v60 }
 0xbd2   : > { %v5337_v4 = vpop.eup %5336  ;;  %v4025_v20 = vpop.xlane.xlu2 %4024 }
 0xbd3   : > { %v4065_v34 = vmul.f32 %v5337_v4, %v4040_v60  ;;  %v4035_v23 = vmul.f32 %v4025_v20, %v9041_v36  ;;  %vm4071_vm7 = vweird.f32 %v5337_v4 }
 0xbd4   : > { %vm4072_vm9 = vmor %vm4070_vm8, %vm4071_vm7 }
 0xbd5   : > { %v4066_v38 = vmul.f32 %v5337_v4, %v4065_v34  ;;  %v4041_v3 = vadd.f32 1e-05, %v4035_v23 }
 0xbd7   : > { %v4067_v31 = vmul.f32 0.5, %v4066_v38  ;;  %5338 = vrsqrt.f32 %v4041_v3  ;;  %vm4080_vm11 = vweird.f32 %v4041_v3 }
 0xbd9   : > { %v4068_v11 = vsub.f32 1.5, %v4067_v31 }
 0xbdb   : > { %v4069_v16 = vmul.f32 %v5337_v4, %v4068_v11  ;;  %v4028_v51 = vpop.xlane.xlu0 %4027 }
 0xbdc   : > { %v4036_v18 = vmul.f32 %v4028_v51, %v9041_v36 }
 0xbdd   : > { %v5339_v47 = vpop.eup %5338  ;;  %v4073_v1 = vsel %vm4072_vm9, %v5337_v4, %v4069_v16  ;;  %v5529_v4 = vld [vmem:[%s5691_s20 + $0x28] sm:$0xf] }
 0xbde   : > { %v4075_v54 = vmul.f32 %v5339_v47, %v4041_v3  ;;  %v4042_v8 = vadd.f32 1e-05, %v4036_v18  ;;  %v4106_v9 = vmul.f32 %v4073_v1, %v9052_v33  ;;  %vm4081_vm10 = vweird.f32 %v5339_v47 }
 0xbdf   : > { %vm4082_vm12 = vmor %vm4080_vm11, %vm4081_vm10 }
 0xbe0   : > { %v4076_v12 = vmul.f32 %v5339_v47, %v4075_v54  ;;  %5340 = vrsqrt.f32 %v4042_v8  ;;  %v4115_v39 = vmul.f32 %v9080_v62, %v4106_v9  ;;  %vm4090_vm15 = vweird.f32 %v4042_v8 }
 0xbe2   : > { %v4077_v44 = vmul.f32 0.5, %v4076_v12  ;;  %v4031_v10 = vpop.xlane.xlu1 %4030  ;;  %v4124_v29 = vadd.f32 %v9085_v15, %v4115_v39 }
 0xbe3   : > { %v4037_v42 = vmul.f32 %v4031_v10, %v9041_v36 }
 0xbe4   : > { %v4078_v19 = vsub.f32 1.5, %v4077_v44  ;;  %v9110_v52 = vadd.f32 %v5526_v50, %v4124_v29 }
 0xbe5   : > { %v4043_v59 = vadd.f32 1e-05, %v4037_v42 }
 0xbe6   : > { %v5341_v30 = vpop.eup %5340  ;;  %v4079_v43 = vmul.f32 %v5339_v47, %v4078_v19  ;;  %v4142_v33 = vsel %vm548_vm0, %v9110_v52, 0.0 }
 0xbe7   : > { %v4085_v27 = vmul.f32 %v5341_v30, %v4042_v8  ;;  %5342 = vrsqrt.f32 %v4043_v59  ;;  %4143 = vadd.xlane.f32.xlu1 %v4142_v33  ;;  %vm4091_vm13 = vweird.f32 %v5341_v30  ;;  %vm4100_vm3 = vweird.f32 %v4043_v59  ;;  %v4923_v33 = vld [vmem:[%s9368_s10 + $0x8] sm:$0xff] }
 0xbe8   : > { %v4083_v40 = vsel %vm4082_vm12, %v5339_v47, %v4079_v43  ;;  %vm4092_vm1 = vmor %vm4090_vm15, %vm4091_vm13  ;;  %4324 = vmatpush.bf16.msrb.mxu0 %v4923_v33 }
 0xbe9   : > { %v4086_v58 = vmul.f32 %v5341_v30, %v4085_v27  ;;  %v4107_v55 = vmul.f32 %v4083_v40, %v9058_v2  ;;  %v4922_v27 = vld [vmem:[%s9368_s10] sm:$0xff] }
 0xbeb   : > { %v4087_v57 = vmul.f32 0.5, %v4086_v58  ;;  %v4116_v6 = vmul.f32 %v9080_v62, %v4107_v55 }
 0xbec   : > { %4325 = vmatpush.bf16.msrb.mxu0 %v4922_v27 }
 0xbed   : > { %v5343_v14 = vpop.eup %5342  ;;  %v4088_v24 = vsub.f32 1.5, %v4087_v57  ;;  %v4125_v63 = vadd.f32 %v9085_v15, %v4116_v6 }
 0xbee   : > { %v4095_v26 = vmul.f32 %v5343_v14, %v4043_v59  ;;  %vm4101_vm2 = vweird.f32 %v5343_v14 }
 0xbef   : > { %v4089_v46 = vmul.f32 %v5341_v30, %v4088_v24  ;;  %v4131_v61 = vadd.f32 %v5527_v35, %v4125_v63  ;;  %vm4102_vm4 = vmor %vm4100_vm3, %vm4101_vm2 }
 0xbf0   : > { %v4096_v17 = vmul.f32 %v5343_v14, %v4095_v26 }
 0xbf1   : > { %v4093_v41 = vsel %vm4092_vm1, %v5341_v30, %v4089_v46  ;;  %v4145_v28 = vsel %vm548_vm0, %v4131_v61, 0.0 }
 0xbf2   : > { %v4097_v2 = vmul.f32 0.5, %v4096_v17  ;;  %4146 = vadd.xlane.f32.xlu2 %v4145_v28  ;;  %v4108_v5 = vmul.f32 %v4093_v41, %v9064_v32 }
 0xbf4   : > { %v4098_v45 = vsub.f32 1.5, %v4097_v2  ;;  %v4117_v37 = vmul.f32 %v9080_v62, %v4108_v5 }
 0xbf6   : > { %v4099_v21 = vmul.f32 %v5343_v14, %v4098_v45  ;;  %v4126_v25 = vadd.f32 %v9085_v15, %v4117_v37  ;;  %v9179_v37 = vld [vmem:[%s9366_s8] ss:$0 sm:$0xff] }
 0xbf8   : > { %v4103_v48 = vsel %vm4102_vm4, %v5343_v14, %v4099_v21  ;;  %v4132_v53 = vadd.f32 %v5528_v7, %v4126_v25  ;;  %v9185_v7 = vld [vmem:[%s9367_s9] ss:$0 sm:$0xff] }
 0xbf9   : > { %v4109_v56 = vmul.f32 %v4103_v48, %v9070_v22 }
 0xbfa   : > { %v4148_v13 = vsel %vm548_vm0, %v4132_v53, 0.0 }
 0xbfb   : > { %4149 = vadd.xlane.f32.xlu0 %v4148_v13  ;;  %v4118_v32 = vmul.f32 %v9080_v62, %v4109_v56 }
 0xbfd   : > { %v4127_v60 = vadd.f32 %v9085_v15, %v4118_v32 }
 0xbff   : > { %v4133_v20 = vadd.f32 %v5529_v4, %v4127_v60 }
 0xc01   : > { %v4151_v34 = vsel %vm3985_vm14, %v4133_v20, 0.0 }
 0xc02   : > { %4152 = vadd.xlane.f32.xlu1 %v4151_v34 }
 0xc29   : > { %v4138_v23 = vpop.xlane.xlu2 %4137 }
 0xc2a   : > { %v4154_v38 = vmul.f32 %v4138_v23, %v9041_v36 }
 0xc2c   : > { %v9131_v3 = vsub.f32 %v9091_v0, %v4154_v38 }
 0xc2d   : > { %v4141_v31 = vpop.xlane.xlu0 %4140 }
 0xc2e   : > { %v4155_v22 = vmul.f32 %v4141_v31, %v9041_v36  ;;  %v4166_v11 = vmul.f32 %v9131_v3, %v9131_v3 }
 0xc30   : > { %v9137_v62 = vsub.f32 %v9098_v49, %v4155_v22  ;;  %v4172_v15 = vsel %vm548_vm0, %v4166_v11, 0.0 }
 0xc31   : > { %4173 = vadd.xlane.f32.xlu2 %v4172_v15 }
 0xc32   : > { %v4167_v16 = vmul.f32 %v9137_v62, %v9137_v62 }
 0xc34   : > { %v4175_v51 = vsel %vm548_vm0, %v4167_v16, 0.0 }
 0xc35   : > { %4176 = vadd.xlane.f32.xlu0 %v4175_v51 }
 0xc5a   : > { %v4144_v0 = vpop.xlane.xlu1 %4143 }
 0xc5b   : > { %v4156_v18 = vmul.f32 %v4144_v0, %v9041_v36 }
 0xc5d   : > { %v9145_v47 = vsub.f32 %v9110_v52, %v4156_v18 }
 0xc5f   : > { %v4168_v1 = vmul.f32 %v9145_v47, %v9145_v47 }
 0xc61   : > { %v4178_v49 = vsel %vm548_vm0, %v4168_v1, 0.0 }
 0xc62   : > { %4179 = vadd.xlane.f32.xlu1 %v4178_v49 }
 0xc65   : > { %v4147_v54 = vpop.xlane.xlu2 %4146 }
 0xc66   : > { %v4157_v8 = vmul.f32 %v4147_v54, %v9041_v36 }
 0xc68   : > { %v9151_v9 = vsub.f32 %v4131_v61, %v4157_v8 }
 0xc6a   : > { %v4169_v12 = vmul.f32 %v9151_v9, %v9151_v9 }
 0xc6c   : > { %v4181_v39 = vsel %vm548_vm0, %v4169_v12, 0.0 }
 0xc6d   : > { %4182 = vadd.xlane.f32.xlu2 %v4181_v39 }
 0xc6e   : > { %v4150_v44 = vpop.xlane.xlu0 %4149 }
 0xc6f   : > { %v4158_v10 = vmul.f32 %v4150_v44, %v9041_v36 }
 0xc71   : > { %v9157_v29 = vsub.f32 %v4132_v53, %v4158_v10 }
 0xc73   : > { %v4170_v42 = vmul.f32 %v9157_v29, %v9157_v29 }
 0xc75   : > { %v4153_v19 = vpop.xlane.xlu1 %4152  ;;  %v4184_v50 = vsel %vm548_vm0, %v4170_v42, 0.0 }
 0xc76   : > { %v4159_v52 = vmul.f32 %v4153_v19, %v9041_v36  ;;  %4185 = vadd.xlane.f32.xlu0 %v4184_v50 }
 0xc78   : > { %v9163_v59 = vsub.f32 %v4133_v20, %v4159_v52 }
 0xc7a   : > { %v4171_v30 = vmul.f32 %v9163_v59, %v9163_v59 }
 0xc7c   : > { %v4187_v43 = vsel %vm3985_vm14, %v4171_v30, 0.0 }
 0xc7d   : > { %4188 = vadd.xlane.f32.xlu1 %v4187_v43 }
 0xca4   : > { %v4174_v40 = vpop.xlane.xlu2 %4173 }
 0xca5   : > { %v4190_v58 = vmul.f32 %v4174_v40, %v9041_v36 }
 0xca7   : > { %v4196_v55 = vadd.f32 1e-05, %v4190_v58 }
 0xca8   : > { %v4177_v57 = vpop.xlane.xlu0 %4176 }
 0xca9   : > { %5344 = vrsqrt.f32 %v4196_v55  ;;  %v4191_v6 = vmul.f32 %v4177_v57, %v9041_v36  ;;  %vm4208_vm6 = vweird.f32 %v4196_v55 }
 0xcab   : > { %v4197_v14 = vadd.f32 1e-05, %v4191_v6 }
 0xcad   : > { %5346 = vrsqrt.f32 %v4197_v14  ;;  %vm4218_vm9 = vweird.f32 %v4197_v14 }
 0xcaf   : > { %v5345_v24 = vpop.eup %5344 }
 0xcb0   : > { %v4203_v63 = vmul.f32 %v5345_v24, %v4196_v55  ;;  %vm4209_vm5 = vweird.f32 %v5345_v24 }
 0xcb1   : > { %vm4210_vm7 = vmor %vm4208_vm6, %vm4209_vm5 }
 0xcb2   : > { %v4204_v26 = vmul.f32 %v5345_v24, %v4203_v63 }
 0xcb3   : > { %v5347_v46 = vpop.eup %5346 }
 0xcb4   : > { %v4205_v35 = vmul.f32 0.5, %v4204_v26  ;;  %v4213_v61 = vmul.f32 %v5347_v46, %v4197_v14  ;;  %vm4219_vm8 = vweird.f32 %v5347_v46 }
 0xcb5   : > { %vm4220_vm10 = vmor %vm4218_vm9, %vm4219_vm8 }
 0xcb6   : > { %v4206_v17 = vsub.f32 1.5, %v4205_v35  ;;  %v4214_v41 = vmul.f32 %v5347_v46, %v4213_v61 }
 0xcb8   : > { %v4207_v28 = vmul.f32 %v5345_v24, %v4206_v17  ;;  %v4215_v2 = vmul.f32 0.5, %v4214_v41 }
 0xcba   : > { %v4211_v5 = vsel %vm4210_vm7, %v5345_v24, %v4207_v28  ;;  %v4216_v45 = vsub.f32 1.5, %v4215_v2 }
 0xcbb   : > { %v4262_v21 = vmul.f32 %v4211_v5, %v9131_v3 }
 0xcbc   : > { %v4217_v25 = vmul.f32 %v5347_v46, %v4216_v45 }
 0xcbd   : > { %v4271_v53 = vmul.f32 %v9179_v37, %v4262_v21 }
 0xcbe   : > { %v4221_v48 = vsel %vm4220_vm10, %v5347_v46, %v4217_v25 }
 0xcbf   : > { %v4263_v56 = vmul.f32 %v4221_v48, %v9137_v62  ;;  %v9191_v32 = vadd.f32 %v9185_v7, %v4271_v53 }
 0xcc1   : > { %v4272_v13 = vmul.f32 %v9179_v37, %v4263_v56  ;;  %v4927_v56 = vld [vmem:[%s9370_s12 + $0x18] sm:$0xff] }
 0xcc3   : > { %v9194_v60 = vadd.f32 %v9185_v7, %v4272_v13  ;;  %v4926_v13 = vld [vmem:[%s9370_s12 + $0x10] sm:$0xff] }
 0xcc5   : > { %v4286_v4 = vpack.c.bf16 %v9194_v60, %v9191_v32 }
 0xcc7   : > { %4879 = vmatmul.msk.bf16.vlgmr.msrb.gmra.mxu0 %vm548_vm0, %v4286_v4  ;;  %v4925_v4 = vld [vmem:[%s9370_s12 + $0x8] sm:$0xff] }
 0xcd5   : > { %v4180_v20 = vpop.xlane.xlu1 %4179 }
 0xcd6   : > { %v4192_v34 = vmul.f32 %v4180_v20, %v9041_v36  ;;  %v4924_v20 = vld [vmem:[%s9370_s12] sm:$0xff] }
 0xcd8   : > { %v4198_v23 = vadd.f32 1e-05, %v4192_v34  ;;  %v5230_v34 = vld [vmem:[%s9369_s11] ss:$0 sm:$0xff] }
 0xcda   : > { %5348 = vrsqrt.f32 %v4198_v23  ;;  %vm4228_vm12 = vweird.f32 %v4198_v23 }
 0xce0   : > { %v5349_v38 = vpop.eup %5348  ;;  %v4183_v3 = vpop.xlane.xlu2 %4182 }
 0xce1   : > { %v4223_v31 = vmul.f32 %v5349_v38, %v4198_v23  ;;  %v4193_v22 = vmul.f32 %v4183_v3, %v9041_v36  ;;  %vm4229_vm11 = vweird.f32 %v5349_v38 }
 0xce2   : > { %vm4230_vm13 = vmor %vm4228_vm12, %vm4229_vm11 }
 0xce3   : > { %v4224_v11 = vmul.f32 %v5349_v38, %v4223_v31  ;;  %v4199_v62 = vadd.f32 1e-05, %v4193_v22 }
 0xce5   : > { %v4225_v15 = vmul.f32 0.5, %v4224_v11  ;;  %5350 = vrsqrt.f32 %v4199_v62  ;;  %vm4238_vm1 = vweird.f32 %v4199_v62 }
 0xce7   : > { %v4226_v16 = vsub.f32 1.5, %v4225_v15 }
 0xce9   : > { %v4186_v51 = vpop.xlane.xlu0 %4185  ;;  %v4227_v1 = vmul.f32 %v5349_v38, %v4226_v16 }
 0xcea   : > { %v4194_v0 = vmul.f32 %v4186_v51, %v9041_v36 }
 0xceb   : > { %v5351_v18 = vpop.eup %5350  ;;  %v4231_v12 = vsel %vm4230_vm13, %v5349_v38, %v4227_v1 }
 0xcec   : > { %v4233_v49 = vmul.f32 %v5351_v18, %v4199_v62  ;;  %v4200_v54 = vadd.f32 1e-05, %v4194_v0  ;;  %vm4239_vm15 = vweird.f32 %v5351_v18  ;;  %v4264_v19 = vmul.f32 %v4231_v12, %v9145_v47 }
 0xced   : > { %vm4240_vm2 = vmor %vm4238_vm1, %vm4239_vm15 }
 0xcee   : > { %v4234_v8 = vmul.f32 %v5351_v18, %v4233_v49  ;;  %5352 = vrsqrt.f32 %v4200_v54  ;;  %v4273_v58 = vmul.f32 %v9179_v37, %v4264_v19  ;;  %vm4248_vm4 = vweird.f32 %v4200_v54 }
 0xcf0   : > { %v4235_v39 = vmul.f32 0.5, %v4234_v8  ;;  %v4189_v44 = vpop.xlane.xlu1 %4188  ;;  %v9208_v47 = vadd.f32 %v9185_v7, %v4273_v58 }
 0xcf1   : > { %v4195_v10 = vmul.f32 %v4189_v44, %v9041_v36 }
 0xcf2   : > { %v4236_v42 = vsub.f32 1.5, %v4235_v39 }
 0xcf3   : > { %v4201_v50 = vadd.f32 1e-05, %v4195_v10 }
 0xcf4   : > { %v5353_v52 = vpop.eup %5352  ;;  %v4237_v30 = vmul.f32 %v5351_v18, %v4236_v42 }
 0xcf5   : > { %v4243_v43 = vmul.f32 %v5353_v52, %v4200_v54  ;;  %5354 = vrsqrt.f32 %v4201_v50  ;;  %vm4249_vm3 = vweird.f32 %v5353_v52  ;;  %vm4258_vm7 = vweird.f32 %v4201_v50 }
 0xcf6   : > { %v4241_v33 = vsel %vm4240_vm2, %v5351_v18, %v4237_v30  ;;  %vm4250_vm5 = vmor %vm4248_vm4, %vm4249_vm3 }
 0xcf7   : > { %v4265_v27 = vmul.f32 %v4241_v33, %v9151_v9  ;;  %v4244_v40 = vmul.f32 %v5353_v52, %v4243_v43 }
 0xcf9   : > { %v4245_v55 = vmul.f32 0.5, %v4244_v40  ;;  %v4274_v57 = vmul.f32 %v9179_v37, %v4265_v27 }
 0xcfb   : > { %v5355_v6 = vpop.eup %5354  ;;  %v4246_v14 = vsub.f32 1.5, %v4245_v55  ;;  %v9211_v24 = vadd.f32 %v9185_v7, %v4274_v57 }
 0xcfc   : > { %v4253_v63 = vmul.f32 %v5355_v6, %v4201_v50  ;;  %vm4259_vm6 = vweird.f32 %v5355_v6 }
 0xcfd   : > { %v4247_v26 = vmul.f32 %v5353_v52, %v4246_v14  ;;  %v4287_v9 = vpack.c.bf16 %v9211_v24, %v9208_v47  ;;  %vm4260_vm8 = vmor %vm4258_vm7, %vm4259_vm6 }
 0xcfe   : > { %v4254_v46 = vmul.f32 %v5355_v6, %v4253_v63 }
 0xcff   : > { %4880 = vmatmul.msk.bf16.gmra.mxu0 %vm548_vm0, %v4287_v9  ;;  %v4251_v35 = vsel %vm4250_vm5, %v5353_v52, %v4247_v26 }
 0xd00   : > { %v4255_v61 = vmul.f32 0.5, %v4254_v46  ;;  %v4266_v41 = vmul.f32 %v4251_v35, %v9157_v29  ;;  %v4931_v29 = vld [vmem:[%s9370_s12 + $0x38] sm:$0xff] }
 0xd01   : > { %4467 = vmatpush.bf16.msrb.mxu1 %v4931_v29 }
 0xd02   : > { %v4256_v17 = vsub.f32 1.5, %v4255_v61  ;;  %v4275_v45 = vmul.f32 %v9179_v37, %v4266_v41 }
 0xd04   : > { %v4257_v28 = vmul.f32 %v5355_v6, %v4256_v17  ;;  %v9221_v25 = vadd.f32 %v9185_v7, %v4275_v45 }
 0xd06   : > { %v4261_v2 = vsel %vm4260_vm8, %v5355_v6, %v4257_v28 }
 0xd07   : > { %v4267_v5 = vmul.f32 %v4261_v2, %v9163_v59  ;;  %v4930_v59 = vld [vmem:[%s9370_s12 + $0x30] sm:$0xff] }
 0xd08   : > { %4468 = vmatpush.bf16.msrb.mxu1 %v4930_v59 }
 0xd09   : > { %v4276_v21 = vmul.f32 %v9179_v37, %v4267_v5  ;;  %v4929_v37 = vld [vmem:[%s9370_s12 + $0x28] sm:$0xff] }
 0xd0b   : > { %v9224_v48 = vadd.f32 %v9185_v7, %v4276_v21  ;;  %v4928_v7 = vld [vmem:[%s9370_s12 + $0x20] sm:$0xff] }
 0xd0c   : > { %4469 = vmatpush.bf16.msrb.mxu1 %v4929_v37 }
 0xd0d   : > { %v4288_v53 = vpack.c.bf16 %v9224_v48, %v9221_v25 }
 0xd0f   : > { %4881 = vmatmul.msk.bf16.gmra.mxu0 %vm548_vm0, %v4288_v53 }
 0xd10   : > { %4470 = vmatpush.bf16.msrb.mxu1 %v4928_v7 }
 0xd14   : > { %4471 = vmatpush.bf16.msrb.mxu1 %v4927_v56 }
 0xd18   : > { %4472 = vmatpush.bf16.msrb.mxu1 %v4926_v13 }
 0xd1c   : > { %4473 = vmatpush.bf16.msrb.mxu1 %v4925_v4 }
 0xd20   : > { %4474 = vmatpush.bf16.msrb.mxu1 %v4924_v20 }
 0xd44   : > { %v4327_v23 = vpop.f32.mrf.mxu0 }
 0xd45   : > { %v4328_v38 = vadd.f32 %v5230_v34, %v4327_v23 }
 0xd47   : > { %v4348_v3 = vmul.f32 0.044715, %v4328_v38  ;;  %v4342_v39 = vmul.f32 0.5, %v4328_v38 }
 0xd49   : > { %v4354_v31 = vmul.f32 %v4348_v3, %v4328_v38 }
 0xd4b   : > { %v4360_v22 = vmul.f32 %v4354_v31, %v4328_v38 }
 0xd4c   : > { %v4329_v11 = vpop.f32.mrf.mxu0 }
 0xd4d   : > { %v4366_v62 = vadd.f32 %v4360_v22, %v4328_v38  ;;  %v4330_v15 = vadd.f32 %v5230_v34, %v4329_v11 }
 0xd4f   : > { %v4349_v16 = vmul.f32 0.044715, %v4330_v15  ;;  %v4372_v51 = vmul.f32 0.7978846, %v4366_v62  ;;  %v4343_v44 = vmul.f32 0.5, %v4330_v15 }
 0xd51   : > { %v4355_v0 = vmul.f32 %v4349_v16, %v4330_v15  ;;  %5356 = vtanh.f32 %v4372_v51 }
 0xd53   : > { %v4361_v18 = vmul.f32 %v4355_v0, %v4330_v15 }
 0xd55   : > { %v4367_v1 = vadd.f32 %v4361_v18, %v4330_v15 }
 0xd57   : > { %v4373_v49 = vmul.f32 0.7978846, %v4367_v1  ;;  %v5357_v54 = vpop.eup %5356  ;;  %v5231_v1 = vld [vmem:[%s9371_s13] ss:$0 sm:$0xff] }
 0xd58   : > { %v4384_v8 = vadd.f32 1.0, %v5357_v54 }
 0xd59   : > { %5358 = vtanh.f32 %v4373_v49 }
 0xd5a   : > { %v4390_v42 = vmul.f32 %v4384_v8, %v4342_v39 }
 0xd5f   : > { %v5359_v12 = vpop.eup %5358 }
 0xd60   : > { %v4385_v10 = vadd.f32 1.0, %v5359_v12 }
 0xd62   : > { %v4391_v19 = vmul.f32 %v4385_v10, %v4343_v44 }
 0xd64   : > { %v4396_v50 = vpack.c.bf16 %v4391_v19, %v4390_v42 }
 0xd66   : > { %4475 = vmatmul.bf16.vlgmr.msrb.gmra.mxu1 %v4396_v50 }
 0xd7c   : > { %v4332_v52 = vpop.f32.mrf.mxu0 }
 0xd7d   : > { %v4333_v30 = vadd.f32 %v5230_v34, %v4332_v52 }
 0xd7f   : > { %v4350_v43 = vmul.f32 0.044715, %v4333_v30  ;;  %v4344_v59 = vmul.f32 0.5, %v4333_v30 }
 0xd81   : > { %v4356_v33 = vmul.f32 %v4350_v43, %v4333_v30 }
 0xd83   : > { %v4362_v27 = vmul.f32 %v4356_v33, %v4333_v30 }
 0xd84   : > { %v4334_v40 = vpop.f32.mrf.mxu0 }
 0xd85   : > { %v4335_v58 = vadd.f32 %v5230_v34, %v4334_v40  ;;  %v4368_v55 = vadd.f32 %v4362_v27, %v4333_v30 }
 0xd87   : > { %v4351_v57 = vmul.f32 0.044715, %v4335_v58  ;;  %v4374_v14 = vmul.f32 0.7978846, %v4368_v55  ;;  %v4345_v37 = vmul.f32 0.5, %v4335_v58 }
 0xd89   : > { %v4357_v6 = vmul.f32 %v4351_v57, %v4335_v58  ;;  %5360 = vtanh.f32 %v4374_v14 }
 0xd8b   : > { %v4363_v63 = vmul.f32 %v4357_v6, %v4335_v58 }
 0xd8c   : > { %v4337_v26 = vpop.f32.mrf.mxu0 }
 0xd8d   : > { %v4338_v9 = vadd.f32 %v5230_v34, %v4337_v26  ;;  %v4369_v46 = vadd.f32 %v4363_v63, %v4335_v58 }
 0xd8f   : > { %v4352_v35 = vmul.f32 0.044715, %v4338_v9  ;;  %v4375_v61 = vmul.f32 0.7978846, %v4369_v46  ;;  %v5361_v41 = vpop.eup %5360  ;;  %v4346_v62 = vmul.f32 0.5, %v4338_v9 }
 0xd90   : > { %v4386_v21 = vadd.f32 1.0, %v5361_v41 }
 0xd91   : > { %5362 = vtanh.f32 %v4375_v61  ;;  %v4358_v17 = vmul.f32 %v4352_v35, %v4338_v9 }
 0xd92   : > { %v4392_v4 = vmul.f32 %v4386_v21, %v4344_v59 }
 0xd93   : > { %v4364_v28 = vmul.f32 %v4358_v17, %v4338_v9 }
 0xd94   : > { %v4339_v2 = vpop.f32.mrf.mxu0 }
 0xd95   : > { %v4340_v5 = vadd.f32 %v5230_v34, %v4339_v2  ;;  %v4370_v45 = vadd.f32 %v4364_v28, %v4338_v9 }
 0xd97   : > { %v5363_v53 = vpop.eup %5362  ;;  %v4353_v29 = vmul.f32 0.044715, %v4340_v5  ;;  %v4376_v13 = vmul.f32 0.7978846, %v4370_v45  ;;  %v4347_v15 = vmul.f32 0.5, %v4340_v5 }
 0xd98   : > { %v4387_v7 = vadd.f32 1.0, %v5363_v53 }
 0xd99   : > { %v4359_v56 = vmul.f32 %v4353_v29, %v4340_v5  ;;  %5364 = vtanh.f32 %v4376_v13 }
 0xd9a   : > { %v4393_v20 = vmul.f32 %v4387_v7, %v4345_v37 }
 0xd9b   : > { %v4365_v23 = vmul.f32 %v4359_v56, %v4340_v5 }
 0xd9c   : > { %v4397_v38 = vpack.c.bf16 %v4393_v20, %v4392_v4 }
 0xd9d   : > { %v4371_v3 = vadd.f32 %v4365_v23, %v4340_v5 }
 0xd9e   : > { %4480 = vmatmul.bf16.gmra.mxu1 %v4397_v38 }
 0xd9f   : > { %v4377_v31 = vmul.f32 0.7978846, %v4371_v3  ;;  %v5365_v22 = vpop.eup %5364 }
 0xda0   : > { %v4388_v34 = vadd.f32 1.0, %v5365_v22 }
 0xda1   : > { %5366 = vtanh.f32 %v4377_v31 }
 0xda2   : > { %v4394_v51 = vmul.f32 %v4388_v34, %v4346_v62 }
 0xda7   : > { %v5367_v11 = vpop.eup %5366 }
 0xda8   : > { %v4389_v16 = vadd.f32 1.0, %v5367_v11 }
 0xdaa   : > { %v4395_v0 = vmul.f32 %v4389_v16, %v4347_v15 }
 0xdac   : > { %v4398_v18 = vpack.c.bf16 %v4395_v0, %v4394_v51 }
 0xdae   : > { %4485 = vmatmul.bf16.gmra.mxu1 %v4398_v18 }
 0xde3   : > { %v4476_v49 = vpop.f32.mrf.mxu1 }
 0xde4   : > { %v4477_v54 = vadd.f32 %v5231_v1, %v4476_v49 }
 0xde6   : > { %v4491_v8 = vadd.f32 %v4477_v54, %v9191_v32 }
 0xde8   : > { %v4499_v12 = vsel %vm548_vm0, %v4491_v8, 0.0 }
 0xde9   : > { %4500 = vadd.xlane.f32.xlu2 %v4499_v12 }
 0xdeb   : > { %v4478_v39 = vpop.f32.mrf.mxu1 }
 0xdec   : > { %v4479_v44 = vadd.f32 %v5231_v1, %v4478_v39 }
 0xdee   : > { %v4492_v10 = vadd.f32 %v4479_v44, %v9194_v60  ;;  %v9308_v44 = vld [vmem:[%s9372_s14] ss:$0 sm:$0xff] }
 0xdf0   : > { %v4502_v42 = vsel %vm548_vm0, %v4492_v10, 0.0 }
 0xdf1   : > { %4503 = vadd.xlane.f32.xlu0 %v4502_v42 }
 0xe1b   : > { %v4481_v19 = vpop.f32.mrf.mxu1 }
 0xe1c   : > { %v4482_v50 = vadd.f32 %v5231_v1, %v4481_v19  ;;  %v9313_v19 = vld [vmem:[%s9373_s15] ss:$0 sm:$0xff] }
 0xe1e   : > { %v4493_v52 = vadd.f32 %v4482_v50, %v9208_v47 }
 0xe20   : > { %v4505_v30 = vsel %vm548_vm0, %v4493_v52, 0.0 }
 0xe21   : > { %4506 = vadd.xlane.f32.xlu1 %v4505_v30 }
 0xe23   : > { %v4483_v43 = vpop.f32.mrf.mxu1 }
 0xe24   : > { %v4484_v33 = vadd.f32 %v5231_v1, %v4483_v43 }
 0xe26   : > { %v4494_v32 = vadd.f32 %v4484_v33, %v9211_v24 }
 0xe28   : > { %v4508_v27 = vsel %vm548_vm0, %v4494_v32, 0.0 }
 0xe29   : > { %4509 = vadd.xlane.f32.xlu2 %v4508_v27 }
 0xe2b   : > { %v4486_v40 = vpop.f32.mrf.mxu1 }
 0xe2c   : > { %v4487_v58 = vadd.f32 %v5231_v1, %v4486_v40 }
 0xe2e   : > { %v4495_v60 = vadd.f32 %v4487_v58, %v9221_v25 }
 0xe30   : > { %v4511_v55 = vsel %vm548_vm0, %v4495_v60, 0.0 }
 0xe31   : > { %4512 = vadd.xlane.f32.xlu0 %v4511_v55 }
 0xe33   : > { %v4488_v57 = vpop.f32.mrf.mxu1 }
 0xe34   : > { %v4489_v6 = vadd.f32 %v5231_v1, %v4488_v57 }
 0xe36   : > { %v4496_v47 = vadd.f32 %v4489_v6, %v9224_v48 }
 0xe38   : > { %v4514_v14 = vsel %vm3985_vm14, %v4496_v47, 0.0 }
 0xe39   : > { %4515 = vadd.xlane.f32.xlu1 %v4514_v14 }
 0xe5c   : > { %v4501_v63 = vpop.xlane.xlu2 %4500 }
 0xe5d   : > { %v4517_v24 = vmul.f32 %v4501_v63, %v9041_v36 }
 0xe5f   : > { %v4523_v26 = vsub.f32 %v4491_v8, %v4517_v24 }
 0xe61   : > { %v4529_v9 = vmul.f32 %v4523_v26, %v4523_v26 }
 0xe63   : > { %v4535_v46 = vsel %vm548_vm0, %v4529_v9, 0.0 }
 0xe64   : > { %4536 = vadd.xlane.f32.xlu2 %v4535_v46  ;;  %v4504_v35 = vpop.xlane.xlu0 %4503 }
 0xe65   : > { %v4518_v25 = vmul.f32 %v4504_v35, %v9041_v36 }
 0xe67   : > { %v9274_v61 = vsub.f32 %v4492_v10, %v4518_v25 }
 0xe69   : > { %v4530_v17 = vmul.f32 %v9274_v61, %v9274_v61 }
 0xe6b   : > { %v4538_v48 = vsel %vm548_vm0, %v4530_v17, 0.0 }
 0xe6c   : > { %4539 = vadd.xlane.f32.xlu0 %v4538_v48 }
 0xe94   : > { %v4507_v41 = vpop.xlane.xlu1 %4506 }
 0xe95   : > { %v4519_v28 = vmul.f32 %v4507_v41, %v9041_v36 }
 0xe97   : > { %v9280_v2 = vsub.f32 %v4493_v52, %v4519_v28 }
 0xe99   : > { %v4531_v5 = vmul.f32 %v9280_v2, %v9280_v2 }
 0xe9b   : > { %v4541_v45 = vsel %vm548_vm0, %v4531_v5, 0.0 }
 0xe9c   : > { %v4510_v21 = vpop.xlane.xlu2 %4509  ;;  %4542 = vadd.xlane.f32.xlu1 %v4541_v45 }
 0xe9d   : > { %v4520_v53 = vmul.f32 %v4510_v21, %v9041_v36 }
 0xe9f   : > { %v9286_v29 = vsub.f32 %v4494_v32, %v4520_v53 }
 0xea1   : > { %v4532_v59 = vmul.f32 %v9286_v29, %v9286_v29 }
 0xea3   : > { %v4544_v37 = vsel %vm548_vm0, %v4532_v59, 0.0 }
 0xea4   : > { %4545 = vadd.xlane.f32.xlu2 %v4544_v37  ;;  %v4513_v7 = vpop.xlane.xlu0 %4512 }
 0xea5   : > { %v4521_v56 = vmul.f32 %v4513_v7, %v9041_v36 }
 0xea7   : > { %v9292_v13 = vsub.f32 %v4495_v60, %v4521_v56 }
 0xea9   : > { %v4533_v4 = vmul.f32 %v9292_v13, %v9292_v13 }
 0xeab   : > { %v4547_v20 = vsel %vm548_vm0, %v4533_v4, 0.0 }
 0xeac   : > { %v4516_v23 = vpop.xlane.xlu1 %4515  ;;  %4548 = vadd.xlane.f32.xlu0 %v4547_v20 }
 0xead   : > { %v4522_v38 = vmul.f32 %v4516_v23, %v9041_v36 }
 0xeaf   : > { %v9298_v3 = vsub.f32 %v4496_v47, %v4522_v38 }
 0xeb1   : > { %v4534_v31 = vmul.f32 %v9298_v3, %v9298_v3 }
 0xeb3   : > { %v4550_v22 = vsel %vm3985_vm14, %v4534_v31, 0.0 }
 0xeb4   : > { %4551 = vadd.xlane.f32.xlu1 %v4550_v22 }
 0xed7   : > { %v4537_v34 = vpop.xlane.xlu2 %4536 }
 0xed8   : > { %v4553_v11 = vmul.f32 %v4537_v34, %v9041_v36 }
 0xeda   : > { %v4559_v62 = vadd.f32 1e-05, %v4553_v11 }
 0xedc   : > { %5368 = vrsqrt.f32 %v4559_v62  ;;  %vm4571_vm10 = vweird.f32 %v4559_v62 }
 0xedf   : > { %v4540_v15 = vpop.xlane.xlu0 %4539 }
 0xee0   : > { %v4554_v16 = vmul.f32 %v4540_v15, %v9041_v36 }
 0xee2   : > { %v5369_v51 = vpop.eup %5368  ;;  %v4560_v0 = vadd.f32 1e-05, %v4554_v16 }
 0xee3   : > { %v4566_v18 = vmul.f32 %v5369_v51, %v4559_v62  ;;  %vm4572_vm9 = vweird.f32 %v5369_v51 }
 0xee4   : > { %5370 = vrsqrt.f32 %v4560_v0  ;;  %vm4573_vm11 = vmor %vm4571_vm10, %vm4572_vm9  ;;  %vm4581_vm13 = vweird.f32 %v4560_v0 }
 0xee5   : > { %v4567_v1 = vmul.f32 %v5369_v51, %v4566_v18 }
 0xee7   : > { %v4568_v49 = vmul.f32 0.5, %v4567_v1 }
 0xee9   : > { %v4569_v54 = vsub.f32 1.5, %v4568_v49 }
 0xeea   : > { %v5371_v8 = vpop.eup %5370 }
 0xeeb   : > { %v4570_v12 = vmul.f32 %v5369_v51, %v4569_v54  ;;  %v4576_v39 = vmul.f32 %v5371_v8, %v4560_v0  ;;  %vm4582_vm12 = vweird.f32 %v5371_v8 }
 0xeec   : > { %vm4583_vm15 = vmor %vm4581_vm13, %vm4582_vm12 }
 0xeed   : > { %v4574_v10 = vsel %vm4573_vm11, %v5369_v51, %v4570_v12  ;;  %v4577_v42 = vmul.f32 %v5371_v8, %v4576_v39 }
 0xeee   : > { %v4625_v50 = vmul.f32 %v4574_v10, %v4523_v26 }
 0xeef   : > { %v4578_v52 = vmul.f32 0.5, %v4577_v42 }
 0xef0   : > { %v4634_v30 = vmul.f32 %v9308_v44, %v4625_v50 }
 0xef1   : > { %v4579_v43 = vsub.f32 1.5, %v4578_v52 }
 0xef2   : > { %v4643_v33 = vadd.f32 %v9313_v19, %v4634_v30 }
 0xef3   : > { %v4580_v32 = vmul.f32 %v5371_v8, %v4579_v43 }
 0xef4   : > { %4649 = vst.msk [vmem:[%s9321_s25] sm:$0xff] %vm548_vm0, %v4643_v33 }
 0xef5   : > { %v4584_v27 = vsel %vm4583_vm15, %v5371_v8, %v4580_v32 }
 0xef6   : > { %v4626_v40 = vmul.f32 %v4584_v27, %v9274_v61 }
 0xef8   : > { %v4635_v58 = vmul.f32 %v9308_v44, %v4626_v40 }
 0xefa   : > { %v4644_v60 = vadd.f32 %v9313_v19, %v4635_v58 }
 0xefc   : > { %4650 = vst.msk [vmem:[%s9321_s25 + $0x8] sm:$0xff] %vm548_vm0, %v4644_v60 }
 0xf0f   : > { %v4543_v55 = vpop.xlane.xlu1 %4542 }
 0xf10   : > { %v4555_v57 = vmul.f32 %v4543_v55, %v9041_v36 }
 0xf12   : > { %v4561_v6 = vadd.f32 1e-05, %v4555_v57 }
 0xf14   : > { %5372 = vrsqrt.f32 %v4561_v6  ;;  %vm4591_vm2 = vweird.f32 %v4561_v6 }
 0xf17   : > { %v4546_v47 = vpop.xlane.xlu2 %4545 }
 0xf18   : > { %v4556_v14 = vmul.f32 %v4546_v47, %v9041_v36 }
 0xf1a   : > { %v5373_v63 = vpop.eup %5372  ;;  %v4562_v24 = vadd.f32 1e-05, %v4556_v14 }
 0xf1b   : > { %v4586_v26 = vmul.f32 %v5373_v63, %v4561_v6  ;;  %vm4592_vm1 = vweird.f32 %v5373_v63 }
 0xf1c   : > { %5374 = vrsqrt.f32 %v4562_v24  ;;  %vm4593_vm3 = vmor %vm4591_vm2, %vm4592_vm1  ;;  %vm4601_vm5 = vweird.f32 %v4562_v24 }
 0xf1d   : > { %v4587_v9 = vmul.f32 %v5373_v63, %v4586_v26 }
 0xf1f   : > { %v4588_v46 = vmul.f32 0.5, %v4587_v9  ;;  %v4549_v35 = vpop.xlane.xlu0 %4548 }
 0xf20   : > { %v4557_v25 = vmul.f32 %v4549_v35, %v9041_v36 }
 0xf21   : > { %v4589_v61 = vsub.f32 1.5, %v4588_v46 }
 0xf22   : > { %v5375_v17 = vpop.eup %5374  ;;  %v4563_v48 = vadd.f32 1e-05, %v4557_v25 }
 0xf23   : > { %v4590_v41 = vmul.f32 %v5373_v63, %v4589_v61  ;;  %v4596_v28 = vmul.f32 %v5375_v17, %v4562_v24  ;;  %vm4602_vm4 = vweird.f32 %v5375_v17 }
 0xf24   : > { %5376 = vrsqrt.f32 %v4563_v48  ;;  %vm4603_vm6 = vmor %vm4601_vm5, %vm4602_vm4  ;;  %vm4611_vm8 = vweird.f32 %v4563_v48 }
 0xf25   : > { %v4594_v5 = vsel %vm4593_vm3, %v5373_v63, %v4590_v41  ;;  %v4597_v45 = vmul.f32 %v5375_v17, %v4596_v28 }
 0xf26   : > { %v4627_v21 = vmul.f32 %v4594_v5, %v9280_v2 }
 0xf27   : > { %v4598_v53 = vmul.f32 0.5, %v4597_v45  ;;  %v4552_v59 = vpop.xlane.xlu1 %4551 }
 0xf28   : > { %v4636_v37 = vmul.f32 %v9308_v44, %v4627_v21  ;;  %v4558_v7 = vmul.f32 %v4552_v59, %v9041_v36 }
 0xf29   : > { %v4599_v56 = vsub.f32 1.5, %v4598_v53 }
 0xf2a   : > { %v5377_v4 = vpop.eup %5376  ;;  %v4645_v20 = vadd.f32 %v9313_v19, %v4636_v37  ;;  %v4564_v23 = vadd.f32 1e-05, %v4558_v7 }
 0xf2b   : > { %v4600_v38 = vmul.f32 %v5375_v17, %v4599_v56  ;;  %v4606_v31 = vmul.f32 %v5377_v4, %v4563_v48  ;;  %vm4612_vm7 = vweird.f32 %v5377_v4 }
 0xf2c   : > { %4651 = vst.msk [vmem:[%s9321_s25 + $0x10] sm:$0xff] %vm548_vm0, %v4645_v20  ;;  %5378 = vrsqrt.f32 %v4564_v23  ;;  %vm4613_vm9 = vmor %vm4611_vm8, %vm4612_vm7  ;;  %vm4621_vm11 = vweird.f32 %v4564_v23 }
 0xf2d   : > { %v4604_v2 = vsel %vm4603_vm6, %v5375_v17, %v4600_v38  ;;  %v4607_v22 = vmul.f32 %v5377_v4, %v4606_v31 }
 0xf2e   : > { %v4628_v34 = vmul.f32 %v4604_v2, %v9286_v29 }
 0xf2f   : > { %v4608_v11 = vmul.f32 0.5, %v4607_v22 }
 0xf30   : > { %v4637_v36 = vmul.f32 %v9308_v44, %v4628_v34 }
 0xf31   : > { %v4609_v62 = vsub.f32 1.5, %v4608_v11 }
 0xf32   : > { %v5379_v15 = vpop.eup %5378  ;;  %v4646_v16 = vadd.f32 %v9313_v19, %v4637_v36 }
 0xf33   : > { %v4610_v51 = vmul.f32 %v5377_v4, %v4609_v62  ;;  %v4616_v0 = vmul.f32 %v5379_v15, %v4564_v23  ;;  %vm4622_vm10 = vweird.f32 %v5379_v15 }
 0xf34   : > { %4652 = vst.msk [vmem:[%s9321_s25 + $0x18] sm:$0xff] %vm548_vm0, %v4646_v16  ;;  %vm4623_vm12 = vmor %vm4621_vm11, %vm4622_vm10 }
 0xf35   : > { %v4614_v18 = vsel %vm4613_vm9, %v5377_v4, %v4610_v51  ;;  %v4617_v1 = vmul.f32 %v5379_v15, %v4616_v0 }
 0xf36   : > { %v4629_v29 = vmul.f32 %v4614_v18, %v9292_v13 }
 0xf37   : > { %v4618_v49 = vmul.f32 0.5, %v4617_v1 }
 0xf38   : > { %v4638_v54 = vmul.f32 %v9308_v44, %v4629_v29 }
 0xf39   : > { %v4619_v8 = vsub.f32 1.5, %v4618_v49 }
 0xf3a   : > { %v4647_v12 = vadd.f32 %v9313_v19, %v4638_v54 }
 0xf3b   : > { %v4620_v39 = vmul.f32 %v5379_v15, %v4619_v8 }
 0xf3c   : > { %4653 = vst.msk [vmem:[%s9321_s25 + $0x20] sm:$0xff] %vm548_vm0, %v4647_v12 }
 0xf3d   : > { %v4624_v10 = vsel %vm4623_vm12, %v5379_v15, %v4620_v39 }
 0xf3e   : > { %v4630_v42 = vmul.f32 %v4624_v10, %v9298_v3 }
 0xf40   : > { %v4639_v50 = vmul.f32 %v9308_v44, %v4630_v42 }
 0xf42   : > { %v4648_v52 = vadd.f32 %v9313_v19, %v4639_v50 }
 0xf44   : > { %4654 = vst.msk [vmem:[%s9321_s25 + $0x28] sm:$0xf] %vm3985_vm14, %v4648_v52 }
 0xf45 PF: > { %s26_s21 = sadd.s32 1, %s5536_s21  }
 0xf46   : > { %p23_p4 = scmp.ge.s32.totalorder %s26_s21, 4  }
 0xf48   :  { %25 = sbr.rel (!%p23_p4) target bundleno = 2 (0x2), region = 128 }

</bundles_post_ra>
